<compile_context>
chip_gen: v7x
topology: tpu7x:2x2x1
jax: 0.10.0
libtpu: 0.0.40
codegen_flags: <defaults>
</compile_context>

<pallas_src>
import jax
import jax.numpy as jnp
from jax.experimental import pallas as pl
from jax.experimental.pallas import tpu as pltpu


_H, _W = 14, 14            # spatial size fixed by the module (3584 = 32*8*14)
_HID = 512                 # LSTM hidden size
_SPATIAL = 8 * 14          # 112 spatial positions per branch after 3 valid convs
_FEAT = 32 * _SPATIAL      # 3584 = LSTM input size


# ------------------------- fused conv-branches kernel ------------------------
def _conv_branches_kernel(x1_ref, x2_ref,
                          w11_ref, w12_ref, w13_ref,
                          w21_ref, w22_ref, w23_ref,
                          cb_ref, o1_ref, o2_ref):
    """One batch element per grid step; both branches, all six convs fused.

    Activations live as (spatial, channel) 2-D slabs in vregs/VMEM.  A length-3
    conv along the *outer* spatial axis (inner axis is 14 throughout) is three
    shifted row slices (offset i*14) matmul'd against (Cin, 32) weight taps.
    """
    def branch(a, w_refs, bias_row0):
        outer = 14                                      # outer spatial extent
        for t, w_ref in enumerate(w_refs):
            outer -= 2                                  # 'valid' conv shrinks by 2
            m = outer * 14
            acc = jnp.zeros((m, 32), jnp.float32)
            for i in range(3):                          # 3 kernel taps
                acc = acc + jnp.dot(a[i * 14:i * 14 + m, :], w_ref[i],
                                    preferred_element_type=jnp.float32)
            acc = acc + cb_ref[bias_row0 + t:bias_row0 + t + 1, :]
            a = jnp.where(acc > 0, acc, 0.01 * acc)     # leaky_relu(0.01)
        return a                                        # (112, 32)

    o1_ref[0] = branch(x1_ref[0], (w11_ref, w12_ref, w13_ref), 0)
    o2_ref[0] = branch(x2_ref[0], (w21_ref, w22_ref, w23_ref), 3)


# -------------------------------- head kernel --------------------------------
def _head_kernel(x_ref, hx_ref, cx_ref,
                 wih_ref, whh_ref, blstm_ref,
                 wfc_ref, bfc_ref, whead_ref, bhead_ref,
                 q_ref, hxo_ref, cxo_ref, gates_ref):
    """grid=(4,): step k streams the bf16 weight tile of LSTM gate k (order
    i, f, g, o) and stores its f32 pre-activation into scratch; the last step
    finishes the cell update, fc1 and the dueling head."""
    k = pl.program_id(0)
    xb = x_ref[...].astype(jnp.bfloat16)
    hb = hx_ref[...].astype(jnp.bfloat16)
    gates_ref[k] = (jnp.dot(xb, wih_ref[...], preferred_element_type=jnp.float32)
                    + jnp.dot(hb, whh_ref[...], preferred_element_type=jnp.float32)
                    + blstm_ref[...])

    @pl.when(k == pl.num_programs(0) - 1)
    def _finish():
        i_g = jax.nn.sigmoid(gates_ref[0])
        f_g = jax.nn.sigmoid(gates_ref[1])
        g_g = jnp.tanh(gates_ref[2])
        o_g = jax.nn.sigmoid(gates_ref[3])
        c_new = f_g * cx_ref[...] + i_g * g_g
        h_new = o_g * jnp.tanh(c_new)
        cxo_ref[...] = c_new
        hxo_ref[...] = h_new

        y = (jnp.dot(h_new.astype(jnp.bfloat16), wfc_ref[...],
                     preferred_element_type=jnp.float32) + bfc_ref[...])
        y = jnp.where(y > 0, y, 0.01 * y)               # leaky_relu(fc1)

        out = (jnp.dot(y, whead_ref[...], preferred_element_type=jnp.float32)
               + bhead_ref[...])                        # columns = [val | adv]
        val = out[:, 0:1]
        adv = out[:, 1:]
        q_ref[...] = val + (adv - jnp.mean(adv))        # torch: global .mean()


# --------------------------------- forward -----------------------------------
def forward(params, x, hx, cx):
    B, C, H, W = x.shape
    assert (H, W) == (_H, _W)

    # Branch-1 sees rows h*14+w (conv along H); branch-2 sees rows w*14+h
    # (conv along W).  Tiny (B,196,C) relayouts of the 3 KiB input, in XLA glue.
    x1in = jnp.transpose(x, (0, 2, 3, 1)).reshape(B, H * W, C)
    x2in = jnp.transpose(x, (0, 3, 2, 1)).reshape(B, H * W, C)

    def _full(shape):
        n = len(shape)
        return pl.BlockSpec(shape, lambda b: (0,) * n)

    o1, o2 = pl.pallas_call(
        _conv_branches_kernel,
        grid=(B,),
        out_shape=(jax.ShapeDtypeStruct((B, _SPATIAL, 32), jnp.float32),
                   jax.ShapeDtypeStruct((B, _SPATIAL, 32), jnp.float32)),
        in_specs=[
            pl.BlockSpec((1, H * W, C), lambda b: (b, 0, 0)),
            pl.BlockSpec((1, H * W, C), lambda b: (b, 0, 0)),
            _full(params['w11'].shape), _full(params['w12'].shape),
            _full(params['w13'].shape), _full(params['w21'].shape),
            _full(params['w22'].shape), _full(params['w23'].shape),
            _full(params['cbias'].shape),
        ],
        out_specs=(pl.BlockSpec((1, _SPATIAL, 32), lambda b: (b, 0, 0)),
                   pl.BlockSpec((1, _SPATIAL, 32), lambda b: (b, 0, 0))),
        compiler_params=pltpu.CompilerParams(
            dimension_semantics=("parallel",)),
    )(x1in, x2in,
      params['w11'], params['w12'], params['w13'],
      params['w21'], params['w22'], params['w23'], params['cbias'])

    # Common (spatial, channel) flatten order m = s*32 + c for both branches
    # (lstm_wih rows were permuted at init to match).  Branch-2 needs one tiny
    # (8,14)->(14,8) spatial transpose (28 KiB) which is the only glue copy.
    x1f = o1.reshape(B, _FEAT)
    x2f = o2.reshape(B, 8, 14, 32).transpose(0, 2, 1, 3).reshape(B, _FEAT)
    xsum = x1f + x2f

    A = params['head_w_t'].shape[1] - 1
    q, hx_new, cx_new = pl.pallas_call(
        _head_kernel,
        grid=(4,),                                       # one LSTM gate per step
        out_shape=(jax.ShapeDtypeStruct((B, A), jnp.float32),
                   jax.ShapeDtypeStruct((B, _HID), jnp.float32),
                   jax.ShapeDtypeStruct((B, _HID), jnp.float32)),
        in_specs=[
            pl.BlockSpec((B, _FEAT), lambda k: (0, 0)),
            pl.BlockSpec((B, _HID), lambda k: (0, 0)),
            pl.BlockSpec((B, _HID), lambda k: (0, 0)),
            pl.BlockSpec((_FEAT, _HID), lambda k: (0, k)),   # lstm_wih bf16 tile
            pl.BlockSpec((_HID, _HID), lambda k: (0, k)),    # lstm_whh bf16 tile
            pl.BlockSpec((1, _HID), lambda k: (0, k)),       # lstm bias tile
            pl.BlockSpec((_HID, 256), lambda k: (0, 0)),
            pl.BlockSpec((1, 256), lambda k: (0, 0)),
            pl.BlockSpec((256, 1 + A), lambda k: (0, 0)),
            pl.BlockSpec((1, 1 + A), lambda k: (0, 0)),
        ],
        out_specs=(pl.BlockSpec((B, A), lambda k: (0, 0)),
                   pl.BlockSpec((B, _HID), lambda k: (0, 0)),
                   pl.BlockSpec((B, _HID), lambda k: (0, 0))),
        scratch_shapes=[pltpu.VMEM((4, B, _HID), jnp.float32)],
        compiler_params=pltpu.CompilerParams(
            dimension_semantics=("arbitrary",),   # finalize step needs all gates
            vmem_limit_bytes=24 * 1024 * 1024),
    )(xsum, hx, cx,
      params['lstm_wih_t'], params['lstm_whh_t'], params['lstm_b'],
      params['fc1_w_t'], params['fc1_b'],
      params['head_w_t'], params['head_b'])
    return q, (hx_new, cx_new)


# --------------------------------- params ------------------------------------
def init_params(key, states_channel, action_num):
    """Deterministic init matching the torch module's __init__.

    Returns (kernel_params, reference_params).  Kernel params are pre-laid-out:
    conv weights as (3, Cin, 32) matmul taps; lstm_wih transposed, row-permuted
    to the kernels' (spatial, channel) flatten order and cast to bf16; fc1/whh
    in bf16; val & adv fused into one (256, 1+A) matrix.  All biases are zero
    (conv/linear per weight_init, LSTM biases explicitly zeroed).
    """
    keys = jax.random.split(key, 11)

    def xavier_normal(k, shape, fan_in, fan_out):
        std = (2.0 / (fan_in + fan_out)) ** 0.5
        return (std * jax.random.normal(k, shape)).astype(jnp.float32)

    def conv_w(k, o, c, kh, kw):
        rf = kh * kw
        return xavier_normal(k, (o, c, kh, kw), c * rf, o * rf)

    c11 = conv_w(keys[0], 32, states_channel, 3, 1)
    c12 = conv_w(keys[1], 32, 32, 3, 1)
    c13 = conv_w(keys[2], 32, 32, 3, 1)
    c21 = conv_w(keys[3], 32, states_channel, 1, 3)
    c22 = conv_w(keys[4], 32, 32, 1, 3)
    c23 = conv_w(keys[5], 32, 32, 1, 3)

    def tap_h(w):   # (O, C, 3, 1) -> (3, C, O)
        return jnp.transpose(w[:, :, :, 0], (2, 1, 0))

    def tap_w(w):   # (O, C, 1, 3) -> (3, C, O)
        return jnp.transpose(w[:, :, 0, :], (2, 1, 0))

    # LSTMCell(3584, 512): torch default uniform(-1/sqrt(H), 1/sqrt(H)); the
    # module zeroes both biases afterwards.
    bound = 1.0 / (_HID ** 0.5)
    wih_t = jax.random.uniform(keys[6], (_FEAT, 4 * _HID), jnp.float32, -bound, bound)
    whh_t = jax.random.uniform(keys[7], (_HID, 4 * _HID), jnp.float32, -bound, bound)

    # Kernels feed x flattened as m = s*32 + c (spatial-major); torch's
    # .view(B,-1) order is k = c*112 + s.  Permute the wih rows once here.
    m = jnp.arange(_FEAT)
    s, ch = m // 32, m % 32
    wih_perm = wih_t[ch * _SPATIAL + s, :]

    fc1_w_t = xavier_normal(keys[8], (_HID, 256), _HID, 256)
    val_w_t = xavier_normal(keys[9], (256, 1), 256, 1)
    adv_w_t = xavier_normal(keys[10], (256, action_num), 256, action_num)

    params = {
        'w11': tap_h(c11), 'w12': tap_h(c12), 'w13': tap_h(c13),
        'w21': tap_w(c21), 'w22': tap_w(c22), 'w23': tap_w(c23),
        'cbias': jnp.zeros((6, 32), jnp.float32),          # conv biases (zero)
        'lstm_wih_t': wih_perm.astype(jnp.bfloat16),       # bf16 weight stream
        'lstm_whh_t': whh_t.astype(jnp.bfloat16),
        'lstm_b': jnp.zeros((1, 4 * _HID), jnp.float32),   # bias_ih + bias_hh
        'fc1_w_t': fc1_w_t.astype(jnp.bfloat16),
        'fc1_b': jnp.zeros((1, 256), jnp.float32),
        'head_w_t': jnp.concatenate([val_w_t, adv_w_t], axis=1),  # (256, 1+A)
        'head_b': jnp.zeros((1, 1 + action_num), jnp.float32),
    }
    ref = {
        'c11w': c11, 'c12w': c12, 'c13w': c13,
        'c21w': c21, 'c22w': c22, 'c23w': c23,
        'wih_t': wih_t, 'whh_t': whh_t,
        'fc1_w_t': fc1_w_t, 'val_w_t': val_w_t, 'adv_w_t': adv_w_t,
    }
    return params, ref


# ------------------------------- f32 reference --------------------------------
def reference_forward(ref, x, hx, cx):
    """Plain-JAX f32 reference with the original torch layout/semantics."""
    def conv_lrelu(v, w):
        y = jax.lax.conv_general_dilated(
            v, w, window_strides=(1, 1), padding='VALID',
            dimension_numbers=('NCHW', 'OIHW', 'NCHW'))
        return jnp.where(y > 0, y, 0.01 * y)               # conv biases are zero

    x1 = conv_lrelu(conv_lrelu(conv_lrelu(x, ref['c11w']), ref['c12w']), ref['c13w'])
    x2 = conv_lrelu(conv_lrelu(conv_lrelu(x, ref['c21w']), ref['c22w']), ref['c23w'])
    B = x.shape[0]
    z = x1.reshape(B, -1) + x2.reshape(B, -1)
    gates = z @ ref['wih_t'] + hx @ ref['whh_t']            # LSTM biases are zero
    i_g = jax.nn.sigmoid(gates[:, :_HID])
    f_g = jax.nn.sigmoid(gates[:, _HID:2 * _HID])
    g_g = jnp.tanh(gates[:, 2 * _HID:3 * _HID])
    o_g = jax.nn.sigmoid(gates[:, 3 * _HID:])
    c_new = f_g * cx + i_g * g_g
    h_new = o_g * jnp.tanh(c_new)
    y = h_new @ ref['fc1_w_t']
    y = jnp.where(y > 0, y, 0.01 * y)
    val = y @ ref['val_w_t']
    adv = y @ ref['adv_w_t']
    return val + (adv - jnp.mean(adv)), (h_new, c_new)


# ---------------------------------- main --------------------------------------
if __name__ == "__main__":
    key = jax.random.PRNGKey(0)
    k_param, k_x, k_h, k_c = jax.random.split(key, 4)

    states_channel, action_num = 4, 8
    B = 2
    # Spatial size 14x14 is fixed by the module (LSTM input 3584 = 32*8*14).
    x = jax.random.normal(k_x, (B, states_channel, _H, _W), jnp.float32)
    hx = jax.random.normal(k_h, (B, _HID), jnp.float32)
    cx = jax.random.normal(k_c, (B, _HID), jnp.float32)

    params, ref_params = init_params(k_param, states_channel, action_num)

    fwd = jax.jit(forward)
    q, (hx_new, cx_new) = fwd(params, x, hx, cx)
    jax.block_until_ready((q, hx_new, cx_new))

    assert q.shape == (B, action_num)
    assert hx_new.shape == (B, _HID) and cx_new.shape == (B, _HID)

    # Correctness vs. a pure-JAX f32 reference (only bf16 weight/activation
    # rounding differs -> loose tolerance).
    q_r, (hx_r, cx_r) = jax.jit(reference_forward)(ref_params, x, hx, cx)
    assert jnp.allclose(q, q_r, atol=5e-2, rtol=5e-2)
    assert jnp.allclose(hx_new, hx_r, atol=5e-2, rtol=5e-2)
    assert jnp.allclose(cx_new, cx_r, atol=5e-2, rtol=5e-2)

    print("KERNEL_OK")
</pallas_src>

<mosaic_0001>
module attributes {stable_mosaic.version = 11 : i64} {
  func.func @_conv_branches_kernel(%arg0: i32, %arg1: memref<1x196x4xf32, #tpu.memory_space<vmem>>, %arg2: memref<1x196x4xf32, #tpu.memory_space<vmem>>, %arg3: memref<3x4x32xf32, #tpu.memory_space<vmem>>, %arg4: memref<3x32x32xf32, #tpu.memory_space<vmem>>, %arg5: memref<3x32x32xf32, #tpu.memory_space<vmem>>, %arg6: memref<3x4x32xf32, #tpu.memory_space<vmem>>, %arg7: memref<3x32x32xf32, #tpu.memory_space<vmem>>, %arg8: memref<3x32x32xf32, #tpu.memory_space<vmem>>, %arg9: memref<6x32xf32, #tpu.memory_space<vmem>>, %arg10: memref<1x112x32xf32, #tpu.memory_space<vmem>>, %arg11: memref<1x112x32xf32, #tpu.memory_space<vmem>>) attributes {dimension_semantics = [#tpu.dimension_semantics<parallel>], iteration_bounds = array<i64: 2>, scalar_prefetch = 0 : i64, scratch_operands = 0 : i64, tpu.core_type = #tpu.core_type<tc>, window_params = [{transform_indices = @transform_0, window_bounds = array<i64: 1, 196, 4>}, {transform_indices = @transform_1, window_bounds = array<i64: 1, 196, 4>}, {pipeline_mode = #tpu.pipeline_mode<synchronous>, transform_indices = @transform_2, window_bounds = array<i64: 3, 4, 32>}, {pipeline_mode = #tpu.pipeline_mode<synchronous>, transform_indices = @transform_3, window_bounds = array<i64: 3, 32, 32>}, {pipeline_mode = #tpu.pipeline_mode<synchronous>, transform_indices = @transform_4, window_bounds = array<i64: 3, 32, 32>}, {pipeline_mode = #tpu.pipeline_mode<synchronous>, transform_indices = @transform_5, window_bounds = array<i64: 3, 4, 32>}, {pipeline_mode = #tpu.pipeline_mode<synchronous>, transform_indices = @transform_6, window_bounds = array<i64: 3, 32, 32>}, {pipeline_mode = #tpu.pipeline_mode<synchronous>, transform_indices = @transform_7, window_bounds = array<i64: 3, 32, 32>}, {pipeline_mode = #tpu.pipeline_mode<synchronous>, transform_indices = @transform_8, window_bounds = array<i64: 6, 32>}, {transform_indices = @transform_9, window_bounds = array<i64: 1, 112, 32>}, {transform_indices = @transform_10, window_bounds = array<i64: 1, 112, 32>}]} {
    %c0 = arith.constant 0 : index
    %c0_0 = arith.constant 0 : index
    %c0_1 = arith.constant 0 : index
    %0 = vector.load %arg1[%c0, %c0_0, %c0_1] : memref<1x196x4xf32, #tpu.memory_space<vmem>>, vector<1x196x4xf32>
    %1 = vector.shape_cast %0 : vector<1x196x4xf32> to vector<196x4xf32>
    %cst = arith.constant 0.000000e+00 : f32
    %2 = vector.broadcast %cst : f32 to vector<168x32xf32>
    %3 = vector.extract_strided_slice %1 {offsets = [0, 0], sizes = [168, 4], strides = [1, 1]} : vector<196x4xf32> to vector<168x4xf32>
    %c0_2 = arith.constant 0 : index
    %c0_3 = arith.constant 0 : index
    %c0_4 = arith.constant 0 : index
    %4 = vector.load %arg3[%c0_2, %c0_3, %c0_4] : memref<3x4x32xf32, #tpu.memory_space<vmem>>, vector<1x4x32xf32>
    %5 = vector.shape_cast %4 : vector<1x4x32xf32> to vector<4x32xf32>
    %cst_5 = arith.constant dense<0.000000e+00> : vector<168x32xf32>
    %6 = tpu.matmul %3, %5, %cst_5 {dimension_numbers = #tpu.dot_dimension_numbers<[1], [0], [0], [1], [0, 0, 1, 1], [], []>} : vector<168x4xf32>, vector<4x32xf32>, vector<168x32xf32> -> vector<168x32xf32>
    %7 = arith.addf %2, %6 : vector<168x32xf32>
    %8 = vector.extract_strided_slice %1 {offsets = [14, 0], sizes = [168, 4], strides = [1, 1]} : vector<196x4xf32> to vector<168x4xf32>
    %c1 = arith.constant 1 : index
    %c0_6 = arith.constant 0 : index
    %c0_7 = arith.constant 0 : index
    %9 = vector.load %arg3[%c1, %c0_6, %c0_7] : memref<3x4x32xf32, #tpu.memory_space<vmem>>, vector<1x4x32xf32>
    %10 = vector.shape_cast %9 : vector<1x4x32xf32> to vector<4x32xf32>
    %cst_8 = arith.constant dense<0.000000e+00> : vector<168x32xf32>
    %11 = tpu.matmul %8, %10, %cst_8 {dimension_numbers = #tpu.dot_dimension_numbers<[1], [0], [0], [1], [0, 0, 1, 1], [], []>} : vector<168x4xf32>, vector<4x32xf32>, vector<168x32xf32> -> vector<168x32xf32>
    %12 = arith.addf %7, %11 : vector<168x32xf32>
    %13 = vector.extract_strided_slice %1 {offsets = [28, 0], sizes = [168, 4], strides = [1, 1]} : vector<196x4xf32> to vector<168x4xf32>
    %c2 = arith.constant 2 : index
    %c0_9 = arith.constant 0 : index
    %c0_10 = arith.constant 0 : index
    %14 = vector.load %arg3[%c2, %c0_9, %c0_10] : memref<3x4x32xf32, #tpu.memory_space<vmem>>, vector<1x4x32xf32>
    %15 = vector.shape_cast %14 : vector<1x4x32xf32> to vector<4x32xf32>
    %cst_11 = arith.constant dense<0.000000e+00> : vector<168x32xf32>
    %16 = tpu.matmul %13, %15, %cst_11 {dimension_numbers = #tpu.dot_dimension_numbers<[1], [0], [0], [1], [0, 0, 1, 1], [], []>} : vector<168x4xf32>, vector<4x32xf32>, vector<168x32xf32> -> vector<168x32xf32>
    %17 = arith.addf %12, %16 : vector<168x32xf32>
    %c0_12 = arith.constant 0 : index
    %c0_13 = arith.constant 0 : index
    %18 = vector.load %arg9[%c0_12, %c0_13] : memref<6x32xf32, #tpu.memory_space<vmem>>, vector<1x32xf32>
    %19 = vector.broadcast %18 : vector<1x32xf32> to vector<168x32xf32>
    %20 = arith.addf %17, %19 : vector<168x32xf32>
    %cst_14 = arith.constant 0.000000e+00 : f32
    %21 = vector.broadcast %cst_14 : f32 to vector<168x32xf32>
    %22 = arith.cmpf ogt, %20, %21 : vector<168x32xf32>
    %cst_15 = arith.constant 0.00999999977 : f32
    %23 = vector.broadcast %cst_15 : f32 to vector<168x32xf32>
    %24 = arith.mulf %23, %20 : vector<168x32xf32>
    %25 = arith.select %22, %20, %24 : vector<168x32xi1>, vector<168x32xf32>
    %cst_16 = arith.constant 0.000000e+00 : f32
    %26 = vector.broadcast %cst_16 : f32 to vector<140x32xf32>
    %27 = vector.extract_strided_slice %25 {offsets = [0, 0], sizes = [140, 32], strides = [1, 1]} : vector<168x32xf32> to vector<140x32xf32>
    %c0_17 = arith.constant 0 : index
    %c0_18 = arith.constant 0 : index
    %c0_19 = arith.constant 0 : index
    %28 = vector.load %arg4[%c0_17, %c0_18, %c0_19] : memref<3x32x32xf32, #tpu.memory_space<vmem>>, vector<1x32x32xf32>
    %29 = vector.shape_cast %28 : vector<1x32x32xf32> to vector<32x32xf32>
    %cst_20 = arith.constant dense<0.000000e+00> : vector<140x32xf32>
    %30 = tpu.matmul %27, %29, %cst_20 {dimension_numbers = #tpu.dot_dimension_numbers<[1], [0], [0], [1], [0, 0, 1, 1], [], []>} : vector<140x32xf32>, vector<32x32xf32>, vector<140x32xf32> -> vector<140x32xf32>
    %31 = arith.addf %26, %30 : vector<140x32xf32>
    %32 = vector.extract_strided_slice %25 {offsets = [14, 0], sizes = [140, 32], strides = [1, 1]} : vector<168x32xf32> to vector<140x32xf32>
    %c1_21 = arith.constant 1 : index
    %c0_22 = arith.constant 0 : index
    %c0_23 = arith.constant 0 : index
    %33 = vector.load %arg4[%c1_21, %c0_22, %c0_23] : memref<3x32x32xf32, #tpu.memory_space<vmem>>, vector<1x32x32xf32>
    %34 = vector.shape_cast %33 : vector<1x32x32xf32> to vector<32x32xf32>
    %cst_24 = arith.constant dense<0.000000e+00> : vector<140x32xf32>
    %35 = tpu.matmul %32, %34, %cst_24 {dimension_numbers = #tpu.dot_dimension_numbers<[1], [0], [0], [1], [0, 0, 1, 1], [], []>} : vector<140x32xf32>, vector<32x32xf32>, vector<140x32xf32> -> vector<140x32xf32>
    %36 = arith.addf %31, %35 : vector<140x32xf32>
    %37 = vector.extract_strided_slice %25 {offsets = [28, 0], sizes = [140, 32], strides = [1, 1]} : vector<168x32xf32> to vector<140x32xf32>
    %c2_25 = arith.constant 2 : index
    %c0_26 = arith.constant 0 : index
    %c0_27 = arith.constant 0 : index
    %38 = vector.load %arg4[%c2_25, %c0_26, %c0_27] : memref<3x32x32xf32, #tpu.memory_space<vmem>>, vector<1x32x32xf32>
    %39 = vector.shape_cast %38 : vector<1x32x32xf32> to vector<32x32xf32>
    %cst_28 = arith.constant dense<0.000000e+00> : vector<140x32xf32>
    %40 = tpu.matmul %37, %39, %cst_28 {dimension_numbers = #tpu.dot_dimension_numbers<[1], [0], [0], [1], [0, 0, 1, 1], [], []>} : vector<140x32xf32>, vector<32x32xf32>, vector<140x32xf32> -> vector<140x32xf32>
    %41 = arith.addf %36, %40 : vector<140x32xf32>
    %c1_29 = arith.constant 1 : index
    %c0_30 = arith.constant 0 : index
    %42 = vector.load %arg9[%c1_29, %c0_30] : memref<6x32xf32, #tpu.memory_space<vmem>>, vector<1x32xf32>
    %43 = vector.broadcast %42 : vector<1x32xf32> to vector<140x32xf32>
    %44 = arith.addf %41, %43 : vector<140x32xf32>
    %cst_31 = arith.constant 0.000000e+00 : f32
    %45 = vector.broadcast %cst_31 : f32 to vector<140x32xf32>
    %46 = arith.cmpf ogt, %44, %45 : vector<140x32xf32>
    %cst_32 = arith.constant 0.00999999977 : f32
    %47 = vector.broadcast %cst_32 : f32 to vector<140x32xf32>
    %48 = arith.mulf %47, %44 : vector<140x32xf32>
    %49 = arith.select %46, %44, %48 : vector<140x32xi1>, vector<140x32xf32>
    %cst_33 = arith.constant 0.000000e+00 : f32
    %50 = vector.broadcast %cst_33 : f32 to vector<112x32xf32>
    %51 = vector.extract_strided_slice %49 {offsets = [0, 0], sizes = [112, 32], strides = [1, 1]} : vector<140x32xf32> to vector<112x32xf32>
    %c0_34 = arith.constant 0 : index
    %c0_35 = arith.constant 0 : index
    %c0_36 = arith.constant 0 : index
    %52 = vector.load %arg5[%c0_34, %c0_35, %c0_36] : memref<3x32x32xf32, #tpu.memory_space<vmem>>, vector<1x32x32xf32>
    %53 = vector.shape_cast %52 : vector<1x32x32xf32> to vector<32x32xf32>
    %cst_37 = arith.constant dense<0.000000e+00> : vector<112x32xf32>
    %54 = tpu.matmul %51, %53, %cst_37 {dimension_numbers = #tpu.dot_dimension_numbers<[1], [0], [0], [1], [0, 0, 1, 1], [], []>} : vector<112x32xf32>, vector<32x32xf32>, vector<112x32xf32> -> vector<112x32xf32>
    %55 = arith.addf %50, %54 : vector<112x32xf32>
    %56 = vector.extract_strided_slice %49 {offsets = [14, 0], sizes = [112, 32], strides = [1, 1]} : vector<140x32xf32> to vector<112x32xf32>
    %c1_38 = arith.constant 1 : index
    %c0_39 = arith.constant 0 : index
    %c0_40 = arith.constant 0 : index
    %57 = vector.load %arg5[%c1_38, %c0_39, %c0_40] : memref<3x32x32xf32, #tpu.memory_space<vmem>>, vector<1x32x32xf32>
    %58 = vector.shape_cast %57 : vector<1x32x32xf32> to vector<32x32xf32>
    %cst_41 = arith.constant dense<0.000000e+00> : vector<112x32xf32>
    %59 = tpu.matmul %56, %58, %cst_41 {dimension_numbers = #tpu.dot_dimension_numbers<[1], [0], [0], [1], [0, 0, 1, 1], [], []>} : vector<112x32xf32>, vector<32x32xf32>, vector<112x32xf32> -> vector<112x32xf32>
    %60 = arith.addf %55, %59 : vector<112x32xf32>
    %61 = vector.extract_strided_slice %49 {offsets = [28, 0], sizes = [112, 32], strides = [1, 1]} : vector<140x32xf32> to vector<112x32xf32>
    %c2_42 = arith.constant 2 : index
    %c0_43 = arith.constant 0 : index
    %c0_44 = arith.constant 0 : index
    %62 = vector.load %arg5[%c2_42, %c0_43, %c0_44] : memref<3x32x32xf32, #tpu.memory_space<vmem>>, vector<1x32x32xf32>
    %63 = vector.shape_cast %62 : vector<1x32x32xf32> to vector<32x32xf32>
    %cst_45 = arith.constant dense<0.000000e+00> : vector<112x32xf32>
    %64 = tpu.matmul %61, %63, %cst_45 {dimension_numbers = #tpu.dot_dimension_numbers<[1], [0], [0], [1], [0, 0, 1, 1], [], []>} : vector<112x32xf32>, vector<32x32xf32>, vector<112x32xf32> -> vector<112x32xf32>
    %65 = arith.addf %60, %64 : vector<112x32xf32>
    %c2_46 = arith.constant 2 : index
    %c0_47 = arith.constant 0 : index
    %66 = vector.load %arg9[%c2_46, %c0_47] : memref<6x32xf32, #tpu.memory_space<vmem>>, vector<1x32xf32>
    %67 = vector.broadcast %66 : vector<1x32xf32> to vector<112x32xf32>
    %68 = arith.addf %65, %67 : vector<112x32xf32>
    %cst_48 = arith.constant 0.000000e+00 : f32
    %69 = vector.broadcast %cst_48 : f32 to vector<112x32xf32>
    %70 = arith.cmpf ogt, %68, %69 : vector<112x32xf32>
    %cst_49 = arith.constant 0.00999999977 : f32
    %71 = vector.broadcast %cst_49 : f32 to vector<112x32xf32>
    %72 = arith.mulf %71, %68 : vector<112x32xf32>
    %73 = arith.select %70, %68, %72 : vector<112x32xi1>, vector<112x32xf32>
    %c0_50 = arith.constant 0 : index
    %c0_51 = arith.constant 0 : index
    %c0_52 = arith.constant 0 : index
    %74 = vector.load %arg10[%c0_50, %c0_51, %c0_52] : memref<1x112x32xf32, #tpu.memory_space<vmem>>, vector<1x112x32xf32>
    %75 = vector.shape_cast %74 : vector<1x112x32xf32> to vector<112x32xf32>
    %76 = vector.shape_cast %73 : vector<112x32xf32> to vector<1x112x32xf32>
    tpu.vector_store %arg10[%c0_50, %c0_51, %c0_52], %76 {strides = array<i32>} : memref<1x112x32xf32, #tpu.memory_space<vmem>>, vector<1x112x32xf32>,
    %c0_53 = arith.constant 0 : index
    %c0_54 = arith.constant 0 : index
    %c0_55 = arith.constant 0 : index
    %77 = vector.load %arg2[%c0_53, %c0_54, %c0_55] : memref<1x196x4xf32, #tpu.memory_space<vmem>>, vector<1x196x4xf32>
    %78 = vector.shape_cast %77 : vector<1x196x4xf32> to vector<196x4xf32>
    %cst_56 = arith.constant 0.000000e+00 : f32
    %79 = vector.broadcast %cst_56 : f32 to vector<168x32xf32>
    %80 = vector.extract_strided_slice %78 {offsets = [0, 0], sizes = [168, 4], strides = [1, 1]} : vector<196x4xf32> to vector<168x4xf32>
    %c0_57 = arith.constant 0 : index
    %c0_58 = arith.constant 0 : index
    %c0_59 = arith.constant 0 : index
    %81 = vector.load %arg6[%c0_57, %c0_58, %c0_59] : memref<3x4x32xf32, #tpu.memory_space<vmem>>, vector<1x4x32xf32>
    %82 = vector.shape_cast %81 : vector<1x4x32xf32> to vector<4x32xf32>
    %cst_60 = arith.constant dense<0.000000e+00> : vector<168x32xf32>
    %83 = tpu.matmul %80, %82, %cst_60 {dimension_numbers = #tpu.dot_dimension_numbers<[1], [0], [0], [1], [0, 0, 1, 1], [], []>} : vector<168x4xf32>, vector<4x32xf32>, vector<168x32xf32> -> vector<168x32xf32>
    %84 = arith.addf %79, %83 : vector<168x32xf32>
    %85 = vector.extract_strided_slice %78 {offsets = [14, 0], sizes = [168, 4], strides = [1, 1]} : vector<196x4xf32> to vector<168x4xf32>
    %c1_61 = arith.constant 1 : index
    %c0_62 = arith.constant 0 : index
    %c0_63 = arith.constant 0 : index
    %86 = vector.load %arg6[%c1_61, %c0_62, %c0_63] : memref<3x4x32xf32, #tpu.memory_space<vmem>>, vector<1x4x32xf32>
    %87 = vector.shape_cast %86 : vector<1x4x32xf32> to vector<4x32xf32>
    %cst_64 = arith.constant dense<0.000000e+00> : vector<168x32xf32>
    %88 = tpu.matmul %85, %87, %cst_64 {dimension_numbers = #tpu.dot_dimension_numbers<[1], [0], [0], [1], [0, 0, 1, 1], [], []>} : vector<168x4xf32>, vector<4x32xf32>, vector<168x32xf32> -> vector<168x32xf32>
    %89 = arith.addf %84, %88 : vector<168x32xf32>
    %90 = vector.extract_strided_slice %78 {offsets = [28, 0], sizes = [168, 4], strides = [1, 1]} : vector<196x4xf32> to vector<168x4xf32>
    %c2_65 = arith.constant 2 : index
    %c0_66 = arith.constant 0 : index
    %c0_67 = arith.constant 0 : index
    %91 = vector.load %arg6[%c2_65, %c0_66, %c0_67] : memref<3x4x32xf32, #tpu.memory_space<vmem>>, vector<1x4x32xf32>
    %92 = vector.shape_cast %91 : vector<1x4x32xf32> to vector<4x32xf32>
    %cst_68 = arith.constant dense<0.000000e+00> : vector<168x32xf32>
    %93 = tpu.matmul %90, %92, %cst_68 {dimension_numbers = #tpu.dot_dimension_numbers<[1], [0], [0], [1], [0, 0, 1, 1], [], []>} : vector<168x4xf32>, vector<4x32xf32>, vector<168x32xf32> -> vector<168x32xf32>
    %94 = arith.addf %89, %93 : vector<168x32xf32>
    %c3 = arith.constant 3 : index
    %c0_69 = arith.constant 0 : index
    %95 = vector.load %arg9[%c3, %c0_69] : memref<6x32xf32, #tpu.memory_space<vmem>>, vector<1x32xf32>
    %96 = vector.broadcast %95 : vector<1x32xf32> to vector<168x32xf32>
    %97 = arith.addf %94, %96 : vector<168x32xf32>
    %cst_70 = arith.constant 0.000000e+00 : f32
    %98 = vector.broadcast %cst_70 : f32 to vector<168x32xf32>
    %99 = arith.cmpf ogt, %97, %98 : vector<168x32xf32>
    %cst_71 = arith.constant 0.00999999977 : f32
    %100 = vector.broadcast %cst_71 : f32 to vector<168x32xf32>
    %101 = arith.mulf %100, %97 : vector<168x32xf32>
    %102 = arith.select %99, %97, %101 : vector<168x32xi1>, vector<168x32xf32>
    %cst_72 = arith.constant 0.000000e+00 : f32
    %103 = vector.broadcast %cst_72 : f32 to vector<140x32xf32>
    %104 = vector.extract_strided_slice %102 {offsets = [0, 0], sizes = [140, 32], strides = [1, 1]} : vector<168x32xf32> to vector<140x32xf32>
    %c0_73 = arith.constant 0 : index
    %c0_74 = arith.constant 0 : index
    %c0_75 = arith.constant 0 : index
    %105 = vector.load %arg7[%c0_73, %c0_74, %c0_75] : memref<3x32x32xf32, #tpu.memory_space<vmem>>, vector<1x32x32xf32>
    %106 = vector.shape_cast %105 : vector<1x32x32xf32> to vector<32x32xf32>
    %cst_76 = arith.constant dense<0.000000e+00> : vector<140x32xf32>
    %107 = tpu.matmul %104, %106, %cst_76 {dimension_numbers = #tpu.dot_dimension_numbers<[1], [0], [0], [1], [0, 0, 1, 1], [], []>} : vector<140x32xf32>, vector<32x32xf32>, vector<140x32xf32> -> vector<140x32xf32>
    %108 = arith.addf %103, %107 : vector<140x32xf32>
    %109 = vector.extract_strided_slice %102 {offsets = [14, 0], sizes = [140, 32], strides = [1, 1]} : vector<168x32xf32> to vector<140x32xf32>
    %c1_77 = arith.constant 1 : index
    %c0_78 = arith.constant 0 : index
    %c0_79 = arith.constant 0 : index
    %110 = vector.load %arg7[%c1_77, %c0_78, %c0_79] : memref<3x32x32xf32, #tpu.memory_space<vmem>>, vector<1x32x32xf32>
    %111 = vector.shape_cast %110 : vector<1x32x32xf32> to vector<32x32xf32>
    %cst_80 = arith.constant dense<0.000000e+00> : vector<140x32xf32>
    %112 = tpu.matmul %109, %111, %cst_80 {dimension_numbers = #tpu.dot_dimension_numbers<[1], [0], [0], [1], [0, 0, 1, 1], [], []>} : vector<140x32xf32>, vector<32x32xf32>, vector<140x32xf32> -> vector<140x32xf32>
    %113 = arith.addf %108, %112 : vector<140x32xf32>
    %114 = vector.extract_strided_slice %102 {offsets = [28, 0], sizes = [140, 32], strides = [1, 1]} : vector<168x32xf32> to vector<140x32xf32>
    %c2_81 = arith.constant 2 : index
    %c0_82 = arith.constant 0 : index
    %c0_83 = arith.constant 0 : index
    %115 = vector.load %arg7[%c2_81, %c0_82, %c0_83] : memref<3x32x32xf32, #tpu.memory_space<vmem>>, vector<1x32x32xf32>
    %116 = vector.shape_cast %115 : vector<1x32x32xf32> to vector<32x32xf32>
    %cst_84 = arith.constant dense<0.000000e+00> : vector<140x32xf32>
    %117 = tpu.matmul %114, %116, %cst_84 {dimension_numbers = #tpu.dot_dimension_numbers<[1], [0], [0], [1], [0, 0, 1, 1], [], []>} : vector<140x32xf32>, vector<32x32xf32>, vector<140x32xf32> -> vector<140x32xf32>
    %118 = arith.addf %113, %117 : vector<140x32xf32>
    %c4 = arith.constant 4 : index
    %c0_85 = arith.constant 0 : index
    %119 = vector.load %arg9[%c4, %c0_85] : memref<6x32xf32, #tpu.memory_space<vmem>>, vector<1x32xf32>
    %120 = vector.broadcast %119 : vector<1x32xf32> to vector<140x32xf32>
    %121 = arith.addf %118, %120 : vector<140x32xf32>
    %cst_86 = arith.constant 0.000000e+00 : f32
    %122 = vector.broadcast %cst_86 : f32 to vector<140x32xf32>
    %123 = arith.cmpf ogt, %121, %122 : vector<140x32xf32>
    %cst_87 = arith.constant 0.00999999977 : f32
    %124 = vector.broadcast %cst_87 : f32 to vector<140x32xf32>
    %125 = arith.mulf %124, %121 : vector<140x32xf32>
    %126 = arith.select %123, %121, %125 : vector<140x32xi1>, vector<140x32xf32>
    %cst_88 = arith.constant 0.000000e+00 : f32
    %127 = vector.broadcast %cst_88 : f32 to vector<112x32xf32>
    %128 = vector.extract_strided_slice %126 {offsets = [0, 0], sizes = [112, 32], strides = [1, 1]} : vector<140x32xf32> to vector<112x32xf32>
    %c0_89 = arith.constant 0 : index
    %c0_90 = arith.constant 0 : index
    %c0_91 = arith.constant 0 : index
    %129 = vector.load %arg8[%c0_89, %c0_90, %c0_91] : memref<3x32x32xf32, #tpu.memory_space<vmem>>, vector<1x32x32xf32>
    %130 = vector.shape_cast %129 : vector<1x32x32xf32> to vector<32x32xf32>
    %cst_92 = arith.constant dense<0.000000e+00> : vector<112x32xf32>
    %131 = tpu.matmul %128, %130, %cst_92 {dimension_numbers = #tpu.dot_dimension_numbers<[1], [0], [0], [1], [0, 0, 1, 1], [], []>} : vector<112x32xf32>, vector<32x32xf32>, vector<112x32xf32> -> vector<112x32xf32>
    %132 = arith.addf %127, %131 : vector<112x32xf32>
    %133 = vector.extract_strided_slice %126 {offsets = [14, 0], sizes = [112, 32], strides = [1, 1]} : vector<140x32xf32> to vector<112x32xf32>
    %c1_93 = arith.constant 1 : index
    %c0_94 = arith.constant 0 : index
    %c0_95 = arith.constant 0 : index
    %134 = vector.load %arg8[%c1_93, %c0_94, %c0_95] : memref<3x32x32xf32, #tpu.memory_space<vmem>>, vector<1x32x32xf32>
    %135 = vector.shape_cast %134 : vector<1x32x32xf32> to vector<32x32xf32>
    %cst_96 = arith.constant dense<0.000000e+00> : vector<112x32xf32>
    %136 = tpu.matmul %133, %135, %cst_96 {dimension_numbers = #tpu.dot_dimension_numbers<[1], [0], [0], [1], [0, 0, 1, 1], [], []>} : vector<112x32xf32>, vector<32x32xf32>, vector<112x32xf32> -> vector<112x32xf32>
    %137 = arith.addf %132, %136 : vector<112x32xf32>
    %138 = vector.extract_strided_slice %126 {offsets = [28, 0], sizes = [112, 32], strides = [1, 1]} : vector<140x32xf32> to vector<112x32xf32>
    %c2_97 = arith.constant 2 : index
    %c0_98 = arith.constant 0 : index
    %c0_99 = arith.constant 0 : index
    %139 = vector.load %arg8[%c2_97, %c0_98, %c0_99] : memref<3x32x32xf32, #tpu.memory_space<vmem>>, vector<1x32x32xf32>
    %140 = vector.shape_cast %139 : vector<1x32x32xf32> to vector<32x32xf32>
    %cst_100 = arith.constant dense<0.000000e+00> : vector<112x32xf32>
    %141 = tpu.matmul %138, %140, %cst_100 {dimension_numbers = #tpu.dot_dimension_numbers<[1], [0], [0], [1], [0, 0, 1, 1], [], []>} : vector<112x32xf32>, vector<32x32xf32>, vector<112x32xf32> -> vector<112x32xf32>
    %142 = arith.addf %137, %141 : vector<112x32xf32>
    %c5 = arith.constant 5 : index
    %c0_101 = arith.constant 0 : index
    %143 = vector.load %arg9[%c5, %c0_101] : memref<6x32xf32, #tpu.memory_space<vmem>>, vector<1x32xf32>
    %144 = vector.broadcast %143 : vector<1x32xf32> to vector<112x32xf32>
    %145 = arith.addf %142, %144 : vector<112x32xf32>
    %cst_102 = arith.constant 0.000000e+00 : f32
    %146 = vector.broadcast %cst_102 : f32 to vector<112x32xf32>
    %147 = arith.cmpf ogt, %145, %146 : vector<112x32xf32>
    %cst_103 = arith.constant 0.00999999977 : f32
    %148 = vector.broadcast %cst_103 : f32 to vector<112x32xf32>
    %149 = arith.mulf %148, %145 : vector<112x32xf32>
    %150 = arith.select %147, %145, %149 : vector<112x32xi1>, vector<112x32xf32>
    %c0_104 = arith.constant 0 : index
    %c0_105 = arith.constant 0 : index
    %c0_106 = arith.constant 0 : index
    %151 = vector.load %arg11[%c0_104, %c0_105, %c0_106] : memref<1x112x32xf32, #tpu.memory_space<vmem>>, vector<1x112x32xf32>
    %152 = vector.shape_cast %151 : vector<1x112x32xf32> to vector<112x32xf32>
    %153 = vector.shape_cast %150 : vector<112x32xf32> to vector<1x112x32xf32>
    tpu.vector_store %arg11[%c0_104, %c0_105, %c0_106], %153 {strides = array<i32>} : memref<1x112x32xf32, #tpu.memory_space<vmem>>, vector<1x112x32xf32>,
    return
  }
  func.func @transform_0(%arg0: i32) -> (i32, i32, i32) {
    %c0_i32 = arith.constant 0 : i32
    %c0_i32_0 = arith.constant 0 : i32
    %c0_i32_1 = arith.constant 0 : i32
    return %arg0, %c0_i32, %c0_i32_0 : i32, i32, i32
  }
  func.func @transform_1(%arg0: i32) -> (i32, i32, i32) {
    %c0_i32 = arith.constant 0 : i32
    %c0_i32_0 = arith.constant 0 : i32
    %c0_i32_1 = arith.constant 0 : i32
    return %arg0, %c0_i32, %c0_i32_0 : i32, i32, i32
  }
  func.func @transform_2(%arg0: i32) -> (i32, i32, i32) {
    %c0_i32 = arith.constant 0 : i32
    %c0_i32_0 = arith.constant 0 : i32
    %c0_i32_1 = arith.constant 0 : i32
    %c0_i32_2 = arith.constant 0 : i32
    return %c0_i32, %c0_i32_0, %c0_i32_1 : i32, i32, i32
  }
  func.func @transform_3(%arg0: i32) -> (i32, i32, i32) {
    %c0_i32 = arith.constant 0 : i32
    %c0_i32_0 = arith.constant 0 : i32
    %c0_i32_1 = arith.constant 0 : i32
    %c0_i32_2 = arith.constant 0 : i32
    return %c0_i32, %c0_i32_0, %c0_i32_1 : i32, i32, i32
  }
  func.func @transform_4(%arg0: i32) -> (i32, i32, i32) {
    %c0_i32 = arith.constant 0 : i32
    %c0_i32_0 = arith.constant 0 : i32
    %c0_i32_1 = arith.constant 0 : i32
    %c0_i32_2 = arith.constant 0 : i32
    return %c0_i32, %c0_i32_0, %c0_i32_1 : i32, i32, i32
  }
  func.func @transform_5(%arg0: i32) -> (i32, i32, i32) {
    %c0_i32 = arith.constant 0 : i32
    %c0_i32_0 = arith.constant 0 : i32
    %c0_i32_1 = arith.constant 0 : i32
    %c0_i32_2 = arith.constant 0 : i32
    return %c0_i32, %c0_i32_0, %c0_i32_1 : i32, i32, i32
  }
  func.func @transform_6(%arg0: i32) -> (i32, i32, i32) {
    %c0_i32 = arith.constant 0 : i32
    %c0_i32_0 = arith.constant 0 : i32
    %c0_i32_1 = arith.constant 0 : i32
    %c0_i32_2 = arith.constant 0 : i32
    return %c0_i32, %c0_i32_0, %c0_i32_1 : i32, i32, i32
  }
  func.func @transform_7(%arg0: i32) -> (i32, i32, i32) {
    %c0_i32 = arith.constant 0 : i32
    %c0_i32_0 = arith.constant 0 : i32
    %c0_i32_1 = arith.constant 0 : i32
    %c0_i32_2 = arith.constant 0 : i32
    return %c0_i32, %c0_i32_0, %c0_i32_1 : i32, i32, i32
  }
  func.func @transform_8(%arg0: i32) -> (i32, i32) {
    %c0_i32 = arith.constant 0 : i32
    %c0_i32_0 = arith.constant 0 : i32
    %c0_i32_1 = arith.constant 0 : i32
    return %c0_i32, %c0_i32_0 : i32, i32
  }
  func.func @transform_9(%arg0: i32) -> (i32, i32, i32) {
    %c0_i32 = arith.constant 0 : i32
    %c0_i32_0 = arith.constant 0 : i32
    %c0_i32_1 = arith.constant 0 : i32
    return %arg0, %c0_i32, %c0_i32_0 : i32, i32, i32
  }
  func.func @transform_10(%arg0: i32) -> (i32, i32, i32) {
    %c0_i32 = arith.constant 0 : i32
    %c0_i32_0 = arith.constant 0 : i32
    %c0_i32_1 = arith.constant 0 : i32
    return %arg0, %c0_i32, %c0_i32_0 : i32, i32, i32
  }
}

module attributes {stable_mosaic.version = 11 : i64} {
  func.func @_head_kernel(%arg0: i32, %arg1: memref<2x3584xf32, #tpu.memory_space<vmem>>, %arg2: memref<2x512xf32, #tpu.memory_space<vmem>>, %arg3: memref<2x512xf32, #tpu.memory_space<vmem>>, %arg4: memref<3584x512xbf16, #tpu.memory_space<vmem>>, %arg5: memref<512x512xbf16, #tpu.memory_space<vmem>>, %arg6: memref<1x512xf32, #tpu.memory_space<vmem>>, %arg7: memref<512x256xbf16, #tpu.memory_space<vmem>>, %arg8: memref<1x256xf32, #tpu.memory_space<vmem>>, %arg9: memref<256x9xf32, #tpu.memory_space<vmem>>, %arg10: memref<1x9xf32, #tpu.memory_space<vmem>>, %arg11: memref<2x8xf32, #tpu.memory_space<vmem>>, %arg12: memref<2x512xf32, #tpu.memory_space<vmem>>, %arg13: memref<2x512xf32, #tpu.memory_space<vmem>>, %arg14: memref<4x2x512xf32, #tpu.memory_space<vmem>>) attributes {dimension_semantics = [#tpu.dimension_semantics<arbitrary>], iteration_bounds = array<i64: 4>, scalar_prefetch = 0 : i64, scratch_operands = 1 : i64, tpu.core_type = #tpu.core_type<tc>, window_params = [{pipeline_mode = #tpu.pipeline_mode<synchronous>, transform_indices = @transform_0, window_bounds = array<i64: 2, 3584>}, {pipeline_mode = #tpu.pipeline_mode<synchronous>, transform_indices = @transform_1, window_bounds = array<i64: 2, 512>}, {pipeline_mode = #tpu.pipeline_mode<synchronous>, transform_indices = @transform_2, window_bounds = array<i64: 2, 512>}, {transform_indices = @transform_3, window_bounds = array<i64: 3584, 512>}, {transform_indices = @transform_4, window_bounds = array<i64: 512, 512>}, {transform_indices = @transform_5, window_bounds = array<i64: 1, 512>}, {pipeline_mode = #tpu.pipeline_mode<synchronous>, transform_indices = @transform_6, window_bounds = array<i64: 512, 256>}, {pipeline_mode = #tpu.pipeline_mode<synchronous>, transform_indices = @transform_7, window_bounds = array<i64: 1, 256>}, {pipeline_mode = #tpu.pipeline_mode<synchronous>, transform_indices = @transform_8, window_bounds = array<i64: 256, 9>}, {pipeline_mode = #tpu.pipeline_mode<synchronous>, transform_indices = @transform_9, window_bounds = array<i64: 1, 9>}, {pipeline_mode = #tpu.pipeline_mode<synchronous>, transform_indices = @transform_10, window_bounds = array<i64: 2, 8>}, {pipeline_mode = #tpu.pipeline_mode<synchronous>, transform_indices = @transform_11, window_bounds = array<i64: 2, 512>}, {pipeline_mode = #tpu.pipeline_mode<synchronous>, transform_indices = @transform_12, window_bounds = array<i64: 2, 512>}]} {
    %c0 = arith.constant 0 : index
    %c0_0 = arith.constant 0 : index
    %0 = vector.load %arg1[%c0, %c0_0] : memref<2x3584xf32, #tpu.memory_space<vmem>>, vector<2x3584xf32>
    %1 = arith.truncf %0 : vector<2x3584xf32> to vector<2x3584xbf16>
    %c0_1 = arith.constant 0 : index
    %c0_2 = arith.constant 0 : index
    %2 = vector.load %arg2[%c0_1, %c0_2] : memref<2x512xf32, #tpu.memory_space<vmem>>, vector<2x512xf32>
    %3 = arith.truncf %2 : vector<2x512xf32> to vector<2x512xbf16>
    %c0_3 = arith.constant 0 : index
    %c0_4 = arith.constant 0 : index
    %4 = vector.load %arg4[%c0_3, %c0_4] : memref<3584x512xbf16, #tpu.memory_space<vmem>>, vector<3584x512xbf16>
    %cst = arith.constant dense<0.000000e+00> : vector<2x512xf32>
    %5 = tpu.matmul %1, %4, %cst {dimension_numbers = #tpu.dot_dimension_numbers<[1], [0], [0], [1], [0, 0, 1, 1], [], []>} : vector<2x3584xbf16>, vector<3584x512xbf16>, vector<2x512xf32> -> vector<2x512xf32>
    %c0_5 = arith.constant 0 : index
    %c0_6 = arith.constant 0 : index
    %6 = vector.load %arg5[%c0_5, %c0_6] : memref<512x512xbf16, #tpu.memory_space<vmem>>, vector<512x512xbf16>
    %cst_7 = arith.constant dense<0.000000e+00> : vector<2x512xf32>
    %7 = tpu.matmul %3, %6, %cst_7 {dimension_numbers = #tpu.dot_dimension_numbers<[1], [0], [0], [1], [0, 0, 1, 1], [], []>} : vector<2x512xbf16>, vector<512x512xbf16>, vector<2x512xf32> -> vector<2x512xf32>
    %8 = arith.addf %5, %7 : vector<2x512xf32>
    %c0_8 = arith.constant 0 : index
    %c0_9 = arith.constant 0 : index
    %9 = vector.load %arg6[%c0_8, %c0_9] : memref<1x512xf32, #tpu.memory_space<vmem>>, vector<1x512xf32>
    %10 = vector.broadcast %9 : vector<1x512xf32> to vector<2x512xf32>
    %11 = arith.addf %8, %10 : vector<2x512xf32>
    %12 = arith.index_cast %arg0 : i32 to index
    %c0_10 = arith.constant 0 : index
    %c0_11 = arith.constant 0 : index
    %13 = vector.load %arg14[%12, %c0_10, %c0_11] : memref<4x2x512xf32, #tpu.memory_space<vmem>>, vector<1x2x512xf32>
    %14 = vector.shape_cast %13 : vector<1x2x512xf32> to vector<2x512xf32>
    %15 = vector.shape_cast %11 : vector<2x512xf32> to vector<1x2x512xf32>
    tpu.vector_store %arg14[%12, %c0_10, %c0_11], %15 {strides = array<i32>} : memref<4x2x512xf32, #tpu.memory_space<vmem>>, vector<1x2x512xf32>,
    %c3_i32 = arith.constant 3 : i32
    %16 = arith.cmpi eq, %arg0, %c3_i32 : i32
    %17 = arith.extui %16 : i1 to i32
    %c0_i32 = arith.constant 0 : i32
    %18 = arith.cmpi ne, %17, %c0_i32 : i32
    scf.if %18 {
      %c0_12 = arith.constant 0 : index
      %c0_13 = arith.constant 0 : index
      %c0_14 = arith.constant 0 : index
      %19 = vector.load %arg14[%c0_12, %c0_13, %c0_14] : memref<4x2x512xf32, #tpu.memory_space<vmem>>, vector<1x2x512xf32>
      %20 = vector.shape_cast %19 : vector<1x2x512xf32> to vector<2x512xf32>
      %21 = arith.negf %20 : vector<2x512xf32>
      %22 = math.exp %21 : vector<2x512xf32>
      %cst_15 = arith.constant 1.000000e+00 : f32
      %23 = vector.broadcast %cst_15 : f32 to vector<2x512xf32>
      %24 = arith.addf %23, %22 : vector<2x512xf32>
      %25 = arith.divf %23, %24 : vector<2x512xf32>
      %c1 = arith.constant 1 : index
      %c0_16 = arith.constant 0 : index
      %c0_17 = arith.constant 0 : index
      %26 = vector.load %arg14[%c1, %c0_16, %c0_17] : memref<4x2x512xf32, #tpu.memory_space<vmem>>, vector<1x2x512xf32>
      %27 = vector.shape_cast %26 : vector<1x2x512xf32> to vector<2x512xf32>
      %28 = arith.negf %27 : vector<2x512xf32>
      %29 = math.exp %28 : vector<2x512xf32>
      %cst_18 = arith.constant 1.000000e+00 : f32
      %30 = vector.broadcast %cst_18 : f32 to vector<2x512xf32>
      %31 = arith.addf %30, %29 : vector<2x512xf32>
      %32 = arith.divf %30, %31 : vector<2x512xf32>
      %c2 = arith.constant 2 : index
      %c0_19 = arith.constant 0 : index
      %c0_20 = arith.constant 0 : index
      %33 = vector.load %arg14[%c2, %c0_19, %c0_20] : memref<4x2x512xf32, #tpu.memory_space<vmem>>, vector<1x2x512xf32>
      %34 = vector.shape_cast %33 : vector<1x2x512xf32> to vector<2x512xf32>
      %35 = math.tanh %34 : vector<2x512xf32>
      %c3 = arith.constant 3 : index
      %c0_21 = arith.constant 0 : index
      %c0_22 = arith.constant 0 : index
      %36 = vector.load %arg14[%c3, %c0_21, %c0_22] : memref<4x2x512xf32, #tpu.memory_space<vmem>>, vector<1x2x512xf32>
      %37 = vector.shape_cast %36 : vector<1x2x512xf32> to vector<2x512xf32>
      %38 = arith.negf %37 : vector<2x512xf32>
      %39 = math.exp %38 : vector<2x512xf32>
      %cst_23 = arith.constant 1.000000e+00 : f32
      %40 = vector.broadcast %cst_23 : f32 to vector<2x512xf32>
      %41 = arith.addf %40, %39 : vector<2x512xf32>
      %42 = arith.divf %40, %41 : vector<2x512xf32>
      %c0_24 = arith.constant 0 : index
      %c0_25 = arith.constant 0 : index
      %43 = vector.load %arg3[%c0_24, %c0_25] : memref<2x512xf32, #tpu.memory_space<vmem>>, vector<2x512xf32>
      %44 = arith.mulf %32, %43 : vector<2x512xf32>
      %45 = arith.mulf %25, %35 : vector<2x512xf32>
      %46 = arith.addf %44, %45 : vector<2x512xf32>
      %47 = math.tanh %46 : vector<2x512xf32>
      %48 = arith.mulf %42, %47 : vector<2x512xf32>
      %c0_26 = arith.constant 0 : index
      %c0_27 = arith.constant 0 : index
      %49 = vector.load %arg13[%c0_26, %c0_27] : memref<2x512xf32, #tpu.memory_space<vmem>>, vector<2x512xf32>
      tpu.vector_store %arg13[%c0_26, %c0_27], %46 {strides = array<i32>} : memref<2x512xf32, #tpu.memory_space<vmem>>, vector<2x512xf32>,
      %c0_28 = arith.constant 0 : index
      %c0_29 = arith.constant 0 : index
      %50 = vector.load %arg12[%c0_28, %c0_29] : memref<2x512xf32, #tpu.memory_space<vmem>>, vector<2x512xf32>
      tpu.vector_store %arg12[%c0_28, %c0_29], %48 {strides = array<i32>} : memref<2x512xf32, #tpu.memory_space<vmem>>, vector<2x512xf32>,
      %51 = arith.truncf %48 : vector<2x512xf32> to vector<2x512xbf16>
      %c0_30 = arith.constant 0 : index
      %c0_31 = arith.constant 0 : index
      %52 = vector.load %arg7[%c0_30, %c0_31] : memref<512x256xbf16, #tpu.memory_space<vmem>>, vector<512x256xbf16>
      %cst_32 = arith.constant dense<0.000000e+00> : vector<2x256xf32>
      %53 = tpu.matmul %51, %52, %cst_32 {dimension_numbers = #tpu.dot_dimension_numbers<[1], [0], [0], [1], [0, 0, 1, 1], [], []>} : vector<2x512xbf16>, vector<512x256xbf16>, vector<2x256xf32> -> vector<2x256xf32>
      %c0_33 = arith.constant 0 : index
      %c0_34 = arith.constant 0 : index
      %54 = vector.load %arg8[%c0_33, %c0_34] : memref<1x256xf32, #tpu.memory_space<vmem>>, vector<1x256xf32>
      %55 = vector.broadcast %54 : vector<1x256xf32> to vector<2x256xf32>
      %56 = arith.addf %53, %55 : vector<2x256xf32>
      %cst_35 = arith.constant 0.000000e+00 : f32
      %57 = vector.broadcast %cst_35 : f32 to vector<2x256xf32>
      %58 = arith.cmpf ogt, %56, %57 : vector<2x256xf32>
      %cst_36 = arith.constant 0.00999999977 : f32
      %59 = vector.broadcast %cst_36 : f32 to vector<2x256xf32>
      %60 = arith.mulf %59, %56 : vector<2x256xf32>
      %61 = arith.select %58, %56, %60 : vector<2x256xi1>, vector<2x256xf32>
      %c0_37 = arith.constant 0 : index
      %c0_38 = arith.constant 0 : index
      %62 = vector.load %arg9[%c0_37, %c0_38] : memref<256x9xf32, #tpu.memory_space<vmem>>, vector<256x9xf32>
      %cst_39 = arith.constant dense<0.000000e+00> : vector<2x9xf32>
      %63 = tpu.matmul %61, %62, %cst_39 {dimension_numbers = #tpu.dot_dimension_numbers<[1], [0], [0], [1], [0, 0, 1, 1], [], []>} : vector<2x256xf32>, vector<256x9xf32>, vector<2x9xf32> -> vector<2x9xf32>
      %c0_40 = arith.constant 0 : index
      %c0_41 = arith.constant 0 : index
      %64 = vector.load %arg10[%c0_40, %c0_41] : memref<1x9xf32, #tpu.memory_space<vmem>>, vector<1x9xf32>
      %65 = vector.broadcast %64 : vector<1x9xf32> to vector<2x9xf32>
      %66 = arith.addf %63, %65 : vector<2x9xf32>
      %67 = vector.extract_strided_slice %66 {offsets = [0, 0], sizes = [2, 1], strides = [1, 1]} : vector<2x9xf32> to vector<2x1xf32>
      %68 = vector.extract_strided_slice %66 {offsets = [0, 1], sizes = [2, 8], strides = [1, 1]} : vector<2x9xf32> to vector<2x8xf32>
      %69 = vector.shape_cast %68 : vector<2x8xf32> to vector<1x2x8xf32>
      %cst_42 = arith.constant dense<0.000000e+00> : vector<1xf32>
      %70 = vector.multi_reduction <add>, %69, %cst_42 [1, 2] : vector<1x2x8xf32> to vector<1xf32>
      %71 = vector.shape_cast %70 : vector<1xf32> to vector<1x1x1xf32>
      %72 = vector.extract %71[0, 0, 0] : f32 from vector<1x1x1xf32>
      %cst_43 = arith.constant 1.600000e+01 : f32
      %73 = arith.divf %72, %cst_43 : f32
      %74 = vector.broadcast %73 : f32 to vector<2x8xf32>
      %75 = arith.subf %68, %74 : vector<2x8xf32>
      %76 = vector.broadcast %67 : vector<2x1xf32> to vector<2x8xf32>
      %77 = arith.addf %76, %75 : vector<2x8xf32>
      %c0_44 = arith.constant 0 : index
      %c0_45 = arith.constant 0 : index
      %78 = vector.load %arg11[%c0_44, %c0_45] : memref<2x8xf32, #tpu.memory_space<vmem>>, vector<2x8xf32>
      tpu.vector_store %arg11[%c0_44, %c0_45], %77 {strides = array<i32>} : memref<2x8xf32, #tpu.memory_space<vmem>>, vector<2x8xf32>,
    } else {
    }
    return
  }
  func.func @transform_0(%arg0: i32) -> (i32, i32) {
    %c0_i32 = arith.constant 0 : i32
    %c0_i32_0 = arith.constant 0 : i32
    %c0_i32_1 = arith.constant 0 : i32
    return %c0_i32, %c0_i32_0 : i32, i32
  }
  func.func @transform_1(%arg0: i32) -> (i32, i32) {
    %c0_i32 = arith.constant 0 : i32
    %c0_i32_0 = arith.constant 0 : i32
    %c0_i32_1 = arith.constant 0 : i32
    return %c0_i32, %c0_i32_0 : i32, i32
  }
  func.func @transform_2(%arg0: i32) -> (i32, i32) {
    %c0_i32 = arith.constant 0 : i32
    %c0_i32_0 = arith.constant 0 : i32
    %c0_i32_1 = arith.constant 0 : i32
    return %c0_i32, %c0_i32_0 : i32, i32
  }
  func.func @transform_3(%arg0: i32) -> (i32, i32) {
    %c0_i32 = arith.constant 0 : i32
    %c0_i32_0 = arith.constant 0 : i32
    return %c0_i32, %arg0 : i32, i32
  }
  func.func @transform_4(%arg0: i32) -> (i32, i32) {
    %c0_i32 = arith.constant 0 : i32
    %c0_i32_0 = arith.constant 0 : i32
    return %c0_i32, %arg0 : i32, i32
  }
  func.func @transform_5(%arg0: i32) -> (i32, i32) {
    %c0_i32 = arith.constant 0 : i32
    %c0_i32_0 = arith.constant 0 : i32
    return %c0_i32, %arg0 : i32, i32
  }
  func.func @transform_6(%arg0: i32) -> (i32, i32) {
    %c0_i32 = arith.constant 0 : i32
    %c0_i32_0 = arith.constant 0 : i32
    %c0_i32_1 = arith.constant 0 : i32
    return %c0_i32, %c0_i32_0 : i32, i32
  }
  func.func @transform_7(%arg0: i32) -> (i32, i32) {
    %c0_i32 = arith.constant 0 : i32
    %c0_i32_0 = arith.constant 0 : i32
    %c0_i32_1 = arith.constant 0 : i32
    return %c0_i32, %c0_i32_0 : i32, i32
  }
  func.func @transform_8(%arg0: i32) -> (i32, i32) {
    %c0_i32 = arith.constant 0 : i32
    %c0_i32_0 = arith.constant 0 : i32
    %c0_i32_1 = arith.constant 0 : i32
    return %c0_i32, %c0_i32_0 : i32, i32
  }
  func.func @transform_9(%arg0: i32) -> (i32, i32) {
    %c0_i32 = arith.constant 0 : i32
    %c0_i32_0 = arith.constant 0 : i32
    %c0_i32_1 = arith.constant 0 : i32
    return %c0_i32, %c0_i32_0 : i32, i32
  }
  func.func @transform_10(%arg0: i32) -> (i32, i32) {
    %c0_i32 = arith.constant 0 : i32
    %c0_i32_0 = arith.constant 0 : i32
    %c0_i32_1 = arith.constant 0 : i32
    return %c0_i32, %c0_i32_0 : i32, i32
  }
  func.func @transform_11(%arg0: i32) -> (i32, i32) {
    %c0_i32 = arith.constant 0 : i32
    %c0_i32_0 = arith.constant 0 : i32
    %c0_i32_1 = arith.constant 0 : i32
    return %c0_i32, %c0_i32_0 : i32, i32
  }
  func.func @transform_12(%arg0: i32) -> (i32, i32) {
    %c0_i32 = arith.constant 0 : i32
    %c0_i32_0 = arith.constant 0 : i32
    %c0_i32_1 = arith.constant 0 : i32
    return %c0_i32, %c0_i32_0 : i32, i32
  }
}

</mosaic_0001>

<bundles_post_ra>
// kernel: forward.2
= control target key start
LH: loop header
LB: loop body
LE: loop exit
PB: predicated region body
PF: predicated region fallthrough
CT: control target
= control target key end

     0   :  { %16 = vsyncpa [#allocation3], 0  ;;  %s9655_s0 = inlined_call_operand.vmem [shape: f32[2,196,4], index: 0, kind: input, shape index: {}]   ;;  %s9656_s1 = inlined_call_operand.vmem [shape: f32[2,196,4], index: 1, kind: input, shape index: {}]   ;;  %s9657_s2 = inlined_call_operand.hbm [shape: f32[3,4,32], index: 2, kind: input, shape index: {}]   ;;  %s9658_s3 = inlined_call_operand.hbm [shape: f32[3,32,32], index: 3, kind: input, shape index: {}]   ;;  %s9659_s4 = inlined_call_operand.hbm [shape: f32[3,32,32], index: 4, kind: input, shape index: {}]   ;;  %s9660_s5 = inlined_call_operand.hbm [shape: f32[3,4,32], index: 5, kind: input, shape index: {}]   ;;  %s9661_s6 = inlined_call_operand.hbm [shape: f32[3,32,32], index: 6, kind: input, shape index: {}]   ;;  %s9662_s7 = inlined_call_operand.hbm [shape: f32[3,32,32], index: 7, kind: input, shape index: {}]   ;;  %s9663_s8 = inlined_call_operand.hbm [shape: f32[6,32], index: 8, kind: input, shape index: {}]   ;;  %s9664_s9 = inlined_call_operand.vmem [shape: f32[2,112,32], index: 9, kind: output, shape index: {0}]   ;;  %s9665_s10 = inlined_call_operand.vmem [shape: f32[2,112,32], index: 10, kind: output, shape index: {1}]  }
   0x1   :  { %17 = vsyncpa [#allocation5], 0 }
   0x2   :  { %18 = vsyncpa [#allocation8], 0 }
   0x3   :  { %19 = vsyncpa [#allocation11], 0  ;;  %s7444_s13 = smov 0  }
   0x4 LB: > { %s7376_s14 = smov [#allocation4]   ;;  %s7450_s16 = sadd.s32 4294967295, %s7374_s13   ;;  %s7374_s13 = sphi %s7444_s13, %s25_s13  }
   0x5   : > { %s306_s15 = sshll.u32 %s7376_s14, 4  ;;  %p5346_p0 = scmp.ge.s32.totalorder %s7374_s13, 1  ;;  %s7455_s15 = int_to_ptr.vmem [resolvable:$true] %s306_s15 }
   0x6   : > { %p281_p1 = scmp.lt.s32.totalorder %s7374_s13, 3  ;;  %p9667_p2 = scmp.eq.s32.totalorder %s7450_s16, 0 }
   0x7   : > { %s7377_s19 = smov [#allocation7]   ;;  %s7378_s21 = smov [#allocation10]  }
   0x8   : > { %p7457_p3 = pnand %p5346_p0, %p281_p1  ;;  %s332_s20 = sshll.u32 %s7377_s19, 4  ;;  %s7469_s20 = int_to_ptr.vmem [resolvable:$true] %s332_s20 }
   0x9   : > { %s358_s22 = sshll.u32 %s7378_s21, 4  ;;  %s7156_s25 = scalar_lea.hbm %s9658_s3, 1536  ;;  %s7471_s22 = int_to_ptr.vmem [resolvable:$true] %s358_s22 }
   0xa   : > { %s9678_s17 = scalar_select %p7457_p3, 1, 0 }
   0xb   : > { %p7099_p4 = pneg %p7457_p3  ;;  %p7157_p6 = scmp.ne.s32.totalorder %s9658_s3, %s7156_s25 }
   0xc   : > { %p7163_p10 = scmp.lt.u32.totalorder %s7156_s25, %s9658_s3 }
   0xd   : > { %p7465_p5 = pnand %p9667_p2, %p7099_p4 }
   0xf   : > { %p7481_p7 = pneg %p7465_p5 }
  0x11   : > { %p7159_p8 = pnand %p7481_p7, %p7157_p6 }
  0x13   : > { %p7160_p9 = pneg %p7159_p8 }
  0x15   : > { %p7165_p11 = pnand %p7163_p10, %p7160_p9 }
  0x17   : > { %7168 = shalt.err (!%p7165_p11)
}
  0x18   : > { %s7169_s11 = scalar_lea.vmem %s7455_s15, 1536  ;;  %p7177_p1 = scmp.lt.s32.totalorder %s7455_s15, %s7455_s15 }
  0x19   : > { %p7170_p12 = scmp.ne.s32.totalorder %s7455_s15, %s7169_s11  ;;  %p7178_p4 = scmp.lt.s32.totalorder %s7169_s11, %s7169_s11 }
  0x1b   : > { %p7172_p13 = pnand %p7170_p12, %p7481_p7  ;;  %p7179_p6 = por %p7178_p4, %p7177_p1 }
  0x1d   : > { %p7173_p0 = pneg %p7172_p13 }
  0x1f   : > { %p7180_p8 = pnand %p7179_p6, %p7173_p0 }
  0x21   : > { %7183 = shalt.err (!%p7180_p8)
}
  0x22   : > { %s7379_s12 = smov 128   ;;  %s7380_s14 = smov 8  }
  0x23   : > { %7105 = dma.hbm_to_vmem [thread:$0]  (!%p7465_p5), %s9658_s3, 1536, %s7455_s15, [#allocation5], %s7379_s12, %s7379_s12, %s7380_s14  }
  0x24   : > { %s7184_s25 = scalar_lea.hbm %s9660_s5, 192 }
  0x25   : > { %p7185_p9 = scmp.ne.s32.totalorder %s9660_s5, %s7184_s25  ;;  %p7191_p12 = scmp.lt.u32.totalorder %s7184_s25, %s9660_s5 }
  0x27   : > { %p7187_p10 = pnand %p7185_p9, %p7481_p7 }
  0x29   : > { %p7188_p11 = pneg %p7187_p10 }
  0x2b   : > { %p7193_p13 = pnand %p7191_p12, %p7188_p11 }
  0x2d   : > { %7196 = shalt.err (!%p7193_p13)
}
  0x2e   : > { %s7197_s15 = scalar_lea.vmem %s7469_s20, 192  ;;  %p7205_p6 = scmp.lt.s32.totalorder %s7469_s20, %s7469_s20 }
  0x2f   : > { %p7198_p0 = scmp.ne.s32.totalorder %s7469_s20, %s7197_s15  ;;  %p7206_p8 = scmp.lt.s32.totalorder %s7197_s15, %s7197_s15 }
  0x31   : > { %p7200_p1 = pnand %p7198_p0, %p7481_p7  ;;  %p7207_p9 = por %p7206_p8, %p7205_p6 }
  0x33   : > { %p7201_p4 = pneg %p7200_p1 }
  0x35   : > { %p7208_p10 = pnand %p7207_p9, %p7201_p4 }
  0x37   : > { %7211 = shalt.err (!%p7208_p10)
}
  0x38   : > { %s9666_s11 = smov 64   ;;  %s7382_s19 = smov 4  }
  0x39   : > { %7111 = dma.hbm_to_vmem [thread:$0]  (!%p7465_p5), %s9660_s5, 192, %s7469_s20, [#allocation8], %s9666_s11, %s9666_s11, %s7382_s19  }
  0x3a   : > { %s7212_s26 = scalar_lea.hbm %s9662_s7, 1536 }
  0x3b   : > { %p7213_p11 = scmp.ne.s32.totalorder %s9662_s7, %s7212_s26  ;;  %p7219_p0 = scmp.lt.u32.totalorder %s7212_s26, %s9662_s7 }
  0x3d   : > { %p7215_p12 = pnand %p7213_p11, %p7481_p7 }
  0x3f   : > { %p7216_p13 = pneg %p7215_p12 }
  0x41   : > { %p7221_p1 = pnand %p7219_p0, %p7216_p13 }
  0x43   : > { %7224 = shalt.err (!%p7221_p1)
}
  0x44   : > { %s7225_s20 = scalar_lea.vmem %s7471_s22, 1536  ;;  %p7233_p9 = scmp.lt.s32.totalorder %s7471_s22, %s7471_s22 }
  0x45   : > { %p7226_p4 = scmp.ne.s32.totalorder %s7471_s22, %s7225_s20  ;;  %p7234_p10 = scmp.lt.s32.totalorder %s7225_s20, %s7225_s20 }
  0x47   : > { %p7228_p6 = pnand %p7226_p4, %p7481_p7  ;;  %p7235_p11 = por %p7234_p10, %p7233_p9 }
  0x49   : > { %p7229_p8 = pneg %p7228_p6 }
  0x4b   : > { %p7236_p12 = pnand %p7235_p11, %p7229_p8 }
  0x4d   : > { %7239 = shalt.err (!%p7236_p12)
}
  0x4e   : > { %7117 = dma.hbm_to_vmem [thread:$0]  (!%p7465_p5), %s9662_s7, 1536, %s7471_s22, [#allocation11], %s7379_s12, %s7379_s12, %s7380_s14  }
  0x4f   : > { %s7383_s24 = smov [#allocation2]   ;;  %s7384_s26 = smov [#allocation6]  }
  0x50   : > { %s293_s25 = sshll.u32 %s7383_s24, 4  ;;  %s319_s27 = sshll.u32 %s7384_s26, 4  ;;  %s294_s25 = int_to_ptr.vmem [resolvable:$true] %s293_s25  ;;  %s7557_s27 = int_to_ptr.vmem [resolvable:$true] %s319_s27 }
  0x51   : > { %s7240_s15 = scalar_lea.hbm %s9657_s2, 192 }
  0x52   : > { %p7241_p13 = scmp.ne.s32.totalorder %s9657_s2, %s7240_s15  ;;  %p7247_p4 = scmp.lt.u32.totalorder %s7240_s15, %s9657_s2 }
  0x54   : > { %p7243_p0 = pnand %p7241_p13, %p7481_p7 }
  0x56   : > { %p7244_p1 = pneg %p7243_p0 }
  0x58   : > { %p7249_p6 = pnand %p7247_p4, %p7244_p1 }
  0x5a   : > { %7252 = shalt.err (!%p7249_p6)
}
  0x5b   : > { %s7253_s23 = scalar_lea.vmem %s294_s25, 192  ;;  %p7261_p11 = scmp.lt.s32.totalorder %s294_s25, %s294_s25 }
  0x5c   : > { %p7254_p8 = scmp.ne.s32.totalorder %s294_s25, %s7253_s23  ;;  %p7262_p12 = scmp.lt.s32.totalorder %s7253_s23, %s7253_s23 }
  0x5e   : > { %p7256_p9 = pnand %p7254_p8, %p7481_p7  ;;  %p7263_p2 = por %p7262_p12, %p7261_p11 }
  0x60   : > { %p7257_p10 = pneg %p7256_p9 }
  0x62   : > { %p7264_p3 = pnand %p7263_p2, %p7257_p10 }
  0x64   : > { %7267 = shalt.err (!%p7264_p3)
}
  0x65   : > { %s9681_s11 = smov 64   ;;  %s7268_s15 = scalar_lea.hbm %s9659_s4, 1536 }
  0x66   : > { %7102 = dma.hbm_to_vmem [thread:$0]  (!%p7465_p5), %s9657_s2, 192, %s294_s25, [#allocation3], %s9681_s11, %s9681_s11, %s7382_s19  }
  0x67   : > { %p7269_p13 = scmp.ne.s32.totalorder %s9659_s4, %s7268_s15  ;;  %p7275_p0 = scmp.lt.u32.totalorder %s7268_s15, %s9659_s4 }
  0x69   : > { %p7271_p2 = pnand %p7269_p13, %p7481_p7 }
  0x6b   : > { %p7272_p3 = pneg %p7271_p2 }
  0x6d   : > { %p7277_p1 = pnand %p7275_p0, %p7272_p3 }
  0x6f   : > { %7280 = shalt.err (!%p7277_p1)
}
  0x70   : > { %s7281_s19 = scalar_lea.vmem %s7557_s27, 1536  ;;  %p7289_p9 = scmp.lt.s32.totalorder %s7557_s27, %s7557_s27 }
  0x71   : > { %p7282_p4 = scmp.ne.s32.totalorder %s7557_s27, %s7281_s19  ;;  %p7290_p10 = scmp.lt.s32.totalorder %s7281_s19, %s7281_s19 }
  0x73   : > { %p7284_p6 = pnand %p7282_p4, %p7481_p7  ;;  %p7291_p11 = por %p7290_p10, %p7289_p9 }
  0x75   : > { %p7285_p8 = pneg %p7284_p6 }
  0x77   : > { %p7292_p12 = pnand %p7291_p11, %p7285_p8 }
  0x79   : > { %7295 = shalt.err (!%p7292_p12)
}
  0x7a   : > { %7108 = dma.hbm_to_vmem [thread:$0]  (!%p7465_p5), %s9659_s4, 1536, %s7557_s27, [#allocation5], %s7379_s12, %s7379_s12, %s7380_s14  }
  0x7b   : > { %s7385_s24 = smov [#allocation9]   ;;  %s7386_s29 = smov [#allocation12]  }
  0x7c   : > { %s345_s26 = sshll.u32 %s7385_s24, 4  ;;  %s372_s30 = sshll.u32 %s7386_s29, 4  ;;  %s346_s26 = int_to_ptr.vmem [resolvable:$true] %s345_s26  ;;  %s7606_s30 = int_to_ptr.vmem [resolvable:$true] %s372_s30 }
  0x7d   : > { %s7296_s21 = scalar_lea.hbm %s9661_s6, 1536 }
  0x7e   : > { %p7297_p13 = scmp.ne.s32.totalorder %s9661_s6, %s7296_s21  ;;  %p7303_p0 = scmp.lt.u32.totalorder %s7296_s21, %s9661_s6 }
  0x80   : > { %p7299_p2 = pnand %p7297_p13, %p7481_p7 }
  0x82   : > { %p7300_p3 = pneg %p7299_p2 }
  0x84   : > { %p7305_p1 = pnand %p7303_p0, %p7300_p3 }
  0x86   : > { %7308 = shalt.err (!%p7305_p1)
}
  0x87   : > { %s7309_s25 = scalar_lea.vmem %s346_s26, 1536  ;;  %p7317_p9 = scmp.lt.s32.totalorder %s346_s26, %s346_s26 }
  0x88   : > { %p7310_p4 = scmp.ne.s32.totalorder %s346_s26, %s7309_s25  ;;  %p7318_p10 = scmp.lt.s32.totalorder %s7309_s25, %s7309_s25 }
  0x8a   : > { %p7312_p6 = pnand %p7310_p4, %p7481_p7  ;;  %p7319_p11 = por %p7318_p10, %p7317_p9 }
  0x8c   : > { %p7313_p8 = pneg %p7312_p6 }
  0x8e   : > { %p7320_p12 = pnand %p7319_p11, %p7313_p8 }
  0x90   : > { %7323 = shalt.err (!%p7320_p12)
}
  0x91   : > { %7114 = dma.hbm_to_vmem [thread:$0]  (!%p7465_p5), %s9661_s6, 1536, %s346_s26, [#allocation8], %s7379_s12, %s7379_s12, %s7380_s14  }
  0x92   : > { %s7324_s20 = scalar_lea.hbm %s9663_s8, 128 }
  0x93   : > { %p7325_p13 = scmp.ne.s32.totalorder %s9663_s8, %s7324_s20  ;;  %p7331_p0 = scmp.lt.u32.totalorder %s7324_s20, %s9663_s8 }
  0x95   : > { %p7327_p2 = pnand %p7325_p13, %p7481_p7 }
  0x97   : > { %p7328_p3 = pneg %p7327_p2 }
  0x99   : > { %p7333_p1 = pnand %p7331_p0, %p7328_p3 }
  0x9b   : > { %7336 = shalt.err (!%p7333_p1)
}
  0x9c   : > { %s7337_s12 = scalar_lea.vmem %s7606_s30, 128  ;;  %p7345_p9 = scmp.lt.s32.totalorder %s7606_s30, %s7606_s30 }
  0x9d   : > { %p7338_p4 = scmp.ne.s32.totalorder %s7606_s30, %s7337_s12  ;;  %p7346_p10 = scmp.lt.s32.totalorder %s7337_s12, %s7337_s12 }
  0x9f   : > { %p7340_p6 = pnand %p7338_p4, %p7481_p7  ;;  %p7347_p11 = por %p7346_p10, %p7345_p9 }
  0xa1   : > { %p7341_p8 = pneg %p7340_p6 }
  0xa3   : > { %p7348_p12 = pnand %p7347_p11, %p7341_p8 }
  0xa5   : > { %7351 = shalt.err (!%p7348_p12)
}
  0xa6   : > { %7120 = dma.hbm_to_vmem [thread:$0]  (!%p7465_p5), %s9663_s8, 128, %s7606_s30, [#allocation11]  }
  0xa7   : > { %p9682_p13 = scmp.ne.s32.totalorder %s9678_s17, 0 }
  0xa9   : > { %401 = sbr.rel (%p9682_p13) target bundleno = 1796 (0x704), region = 56 }
  0xb0   : > { %p9683_p2 = scmp.eq.s32.totalorder %s7450_s16, 0 }
  0xb2   : > { %7357 = dma.done.wait (%p9683_p2), [#allocation3], 192   ;;  %p9684_p7 = pmov %p9683_p2 }
  0xb3   : > { %p9685_p3 = pmov %p9683_p2 }
  0xb4   : > { %7359 = vsyncadd (%p9684_p7), [#allocation3], 4294967104 }
  0xb5   : > { %7361 = dma.done.wait (%p9685_p3), [#allocation5], 3072   ;;  %p9686_p0 = pmov %p9683_p2 }
  0xb7   : > { %7363 = vsyncadd (%p9686_p0), [#allocation5], 4294964224  ;;  %p9687_p1 = pmov %p9686_p0 }
  0xb8   : > { %p9688_p5 = pmov %p9686_p0 }
  0xb9   : > { %7365 = dma.done.wait (%p9687_p1), [#allocation8], 1728  }
  0xba   : > { %7367 = vsyncadd (%p9688_p5), [#allocation8], 4294965568  ;;  %p9689_p4 = pmov %p9686_p0 }
  0xbb   : > { %p9690_p6 = pmov %p9686_p0 }
  0xbc   : > { %7369 = dma.done.wait (%p9689_p4), [#allocation11], 1664  }
  0xbd   : > { %7371 = vsyncadd (%p9690_p6), [#allocation11], 4294965632  ;;  %p473_p8 = scmp.lt.s32.totalorder %s7450_s16, 1  ;;  %v9669_v0 = vmov 0.0   ;;  %vm7388_vm0 = vmmov 0   ;;  %vm630_vm1 = vcmask 1043456  }
  0xbe   : > { %6071 = vmatprep.subr.mxu0 %v9669_v0  ;;  %6136 = vmatprep.subr.mxu1 %v9669_v0  ;;  %vm587_vm2 = vcmask 31744   ;;  %v520_v1 = vld [vmem:[#allocation2 + $0x4] sm:$0xf]  ;;  %v518_v2 = vld [vmem:[#allocation2] sm:$0xf]  ;;  %vm543_vm3 = vcmask 1041408  }
  0xbf   : > { %6073 = vmatprep.mubr.msk.f32.mxu0 %vm7388_vm0, %v9669_v0  ;;  %6138 = vmatprep.mubr.msk.f32.mxu1 %vm7388_vm0, %v9669_v0  ;;  %s9708_s16 = smov (!%p473_p8, %s7450_s16), 1  ;;  %v1021_v9 = vld [vmem:[#allocation2 + $0x8] sm:$0xf]  ;;  %vm1457_vm6 = vcmask 261120  }
  0xc0   : > { %s7069_s17 = smul.u32 200, %s9708_s16  ;;  %6072 = vmatpush3.msk.msra.mxu0 %vm630_vm1, %v520_v1  ;;  %6137 = vmatpush3.msk.msra.mxu1 %vm630_vm1, %v518_v2 }
  0xc1   : > { %6201 = vmatprep.subr.mxu0 %v9669_v0  ;;  %s7070_s24 = smul.u32 112, %s9708_s16 }
  0xc2   : > { %s7686_s30 = scalar_lea.vmem %s9655_s0, %s7069_s17  ;;  %s8408_s11 = scalar_lea.vmem %s9656_s1, %s7069_s17 }
  0xc3   : > { %v494_v3 = vld [vmem:[%s7686_s30 + $0x8] sm:$0xff]  ;;  %v495_v4 = vld [vmem:[%s7686_s30 + $0x10] sm:$0xff]  ;;  %v493_v6 = vld [vmem:[%s7686_s30] sm:$0xff]  ;;  %s9093_s20 = scalar_lea.vmem %s9664_s9, %s7070_s24  ;;  %s9610_s23 = scalar_lea.vmem %s9665_s10, %s7070_s24 }
  0xc4   : > { %v544_v5 = vrot.slane %v494_v3, 6  ;;  %v545_v7 = vrot.slane %v495_v4, 6  ;;  %6139 = vmatmul.mubr.msk.f32.vlgmr.msra.gmra.mrb[0].mxu1 %vm587_vm2, %v493_v6  ;;  %v496_v8 = vld [vmem:[%s7686_s30 + $0x18] sm:$0xff]  ;;  %v497_v11 = vld [vmem:[%s7686_s30 + $0x20] sm:$0xff]  ;;  %v7707_v15 = vld [vmem:[%s7686_s30 + $0x28] sm:$0xff] }
  0xc5   : > { %6141 = vmatprep.mubr.msk.f32.mxu1 %vm7388_vm0, %v9669_v0  ;;  %v547_v10 = vrot.slane %v496_v8, 6  ;;  %v549_v14 = vrot.slane %v497_v11, 6  ;;  %v7710_v16 = vld [vmem:[%s7686_s30 + $0x30] sm:$0xff]  ;;  %v1024_v17 = vrot.slane %v496_v8, 4  ;;  %v1025_v18 = vrot.slane %v497_v11, 4  ;;  %v7721_v22 = vld [vmem:[%s7686_s30 + $0x38] sm:$0xff] }
  0xc6   : > { %v546_v12 = vsel %vm543_vm3, %v544_v5, %v545_v7  ;;  %v551_v20 = vrot.slane %v7707_v15, 6  ;;  %v553_v21 = vrot.slane %v7710_v16, 6  ;;  %v555_v24 = vrot.slane %v7721_v22, 6  ;;  %v7732_v25 = vld [vmem:[%s7686_s30 + $0x40] sm:$0xff]  ;;  %v7741_v30 = vld [vmem:[%s7686_s30 + $0x48] sm:$0xff]  ;;  %v7744_v31 = vld [vmem:[%s7686_s30 + $0x50] sm:$0xff] }
  0xc7   : > { %6074 = vmatmul.mubr.msk.f32.vlgmr.msra.gmra.mrb[0].mxu0 %vm587_vm2, %v546_v12  ;;  %v548_v13 = vsel %vm543_vm3, %v545_v7, %v547_v10  ;;  %v550_v19 = vsel %vm543_vm3, %v547_v10, %v549_v14  ;;  %v7727_v23 = vsel %vm630_vm1, %v1024_v17, %v1025_v18  ;;  %v1027_v26 = vrot.slane %v7707_v15, 4  ;;  %v7750_v34 = vld [vmem:[%s7686_s30 + $0x58] sm:$0xff]  ;;  %v7753_v35 = vld [vmem:[%s7686_s30 + $0x60] sm:$0xff]  ;;  %v7766_v40 = vld [vmem:[%s7686_s30 + $0x68] sm:$0xff] }
  0xc8   : > { %6202 = vmatpush3.msk.msra.mxu0 %vm630_vm1, %v1021_v9  ;;  %6076 = vmatprep.mubr.msk.f32.mxu0 %vm7388_vm0, %v9669_v0  ;;  %v1029_v27 = vrot.slane %v7710_v16, 4  ;;  %v552_v28 = vsel %vm543_vm3, %v549_v14, %v551_v20  ;;  %v554_v29 = vsel %vm543_vm3, %v551_v20, %v553_v21  ;;  %v1031_v32 = vrot.slane %v7721_v22, 4  ;;  %v7769_v41 = vld [vmem:[%s7686_s30 + $0x70] sm:$0xff]  ;;  %v7781_v46 = vld [vmem:[%s7686_s30 + $0x78] sm:$0xff]  ;;  %v7784_v47 = vld [vmem:[%s7686_s30 + $0x80] sm:$0xff] }
  0xc9   : > { %6142 = vmatmul.mubr.msk.f32.gmra.mrb[2].mxu1 %vm587_vm2, %v494_v3  ;;  %v1033_v33 = vrot.slane %v7732_v25, 4  ;;  %v7756_v36 = vsel %vm630_vm1, %v1025_v18, %v1027_v26  ;;  %v1035_v38 = vrot.slane %v7741_v30, 4  ;;  %v1037_v39 = vrot.slane %v7744_v31, 4  ;;  %v7797_v52 = vld [vmem:[%s7686_s30 + $0x88] sm:$0xff]  ;;  %v7851_v5 = vld [vmem:[%s7686_s30 + $0xb0] sm:$0xff] }
  0xca   : > { %6144 = vmatprep.mubr.msk.f32.mxu1 %vm7388_vm0, %v9669_v0  ;;  %v7759_v37 = vsel %vm630_vm1, %v1027_v26, %v1029_v27  ;;  %v7772_v42 = vsel %vm630_vm1, %v1029_v27, %v1031_v32  ;;  %v1039_v44 = vrot.slane %v7750_v34, 4  ;;  %v1041_v45 = vrot.slane %v7753_v35, 4 }
  0xcb   : > { %6077 = vmatmul.mubr.msk.f32.gmra.mrb[2].mxu0 %vm587_vm2, %v548_v13  ;;  %v7775_v43 = vsel %vm630_vm1, %v1031_v32, %v1033_v33  ;;  %v7787_v48 = vsel %vm630_vm1, %v1033_v33, %v1035_v38  ;;  %v7790_v49 = vsel %vm630_vm1, %v1035_v38, %v1037_v39  ;;  %v1043_v50 = vrot.slane %v7766_v40, 4  ;;  %v7951_v32 = vld [vmem:[%s7686_s30 + $0x98] sm:$0xff] }
  0xcc   : > { %6079 = vmatprep.mubr.msk.f32.mxu0 %vm7388_vm0, %v9669_v0  ;;  %v1045_v51 = vrot.slane %v7769_v41, 4  ;;  %v7800_v53 = vsel %vm630_vm1, %v1037_v39, %v1039_v44  ;;  %v7803_v54 = vsel %vm630_vm1, %v1039_v44, %v1041_v45  ;;  %v1047_v55 = vrot.slane %v7781_v46, 4 }
  0xcd   : > { %6145 = vmatmul.mubr.msk.f32.gmra.mrb[4].mxu1 %vm587_vm2, %v495_v4  ;;  %v1049_v56 = vrot.slane %v7784_v47, 4  ;;  %v7809_v57 = vsel %vm630_vm1, %v1041_v45, %v1043_v50  ;;  %v1051_v59 = vrot.slane %v7797_v52, 4  ;;  %v556_v63 = vsel %vm543_vm3, %v553_v21, %v555_v24  ;;  %v7848_v4 = vld [vmem:[%s7686_s30 + $0xa8] sm:$0xff] }
  0xce   : > { %6147 = vmatprep.mubr.msk.f32.mxu1 %vm7388_vm0, %v9669_v0  ;;  %v7812_v58 = vsel %vm630_vm1, %v1043_v50, %v1045_v51  ;;  %v7818_v60 = vsel %vm630_vm1, %v1045_v51, %v1047_v55  ;;  %v557_v1 = vrot.slane %v7732_v25, 6  ;;  %v559_v3 = vrot.slane %v7741_v30, 6 }
  0xcf   : > { %6080 = vmatmul.mubr.msk.f32.gmra.mrb[4].mxu0 %vm587_vm2, %v550_v19  ;;  %v7821_v61 = vsel %vm630_vm1, %v1047_v55, %v1049_v56  ;;  %v7827_v62 = vsel %vm630_vm1, %v1049_v56, %v1051_v59  ;;  %v561_v7 = vrot.slane %v7744_v31, 6  ;;  %v1061_v9 = vrot.slane %v7851_v5, 4  ;;  %v1399_v55 = vld [vmem:[#allocation4 + $0x30] sm:$0xff]  ;;  %v1400_v56 = vld [vmem:[#allocation4 + $0x38] sm:$0xff] }
  0xd0   : > { %6082 = vmatprep.mubr.msk.f32.mxu0 %vm7388_vm0, %v9669_v0  ;;  %v558_v2 = vsel %vm543_vm3, %v555_v24, %v557_v1  ;;  %v560_v6 = vsel %vm543_vm3, %v557_v1, %v559_v3  ;;  %v563_v13 = vrot.slane %v7750_v34, 6  ;;  %v565_v17 = vrot.slane %v7753_v35, 6 }
  0xd1   : > { %6148 = vmatmul.mubr.msk.f32.gmra.mrb[6].mxu1 %vm587_vm2, %v496_v8  ;;  %v1059_v8 = vrot.slane %v7848_v4, 4  ;;  %v562_v12 = vsel %vm543_vm3, %v559_v3, %v561_v7  ;;  %v567_v19 = vrot.slane %v7766_v40, 6  ;;  %v569_v21 = vrot.slane %v7769_v41, 6 }
  0xd2   : > { %6150 = vmatprep.mubr.msk.f32.mxu1 %vm7388_vm0, %v9669_v0  ;;  %v566_v18 = vsel %vm543_vm3, %v563_v13, %v565_v17  ;;  %v571_v24 = vrot.slane %v7781_v46, 6  ;;  %v573_v26 = vrot.slane %v7784_v47, 6  ;;  %v585_v45 = vrot.slane %v7851_v5, 6 }
  0xd3   : > { %6083 = vmatmul.mubr.msk.f32.gmra.mrb[6].mxu0 %vm587_vm2, %v552_v28  ;;  %v7866_v10 = vsel %vm630_vm1, %v1059_v8, %v1061_v9  ;;  %v568_v20 = vsel %vm543_vm3, %v565_v17, %v567_v19  ;;  %v575_v28 = vrot.slane %v7797_v52, 6  ;;  %v1392_v17 = vld [vmem:[#allocation4] sm:$0xff] }
  0xd4   : > { %6085 = vmatprep.mubr.msk.f32.mxu0 %vm7388_vm0, %v9669_v0  ;;  %v574_v27 = vsel %vm543_vm3, %v571_v24, %v573_v26 }
  0xd5   : > { %6151 = vmatmul.mubr.msk.f32.gmra.mrb[8].mxu1 %vm587_vm2, %v497_v11  ;;  %v7870_v11 = vld [vmem:[%s7686_s30 + $0xb8] sm:$0xff] }
  0xd6   : > { %6153 = vmatprep.mubr.msk.f32.mxu1 %vm7388_vm0, %v9669_v0  ;;  %v1063_v14 = vrot.slane %v7870_v11, 4 }
  0xd7   : > { %6086 = vmatmul.mubr.msk.f32.gmra.mrb[8].mxu0 %vm587_vm2, %v554_v29  ;;  %v7939_v29 = vld [vmem:[%s7686_s30 + $0x90] sm:$0xff] }
  0xd8   : > { %6088 = vmatprep.mubr.msk.f32.mxu0 %vm7388_vm0, %v9669_v0 }
  0xd9   : > { %6154 = vmatmul.mubr.msk.f32.gmra.mrb[10].mxu1 %vm587_vm2, %v7707_v15  ;;  %v7884_v15 = vsel %vm630_vm1, %v1061_v9, %v1063_v14 }
  0xda   : > { %6156 = vmatprep.mubr.msk.f32.mxu1 %vm7388_vm0, %v9669_v0 }
  0xdb   : > { %6089 = vmatmul.mubr.msk.f32.gmra.mrb[10].mxu0 %vm587_vm2, %v556_v63 }
  0xdc   : > { %6091 = vmatprep.mubr.msk.f32.mxu0 %vm7388_vm0, %v9669_v0 }
  0xdd   : > { %6157 = vmatmul.mubr.msk.f32.gmra.mrb[12].mxu1 %vm587_vm2, %v7710_v16  ;;  %v564_v16 = vsel %vm543_vm3, %v561_v7, %v563_v13 }
  0xde   : > { %6159 = vmatprep.mubr.msk.f32.mxu1 %vm7388_vm0, %v9669_v0 }
  0xdf   : > { %6092 = vmatmul.mubr.msk.f32.gmra.mrb[12].mxu0 %vm587_vm2, %v558_v2 }
  0xe0   : > { %6094 = vmatprep.mubr.msk.f32.mxu0 %vm7388_vm0, %v9669_v0 }
  0xe1   : > { %6160 = vmatmul.mubr.msk.f32.gmra.mrb[14].mxu1 %vm587_vm2, %v7721_v22  ;;  %v570_v22 = vsel %vm543_vm3, %v567_v19, %v569_v21 }
  0xe2   : > { %6162 = vmatprep.mubr.msk.f32.mxu1 %vm7388_vm0, %v9669_v0 }
  0xe3   : > { %6095 = vmatmul.mubr.msk.f32.gmra.mrb[14].mxu0 %vm587_vm2, %v560_v6 }
  0xe4   : > { %6097 = vmatprep.mubr.msk.f32.mxu0 %vm7388_vm0, %v9669_v0 }
  0xe5   : > { %6163 = vmatmul.mubr.msk.f32.gmra.mrb[16].mxu1 %vm587_vm2, %v7732_v25  ;;  %v572_v25 = vsel %vm543_vm3, %v569_v21, %v571_v24 }
  0xe6   : > { %6165 = vmatprep.mubr.msk.f32.mxu1 %vm7388_vm0, %v9669_v0 }
  0xe7   : > { %6098 = vmatmul.mubr.msk.f32.gmra.mrb[16].mxu0 %vm587_vm2, %v562_v12 }
  0xe8   : > { %6100 = vmatprep.mubr.msk.f32.mxu0 %vm7388_vm0, %v9669_v0 }
  0xe9   : > { %6166 = vmatmul.mubr.msk.f32.gmra.mrb[18].mxu1 %vm587_vm2, %v7741_v30  ;;  %v576_v30 = vsel %vm543_vm3, %v573_v26, %v575_v28 }
  0xea   : > { %6168 = vmatprep.mubr.msk.f32.mxu1 %vm7388_vm0, %v9669_v0 }
  0xeb   : > { %6101 = vmatmul.mubr.msk.f32.gmra.mrb[18].mxu0 %vm587_vm2, %v564_v16 }
  0xec   : > { %6103 = vmatprep.mubr.msk.f32.mxu0 %vm7388_vm0, %v9669_v0 }
  0xed   : > { %6169 = vmatmul.mubr.msk.f32.gmra.mrb[20].mxu1 %vm587_vm2, %v7744_v31  ;;  %v577_v31 = vrot.slane %v7939_v29, 6 }
  0xee   : > { %6171 = vmatprep.mubr.msk.f32.mxu1 %vm7388_vm0, %v9669_v0 }
  0xef   : > { %6104 = vmatmul.mubr.msk.f32.gmra.mrb[20].mxu0 %vm587_vm2, %v566_v18  ;;  %v578_v33 = vsel %vm543_vm3, %v575_v28, %v577_v31  ;;  %v1393_v18 = vld [vmem:[#allocation4 + $0x8] sm:$0xff] }
  0xf0   : > { %6106 = vmatprep.mubr.msk.f32.mxu0 %vm7388_vm0, %v9669_v0 }
  0xf1   : > { %6172 = vmatmul.mubr.msk.f32.gmra.mrb[22].mxu1 %vm587_vm2, %v7750_v34  ;;  %v579_v34 = vrot.slane %v7951_v32, 6 }
  0xf2   : > { %6174 = vmatprep.mubr.msk.f32.mxu1 %vm7388_vm0, %v9669_v0 }
  0xf3   : > { %6107 = vmatmul.mubr.msk.f32.gmra.mrb[22].mxu0 %vm587_vm2, %v568_v20  ;;  %v580_v38 = vsel %vm543_vm3, %v577_v31, %v579_v34  ;;  %v8103_v20 = vpack.c.bf16 %v1393_v18, %v1392_v17 }
  0xf4   : > { %6109 = vmatprep.mubr.msk.f32.mxu0 %vm7388_vm0, %v9669_v0 }
  0xf5   : > { %6175 = vmatmul.mubr.msk.f32.gmra.mrb[24].mxu1 %vm587_vm2, %v7753_v35  ;;  %v7963_v35 = vld [vmem:[%s7686_s30 + $0xa0] sm:$0xff] }
  0xf6   : > { %6177 = vmatprep.mubr.msk.f32.mxu1 %vm7388_vm0, %v9669_v0  ;;  %v581_v39 = vrot.slane %v7963_v35, 6 }
  0xf7   : > { %6110 = vmatmul.mubr.msk.f32.gmra.mrb[24].mxu0 %vm587_vm2, %v570_v22 }
  0xf8   : > { %6112 = vmatprep.mubr.msk.f32.mxu0 %vm7388_vm0, %v9669_v0 }
  0xf9   : > { %6178 = vmatmul.mubr.msk.f32.gmra.mrb[26].mxu1 %vm587_vm2, %v7766_v40  ;;  %v582_v40 = vsel %vm543_vm3, %v579_v34, %v581_v39 }
  0xfa   : > { %6180 = vmatprep.mubr.msk.f32.mxu1 %vm7388_vm0, %v9669_v0 }
  0xfb   : > { %6113 = vmatmul.mubr.msk.f32.gmra.mrb[26].mxu0 %vm587_vm2, %v572_v25 }
  0xfc   : > { %6115 = vmatprep.mubr.msk.f32.mxu0 %vm7388_vm0, %v9669_v0 }
  0xfd   : > { %6181 = vmatmul.mubr.msk.f32.gmra.mrb[28].mxu1 %vm587_vm2, %v7769_v41  ;;  %v583_v41 = vrot.slane %v7848_v4, 6 }
  0xfe   : > { %6183 = vmatprep.mubr.msk.f32.mxu1 %vm7388_vm0, %v9669_v0 }
  0xff   : > { %6116 = vmatmul.mubr.msk.f32.gmra.mrb[28].mxu0 %vm587_vm2, %v574_v27  ;;  %v584_v44 = vsel %vm543_vm3, %v581_v39, %v583_v41 }
 0x100   : > { %6118 = vmatprep.mubr.msk.f32.mxu0 %vm7388_vm0, %v9669_v0 }
 0x101   : > { %6184 = vmatmul.mubr.msk.f32.gmra.mrb[30].mxu1 %vm587_vm2, %v7781_v46  ;;  %v586_v46 = vsel %vm543_vm3, %v583_v41, %v585_v45 }
 0x102   : > { %6186 = vmatprep.mubr.msk.f32.mxu1 %vm7388_vm0, %v9669_v0 }
 0x103   : > { %6119 = vmatmul.mubr.msk.f32.gmra.mrb[30].mxu0 %vm587_vm2, %v576_v30 }
 0x104   : > { %6121 = vmatprep.mubr.msk.f32.mxu0 %vm7388_vm0, %v9669_v0 }
 0x105   : > { %6187 = vmatmul.mubr.msk.f32.gmra.mrb[32].mxu1 %vm587_vm2, %v7784_v47 }
 0x106   : > { %6189 = vmatprep.mubr.msk.f32.mxu1 %vm7388_vm0, %v9669_v0 }
 0x107   : > { %6122 = vmatmul.mubr.msk.f32.gmra.mrb[32].mxu0 %vm587_vm2, %v578_v33 }
 0x108   : > { %6124 = vmatprep.mubr.msk.f32.mxu0 %vm7388_vm0, %v9669_v0 }
 0x109   : > { %6190 = vmatmul.mubr.msk.f32.gmra.mrb[34].mxu1 %vm587_vm2, %v7797_v52  ;;  %v517_v52 = vld [vmem:[%s7686_s30 + $0xc0] sm:$0xf] }
 0x10a   : > { %6192 = vmatprep.mubr.msk.f32.mxu1 %vm7388_vm0, %v9669_v0 }
 0x10b   : > { %6125 = vmatmul.mubr.msk.f32.gmra.mrb[34].mxu0 %vm587_vm2, %v580_v38 }
 0x10c   : > { %6127 = vmatprep.mubr.msk.f32.mxu0 %vm7388_vm0, %v9669_v0 }
 0x10d   : > { %6193 = vmatmul.mubr.msk.f32.gmra.mrb[36].mxu1 %vm587_vm2, %v7939_v29 }
 0x10e   : > { %6195 = vmatprep.mubr.msk.f32.mxu1 %vm7388_vm0, %v9669_v0 }
 0x10f   : > { %6128 = vmatmul.mubr.msk.f32.gmra.mrb[36].mxu0 %vm587_vm2, %v582_v40 }
 0x110   : > { %6130 = vmatprep.mubr.msk.f32.mxu0 %vm7388_vm0, %v9669_v0 }
 0x111   : > { %6196 = vmatmul.mubr.msk.f32.gmra.mrb[38].mxu1 %vm587_vm2, %v7951_v32 }
 0x112   : > { %6198 = vmatprep.mubr.msk.f32.mxu1 %vm7388_vm0, %v9669_v0 }
 0x113   : > { %6131 = vmatmul.mubr.msk.f32.gmra.mrb[38].mxu0 %vm587_vm2, %v584_v44 }
 0x114   : > { %6133 = vmatprep.mubr.msk.f32.mxu0 %vm7388_vm0, %v9669_v0 }
 0x115   : > { %6199 = vmatmul.mubr.msk.f32.gmra.mrb[40].mxu1 %vm587_vm2, %v7963_v35 }
 0x117   : > { %6134 = vmatmul.mubr.msk.f32.gmra.mrb[40].mxu0 %vm587_vm2, %v586_v46 }
 0x118   : > { %6203 = vmatprep.mubr.msk.f32.mxu0 %vm7388_vm0, %v9669_v0 }
 0x11b   : > { %6204 = vmatmul.mubr.msk.f32.vlgmr.msra.gmra.mrb[42].mxu0 %vm587_vm2, %v7727_v23  ;;  %v1053_v23 = vrot.slane %v7939_v29, 4 }
 0x11c   : > { %6206 = vmatprep.mubr.msk.f32.mxu0 %vm7388_vm0, %v9669_v0 }
 0x11f   : > { %6207 = vmatmul.mubr.msk.f32.gmra.mrb[44].mxu0 %vm587_vm2, %v7756_v36  ;;  %v1397_v36 = vld [vmem:[#allocation4 + $0x20] sm:$0xff] }
 0x120   : > { %6209 = vmatprep.mubr.msk.f32.mxu0 %vm7388_vm0, %v9669_v0 }
 0x123   : > { %6210 = vmatmul.mubr.msk.f32.gmra.mrb[46].mxu0 %vm587_vm2, %v7759_v37  ;;  %v1398_v37 = vld [vmem:[#allocation4 + $0x28] sm:$0xff] }
 0x124   : > { %6212 = vmatprep.mubr.msk.f32.mxu0 %vm7388_vm0, %v9669_v0  ;;  %v6845_v47 = vpack.c.bf16 %v1398_v37, %v1397_v36 }
 0x126   : > { %6846 = vmatprep.subr.bf16.mxu1 %v6845_v47 }
 0x127   : > { %6213 = vmatmul.mubr.msk.f32.gmra.mrb[48].mxu0 %vm587_vm2, %v7772_v42  ;;  %v1054_v42 = vsel %vm630_vm1, %v1051_v59, %v1053_v23  ;;  %6848 = vmatpush3.bf16.msra.mxu1 %v6845_v47 }
 0x128   : > { %6215 = vmatprep.mubr.msk.f32.mxu0 %vm7388_vm0, %v9669_v0 }
 0x12b   : > { %6216 = vmatmul.mubr.msk.f32.gmra.mrb[50].mxu0 %vm587_vm2, %v7775_v43  ;;  %v1055_v43 = vrot.slane %v7951_v32, 4 }
 0x12c   : > { %6218 = vmatprep.mubr.msk.f32.mxu0 %vm7388_vm0, %v9669_v0 }
 0x12f   : > { %6219 = vmatmul.mubr.msk.f32.gmra.mrb[52].mxu0 %vm587_vm2, %v7787_v48  ;;  %v1056_v48 = vsel %vm630_vm1, %v1053_v23, %v1055_v43 }
 0x130   : > { %6221 = vmatprep.mubr.msk.f32.mxu0 %vm7388_vm0, %v9669_v0 }
 0x133   : > { %6222 = vmatmul.mubr.msk.f32.gmra.mrb[54].mxu0 %vm587_vm2, %v7790_v49  ;;  %v1057_v49 = vrot.slane %v7963_v35, 4 }
 0x134   : > { %6224 = vmatprep.mubr.msk.f32.mxu0 %vm7388_vm0, %v9669_v0 }
 0x135   : > { %v1058_v50 = vsel %vm630_vm1, %v1055_v43, %v1057_v49  ;;  %v1060_v51 = vsel %vm630_vm1, %v1057_v49, %v1059_v8 }
 0x137   : > { %6225 = vmatmul.mubr.msk.f32.gmra.mrb[56].mxu0 %vm587_vm2, %v7800_v53  ;;  %v1065_v53 = vrot.slane %v517_v52, 4 }
 0x138   : > { %6227 = vmatprep.mubr.msk.f32.mxu0 %vm7388_vm0, %v9669_v0 }
 0x13b   : > { %6228 = vmatmul.mubr.msk.f32.gmra.mrb[58].mxu0 %vm587_vm2, %v7803_v54  ;;  %v1066_v54 = vsel %vm630_vm1, %v1063_v14, %v1065_v53 }
 0x13c   : > { %6230 = vmatprep.mubr.msk.f32.mxu0 %vm7388_vm0, %v9669_v0 }
 0x13f   : > { %6231 = vmatmul.mubr.msk.f32.gmra.mrb[60].mxu0 %vm587_vm2, %v7809_v57  ;;  %v6849_v57 = vpack.c.bf16 %v1400_v56, %v1399_v55 }
 0x140   : > { %6233 = vmatprep.mubr.msk.f32.mxu0 %vm7388_vm0, %v9669_v0 }
 0x141   : > { %6850 = vmatprep.subr.bf16.mxu1 %v6849_v57 }
 0x142   : > { %6852 = vmatpush3.bf16.msra.mxu1 %v6849_v57 }
 0x143   : > { %6234 = vmatmul.mubr.msk.f32.gmra.mrb[62].mxu0 %vm587_vm2, %v7812_v58  ;;  %6854 = vmatprep.subr.bf16.mxu1 %v8103_v20 }
 0x144   : > { %6236 = vmatprep.mubr.msk.f32.mxu0 %vm7388_vm0, %v9669_v0 }
 0x147   : > { %6237 = vmatmul.mubr.msk.f32.gmra.mrb[64].mxu0 %vm587_vm2, %v7818_v60 }
 0x148   : > { %6239 = vmatprep.mubr.msk.f32.mxu0 %vm7388_vm0, %v9669_v0 }
 0x14b   : > { %6240 = vmatmul.mubr.msk.f32.gmra.mrb[66].mxu0 %vm587_vm2, %v7821_v61 }
 0x14c   : > { %6242 = vmatprep.mubr.msk.f32.mxu0 %vm7388_vm0, %v9669_v0 }
 0x14f   : > { %6243 = vmatmul.mubr.msk.f32.gmra.mrb[68].mxu0 %vm587_vm2, %v7827_v62 }
 0x150   : > { %6245 = vmatprep.mubr.msk.f32.mxu0 %vm7388_vm0, %v9669_v0 }
 0x153   : > { %6246 = vmatmul.mubr.msk.f32.gmra.mrb[70].mxu0 %vm587_vm2, %v1054_v42 }
 0x154   : > { %6248 = vmatprep.mubr.msk.f32.mxu0 %vm7388_vm0, %v9669_v0 }
 0x157   : > { %6249 = vmatmul.mubr.msk.f32.gmra.mrb[72].mxu0 %vm587_vm2, %v1056_v48 }
 0x158   : > { %6251 = vmatprep.mubr.msk.f32.mxu0 %vm7388_vm0, %v9669_v0 }
 0x15b   : > { %6252 = vmatmul.mubr.msk.f32.gmra.mrb[74].mxu0 %vm587_vm2, %v1058_v50 }
 0x15c   : > { %6254 = vmatprep.mubr.msk.f32.mxu0 %vm7388_vm0, %v9669_v0 }
 0x15f   : > { %6255 = vmatmul.mubr.msk.f32.gmra.mrb[76].mxu0 %vm587_vm2, %v1060_v51 }
 0x160   : > { %6257 = vmatprep.mubr.msk.f32.mxu0 %vm7388_vm0, %v9669_v0 }
 0x163   : > { %6258 = vmatmul.mubr.msk.f32.gmra.mrb[78].mxu0 %vm587_vm2, %v7866_v10 }
 0x164   : > { %6260 = vmatprep.mubr.msk.f32.mxu0 %vm7388_vm0, %v9669_v0 }
 0x167   : > { %6261 = vmatmul.mubr.msk.f32.gmra.mrb[80].mxu0 %vm587_vm2, %v7884_v15 }
 0x168   : > { %6263 = vmatprep.mubr.msk.f32.mxu0 %vm7388_vm0, %v9669_v0 }
 0x16b   : > { %6264 = vmatmul.mubr.msk.f32.gmra.mrb[82].mxu0 %vm587_vm2, %v1066_v54 }
 0x197   : > { %v916_v58 = vpop.f32.mrb[0].mxu1 }
 0x198   : > { %v6140_v59 = vpop.f32.mrb[1].mxu1 }
 0x19a   : > { %v700_v60 = vpop.f32.mrb[0].mxu0 }
 0x19b   : > { %v8095_v61 = vadd.f32 %v916_v58, %v700_v60  ;;  %v6075_v62 = vpop.f32.mrb[1].mxu0 }
 0x19c   : > { %v921_v63 = vpop.f32.mrb[2].mxu1 }
 0x19d   : > { %v6143_v1 = vpop.f32.mrb[3].mxu1 }
 0x19e   : > { %v705_v2 = vpop.f32.mrb[2].mxu0 }
 0x19f   : > { %v8097_v3 = vadd.f32 %v921_v63, %v705_v2  ;;  %v6078_v4 = vpop.f32.mrb[3].mxu0 }
 0x1a0   : > { %v926_v5 = vpop.f32.mrb[4].mxu1 }
 0x1a1   : > { %v6146_v6 = vpop.f32.mrb[5].mxu1 }
 0x1a2   : > { %v710_v7 = vpop.f32.mrb[4].mxu0 }
 0x1a3   : > { %v8099_v8 = vadd.f32 %v926_v5, %v710_v7  ;;  %v6081_v9 = vpop.f32.mrb[5].mxu0 }
 0x1a4   : > { %v931_v10 = vpop.f32.mrb[6].mxu1 }
 0x1a5   : > { %v6149_v11 = vpop.f32.mrb[7].mxu1 }
 0x1a6   : > { %v715_v12 = vpop.f32.mrb[6].mxu0 }
 0x1a7   : > { %v8101_v13 = vadd.f32 %v931_v10, %v715_v12  ;;  %v6084_v14 = vpop.f32.mrb[7].mxu0 }
 0x1a8   : > { %v936_v15 = vpop.f32.mrb[8].mxu1 }
 0x1a9   : > { %v6152_v16 = vpop.f32.mrb[9].mxu1 }
 0x1aa   : > { %v720_v19 = vpop.f32.mrb[8].mxu0 }
 0x1ab   : > { %v8105_v21 = vadd.f32 %v936_v15, %v720_v19  ;;  %v6087_v22 = vpop.f32.mrb[9].mxu0 }
 0x1ac   : > { %v941_v24 = vpop.f32.mrb[10].mxu1 }
 0x1ad   : > { %v6155_v25 = vpop.f32.mrb[11].mxu1 }
 0x1ae   : > { %v725_v26 = vpop.f32.mrb[10].mxu0 }
 0x1af   : > { %v8108_v27 = vadd.f32 %v941_v24, %v725_v26  ;;  %v6090_v28 = vpop.f32.mrb[11].mxu0 }
 0x1b0   : > { %v946_v29 = vpop.f32.mrb[12].mxu1 }
 0x1b1   : > { %v6158_v30 = vpop.f32.mrb[13].mxu1 }
 0x1b2   : > { %v730_v31 = vpop.f32.mrb[12].mxu0 }
 0x1b3   : > { %v8110_v32 = vadd.f32 %v946_v29, %v730_v31  ;;  %v6093_v33 = vpop.f32.mrb[13].mxu0 }
 0x1b4   : > { %v951_v34 = vpop.f32.mrb[14].mxu1 }
 0x1b5   : > { %v6161_v35 = vpop.f32.mrb[15].mxu1 }
 0x1b6   : > { %v735_v38 = vpop.f32.mrb[14].mxu0 }
 0x1b7   : > { %v8112_v39 = vadd.f32 %v951_v34, %v735_v38  ;;  %v6096_v40 = vpop.f32.mrb[15].mxu0 }
 0x1b8   : > { %v956_v41 = vpop.f32.mrb[16].mxu1 }
 0x1b9   : > { %v6164_v44 = vpop.f32.mrb[17].mxu1 }
 0x1ba   : > { %v740_v45 = vpop.f32.mrb[16].mxu0 }
 0x1bb   : > { %v8114_v46 = vadd.f32 %v956_v41, %v740_v45  ;;  %v6099_v23 = vpop.f32.mrb[17].mxu0 }
 0x1bc   : > { %v961_v36 = vpop.f32.mrb[18].mxu1 }
 0x1bd   : > { %v6167_v37 = vpop.f32.mrb[19].mxu1 }
 0x1be   : > { %v745_v42 = vpop.f32.mrb[18].mxu0 }
 0x1bf   : > { %v8116_v43 = vadd.f32 %v961_v36, %v745_v42  ;;  %v6102_v47 = vpop.f32.mrb[19].mxu0 }
 0x1c0   : > { %v966_v48 = vpop.f32.mrb[20].mxu1 }
 0x1c1   : > { %v6170_v49 = vpop.f32.mrb[21].mxu1 }
 0x1c2   : > { %v750_v50 = vpop.f32.mrb[20].mxu0 }
 0x1c3   : > { %v8118_v51 = vadd.f32 %v966_v48, %v750_v50  ;;  %v6105_v52 = vpop.f32.mrb[21].mxu0 }
 0x1c4   : > { %v971_v53 = vpop.f32.mrb[22].mxu1 }
 0x1c5   : > { %v6173_v54 = vpop.f32.mrb[23].mxu1 }
 0x1c6   : > { %v755_v55 = vpop.f32.mrb[22].mxu0 }
 0x1c7   : > { %v8120_v56 = vadd.f32 %v971_v53, %v755_v55  ;;  %v6108_v57 = vpop.f32.mrb[23].mxu0 }
 0x1c8   : > { %v976_v58 = vpop.f32.mrb[24].mxu1 }
 0x1c9   : > { %v6176_v59 = vpop.f32.mrb[25].mxu1 }
 0x1ca   : > { %v760_v60 = vpop.f32.mrb[24].mxu0  ;;  %v8144_v59 = vld [vmem:[#allocation12] ss:$0 sm:$0xff] }
 0x1cb   : > { %v8122_v62 = vadd.f32 %v976_v58, %v760_v60  ;;  %v6111_v63 = vpop.f32.mrb[25].mxu0 }
 0x1cc   : > { %v981_v1 = vpop.f32.mrb[26].mxu1 }
 0x1cd   : > { %v6179_v2 = vpop.f32.mrb[27].mxu1 }
 0x1ce   : > { %v765_v4 = vpop.f32.mrb[26].mxu0 }
 0x1cf   : > { %v8124_v5 = vadd.f32 %v981_v1, %v765_v4  ;;  %v6114_v6 = vpop.f32.mrb[27].mxu0 }
 0x1d0   : > { %v986_v7 = vpop.f32.mrb[28].mxu1 }
 0x1d1   : > { %v6182_v9 = vpop.f32.mrb[29].mxu1 }
 0x1d2   : > { %v770_v10 = vpop.f32.mrb[28].mxu0 }
 0x1d3   : > { %v8126_v11 = vadd.f32 %v986_v7, %v770_v10  ;;  %v6117_v12 = vpop.f32.mrb[29].mxu0 }
 0x1d4   : > { %v991_v14 = vpop.f32.mrb[30].mxu1 }
 0x1d5   : > { %v6185_v15 = vpop.f32.mrb[31].mxu1 }
 0x1d6   : > { %v775_v16 = vpop.f32.mrb[30].mxu0 }
 0x1d7   : > { %v8128_v17 = vadd.f32 %v991_v14, %v775_v16  ;;  %v6120_v18 = vpop.f32.mrb[31].mxu0 }
 0x1d8   : > { %v996_v19 = vpop.f32.mrb[32].mxu1 }
 0x1d9   : > { %v6188_v22 = vpop.f32.mrb[33].mxu1 }
 0x1da   : > { %v780_v24 = vpop.f32.mrb[32].mxu0 }
 0x1db   : > { %v8130_v25 = vadd.f32 %v996_v19, %v780_v24  ;;  %v6123_v26 = vpop.f32.mrb[33].mxu0 }
 0x1dc   : > { %v1001_v28 = vpop.f32.mrb[34].mxu1  ;;  %v1394_v26 = vld [vmem:[#allocation4 + $0x10] sm:$0xff] }
 0x1dd   : > { %v6191_v29 = vpop.f32.mrb[35].mxu1 }
 0x1de   : > { %v785_v30 = vpop.f32.mrb[34].mxu0 }
 0x1df   : > { %v8132_v31 = vadd.f32 %v1001_v28, %v785_v30  ;;  %v6126_v33 = vpop.f32.mrb[35].mxu0 }
 0x1e0   : > { %v1006_v34 = vpop.f32.mrb[36].mxu1 }
 0x1e1   : > { %v6194_v35 = vpop.f32.mrb[37].mxu1 }
 0x1e2   : > { %v790_v38 = vpop.f32.mrb[36].mxu0 }
 0x1e3   : > { %v8134_v40 = vadd.f32 %v1006_v34, %v790_v38  ;;  %v6129_v41 = vpop.f32.mrb[37].mxu0 }
 0x1e4   : > { %v1011_v44 = vpop.f32.mrb[38].mxu1 }
 0x1e5   : > { %v6197_v45 = vpop.f32.mrb[39].mxu1 }
 0x1e6   : > { %v795_v23 = vpop.f32.mrb[38].mxu0  ;;  %v1843_v45 = vld [vmem:[#allocation4 + $0x48] sm:$0xff] }
 0x1e7   : > { %v8136_v36 = vadd.f32 %v1011_v44, %v795_v23  ;;  %v6132_v37 = vpop.f32.mrb[39].mxu0  ;;  %v1842_v44 = vld [vmem:[#allocation4 + $0x40] sm:$0xff] }
 0x1e8   : > { %v1016_v42 = vpop.f32.mrb[40].mxu1 }
 0x1e9   : > { %v6200_v47 = vpop.f32.mrb[41].mxu1 }
 0x1ea   : > { %v800_v48 = vpop.f32.mrb[40].mxu0 }
 0x1eb   : > { %v8138_v49 = vadd.f32 %v1016_v42, %v800_v48  ;;  %v6135_v50 = vpop.f32.mrb[41].mxu0 }
 0x1ee   : > { %v1178_v52 = vpop.f32.mrb[42].mxu0 }
 0x1ef   : > { %v8141_v53 = vadd.f32 %v1178_v52, %v8095_v61  ;;  %v6205_v54 = vpop.f32.mrb[43].mxu0  ;;  %v8173_v52 = vpack.c.bf16 %v1843_v45, %v1842_v44 }
 0x1f2   : > { %v1183_v55 = vpop.f32.mrb[44].mxu0 }
 0x1f3   : > { %v1283_v57 = vadd.f32 %v1183_v55, %v8097_v3  ;;  %v6208_v58 = vpop.f32.mrb[45].mxu0 }
 0x1f5   : > { %v1309_v60 = vadd.f32 %v8144_v59, %v1283_v57 }
 0x1f6   : > { %v1188_v63 = vpop.f32.mrb[46].mxu0 }
 0x1f7   : > { %v1351_v1 = vmul.f32 0.01, %v1309_v60  ;;  %v1284_v2 = vadd.f32 %v1188_v63, %v8099_v8  ;;  %v6211_v4 = vpop.f32.mrb[47].mxu0  ;;  %vm1330_vm4 = vcmp.gt.f32.partialorder %v1309_v60, 0.0 }
 0x1f9   : > { %v1310_v6 = vadd.f32 %v8144_v59, %v1284_v2  ;;  %v8149_v61 = vsel %vm1330_vm4, %v1309_v60, %v1351_v1 }
 0x1fa   : > { %v1193_v7 = vpop.f32.mrb[48].mxu0  ;;  %v1420_v16 = vrot.slane %v8149_v61, 6 }
 0x1fb   : > { %vm1331_vm5 = vcmp.gt.f32.partialorder %v1310_v6, 0.0  ;;  %v1352_v9 = vmul.f32 0.01, %v1310_v6  ;;  %v1285_v3 = vadd.f32 %v1193_v7, %v8101_v13  ;;  %v6214_v10 = vpop.f32.mrb[49].mxu0  ;;  %v1395_v13 = vld [vmem:[#allocation4 + $0x18] sm:$0xff]  ;;  %v2174_v7 = vld [vmem:[#allocation6 + $0x28] sm:$0xff] }
 0x1fd   : > { %v8152_v12 = vsel %vm1331_vm5, %v1310_v6, %v1352_v9  ;;  %v1311_v14 = vadd.f32 %v8144_v59, %v1285_v3  ;;  %v2173_v6 = vld [vmem:[#allocation6 + $0x20] sm:$0xff]  ;;  %v2175_v9 = vld [vmem:[#allocation6 + $0x30] sm:$0xff] }
 0x1fe   : > { %v1198_v15 = vpop.f32.mrb[50].mxu0  ;;  %v1421_v8 = vrot.slane %v8152_v12, 6 }
 0x1ff   : > { %vm1332_vm7 = vcmp.gt.f32.partialorder %v1311_v14, 0.0  ;;  %v1353_v18 = vmul.f32 0.01, %v1311_v14  ;;  %v1286_v19 = vadd.f32 %v1198_v15, %v8105_v21  ;;  %v6217_v22 = vpop.f32.mrb[51].mxu0  ;;  %v6857_v21 = vpack.c.bf16 %v1395_v13, %v1394_v26  ;;  %v2176_v15 = vld [vmem:[#allocation6 + $0x38] sm:$0xff] }
 0x200   : > { %v1422_v24 = vsel %vm543_vm3, %v1420_v16, %v1421_v8 }
 0x201   : > { %v8159_v28 = vsel %vm1332_vm7, %v1311_v14, %v1353_v18  ;;  %v1312_v29 = vadd.f32 %v8144_v59, %v1286_v19  ;;  %6274 = vmatprep.mubr.msk.f32.mxu1 %vm1457_vm6, %v1422_v24  ;;  %v6869_v14 = vpack.c.bf16 %v2174_v7, %v2173_v6  ;;  %v6873_v18 = vpack.c.bf16 %v2176_v15, %v2175_v9 }
 0x202   : > { %v1423_v30 = vrot.slane %v8159_v28, 6  ;;  %v1203_v33 = vpop.f32.mrb[52].mxu0 }
 0x203   : > { %vm1333_vm8 = vcmp.gt.f32.partialorder %v1312_v29, 0.0  ;;  %v1354_v34 = vmul.f32 0.01, %v1312_v29  ;;  %v1287_v35 = vadd.f32 %v1203_v33, %v8108_v27  ;;  %v6220_v38 = vpop.f32.mrb[53].mxu0  ;;  %6870 = vmatprep.subr.bf16.mxu0 %v6869_v14 }
 0x204   : > { %v1424_v41 = vsel %vm543_vm3, %v1421_v8, %v1423_v30  ;;  %6872 = vmatpush3.bf16.msra.mxu0 %v6869_v14 }
 0x205   : > { %v8166_v23 = vsel %vm1333_vm8, %v1312_v29, %v1354_v34  ;;  %v1313_v37 = vadd.f32 %v8144_v59, %v1287_v35  ;;  %6275 = vmatmul.mubr.msk.f32.vlgmr.msra.gmra.mrb[42].mxu1 %vm1457_vm6, %v1424_v41  ;;  %6874 = vmatprep.subr.bf16.mxu0 %v6873_v18 }
 0x206   : > { %v1208_v42 = vpop.f32.mrb[54].mxu0  ;;  %v1425_v47 = vrot.slane %v8166_v23, 6  ;;  %6856 = vmatpush3.bf16.msra.mxu1 %v8103_v20 }
 0x207   : > { %vm1334_vm9 = vcmp.gt.f32.partialorder %v1313_v37, 0.0  ;;  %v1355_v48 = vmul.f32 0.01, %v1313_v37  ;;  %v1288_v27 = vadd.f32 %v1208_v42, %v8110_v32  ;;  %v6223_v50 = vpop.f32.mrb[55].mxu0  ;;  %6858 = vmatprep.subr.bf16.mxu1 %v6857_v21 }
 0x208   : > { %v1426_v54 = vsel %vm543_vm3, %v1423_v30, %v1425_v47  ;;  %6876 = vmatpush3.bf16.msra.mxu0 %v6873_v18 }
 0x209   : > { %v8176_v55 = vsel %vm1334_vm9, %v1313_v37, %v1355_v48  ;;  %v1314_v57 = vadd.f32 %v8144_v59, %v1288_v27  ;;  %6277 = vmatprep.mubr.msk.f32.mxu1 %vm1457_vm6, %v1426_v54 }
 0x20a   : > { %v1213_v58 = vpop.f32.mrb[56].mxu0  ;;  %v1427_v60 = vrot.slane %v8176_v55, 6  ;;  %6860 = vmatpush3.bf16.msra.mxu1 %v6857_v21 }
 0x20b   : > { %vm1335_vm10 = vcmp.gt.f32.partialorder %v1314_v57, 0.0  ;;  %v1356_v20 = vmul.f32 0.01, %v1314_v57  ;;  %v1289_v32 = vadd.f32 %v1213_v58, %v8112_v39  ;;  %v6226_v63 = vpop.f32.mrb[57].mxu0  ;;  %6862 = vmatprep.subr.bf16.mxu1 %v8173_v52 }
 0x20c   : > { %v1428_v1 = vsel %vm543_vm3, %v1425_v47, %v1427_v60 }
 0x20d   : > { %v8184_v2 = vsel %vm1335_vm10, %v1314_v57, %v1356_v20  ;;  %v1315_v4 = vadd.f32 %v8144_v59, %v1289_v32  ;;  %6278 = vmatmul.mubr.msk.f32.gmra.mrb[44].mxu1 %vm1457_vm6, %v1428_v1 }
 0x20e   : > { %v1218_v3 = vpop.f32.mrb[58].mxu0  ;;  %v1429_v10 = vrot.slane %v8184_v2, 6 }
 0x20f   : > { %vm1336_vm11 = vcmp.gt.f32.partialorder %v1315_v4, 0.0  ;;  %v1357_v39 = vmul.f32 0.01, %v1315_v4  ;;  %v1290_v16 = vadd.f32 %v1218_v3, %v8114_v46  ;;  %v6229_v8 = vpop.f32.mrb[59].mxu0 }
 0x210   : > { %v1430_v19 = vsel %vm543_vm3, %v1427_v60, %v1429_v10 }
 0x211   : > { %v8191_v22 = vsel %vm1336_vm11, %v1315_v4, %v1357_v39  ;;  %v1316_v24 = vadd.f32 %v8144_v59, %v1290_v16  ;;  %6280 = vmatprep.mubr.msk.f32.mxu1 %vm1457_vm6, %v1430_v19 }
 0x212   : > { %v1223_v26 = vpop.f32.mrb[60].mxu0  ;;  %v1431_v13 = vrot.slane %v8191_v22, 6 }
 0x213   : > { %vm1337_vm12 = vcmp.gt.f32.partialorder %v1316_v24, 0.0  ;;  %v1358_v29 = vmul.f32 0.01, %v1316_v24  ;;  %v1291_v46 = vadd.f32 %v1223_v26, %v8116_v43  ;;  %v6232_v30 = vpop.f32.mrb[61].mxu0 }
 0x214   : > { %v1432_v33 = vsel %vm543_vm3, %v1429_v10, %v1431_v13 }
 0x215   : > { %v8198_v34 = vsel %vm1337_vm12, %v1316_v24, %v1358_v29  ;;  %v1317_v35 = vadd.f32 %v8144_v59, %v1291_v46  ;;  %6281 = vmatmul.mubr.msk.f32.gmra.mrb[46].mxu1 %vm1457_vm6, %v1432_v33 }
 0x216   : > { %v1228_v38 = vpop.f32.mrb[62].mxu0  ;;  %v1433_v21 = vrot.slane %v8198_v34, 6  ;;  %v1856_v27 = vrot.slane %v8198_v34, 4 }
 0x217   : > { %vm1338_vm13 = vcmp.gt.f32.partialorder %v1317_v35, 0.0  ;;  %v1359_v41 = vmul.f32 0.01, %v1317_v35  ;;  %v1292_v44 = vadd.f32 %v1228_v38, %v8118_v51  ;;  %v6235_v45 = vpop.f32.mrb[63].mxu0 }
 0x218   : > { %v1434_v43 = vsel %vm543_vm3, %v1431_v13, %v1433_v21 }
 0x219   : > { %v8205_v37 = vsel %vm1338_vm13, %v1317_v35, %v1359_v41  ;;  %v1318_v42 = vadd.f32 %v8144_v59, %v1292_v44  ;;  %6283 = vmatprep.mubr.msk.f32.mxu1 %vm1457_vm6, %v1434_v43 }
 0x21a   : > { %v1233_v47 = vpop.f32.mrb[64].mxu0  ;;  %v1435_v48 = vrot.slane %v8205_v37, 6  ;;  %v1858_v50 = vrot.slane %v8205_v37, 4 }
 0x21b   : > { %vm1339_vm14 = vcmp.gt.f32.partialorder %v1318_v42, 0.0  ;;  %v1360_v54 = vmul.f32 0.01, %v1318_v42  ;;  %v1293_v51 = vadd.f32 %v1233_v47, %v8120_v56  ;;  %v6238_v57 = vpop.f32.mrb[65].mxu0 }
 0x21c   : > { %v1436_v58 = vsel %vm543_vm3, %v1433_v21, %v1435_v48  ;;  %v8217_v60 = vsel %vm630_vm1, %v1856_v27, %v1858_v50 }
 0x21d   : > { %v8219_v20 = vsel %vm1339_vm14, %v1318_v42, %v1360_v54  ;;  %v1319_v32 = vadd.f32 %v8144_v59, %v1293_v51  ;;  %6284 = vmatmul.mubr.msk.f32.gmra.mrb[48].mxu1 %vm1457_vm6, %v1436_v58 }
 0x21e   : > { %v1238_v63 = vpop.f32.mrb[66].mxu0  ;;  %v1437_v1 = vrot.slane %v8219_v20, 6  ;;  %v1860_v4 = vrot.slane %v8219_v20, 4 }
 0x21f   : > { %vm1340_vm15 = vcmp.gt.f32.partialorder %v1319_v32, 0.0  ;;  %v1361_v56 = vmul.f32 0.01, %v1319_v32  ;;  %v1294_v6 = vadd.f32 %v1238_v63, %v8122_v62  ;;  %v6241_v7 = vpop.f32.mrb[67].mxu0 }
 0x220   : > { %v1438_v9 = vsel %vm543_vm3, %v1435_v48, %v1437_v1  ;;  %v8228_v3 = vsel %vm630_vm1, %v1858_v50, %v1860_v4 }
 0x221   : > { %v8230_v10 = vsel %vm1340_vm15, %v1319_v32, %v1361_v56  ;;  %v1320_v14 = vadd.f32 %v8144_v59, %v1294_v6  ;;  %6286 = vmatprep.mubr.msk.f32.mxu1 %vm1457_vm6, %v1438_v9 }
 0x222   : > { %v1243_v15 = vpop.f32.mrb[68].mxu0  ;;  %v1439_v39 = vrot.slane %v8230_v10, 6  ;;  %v1862_v16 = vrot.slane %v8230_v10, 4 }
 0x223   : > { %vm1341_vm4 = vcmp.gt.f32.partialorder %v1320_v14, 0.0  ;;  %v1362_v8 = vmul.f32 0.01, %v1320_v14  ;;  %v1295_v62 = vadd.f32 %v1243_v15, %v8124_v5  ;;  %v6244_v18 = vpop.f32.mrb[69].mxu0 }
 0x224   : > { %v1440_v19 = vsel %vm543_vm3, %v1437_v1, %v1439_v39  ;;  %v8239_v24 = vsel %vm630_vm1, %v1860_v4, %v1862_v16 }
 0x225   : > { %v8241_v26 = vsel %vm1341_vm4, %v1320_v14, %v1362_v8  ;;  %v1321_v13 = vadd.f32 %v8144_v59, %v1295_v62  ;;  %6287 = vmatmul.mubr.msk.f32.gmra.mrb[50].mxu1 %vm1457_vm6, %v1440_v19 }
 0x226   : > { %v1248_v29 = vpop.f32.mrb[70].mxu0  ;;  %v1441_v46 = vrot.slane %v8241_v26, 6  ;;  %v1864_v30 = vrot.slane %v8241_v26, 4 }
 0x227   : > { %vm1342_vm5 = vcmp.gt.f32.partialorder %v1321_v13, 0.0  ;;  %v1363_v33 = vmul.f32 0.01, %v1321_v13  ;;  %v1296_v5 = vadd.f32 %v1248_v29, %v8126_v11  ;;  %v6247_v35 = vpop.f32.mrb[71].mxu0 }
 0x228   : > { %v1442_v38 = vsel %vm543_vm3, %v1439_v39, %v1441_v46  ;;  %v8250_v21 = vsel %vm630_vm1, %v1862_v16, %v1864_v30 }
 0x229   : > { %v8252_v41 = vsel %vm1342_vm5, %v1321_v13, %v1363_v33  ;;  %v1322_v44 = vadd.f32 %v8144_v59, %v1296_v5  ;;  %6289 = vmatprep.mubr.msk.f32.mxu1 %vm1457_vm6, %v1442_v38 }
 0x22a   : > { %v1253_v45 = vpop.f32.mrb[72].mxu0  ;;  %v1443_v43 = vrot.slane %v8252_v41, 6  ;;  %v1866_v42 = vrot.slane %v8252_v41, 4 }
 0x22b   : > { %vm1343_vm7 = vcmp.gt.f32.partialorder %v1322_v44, 0.0  ;;  %v1364_v47 = vmul.f32 0.01, %v1322_v44  ;;  %v1297_v11 = vadd.f32 %v1253_v45, %v8128_v17  ;;  %v6250_v48 = vpop.f32.mrb[73].mxu0 }
 0x22c   : > { %v1444_v50 = vsel %vm543_vm3, %v1441_v46, %v1443_v43  ;;  %v8261_v54 = vsel %vm630_vm1, %v1864_v30, %v1866_v42 }
 0x22d   : > { %v8263_v51 = vsel %vm1343_vm7, %v1322_v44, %v1364_v47  ;;  %v1323_v57 = vadd.f32 %v8144_v59, %v1297_v11  ;;  %6290 = vmatmul.mubr.msk.f32.gmra.mrb[52].mxu1 %vm1457_vm6, %v1444_v50 }
 0x22e   : > { %v1258_v58 = vpop.f32.mrb[74].mxu0  ;;  %v1445_v32 = vrot.slane %v8263_v51, 6  ;;  %v1868_v63 = vrot.slane %v8263_v51, 4 }
 0x22f   : > { %vm1344_vm8 = vcmp.gt.f32.partialorder %v1323_v57, 0.0  ;;  %v1365_v1 = vmul.f32 0.01, %v1323_v57  ;;  %v1298_v17 = vadd.f32 %v1258_v58, %v8130_v25  ;;  %v6253_v4 = vpop.f32.mrb[75].mxu0  ;;  %v1308_v58 = vadd.f32 %v8144_v59, %v8141_v53 }
 0x230   : > { %v1446_v56 = vsel %vm543_vm3, %v1443_v43, %v1445_v32  ;;  %v8272_v6 = vsel %vm630_vm1, %v1866_v42, %v1868_v63 }
 0x231   : > { %v8274_v7 = vsel %vm1344_vm8, %v1323_v57, %v1365_v1  ;;  %v1324_v9 = vadd.f32 %v8144_v59, %v1298_v17  ;;  %6292 = vmatprep.mubr.msk.f32.mxu1 %vm1457_vm6, %v1446_v56  ;;  %vm1329_vm13 = vcmp.gt.f32.partialorder %v1308_v58, 0.0 }
 0x232   : > { %v1263_v14 = vpop.f32.mrb[76].mxu0  ;;  %v1447_v15 = vrot.slane %v8274_v7, 6  ;;  %v1870_v39 = vrot.slane %v8274_v7, 4 }
 0x233   : > { %vm1345_vm9 = vcmp.gt.f32.partialorder %v1324_v9, 0.0  ;;  %v1366_v16 = vmul.f32 0.01, %v1324_v9  ;;  %v1299_v25 = vadd.f32 %v1263_v14, %v8132_v31  ;;  %v6256_v8 = vpop.f32.mrb[77].mxu0 }
 0x234   : > { %v1448_v62 = vsel %vm543_vm3, %v1445_v32, %v1447_v15  ;;  %v8283_v18 = vsel %vm630_vm1, %v1868_v63, %v1870_v39 }
 0x235   : > { %v8285_v19 = vsel %vm1345_vm9, %v1324_v9, %v1366_v16  ;;  %v1325_v13 = vadd.f32 %v8144_v59, %v1299_v25  ;;  %6293 = vmatmul.mubr.msk.f32.gmra.mrb[54].mxu1 %vm1457_vm6, %v1448_v62 }
 0x236   : > { %v1268_v29 = vpop.f32.mrb[78].mxu0  ;;  %v1449_v46 = vrot.slane %v8285_v19, 6  ;;  %v1872_v30 = vrot.slane %v8285_v19, 4 }
 0x237   : > { %vm1346_vm10 = vcmp.gt.f32.partialorder %v1325_v13, 0.0  ;;  %v1367_v33 = vmul.f32 0.01, %v1325_v13  ;;  %v1300_v31 = vadd.f32 %v1268_v29, %v8134_v40  ;;  %v6259_v5 = vpop.f32.mrb[79].mxu0  ;;  %v1845_v29 = vld [vmem:[#allocation4 + $0x58] sm:$0xff] }
 0x238   : > { %v1450_v35 = vsel %vm543_vm3, %v1447_v15, %v1449_v46  ;;  %v8294_v38 = vsel %vm630_vm1, %v1870_v39, %v1872_v30  ;;  %v1350_v39 = vmul.f32 0.01, %v1308_v58 }
 0x239   : > { %v8296_v44 = vsel %vm1346_vm10, %v1325_v13, %v1367_v33  ;;  %v1326_v45 = vadd.f32 %v8144_v59, %v1300_v31  ;;  %6295 = vmatprep.mubr.msk.f32.mxu1 %vm1457_vm6, %v1450_v35 }
 0x23a   : > { %v1273_v43 = vpop.f32.mrb[80].mxu0  ;;  %v1451_v42 = vrot.slane %v8296_v44, 6  ;;  %v1874_v47 = vrot.slane %v8296_v44, 4  ;;  %v1371_v33 = vsel %vm1329_vm13, %v1308_v58, %v1350_v39 }
 0x23b   : > { %vm1347_vm11 = vcmp.gt.f32.partialorder %v1326_v45, 0.0  ;;  %v1368_v11 = vmul.f32 0.01, %v1326_v45  ;;  %v1301_v40 = vadd.f32 %v1273_v43, %v8136_v36  ;;  %v6262_v48 = vpop.f32.mrb[81].mxu0  ;;  %v8448_v43 = vld [vmem:[%s8408_s11 + $0x30] sm:$0xff] }
 0x23c   : > { %v1452_v50 = vsel %vm543_vm3, %v1449_v46, %v1451_v42  ;;  %v8305_v57 = vsel %vm630_vm1, %v1872_v30, %v1874_v47 }
 0x23d   : > { %v1389_v32 = vsel %vm1347_vm11, %v1326_v45, %v1368_v11  ;;  %v1327_v63 = vadd.f32 %v8144_v59, %v1301_v40  ;;  %6296 = vmatmul.mubr.msk.f32.gmra.mrb[56].mxu1 %vm1457_vm6, %v1452_v50  ;;  %v8456_v11 = vld [vmem:[%s8408_s11 + $0x38] sm:$0xff]  ;;  %v8464_v50 = vld [vmem:[%s8408_s11 + $0x40] sm:$0xff] }
 0x23e   : > { %v1278_v1 = vpop.f32.mrb[82].mxu0  ;;  %v1453_v17 = vrot.slane %v1389_v32, 6  ;;  %v1876_v4 = vrot.slane %v1389_v32, 4  ;;  %v2897_v40 = vrot.slane %v8456_v11, 6  ;;  %9691 = vst [vmem:[#allocation17_spill] sm:$0xff] %v8464_v50  ;;  %v8472_v32 = vld [vmem:[%s8408_s11 + $0x48] sm:$0xff] }
 0x23f   : > { %vm1348_vm12 = vcmp.gt.f32.partialorder %v1327_v63, 0.0  ;;  %v1369_v56 = vmul.f32 0.01, %v1327_v63  ;;  %v1302_v36 = vadd.f32 %v1278_v1, %v8138_v49  ;;  %v6265_v9 = vpop.f32.mrb[83].mxu0  ;;  %v1844_v49 = vld [vmem:[#allocation4 + $0x50] sm:$0xff]  ;;  %9692 = vst [vmem:[#allocation18_spill] sm:$0xff] %v8472_v32 }
 0x240   : > { %v1454_v14 = vsel %vm543_vm3, %v1451_v42, %v1453_v17  ;;  %v8314_v15 = vsel %vm630_vm1, %v1874_v47, %v1876_v4  ;;  %v2895_v42 = vrot.slane %v8448_v43, 6 }
 0x241   : > { %v1390_v53 = vsel %vm1348_vm12, %v1327_v63, %v1369_v56  ;;  %v1328_v16 = vadd.f32 %v8144_v59, %v1302_v36  ;;  %6298 = vmatprep.mubr.msk.f32.mxu1 %vm1457_vm6, %v1454_v14  ;;  %v6865_v59 = vpack.c.bf16 %v1845_v29, %v1844_v49  ;;  %v2901_v63 = vrot.slane %v8472_v32, 6  ;;  %v8488_v36 = vld [vmem:[%s8408_s11 + $0x58] sm:$0xff] }
 0x242   : > { %v1455_v25 = vrot.slane %v1390_v53, 6  ;;  %v1878_v8 = vrot.slane %v1390_v53, 4  ;;  %v2898_v48 = vsel %vm543_vm3, %v2895_v42, %v2897_v40  ;;  %9694 = vst [vmem:[#allocation20_spill] sm:$0xff] %v8488_v36  ;;  %v2905_v9 = vrot.slane %v8488_v36, 6  ;;  %v8523_v29 = vld [vmem:[%s8408_s11 + $0x78] sm:$0xff] }
 0x243   : > { %vm1349_vm14 = vcmp.gt.f32.partialorder %v1328_v16, 0.0  ;;  %v1370_v62 = vmul.f32 0.01, %v1328_v16 }
 0x244   : > { %v1456_v13 = vsel %vm543_vm3, %v1453_v17, %v1455_v25  ;;  %v1879_v46 = vsel %vm630_vm1, %v1876_v4, %v1878_v8  ;;  %v8480_v17 = vld [vmem:[%s8408_s11 + $0x50] sm:$0xff] }
 0x245   : > { %v1391_v30 = vsel %vm1349_vm14, %v1328_v16, %v1370_v62  ;;  %6299 = vmatmul.mubr.msk.f32.gmra.mrb[58].mxu1 %vm1457_vm6, %v1456_v13  ;;  %9693 = vst [vmem:[#allocation19_spill] sm:$0xff] %v8480_v17  ;;  %v2903_v4 = vrot.slane %v8480_v17, 6  ;;  %v8504_v16 = vld [vmem:[%s8408_s11 + $0x68] sm:$0xff]  ;;  %v8512_v62 = vld [vmem:[%s8408_s11 + $0x70] sm:$0xff] }
 0x246   : > { %v1880_v31 = vrot.slane %v1391_v30, 4  ;;  %6309 = vmatprep.mubr.msk.f32.mxu1 %vm1457_vm6, %v1371_v33  ;;  %9696 = vst [vmem:[#allocation22_spill] sm:$0xff] %v8504_v16  ;;  %v2909_v25 = vrot.slane %v8504_v16, 6  ;;  %v2911_v13 = vrot.slane %v8512_v62, 6  ;;  %v8529_v33 = vld [vmem:[%s8408_s11 + $0x80] sm:$0xff] }
 0x247   : > { %v2904_v56 = vsel %vm543_vm3, %v2901_v63, %v2903_v4  ;;  %v2906_v14 = vsel %vm543_vm3, %v2903_v4, %v2905_v9 }
 0x248   : > { %v1881_v5 = vsel %vm630_vm1, %v1878_v8, %v1880_v31  ;;  %v2912_v49 = vsel %vm543_vm3, %v2909_v25, %v2911_v13 }
 0x249   : > { %6310 = vmatmul.mubr.msk.f32.vlgmr.msra.gmra.mrb[42].mxu1 %vm1457_vm6, %v8149_v61  ;;  %v1848_v61 = vrot.slane %v8166_v23, 4 }
 0x24a   : > { %6864 = vmatpush3.bf16.msra.mxu1 %v8173_v52  ;;  %6312 = vmatprep.mubr.msk.f32.mxu1 %vm1457_vm6, %v8152_v12  ;;  %v1847_v12 = vrot.slane %v8159_v28, 4  ;;  %v1850_v52 = vrot.slane %v8176_v55, 4 }
 0x24b   : > { %6866 = vmatprep.subr.bf16.mxu1 %v6865_v59 }
 0x24d   : > { %6313 = vmatmul.mubr.msk.f32.gmra.mrb[44].mxu1 %vm1457_vm6, %v8159_v28 }
 0x24e   : > { %6315 = vmatprep.mubr.msk.f32.mxu1 %vm1457_vm6, %v8166_v23  ;;  %6868 = vmatpush3.bf16.msra.mxu1 %v6865_v59  ;;  %v1854_v23 = vrot.slane %v8191_v22, 4 }
 0x24f   : > { %6458 = vmatprep.subr.mxu1 %v9669_v0 }
 0x251   : > { %6316 = vmatmul.mubr.msk.f32.gmra.mrb[46].mxu1 %vm1457_vm6, %v8176_v55 }
 0x252   : > { %6318 = vmatprep.mubr.msk.f32.mxu1 %vm1457_vm6, %v8184_v2 }
 0x255   : > { %6319 = vmatmul.mubr.msk.f32.gmra.mrb[48].mxu1 %vm1457_vm6, %v8191_v22  ;;  %v8411_v22 = vld [vmem:[%s8408_s11 + $0x8] sm:$0xff] }
 0x256   : > { %6321 = vmatprep.mubr.msk.f32.mxu1 %vm1457_vm6, %v8198_v34  ;;  %v8414_v34 = vld [vmem:[%s8408_s11 + $0x10] sm:$0xff] }
 0x259   : > { %6322 = vmatmul.mubr.msk.f32.gmra.mrb[50].mxu1 %vm1457_vm6, %v8205_v37  ;;  %v1849_v37 = vsel %vm630_vm1, %v1847_v12, %v1848_v61 }
 0x25a   : > { %6324 = vmatprep.mubr.msk.f32.mxu1 %vm1457_vm6, %v8219_v20  ;;  %v1852_v20 = vrot.slane %v8184_v2, 4  ;;  %v1857_v2 = vsel %vm630_vm1, %v1854_v23, %v1856_v27  ;;  %v2886_v27 = vrot.slane %v8411_v22, 6 }
 0x25c   : > { %v1853_v28 = vsel %vm630_vm1, %v1850_v52, %v1852_v20  ;;  %v1855_v55 = vsel %vm630_vm1, %v1852_v20, %v1854_v23 }
 0x25d   : > { %6325 = vmatmul.mubr.msk.f32.gmra.mrb[52].mxu1 %vm1457_vm6, %v8230_v10  ;;  %v2863_v10 = vld [vmem:[#allocation7 + $0x4] sm:$0xf] }
 0x25e   : > { %6327 = vmatprep.mubr.msk.f32.mxu1 %vm1457_vm6, %v8241_v26  ;;  %v1851_v26 = vsel %vm630_vm1, %v1848_v61, %v1850_v52  ;;  %v8545_v52 = vld [vmem:[%s8408_s11 + $0x90] sm:$0xff] }
 0x261   : > { %6328 = vmatmul.mubr.msk.f32.gmra.mrb[54].mxu1 %vm1457_vm6, %v8252_v41  ;;  %v2168_v41 = vld [vmem:[#allocation6] sm:$0xff] }
 0x262   : > { %6330 = vmatprep.mubr.msk.f32.mxu1 %vm1457_vm6, %v8263_v51 }
 0x265   : > { %6331 = vmatmul.mubr.msk.f32.gmra.mrb[56].mxu1 %vm1457_vm6, %v8274_v7  ;;  %v8431_v7 = vld [vmem:[%s8408_s11 + $0x20] sm:$0xff] }
 0x266   : > { %6333 = vmatprep.mubr.msk.f32.mxu1 %vm1457_vm6, %v8285_v19  ;;  %v3361_v19 = vld [vmem:[#allocation7 + $0x8] sm:$0xf] }
 0x269   : > { %6334 = vmatmul.mubr.msk.f32.gmra.mrb[58].mxu1 %vm1457_vm6, %v8296_v44 }
 0x26a   : > { %6344 = vmatprep.mubr.msk.f32.mxu1 %vm1457_vm6, %v1849_v37  ;;  %v2919_v37 = vrot.slane %v8545_v52, 6 }
 0x26d   : > { %6345 = vmatmul.mubr.msk.f32.vlgmr.msra.gmra.mrb[42].mxu1 %vm1457_vm6, %v1851_v26 }
 0x26e   : > { %6347 = vmatprep.mubr.msk.f32.mxu1 %vm1457_vm6, %v1853_v28  ;;  %6459 = vmatpush3.msk.msra.mxu1 %vm630_vm1, %v2863_v10  ;;  %v8553_v10 = vld [vmem:[%s8408_s11 + $0x98] sm:$0xff]  ;;  %v8561_v28 = vld [vmem:[%s8408_s11 + $0xa0] sm:$0xff] }
 0x26f   : > { %6588 = vmatprep.subr.mxu1 %v9669_v0  ;;  %v2921_v26 = vrot.slane %v8553_v10, 6 }
 0x271   : > { %6348 = vmatmul.mubr.msk.f32.gmra.mrb[44].mxu1 %vm1457_vm6, %v1855_v55  ;;  %v2922_v23 = vsel %vm543_vm3, %v2919_v37, %v2921_v26  ;;  %v2923_v55 = vrot.slane %v8561_v28, 6 }
 0x272   : > { %6350 = vmatprep.mubr.msk.f32.mxu1 %vm1457_vm6, %v1857_v2 }
 0x273   : > { %v2924_v2 = vsel %vm543_vm3, %v2921_v26, %v2923_v55  ;;  %v2550_v26 = vld [vmem:[#allocation6 + $0x48] sm:$0xff] }
 0x275   : > { %6351 = vmatmul.mubr.msk.f32.gmra.mrb[46].mxu1 %vm1457_vm6, %v8217_v60  ;;  %v2887_v60 = vrot.slane %v8414_v34, 6 }
 0x276   : > { %6353 = vmatprep.mubr.msk.f32.mxu1 %vm1457_vm6, %v8228_v3 }
 0x277   : > { %v2888_v3 = vsel %vm543_vm3, %v2886_v27, %v2887_v60  ;;  %v8569_v27 = vld [vmem:[%s8408_s11 + $0xa8] sm:$0xff] }
 0x279   : > { %6354 = vmatmul.mubr.msk.f32.gmra.mrb[48].mxu1 %vm1457_vm6, %v8239_v24  ;;  %v8421_v24 = vld [vmem:[%s8408_s11 + $0x18] sm:$0xff] }
 0x27a   : > { %6356 = vmatprep.mubr.msk.f32.mxu1 %vm1457_vm6, %v8250_v21  ;;  %v2889_v21 = vrot.slane %v8421_v24, 6 }
 0x27c   : > { %v2890_v51 = vsel %vm543_vm3, %v2887_v60, %v2889_v21  ;;  %v2925_v60 = vrot.slane %v8569_v27, 6 }
 0x27d   : > { %6357 = vmatmul.mubr.msk.f32.gmra.mrb[50].mxu1 %vm1457_vm6, %v8261_v54  ;;  %v2169_v54 = vld [vmem:[#allocation6 + $0x8] sm:$0xff] }
 0x27e   : > { %6359 = vmatprep.mubr.msk.f32.mxu1 %vm1457_vm6, %v8272_v6  ;;  %v8427_v6 = vpack.c.bf16 %v2169_v54, %v2168_v41  ;;  %v3364_v41 = vrot.slane %v8421_v24, 4  ;;  %v3365_v54 = vrot.slane %v8431_v7, 4 }
 0x280   : > { %6878 = vmatprep.subr.bf16.mxu0 %v8427_v6 }
 0x281   : > { %6360 = vmatmul.mubr.msk.f32.gmra.mrb[52].mxu1 %vm1457_vm6, %v8283_v18  ;;  %v2891_v18 = vrot.slane %v8431_v7, 6 }
 0x282   : > { %6362 = vmatprep.mubr.msk.f32.mxu1 %vm1457_vm6, %v8294_v38  ;;  %v8440_v38 = vld [vmem:[%s8408_s11 + $0x28] sm:$0xff] }
 0x283   : > { %v2892_v35 = vsel %vm543_vm3, %v2889_v21, %v2891_v18  ;;  %v2893_v44 = vrot.slane %v8440_v38, 6  ;;  %v8577_v21 = vld [vmem:[%s8408_s11 + $0xb0] sm:$0xff] }
 0x285   : > { %6363 = vmatmul.mubr.msk.f32.gmra.mrb[54].mxu1 %vm1457_vm6, %v8305_v57  ;;  %v2894_v45 = vsel %vm543_vm3, %v2891_v18, %v2893_v44  ;;  %v2896_v47 = vsel %vm543_vm3, %v2893_v44, %v2895_v42  ;;  %v2899_v57 = vrot.slane %v8464_v50, 6 }
 0x286   : > { %6365 = vmatprep.mubr.msk.f32.mxu1 %vm1457_vm6, %v8314_v15  ;;  %v8496_v15 = vld [vmem:[%s8408_s11 + $0x60] sm:$0xff] }
 0x287   : > { %v2900_v58 = vsel %vm543_vm3, %v2897_v40, %v2899_v57  ;;  %v2902_v1 = vsel %vm543_vm3, %v2899_v57, %v2901_v63  ;;  %9695 = vst [vmem:[#allocation21_spill] sm:$0xff] %v8496_v15  ;;  %v2907_v39 = vrot.slane %v8496_v15, 6 }
 0x289   : > { %6366 = vmatmul.mubr.msk.f32.gmra.mrb[56].mxu1 %vm1457_vm6, %v1879_v46  ;;  %v2908_v53 = vsel %vm543_vm3, %v2905_v9, %v2907_v39  ;;  %v2910_v8 = vsel %vm543_vm3, %v2907_v39, %v2909_v25  ;;  %v2913_v46 = vrot.slane %v8523_v29, 6  ;;  %v3379_v9 = vrot.slane %v8488_v36, 4 }
 0x28a   : > { %6368 = vmatprep.mubr.msk.f32.mxu1 %vm1457_vm6, %v1881_v5  ;;  %v8537_v5 = vld [vmem:[%s8408_s11 + $0x88] sm:$0xff] }
 0x28b   : > { %v2914_v30 = vsel %vm543_vm3, %v2911_v13, %v2913_v46  ;;  %v2917_v61 = vrot.slane %v8537_v5, 6 }
 0x28d   : > { %6369 = vmatmul.mubr.msk.f32.gmra.mrb[58].mxu1 %vm1457_vm6, %v1880_v31  ;;  %v2915_v31 = vrot.slane %v8529_v33, 6  ;;  %v2920_v20 = vsel %vm543_vm3, %v2917_v61, %v2919_v37 }
 0x28e   : > { %6460 = vmatprep.mubr.msk.f32.mxu1 %vm7388_vm0, %v9669_v0 }
 0x28f   : > { %v2916_v59 = vsel %vm543_vm3, %v2913_v46, %v2915_v31  ;;  %v2918_v12 = vsel %vm543_vm3, %v2915_v31, %v2917_v61  ;;  %v2170_v31 = vld [vmem:[#allocation6 + $0x10] sm:$0xff] }
 0x291   : > { %6461 = vmatmul.mubr.msk.f32.vlgmr.msra.gmra.mrb[60].mxu1 %vm587_vm2, %v2888_v3  ;;  %v2926_v3 = vsel %vm543_vm3, %v2923_v55, %v2925_v60  ;;  %v3383_v55 = vrot.slane %v8504_v16, 4 }
 0x292   : > { %6463 = vmatprep.mubr.msk.f32.mxu1 %vm7388_vm0, %v9669_v0  ;;  %6589 = vmatpush3.msk.msra.mxu1 %vm630_vm1, %v3361_v19  ;;  %v3366_v19 = vsel %vm630_vm1, %v3364_v41, %v3365_v54 }
 0x295   : > { %6464 = vmatmul.mubr.msk.f32.gmra.mrb[62].mxu1 %vm587_vm2, %v2890_v51  ;;  %v2927_v51 = vrot.slane %v8577_v21, 6 }
 0x296   : > { %6466 = vmatprep.mubr.msk.f32.mxu1 %vm7388_vm0, %v9669_v0 }
 0x297   : > { %v2928_v18 = vsel %vm543_vm3, %v2925_v60, %v2927_v51 }
 0x299   : > { %6467 = vmatmul.mubr.msk.f32.gmra.mrb[64].mxu1 %vm587_vm2, %v2892_v35  ;;  %v3367_v35 = vrot.slane %v8440_v38, 4 }
 0x29a   : > { %6469 = vmatprep.mubr.msk.f32.mxu1 %vm7388_vm0, %v9669_v0 }
 0x29b   : > { %v3368_v44 = vsel %vm630_vm1, %v3365_v54, %v3367_v35 }
 0x29d   : > { %6470 = vmatmul.mubr.msk.f32.gmra.mrb[66].mxu1 %vm587_vm2, %v2894_v45  ;;  %v3369_v45 = vrot.slane %v8448_v43, 4 }
 0x29e   : > { %6472 = vmatprep.mubr.msk.f32.mxu1 %vm7388_vm0, %v9669_v0 }
 0x29f   : > { %v3370_v42 = vsel %vm630_vm1, %v3367_v35, %v3369_v45 }
 0x2a1   : > { %6473 = vmatmul.mubr.msk.f32.gmra.mrb[68].mxu1 %vm587_vm2, %v2896_v47  ;;  %v3371_v47 = vrot.slane %v8456_v11, 4 }
 0x2a2   : > { %6475 = vmatprep.mubr.msk.f32.mxu1 %vm7388_vm0, %v9669_v0 }
 0x2a3   : > { %v3372_v40 = vsel %vm630_vm1, %v3369_v45, %v3371_v47 }
 0x2a5   : > { %6476 = vmatmul.mubr.msk.f32.gmra.mrb[70].mxu1 %vm587_vm2, %v2898_v48  ;;  %v3373_v48 = vrot.slane %v8464_v50, 4 }
 0x2a6   : > { %6478 = vmatprep.mubr.msk.f32.mxu1 %vm7388_vm0, %v9669_v0 }
 0x2a7   : > { %v3374_v57 = vsel %vm630_vm1, %v3371_v47, %v3373_v48 }
 0x2a9   : > { %6479 = vmatmul.mubr.msk.f32.gmra.mrb[72].mxu1 %vm587_vm2, %v2900_v58  ;;  %v3375_v58 = vrot.slane %v8472_v32, 4 }
 0x2aa   : > { %6481 = vmatprep.mubr.msk.f32.mxu1 %vm7388_vm0, %v9669_v0 }
 0x2ab   : > { %v3376_v63 = vsel %vm630_vm1, %v3373_v48, %v3375_v58 }
 0x2ad   : > { %6482 = vmatmul.mubr.msk.f32.gmra.mrb[74].mxu1 %vm587_vm2, %v2902_v1  ;;  %v3377_v1 = vrot.slane %v8480_v17, 4 }
 0x2ae   : > { %6484 = vmatprep.mubr.msk.f32.mxu1 %vm7388_vm0, %v9669_v0 }
 0x2af   : > { %v3378_v4 = vsel %vm630_vm1, %v3375_v58, %v3377_v1  ;;  %v3380_v25 = vsel %vm630_vm1, %v3377_v1, %v3379_v9 }
 0x2b1   : > { %6485 = vmatmul.mubr.msk.f32.gmra.mrb[76].mxu1 %vm587_vm2, %v2904_v56  ;;  %v8619_v56 = vld [vmem:[#allocation12 + $0x1] ss:$0 sm:$0xff] }
 0x2b2   : > { %6487 = vmatprep.mubr.msk.f32.mxu1 %vm7388_vm0, %v9669_v0 }
 0x2b5   : > { %6488 = vmatmul.mubr.msk.f32.gmra.mrb[78].mxu1 %vm587_vm2, %v2906_v14 }
 0x2b6   : > { %6490 = vmatprep.mubr.msk.f32.mxu1 %vm7388_vm0, %v9669_v0 }
 0x2b9   : > { %6491 = vmatmul.mubr.msk.f32.gmra.mrb[80].mxu1 %vm587_vm2, %v2908_v53 }
 0x2ba   : > { %6493 = vmatprep.mubr.msk.f32.mxu1 %vm7388_vm0, %v9669_v0 }
 0x2bd   : > { %6494 = vmatmul.mubr.msk.f32.gmra.mrb[82].mxu1 %vm587_vm2, %v2910_v8  ;;  %v3381_v8 = vrot.slane %v8496_v15, 4 }
 0x2be   : > { %6496 = vmatprep.mubr.msk.f32.mxu1 %vm7388_vm0, %v9669_v0 }
 0x2bf   : > { %v3382_v61 = vsel %vm630_vm1, %v3379_v9, %v3381_v8  ;;  %v3384_v35 = vsel %vm630_vm1, %v3381_v8, %v3383_v55 }
 0x2c1   : > { %6497 = vmatmul.mubr.msk.f32.gmra.mrb[84].mxu1 %vm587_vm2, %v2912_v49 }
 0x2c2   : > { %6499 = vmatprep.mubr.msk.f32.mxu1 %vm7388_vm0, %v9669_v0 }
 0x2c5   : > { %6500 = vmatmul.mubr.msk.f32.gmra.mrb[86].mxu1 %vm587_vm2, %v2914_v30 }
 0x2c6   : > { %6502 = vmatprep.mubr.msk.f32.mxu1 %vm7388_vm0, %v9669_v0 }
 0x2c9   : > { %6503 = vmatmul.mubr.msk.f32.gmra.mrb[88].mxu1 %vm587_vm2, %v2916_v59  ;;  %v2171_v59 = vld [vmem:[#allocation6 + $0x18] sm:$0xff] }
 0x2ca   : > { %6505 = vmatprep.mubr.msk.f32.mxu1 %vm7388_vm0, %v9669_v0  ;;  %v8641_v41 = vpack.c.bf16 %v2171_v59, %v2170_v31 }
 0x2cd   : > { %6506 = vmatmul.mubr.msk.f32.gmra.mrb[90].mxu1 %vm587_vm2, %v2918_v12 }
 0x2ce   : > { %6508 = vmatprep.mubr.msk.f32.mxu1 %vm7388_vm0, %v9669_v0 }
 0x2d1   : > { %6509 = vmatmul.mubr.msk.f32.gmra.mrb[92].mxu1 %vm587_vm2, %v2920_v20  ;;  %v2549_v20 = vld [vmem:[#allocation6 + $0x40] sm:$0xff] }
 0x2d2   : > { %6511 = vmatprep.mubr.msk.f32.mxu1 %vm7388_vm0, %v9669_v0 }
 0x2d5   : > { %6512 = vmatmul.mubr.msk.f32.gmra.mrb[94].mxu1 %vm587_vm2, %v2922_v23 }
 0x2d6   : > { %6514 = vmatprep.mubr.msk.f32.mxu1 %vm7388_vm0, %v9669_v0 }
 0x2d9   : > { %6515 = vmatmul.mubr.msk.f32.gmra.mrb[96].mxu1 %vm587_vm2, %v2924_v2 }
 0x2da   : > { %6517 = vmatprep.mubr.msk.f32.mxu1 %vm7388_vm0, %v9669_v0 }
 0x2dd   : > { %6518 = vmatmul.mubr.msk.f32.gmra.mrb[98].mxu1 %vm587_vm2, %v2926_v3 }
 0x2de   : > { %6520 = vmatprep.mubr.msk.f32.mxu1 %vm7388_vm0, %v9669_v0 }
 0x2e1   : > { %6521 = vmatmul.mubr.msk.f32.gmra.mrb[100].mxu1 %vm587_vm2, %v2928_v18 }
 0x2e2   : > { %6590 = vmatprep.mubr.msk.f32.mxu1 %vm7388_vm0, %v9669_v0 }
 0x2e5   : > { %6591 = vmatmul.mubr.msk.f32.vlgmr.msra.gmra.mrb[102].mxu1 %vm587_vm2, %v3366_v19  ;;  %v8648_v19 = vpack.c.bf16 %v2550_v26, %v2549_v20 }
 0x2e6   : > { %6593 = vmatprep.mubr.msk.f32.mxu1 %vm7388_vm0, %v9669_v0 }
 0x2e9   : > { %6594 = vmatmul.mubr.msk.f32.gmra.mrb[104].mxu1 %vm587_vm2, %v3368_v44 }
 0x2ea   : > { %6596 = vmatprep.mubr.msk.f32.mxu1 %vm7388_vm0, %v9669_v0 }
 0x2ed   : > { %6597 = vmatmul.mubr.msk.f32.gmra.mrb[106].mxu1 %vm587_vm2, %v3370_v42 }
 0x2ee   : > { %6599 = vmatprep.mubr.msk.f32.mxu1 %vm7388_vm0, %v9669_v0 }
 0x2f1   : > { %6600 = vmatmul.mubr.msk.f32.gmra.mrb[108].mxu1 %vm587_vm2, %v3372_v40 }
 0x2f2   : > { %6602 = vmatprep.mubr.msk.f32.mxu1 %vm7388_vm0, %v9669_v0 }
 0x2f5   : > { %6603 = vmatmul.mubr.msk.f32.gmra.mrb[110].mxu1 %vm587_vm2, %v3374_v57 }
 0x2f6   : > { %6605 = vmatprep.mubr.msk.f32.mxu1 %vm7388_vm0, %v9669_v0 }
 0x2f9   : > { %6606 = vmatmul.mubr.msk.f32.gmra.mrb[112].mxu1 %vm587_vm2, %v3376_v63 }
 0x2fa   : > { %6608 = vmatprep.mubr.msk.f32.mxu1 %vm7388_vm0, %v9669_v0 }
 0x2fd   : > { %6609 = vmatmul.mubr.msk.f32.gmra.mrb[114].mxu1 %vm587_vm2, %v3378_v4  ;;  %v9671_v4 = vrot.slane %v8512_v62, 4 }
 0x2fe   : > { %6611 = vmatprep.mubr.msk.f32.mxu1 %vm7388_vm0, %v9669_v0 }
 0x2ff   : > { %v3386_v20 = vsel %vm630_vm1, %v3383_v55, %v9671_v4 }
 0x301   : > { %6612 = vmatmul.mubr.msk.f32.gmra.mrb[116].mxu1 %vm587_vm2, %v3380_v25 }
 0x302   : > { %6614 = vmatprep.mubr.msk.f32.mxu1 %vm7388_vm0, %v9669_v0 }
 0x305   : > { %6615 = vmatmul.mubr.msk.f32.gmra.mrb[118].mxu1 %vm587_vm2, %v3382_v61 }
 0x306   : > { %6617 = vmatprep.mubr.msk.f32.mxu1 %vm7388_vm0, %v9669_v0 }
 0x309   : > { %6618 = vmatmul.mubr.msk.f32.gmra.mrb[120].mxu1 %vm587_vm2, %v3384_v35 }
 0x30a   : > { %6620 = vmatprep.mubr.msk.f32.mxu1 %vm7388_vm0, %v9669_v0 }
 0x30d   : > { %6621 = vmatmul.mubr.msk.f32.gmra.mrb[122].mxu1 %vm587_vm2, %v3386_v20 }
 0x30e   : > { %6623 = vmatprep.mubr.msk.f32.mxu1 %vm7388_vm0, %v9669_v0 }
 0x340   : > { %v6346_v14 = vpop.f32.mrb[42].mxu1 }
 0x341   : > { %v2097_v39 = vadd.f32 %v6346_v14, %v8619_v56  ;;  %v1984_v53 = vpop.f32.mrb[43].mxu1 }
 0x342   : > { %v8634_v12 = vadd.f32 %v8619_v56, %v1984_v53 }
 0x343   : > { %v2133_v13 = vmul.f32 0.01, %v2097_v39  ;;  %vm2115_vm15 = vcmp.gt.f32.partialorder %v2097_v39, 0.0 }
 0x344   : > { %v6349_v49 = vpop.f32.mrb[44].mxu1  ;;  %v8652_v44 = vmul.f32 0.01, %v8634_v12 }
 0x345   : > { %v2099_v46 = vadd.f32 %v6349_v49, %v8619_v56  ;;  %v1994_v30 = vpop.f32.mrb[45].mxu1  ;;  %v8639_v2 = vsel %vm2115_vm15, %v2097_v39, %v2133_v13 }
 0x346   : > { %v2098_v37 = vadd.f32 %v8619_v56, %v1994_v30  ;;  %v2192_v40 = vrot.slane %v8639_v2, 6 }
 0x347   : > { %vm2117_vm4 = vcmp.gt.f32.partialorder %v2099_v46, 0.0  ;;  %v2135_v23 = vmul.f32 0.01, %v2099_v46 }
 0x348   : > { %vm2116_vm5 = vcmp.gt.f32.partialorder %v2098_v37, 0.0  ;;  %v2134_v60 = vmul.f32 0.01, %v2098_v37  ;;  %v6352_v3 = vpop.f32.mrb[46].mxu1 }
 0x349   : > { %v8645_v54 = vsel %vm2117_vm4, %v2099_v46, %v2135_v23  ;;  %v2101_v51 = vadd.f32 %v6352_v3, %v8619_v56  ;;  %v2004_v18 = vpop.f32.mrb[47].mxu1  ;;  %vm2114_vm4 = vcmp.gt.f32.partialorder %v8634_v12, 0.0 }
 0x34a   : > { %v2195_v45 = vrot.slane %v8645_v54, 6  ;;  %v8655_v42 = vsel %vm2116_vm5, %v2098_v37, %v2134_v60  ;;  %v2100_v47 = vadd.f32 %v8619_v56, %v2004_v18  ;;  %v2555_v58 = vrot.slane %v8645_v54, 4 }
 0x34b   : > { %v2193_v48 = vrot.slane %v8655_v42, 6  ;;  %vm2119_vm7 = vcmp.gt.f32.partialorder %v2101_v51, 0.0  ;;  %v2137_v57 = vmul.f32 0.01, %v2101_v51 }
 0x34c   : > { %vm2118_vm8 = vcmp.gt.f32.partialorder %v2100_v47, 0.0  ;;  %v2136_v63 = vmul.f32 0.01, %v2100_v47  ;;  %v6355_v1 = vpop.f32.mrb[48].mxu1 }
 0x34d   : > { %v8665_v9 = vsel %vm2119_vm7, %v2101_v51, %v2137_v57  ;;  %v2103_v14 = vadd.f32 %v6355_v1, %v8619_v56  ;;  %v2014_v39 = vpop.f32.mrb[49].mxu1  ;;  %v2194_v53 = vsel %vm543_vm3, %v2192_v40, %v2193_v48  ;;  %v2196_v25 = vsel %vm543_vm3, %v2193_v48, %v2195_v45 }
 0x34e   : > { %v2199_v8 = vrot.slane %v8665_v9, 6  ;;  %v2558_v13 = vrot.slane %v8665_v9, 4  ;;  %v8672_v49 = vsel %vm2118_vm8, %v2100_v47, %v2136_v63  ;;  %v2102_v46 = vadd.f32 %v8619_v56, %v2014_v39  ;;  %6379 = vmatprep.mubr.msk.f32.mxu0 %vm1457_vm6, %v2194_v53 }
 0x34f   : > { %v2197_v30 = vrot.slane %v8672_v49, 6  ;;  %v2556_v31 = vrot.slane %v8672_v49, 4  ;;  %vm2121_vm9 = vcmp.gt.f32.partialorder %v2103_v14, 0.0  ;;  %v2139_v59 = vmul.f32 0.01, %v2103_v14  ;;  %6380 = vmatmul.mubr.msk.f32.vlgmr.msra.gmra.mrb[84].mxu0 %vm1457_vm6, %v2196_v25 }
 0x350   : > { %vm2120_vm10 = vcmp.gt.f32.partialorder %v2102_v46, 0.0  ;;  %v2138_v61 = vmul.f32 0.01, %v2102_v46  ;;  %6880 = vmatpush3.bf16.msra.mxu0 %v8427_v6  ;;  %v6358_v37 = vpop.f32.mrb[50].mxu1 }
 0x351   : > { %v8684_v23 = vsel %vm2121_vm9, %v2103_v14, %v2139_v59  ;;  %v2105_v60 = vadd.f32 %v6358_v37, %v8619_v56  ;;  %v2024_v3 = vpop.f32.mrb[51].mxu1  ;;  %v2198_v51 = vsel %vm543_vm3, %v2195_v45, %v2197_v30  ;;  %v2200_v18 = vsel %vm543_vm3, %v2197_v30, %v2199_v8  ;;  %6882 = vmatprep.subr.bf16.mxu0 %v8641_v41 }
 0x352   : > { %v2203_v6 = vrot.slane %v8684_v23, 6  ;;  %v2562_v35 = vrot.slane %v8684_v23, 4  ;;  %v8692_v47 = vsel %vm2120_vm10, %v2102_v46, %v2138_v61  ;;  %v2104_v55 = vadd.f32 %v8619_v56, %v2024_v3  ;;  %6382 = vmatprep.mubr.msk.f32.mxu0 %vm1457_vm6, %v2198_v51 }
 0x353   : > { %v2201_v40 = vrot.slane %v8692_v47, 6  ;;  %v2560_v45 = vrot.slane %v8692_v47, 4  ;;  %vm2123_vm11 = vcmp.gt.f32.partialorder %v2105_v60, 0.0  ;;  %v2141_v48 = vmul.f32 0.01, %v2105_v60  ;;  %6383 = vmatmul.mubr.msk.f32.gmra.mrb[86].mxu0 %vm1457_vm6, %v2200_v18 }
 0x354   : > { %vm2122_vm12 = vcmp.gt.f32.partialorder %v2104_v55, 0.0  ;;  %v2140_v57 = vmul.f32 0.01, %v2104_v55  ;;  %v6361_v63 = vpop.f32.mrb[52].mxu1  ;;  %6884 = vmatpush3.bf16.msra.mxu0 %v8641_v41  ;;  %v8704_v1 = vsel %vm630_vm1, %v2555_v58, %v2556_v31  ;;  %v8707_v14 = vsel %vm630_vm1, %v2556_v31, %v2558_v13 }
 0x355   : > { %v8709_v39 = vsel %vm2123_vm11, %v2105_v60, %v2141_v48  ;;  %v2107_v53 = vadd.f32 %v6361_v63, %v8619_v56  ;;  %v2034_v25 = vpop.f32.mrb[53].mxu1  ;;  %v2202_v46 = vsel %vm543_vm3, %v2199_v8, %v2201_v40  ;;  %v2204_v30 = vsel %vm543_vm3, %v2201_v40, %v2203_v6  ;;  %6886 = vmatprep.subr.bf16.mxu0 %v8648_v19 }
 0x356   : > { %v2207_v59 = vrot.slane %v8709_v39, 6  ;;  %v2566_v41 = vrot.slane %v8709_v39, 4  ;;  %v8717_v58 = vsel %vm2122_vm12, %v2104_v55, %v2140_v57  ;;  %v2106_v31 = vadd.f32 %v8619_v56, %v2034_v25  ;;  %6385 = vmatprep.mubr.msk.f32.mxu0 %vm1457_vm6, %v2202_v46 }
 0x357   : > { %v2205_v61 = vrot.slane %v8717_v58, 6  ;;  %v2564_v37 = vrot.slane %v8717_v58, 4  ;;  %vm2125_vm13 = vcmp.gt.f32.partialorder %v2107_v53, 0.0  ;;  %v2143_v8 = vmul.f32 0.01, %v2107_v53  ;;  %6386 = vmatmul.mubr.msk.f32.gmra.mrb[88].mxu0 %vm1457_vm6, %v2204_v30 }
 0x358   : > { %vm2124_vm14 = vcmp.gt.f32.partialorder %v2106_v31, 0.0  ;;  %v2142_v20 = vmul.f32 0.01, %v2106_v31  ;;  %v6364_v60 = vpop.f32.mrb[54].mxu1  ;;  %v8725_v3 = vsel %vm630_vm1, %v2558_v13, %v2560_v45  ;;  %v8728_v51 = vsel %vm630_vm1, %v2560_v45, %v2562_v35 }
 0x359   : > { %v8730_v18 = vsel %vm2125_vm13, %v2107_v53, %v2143_v8  ;;  %v2109_v55 = vadd.f32 %v6364_v60, %v8619_v56  ;;  %v2044_v40 = vpop.f32.mrb[55].mxu1  ;;  %v2206_v48 = vsel %vm543_vm3, %v2203_v6, %v2205_v61  ;;  %v2208_v57 = vsel %vm543_vm3, %v2205_v61, %v2207_v59 }
 0x35a   : > { %v2211_v63 = vrot.slane %v8730_v18, 6  ;;  %v2570_v25 = vrot.slane %v8730_v18, 4  ;;  %v8737_v46 = vsel %vm2124_vm14, %v2106_v31, %v2142_v20  ;;  %v2108_v13 = vadd.f32 %v8619_v56, %v2044_v40  ;;  %6388 = vmatprep.mubr.msk.f32.mxu0 %vm1457_vm6, %v2206_v48 }
 0x35b   : > { %v2209_v45 = vrot.slane %v8737_v46, 6  ;;  %v2568_v53 = vrot.slane %v8737_v46, 4  ;;  %vm2127_vm15 = vcmp.gt.f32.partialorder %v2109_v55, 0.0  ;;  %v2145_v30 = vmul.f32 0.01, %v2109_v55  ;;  %6389 = vmatmul.mubr.msk.f32.gmra.mrb[90].mxu0 %vm1457_vm6, %v2208_v57 }
 0x35c   : > { %vm2126_vm5 = vcmp.gt.f32.partialorder %v2108_v13, 0.0  ;;  %v2144_v6 = vmul.f32 0.01, %v2108_v13  ;;  %v6367_v61 = vpop.f32.mrb[56].mxu1  ;;  %v8746_v31 = vsel %vm630_vm1, %v2562_v35, %v2564_v37  ;;  %v8749_v8 = vsel %vm630_vm1, %v2564_v37, %v2566_v41 }
 0x35d   : > { %v8751_v20 = vsel %vm2127_vm15, %v2109_v55, %v2145_v30  ;;  %v2111_v60 = vadd.f32 %v6367_v61, %v8619_v56  ;;  %v2054_v40 = vpop.f32.mrb[57].mxu1  ;;  %v2210_v48 = vsel %vm543_vm3, %v2207_v59, %v2209_v45  ;;  %v2212_v57 = vsel %vm543_vm3, %v2209_v45, %v2211_v63 }
 0x35e   : > { %v2215_v0 = vrot.slane %v8751_v20, 6  ;;  %v2574_v4 = vrot.slane %v8751_v20, 4  ;;  %v8758_v26 = vsel %vm2126_vm5, %v2108_v13, %v2144_v6  ;;  %v2110_v35 = vadd.f32 %v8619_v56, %v2054_v40  ;;  %6391 = vmatprep.mubr.msk.f32.mxu0 %vm1457_vm6, %v2210_v48 }
 0x35f   : > { %v2213_v37 = vrot.slane %v8758_v26, 6  ;;  %v2572_v55 = vrot.slane %v8758_v26, 4  ;;  %vm2129_vm7 = vcmp.gt.f32.partialorder %v2111_v60, 0.0  ;;  %v2147_v30 = vmul.f32 0.01, %v2111_v60  ;;  %6392 = vmatmul.mubr.msk.f32.gmra.mrb[92].mxu0 %vm1457_vm6, %v2212_v57 }
 0x360   : > { %vm2128_vm8 = vcmp.gt.f32.partialorder %v2110_v35, 0.0  ;;  %v2146_v59 = vmul.f32 0.01, %v2110_v35  ;;  %v6370_v45 = vpop.f32.mrb[58].mxu1  ;;  %v8766_v61 = vsel %vm630_vm1, %v2566_v41, %v2568_v53  ;;  %v8769_v13 = vsel %vm630_vm1, %v2568_v53, %v2570_v25 }
 0x361   : > { %v2165_v6 = vsel %vm2129_vm7, %v2111_v60, %v2147_v30  ;;  %v2113_v40 = vadd.f32 %v6370_v45, %v8619_v56  ;;  %v2064_v48 = vpop.f32.mrb[59].mxu1  ;;  %v2214_v16 = vsel %vm543_vm3, %v2211_v63, %v2213_v37  ;;  %v2216_v15 = vsel %vm543_vm3, %v2213_v37, %v2215_v0 }
 0x362   : > { %v2219_v36 = vrot.slane %v2165_v6, 6  ;;  %v2578_v17 = vrot.slane %v2165_v6, 4  ;;  %v2164_v57 = vsel %vm2128_vm8, %v2110_v35, %v2146_v59  ;;  %v2112_v32 = vadd.f32 %v8619_v56, %v2064_v48  ;;  %6394 = vmatprep.mubr.msk.f32.mxu0 %vm1457_vm6, %v2214_v16  ;;  %v2552_v6 = vld [vmem:[#allocation6 + $0x58] sm:$0xff] }
 0x363   : > { %v2217_v41 = vrot.slane %v2164_v57, 6  ;;  %v2576_v50 = vrot.slane %v2164_v57, 4  ;;  %vm2131_vm9 = vcmp.gt.f32.partialorder %v2113_v40, 0.0  ;;  %v2149_v53 = vmul.f32 0.01, %v2113_v40  ;;  %6395 = vmatmul.mubr.msk.f32.gmra.mrb[94].mxu0 %vm1457_vm6, %v2216_v15  ;;  %v2551_v15 = vld [vmem:[#allocation6 + $0x50] sm:$0xff] }
 0x364   : > { %vm2130_vm10 = vcmp.gt.f32.partialorder %v2112_v32, 0.0  ;;  %v2148_v60 = vmul.f32 0.01, %v2112_v32  ;;  %v8778_v30 = vsel %vm630_vm1, %v2570_v25, %v2572_v55  ;;  %v8781_v63 = vsel %vm630_vm1, %v2572_v55, %v2574_v4 }
 0x365   : > { %v2167_v37 = vsel %vm2131_vm9, %v2113_v40, %v2149_v53  ;;  %v2218_v35 = vsel %vm543_vm3, %v2215_v0, %v2217_v41  ;;  %v2220_v56 = vsel %vm543_vm3, %v2217_v41, %v2219_v36  ;;  %v8786_v16 = vsel %vm630_vm1, %v2574_v4, %v2576_v50 }
 0x366   : > { %v2582_v59 = vrot.slane %v2167_v37, 4  ;;  %v2166_v45 = vsel %vm2130_vm10, %v2112_v32, %v2148_v60  ;;  %6397 = vmatprep.mubr.msk.f32.mxu0 %vm1457_vm6, %v2218_v35  ;;  %v8790_v25 = vsel %vm630_vm1, %v2576_v50, %v2578_v17  ;;  %v9697_v55 = vrot.slane %v8523_v29, 4 }
 0x367   : > { %v9698_v40 = vrot.slane %v8512_v62, 4  ;;  %v2580_v48 = vrot.slane %v2166_v45, 4  ;;  %6398 = vmatmul.mubr.msk.f32.gmra.mrb[96].mxu0 %vm1457_vm6, %v2220_v56  ;;  %v2150_v32 = vsel %vm2114_vm4, %v8634_v12, %v8652_v44  ;;  %v3389_v36 = vrot.slane %v8529_v33, 4  ;;  %v9701_v56 = vld [vmem:[#allocation17_spill] sm:$0xff] }
 0x368   : > { %6408 = vmatprep.mubr.msk.f32.mxu0 %vm1457_vm6, %v2150_v32  ;;  %v9699_v50 = vmov 0.0   ;;  %v3391_v4 = vrot.slane %v8537_v5, 4  ;;  %v6889_v57 = vpack.c.bf16 %v2552_v6, %v2551_v15  ;;  %v9700_v12 = vmov %v9697_v55  ;;  %v9703_v15 = vld [vmem:[#allocation19_spill] sm:$0xff] }
 0x369   : > { %v3388_v0 = vsel %vm630_vm1, %v9698_v40, %v9697_v55  ;;  %v8809_v41 = vsel %vm630_vm1, %v2578_v17, %v2580_v48  ;;  %v8812_v53 = vsel %vm630_vm1, %v2580_v48, %v2582_v59  ;;  %v3390_v44 = vsel %vm630_vm1, %v9700_v12, %v3389_v36  ;;  %v9702_v59 = vld [vmem:[#allocation18_spill] sm:$0xff]  ;;  %v9704_v55 = vld [vmem:[#allocation20_spill] sm:$0xff]  ;;  %v9705_v48 = vld [vmem:[#allocation21_spill] sm:$0xff] }
 0x36a   : > { %6624 = vmatmul.mubr.msk.f32.gmra.mrb[124].mxu1 %vm587_vm2, %v3388_v0  ;;  %v3392_v17 = vsel %vm630_vm1, %v3389_v36, %v3391_v4  ;;  %v3393_v60 = vrot.slane %v8545_v52, 4 }
 0x36b   : > { %6626 = vmatprep.mubr.msk.f32.mxu1 %vm7388_vm0, %v9699_v50  ;;  %6409 = vmatmul.mubr.msk.f32.vlgmr.msra.gmra.mrb[84].mxu0 %vm1457_vm6, %v8639_v2 }
 0x36c   : > { %6888 = vmatpush3.bf16.msra.mxu0 %v8648_v19  ;;  %6411 = vmatprep.mubr.msk.f32.mxu0 %vm1457_vm6, %v8655_v42  ;;  %v3394_v2 = vsel %vm630_vm1, %v3391_v4, %v3393_v60  ;;  %v3395_v19 = vrot.slane %v8553_v10, 4  ;;  %v3397_v42 = vrot.slane %v8561_v28, 4  ;;  %v9706_v4 = vld [vmem:[#allocation22_spill] sm:$0xff] }
 0x36d   : > { %6890 = vmatprep.subr.bf16.mxu0 %v6889_v57 }
 0x36e   : > { %6627 = vmatmul.mubr.msk.f32.gmra.mrb[126].mxu1 %vm587_vm2, %v3390_v44  ;;  %v3737_v44 = vld [vmem:[#allocation9 + $0x20] sm:$0xff] }
 0x36f   : > { %6629 = vmatprep.mubr.msk.f32.mxu1 %vm7388_vm0, %v9699_v50  ;;  %6412 = vmatmul.mubr.msk.f32.gmra.mrb[86].mxu0 %vm1457_vm6, %v8645_v54  ;;  %v3396_v54 = vsel %vm630_vm1, %v3393_v60, %v3395_v19 }
 0x370   : > { %6414 = vmatprep.mubr.msk.f32.mxu0 %vm1457_vm6, %v8672_v49  ;;  %6892 = vmatpush3.bf16.msra.mxu0 %v6889_v57  ;;  %v3399_v49 = vrot.slane %v8569_v27, 4 }
 0x371   : > { %6523 = vmatprep.subr.mxu0 %v9699_v50 }
 0x372   : > { %6630 = vmatmul.mubr.msk.f32.gmra.mrb[128].mxu1 %vm587_vm2, %v3392_v17  ;;  %v3738_v17 = vld [vmem:[#allocation9 + $0x28] sm:$0xff] }
 0x373   : > { %6632 = vmatprep.mubr.msk.f32.mxu1 %vm7388_vm0, %v9699_v50  ;;  %6415 = vmatmul.mubr.msk.f32.gmra.mrb[88].mxu0 %vm1457_vm6, %v8665_v9  ;;  %v3398_v9 = vsel %vm630_vm1, %v3395_v19, %v3397_v42  ;;  %v6893_v60 = vpack.c.bf16 %v3738_v17, %v3737_v44 }
 0x374   : > { %6417 = vmatprep.mubr.msk.f32.mxu0 %vm1457_vm6, %v8692_v47  ;;  %v3401_v47 = vrot.slane %v8577_v21, 4 }
 0x376   : > { %6633 = vmatmul.mubr.msk.f32.gmra.mrb[130].mxu1 %vm587_vm2, %v3394_v2  ;;  %v3402_v27 = vsel %vm630_vm1, %v3399_v49, %v3401_v47 }
 0x377   : > { %6635 = vmatprep.mubr.msk.f32.mxu1 %vm7388_vm0, %v9699_v50  ;;  %6418 = vmatmul.mubr.msk.f32.gmra.mrb[90].mxu0 %vm1457_vm6, %v8684_v23  ;;  %v3400_v23 = vsel %vm630_vm1, %v3397_v42, %v3399_v49 }
 0x378   : > { %6420 = vmatprep.mubr.msk.f32.mxu0 %vm1457_vm6, %v8717_v58  ;;  %v2859_v58 = vld [vmem:[%s8408_s11 + $0xb8] sm:$0xff] }
 0x37a   : > { %6636 = vmatmul.mubr.msk.f32.gmra.mrb[132].mxu1 %vm587_vm2, %v3396_v54 }
 0x37b   : > { %6638 = vmatprep.mubr.msk.f32.mxu1 %vm7388_vm0, %v9699_v50  ;;  %6421 = vmatmul.mubr.msk.f32.gmra.mrb[92].mxu0 %vm1457_vm6, %v8709_v39  ;;  %v3403_v39 = vrot.slane %v2859_v58, 4 }
 0x37c   : > { %6423 = vmatprep.mubr.msk.f32.mxu0 %vm1457_vm6, %v8737_v46  ;;  %v2860_v46 = vld [vmem:[%s8408_s11 + $0xc0] sm:$0xf] }
 0x37d   : > { %v3404_v21 = vsel %vm630_vm1, %v3401_v47, %v3403_v39 }
 0x37e   : > { %6639 = vmatmul.mubr.msk.f32.gmra.mrb[134].mxu1 %vm587_vm2, %v3398_v9 }
 0x37f   : > { %6641 = vmatprep.mubr.msk.f32.mxu1 %vm7388_vm0, %v9699_v50  ;;  %6424 = vmatmul.mubr.msk.f32.gmra.mrb[94].mxu0 %vm1457_vm6, %v8730_v18  ;;  %v2861_v18 = vld [vmem:[#allocation7] sm:$0xf] }
 0x380   : > { %6426 = vmatprep.mubr.msk.f32.mxu0 %vm1457_vm6, %v8758_v26  ;;  %v3405_v26 = vrot.slane %v2860_v46, 4 }
 0x382   : > { %6642 = vmatmul.mubr.msk.f32.gmra.mrb[136].mxu1 %vm587_vm2, %v3400_v23 }
 0x383   : > { %6644 = vmatprep.mubr.msk.f32.mxu1 %vm7388_vm0, %v9699_v50  ;;  %6427 = vmatmul.mubr.msk.f32.gmra.mrb[96].mxu0 %vm1457_vm6, %v8751_v20 }
 0x384   : > { %6437 = vmatprep.mubr.msk.f32.mxu0 %vm1457_vm6, %v8704_v1  ;;  %v3406_v1 = vsel %vm630_vm1, %v3403_v39, %v3405_v26 }
 0x386   : > { %6645 = vmatmul.mubr.msk.f32.gmra.mrb[138].mxu1 %vm587_vm2, %v3402_v27 }
 0x387   : > { %6647 = vmatprep.mubr.msk.f32.mxu1 %vm7388_vm0, %v9699_v50  ;;  %6438 = vmatmul.mubr.msk.f32.vlgmr.msra.gmra.mrb[84].mxu0 %vm1457_vm6, %v8707_v14  ;;  %v2836_v14 = vld [vmem:[%s8408_s11] sm:$0xff] }
 0x388   : > { %6524 = vmatpush3.msk.msra.mxu0 %vm630_vm1, %v2861_v18  ;;  %6440 = vmatprep.mubr.msk.f32.mxu0 %vm1457_vm6, %v8725_v3  ;;  %v8918_v3 = vpop.f32.mrb[60].mxu1  ;;  %v3739_v18 = vld [vmem:[#allocation9 + $0x30] sm:$0xff] }
 0x389   : > { %6894 = vmatprep.subr.bf16.mxu0 %v6893_v60 }
 0x38a   : > { %6648 = vmatmul.mubr.msk.f32.gmra.mrb[140].mxu1 %vm587_vm2, %v3404_v21 }
 0x38b   : > { %6650 = vmatprep.mubr.msk.f32.mxu1 %vm7388_vm0, %v9699_v50  ;;  %6441 = vmatmul.mubr.msk.f32.gmra.mrb[86].mxu0 %vm1457_vm6, %v8728_v51  ;;  %v6462_v51 = vpop.f32.mrb[61].mxu1 }
 0x38c   : > { %6443 = vmatprep.mubr.msk.f32.mxu0 %vm1457_vm6, %v8746_v31  ;;  %v8924_v31 = vpop.f32.mrb[62].mxu1 }
 0x38e   : > { %6651 = vmatmul.mubr.msk.f32.gmra.mrb[142].mxu1 %vm587_vm2, %v3406_v1 }
 0x38f   : > { %6444 = vmatmul.mubr.msk.f32.gmra.mrb[88].mxu0 %vm1457_vm6, %v8749_v8  ;;  %v6465_v8 = vpop.f32.mrb[63].mxu1 }
 0x390   : > { %6446 = vmatprep.mubr.msk.f32.mxu0 %vm1457_vm6, %v8766_v61  ;;  %v8932_v20 = vpop.f32.mrb[64].mxu1 }
 0x391   : > { %v6468_v61 = vpop.f32.mrb[65].mxu1 }
 0x393   : > { %6447 = vmatmul.mubr.msk.f32.gmra.mrb[90].mxu0 %vm1457_vm6, %v8769_v13 }
 0x394   : > { %6449 = vmatprep.mubr.msk.f32.mxu0 %vm1457_vm6, %v8778_v30 }
 0x397   : > { %6450 = vmatmul.mubr.msk.f32.gmra.mrb[92].mxu0 %vm1457_vm6, %v8781_v63 }
 0x398   : > { %6452 = vmatprep.mubr.msk.f32.mxu0 %vm1457_vm6, %v8786_v16 }
 0x39b   : > { %6453 = vmatmul.mubr.msk.f32.gmra.mrb[94].mxu0 %vm1457_vm6, %v8790_v25 }
 0x39c   : > { %6455 = vmatprep.mubr.msk.f32.mxu0 %vm1457_vm6, %v8809_v41 }
 0x39f   : > { %6456 = vmatmul.mubr.msk.f32.gmra.mrb[96].mxu0 %vm1457_vm6, %v8812_v53 }
 0x3a0   : > { %6525 = vmatprep.mubr.msk.f32.mxu0 %vm7388_vm0, %v9699_v50 }
 0x3a3   : > { %6526 = vmatmul.mubr.msk.f32.vlgmr.msra.gmra.mrb[98].mxu0 %vm587_vm2, %v2836_v14 }
 0x3a4   : > { %6528 = vmatprep.mubr.msk.f32.mxu0 %vm7388_vm0, %v9699_v50  ;;  %6896 = vmatpush3.bf16.msra.mxu0 %v6893_v60 }
 0x3a7   : > { %6529 = vmatmul.mubr.msk.f32.gmra.mrb[100].mxu0 %vm587_vm2, %v8411_v22  ;;  %v8938_v22 = vpop.f32.mrb[66].mxu1 }
 0x3a8   : > { %6531 = vmatprep.mubr.msk.f32.mxu0 %vm7388_vm0, %v9699_v50  ;;  %v6471_v13 = vpop.f32.mrb[67].mxu1 }
 0x3ab   : > { %6532 = vmatmul.mubr.msk.f32.gmra.mrb[102].mxu0 %vm587_vm2, %v8414_v34  ;;  %v8944_v34 = vpop.f32.mrb[68].mxu1 }
 0x3ac   : > { %6534 = vmatprep.mubr.msk.f32.mxu0 %vm7388_vm0, %v9699_v50  ;;  %v6474_v30 = vpop.f32.mrb[69].mxu1 }
 0x3af   : > { %6535 = vmatmul.mubr.msk.f32.gmra.mrb[104].mxu0 %vm587_vm2, %v8421_v24  ;;  %v8950_v24 = vpop.f32.mrb[70].mxu1 }
 0x3b0   : > { %6537 = vmatprep.mubr.msk.f32.mxu0 %vm7388_vm0, %v9699_v50  ;;  %v6477_v63 = vpop.f32.mrb[71].mxu1 }
 0x3b3   : > { %6538 = vmatmul.mubr.msk.f32.gmra.mrb[106].mxu0 %vm587_vm2, %v8431_v7  ;;  %v8956_v7 = vpop.f32.mrb[72].mxu1 }
 0x3b4   : > { %6540 = vmatprep.mubr.msk.f32.mxu0 %vm7388_vm0, %v9699_v50  ;;  %v6480_v37 = vpop.f32.mrb[73].mxu1 }
 0x3b7   : > { %6541 = vmatmul.mubr.msk.f32.gmra.mrb[108].mxu0 %vm587_vm2, %v8440_v38  ;;  %v8962_v38 = vpop.f32.mrb[74].mxu1 }
 0x3b8   : > { %6543 = vmatprep.mubr.msk.f32.mxu0 %vm7388_vm0, %v9699_v50  ;;  %v6483_v35 = vpop.f32.mrb[75].mxu1 }
 0x3bb   : > { %6544 = vmatmul.mubr.msk.f32.gmra.mrb[110].mxu0 %vm587_vm2, %v8448_v43  ;;  %v8968_v43 = vpop.f32.mrb[76].mxu1 }
 0x3bc   : > { %6546 = vmatprep.mubr.msk.f32.mxu0 %vm7388_vm0, %v9699_v50  ;;  %v6486_v16 = vpop.f32.mrb[77].mxu1 }
 0x3bf   : > { %6547 = vmatmul.mubr.msk.f32.gmra.mrb[112].mxu0 %vm587_vm2, %v8456_v11  ;;  %v8974_v11 = vpop.f32.mrb[78].mxu1 }
 0x3c0   : > { %6549 = vmatprep.mubr.msk.f32.mxu0 %vm7388_vm0, %v9699_v50  ;;  %v6489_v45 = vpop.f32.mrb[79].mxu1 }
 0x3c1   : > { %v8980_v6 = vpop.f32.mrb[80].mxu1 }
 0x3c2   : > { %v6492_v25 = vpop.f32.mrb[81].mxu1 }
 0x3c3   : > { %6550 = vmatmul.mubr.msk.f32.gmra.mrb[114].mxu0 %vm587_vm2, %v9701_v56  ;;  %v8986_v40 = vpop.f32.mrb[82].mxu1  ;;  %v3733_v25 = vld [vmem:[#allocation9 + $0x8] sm:$0xff] }
 0x3c4   : > { %6552 = vmatprep.mubr.msk.f32.mxu0 %vm7388_vm0, %v9699_v50  ;;  %v6495_v0 = vpop.f32.mrb[83].mxu1 }
 0x3c5   : > { %v8992_v32 = vpop.f32.mrb[84].mxu1 }
 0x3c6   : > { %v6498_v36 = vpop.f32.mrb[85].mxu1 }
 0x3c7   : > { %6553 = vmatmul.mubr.msk.f32.gmra.mrb[116].mxu0 %vm587_vm2, %v9702_v59  ;;  %v8998_v57 = vpop.f32.mrb[86].mxu1 }
 0x3c8   : > { %6555 = vmatprep.mubr.msk.f32.mxu0 %vm7388_vm0, %v9699_v50  ;;  %v6501_v41 = vpop.f32.mrb[87].mxu1 }
 0x3c9   : > { %v9004_v53 = vpop.f32.mrb[88].mxu1 }
 0x3ca   : > { %v6504_v12 = vpop.f32.mrb[89].mxu1 }
 0x3cb   : > { %6556 = vmatmul.mubr.msk.f32.gmra.mrb[118].mxu0 %vm587_vm2, %v9703_v15  ;;  %v9010_v2 = vpop.f32.mrb[90].mxu1  ;;  %v3732_v15 = vld [vmem:[#allocation9] sm:$0xff] }
 0x3cc   : > { %6558 = vmatprep.mubr.msk.f32.mxu0 %vm7388_vm0, %v9699_v50 }
 0x3cf   : > { %6559 = vmatmul.mubr.msk.f32.gmra.mrb[120].mxu0 %vm587_vm2, %v9704_v55  ;;  %v9062_v55 = vpack.c.bf16 %v3733_v25, %v3732_v15 }
 0x3d0   : > { %6561 = vmatprep.mubr.msk.f32.mxu0 %vm7388_vm0, %v9699_v50 }
 0x3d3   : > { %6562 = vmatmul.mubr.msk.f32.gmra.mrb[122].mxu0 %vm587_vm2, %v9705_v48 }
 0x3d4   : > { %6564 = vmatprep.mubr.msk.f32.mxu0 %vm7388_vm0, %v9699_v50 }
 0x3d7   : > { %6565 = vmatmul.mubr.msk.f32.gmra.mrb[124].mxu0 %vm587_vm2, %v9706_v4 }
 0x3d8   : > { %6567 = vmatprep.mubr.msk.f32.mxu0 %vm7388_vm0, %v9699_v50 }
 0x3db   : > { %6568 = vmatmul.mubr.msk.f32.gmra.mrb[126].mxu0 %vm587_vm2, %v8512_v62  ;;  %v6507_v62 = vpop.f32.mrb[91].mxu1 }
 0x3dc   : > { %6570 = vmatprep.mubr.msk.f32.mxu0 %vm7388_vm0, %v9699_v50  ;;  %v9016_v19 = vpop.f32.mrb[92].mxu1 }
 0x3df   : > { %6571 = vmatmul.mubr.msk.f32.gmra.mrb[128].mxu0 %vm587_vm2, %v8523_v29  ;;  %v6510_v29 = vpop.f32.mrb[93].mxu1 }
 0x3e0   : > { %6573 = vmatprep.mubr.msk.f32.mxu0 %vm7388_vm0, %v9699_v50  ;;  %v9022_v54 = vpop.f32.mrb[94].mxu1 }
 0x3e3   : > { %6574 = vmatmul.mubr.msk.f32.gmra.mrb[130].mxu0 %vm587_vm2, %v8529_v33  ;;  %v6513_v33 = vpop.f32.mrb[95].mxu1 }
 0x3e4   : > { %6576 = vmatprep.mubr.msk.f32.mxu0 %vm7388_vm0, %v9699_v50  ;;  %v9028_v42 = vpop.f32.mrb[96].mxu1 }
 0x3e5   : > { %v6516_v9 = vpop.f32.mrb[97].mxu1 }
 0x3e7   : > { %6577 = vmatmul.mubr.msk.f32.gmra.mrb[132].mxu0 %vm587_vm2, %v8537_v5  ;;  %v9034_v5 = vpop.f32.mrb[98].mxu1 }
 0x3e8   : > { %6579 = vmatprep.mubr.msk.f32.mxu0 %vm7388_vm0, %v9699_v50  ;;  %v6519_v49 = vpop.f32.mrb[99].mxu1 }
 0x3eb   : > { %6580 = vmatmul.mubr.msk.f32.gmra.mrb[134].mxu0 %vm587_vm2, %v8545_v52  ;;  %v9038_v52 = vpop.f32.mrb[100].mxu1 }
 0x3ec   : > { %6582 = vmatprep.mubr.msk.f32.mxu0 %vm7388_vm0, %v9699_v50  ;;  %v6522_v23 = vpop.f32.mrb[101].mxu1 }
 0x3ed   : > { %v9040_v47 = vpop.f32.mrb[102].mxu1 }
 0x3ee   : > { %v6592_v58 = vpop.f32.mrb[103].mxu1 }
 0x3ef   : > { %6583 = vmatmul.mubr.msk.f32.gmra.mrb[136].mxu0 %vm587_vm2, %v8553_v10  ;;  %v9042_v27 = vpop.f32.mrb[104].mxu1 }
 0x3f0   : > { %6585 = vmatprep.mubr.msk.f32.mxu0 %vm7388_vm0, %v9699_v50  ;;  %v6595_v39 = vpop.f32.mrb[105].mxu1 }
 0x3f1   : > { %v9044_v10 = vpop.f32.mrb[106].mxu1  ;;  %v9081_v39 = vld [vmem:[#allocation12 + $0x2] ss:$0 sm:$0xff] }
 0x3f2   : > { %v6598_v46 = vpop.f32.mrb[107].mxu1 }
 0x3f3   : > { %6586 = vmatmul.mubr.msk.f32.gmra.mrb[138].mxu0 %vm587_vm2, %v8561_v28  ;;  %v9046_v21 = vpop.f32.mrb[108].mxu1  ;;  %v3740_v28 = vld [vmem:[#allocation9 + $0x38] sm:$0xff] }
 0x3f4   : > { %v6601_v50 = vpop.f32.mrb[109].mxu1  ;;  %v6897_v14 = vpack.c.bf16 %v3740_v28, %v3739_v18 }
 0x3f5   : > { %v9048_v26 = vpop.f32.mrb[110].mxu1 }
 0x3f6   : > { %v6604_v1 = vpop.f32.mrb[111].mxu1  ;;  %6898 = vmatprep.subr.bf16.mxu0 %v6897_v14 }
 0x3f7   : > { %v9050_v51 = vpop.f32.mrb[112].mxu1  ;;  %6900 = vmatpush3.bf16.msra.mxu0 %v6897_v14 }
 0x3f8   : > { %v6607_v8 = vpop.f32.mrb[113].mxu1  ;;  %6902 = vmatprep.subr.bf16.mxu0 %v9062_v55 }
 0x3f9   : > { %v9052_v61 = vpop.f32.mrb[114].mxu1 }
 0x3fa   : > { %v6610_v13 = vpop.f32.mrb[115].mxu1 }
 0x3fb   : > { %v9054_v30 = vpop.f32.mrb[116].mxu1 }
 0x3fc   : > { %v6613_v63 = vpop.f32.mrb[117].mxu1 }
 0x3fd   : > { %v9056_v37 = vpop.f32.mrb[118].mxu1 }
 0x3fe   : > { %v6616_v35 = vpop.f32.mrb[119].mxu1 }
 0x3ff   : > { %v9058_v56 = vpop.f32.mrb[120].mxu1 }
 0x400   : > { %v6619_v16 = vpop.f32.mrb[121].mxu1 }
 0x401   : > { %v9060_v59 = vpop.f32.mrb[122].mxu1 }
 0x402   : > { %v6622_v45 = vpop.f32.mrb[123].mxu1 }
 0x43d   : > { %v9065_v0 = vpop.f32.mrb[124].mxu1 }
 0x43e   : > { %v6625_v48 = vpop.f32.mrb[125].mxu1 }
 0x441   : > { %v9067_v36 = vpop.f32.mrb[126].mxu1 }
 0x442   : > { %v6628_v4 = vpop.f32.mrb[127].mxu1 }
 0x445   : > { %v9069_v41 = vpop.f32.mrb[128].mxu1 }
 0x446   : > { %v6631_v12 = vpop.f32.mrb[129].mxu1 }
 0x449   : > { %v9071_v44 = vpop.f32.mrb[130].mxu1 }
 0x44a   : > { %v6634_v17 = vpop.f32.mrb[131].mxu1 }
 0x44d   : > { %v9073_v60 = vpop.f32.mrb[132].mxu1 }
 0x44e   : > { %v6637_v62 = vpop.f32.mrb[133].mxu1 }
 0x451   : > { %v9075_v29 = vpop.f32.mrb[134].mxu1 }
 0x452   : > { %v6640_v33 = vpop.f32.mrb[135].mxu1 }
 0x455   : > { %v9077_v9 = vpop.f32.mrb[136].mxu1 }
 0x456   : > { %v6643_v49 = vpop.f32.mrb[137].mxu1 }
 0x459   : > { %v9079_v23 = vpop.f32.mrb[138].mxu1 }
 0x45a   : > { %v6646_v58 = vpop.f32.mrb[139].mxu1  ;;  %v6439_v46 = vpop.f32.mrb[84].mxu0 }
 0x45b   : > { %v2767_v18 = vadd.f32 %v6439_v46, %v9081_v39  ;;  %v2678_v28 = vpop.f32.mrb[85].mxu0 }
 0x45c   : > { %v2766_v14 = vadd.f32 %v9081_v39, %v2678_v28 }
 0x45d   : > { %v9084_v50 = vpop.f32.mrb[140].mxu1  ;;  %vm2781_vm0 = vcmp.gt.f32.partialorder %v2767_v18, 0.0  ;;  %v2795_v8 = vmul.f32 0.01, %v2767_v18 }
 0x45e   : > { %v6649_v1 = vpop.f32.mrb[141].mxu1  ;;  %vm2780_vm2 = vcmp.gt.f32.partialorder %v2766_v14, 0.0  ;;  %v2794_v13 = vmul.f32 0.01, %v2766_v14  ;;  %v6442_v63 = vpop.f32.mrb[86].mxu0 }
 0x45f   : > { %v2809_v16 = vsel %vm2781_vm0, %v2767_v18, %v2795_v8  ;;  %v2769_v45 = vadd.f32 %v6442_v63, %v9081_v39  ;;  %v2688_v15 = vpop.f32.mrb[87].mxu0 }
 0x460   : > { %2823 = vst.msk [vmem:[%s9093_s20 + $0x8] sm:$0xff] %vm1457_vm6, %v2809_v16  ;;  %v2808_v48 = vsel %vm2780_vm2, %v2766_v14, %v2794_v13  ;;  %v2768_v4 = vadd.f32 %v9081_v39, %v2688_v15 }
 0x461   : > { %v9095_v35 = vpop.f32.mrb[142].mxu1  ;;  %2822 = vst.msk [vmem:[%s9093_s20] sm:$0xff] %vm1457_vm6, %v2808_v48  ;;  %vm2783_vm11 = vcmp.gt.f32.partialorder %v2769_v45, 0.0  ;;  %v2797_v12 = vmul.f32 0.01, %v2769_v45 }
 0x462   : > { %v6652_v25 = vpop.f32.mrb[143].mxu1  ;;  %vm2782_vm12 = vcmp.gt.f32.partialorder %v2768_v4, 0.0  ;;  %v2796_v17 = vmul.f32 0.01, %v2768_v4  ;;  %v6445_v62 = vpop.f32.mrb[88].mxu0 }
 0x463   : > { %v2811_v33 = vsel %vm2783_vm11, %v2769_v45, %v2797_v12  ;;  %v2771_v49 = vadd.f32 %v6445_v62, %v9081_v39  ;;  %v2698_v58 = vpop.f32.mrb[89].mxu0 }
 0x464   : > { %2825 = vst.msk [vmem:[%s9093_s20 + $0x18] sm:$0xff] %vm1457_vm6, %v2811_v33  ;;  %v2810_v46 = vsel %vm2782_vm12, %v2768_v4, %v2796_v17  ;;  %v2770_v18 = vadd.f32 %v9081_v39, %v2698_v58 }
 0x465   : > { %2824 = vst.msk [vmem:[%s9093_s20 + $0x10] sm:$0xff] %vm1457_vm6, %v2810_v46  ;;  %vm2785_vm13 = vcmp.gt.f32.partialorder %v2771_v49, 0.0  ;;  %v2799_v28 = vmul.f32 0.01, %v2771_v49 }
 0x466   : > { %vm2784_vm14 = vcmp.gt.f32.partialorder %v2770_v18, 0.0  ;;  %v2798_v1 = vmul.f32 0.01, %v2770_v18  ;;  %v6448_v14 = vpop.f32.mrb[90].mxu0 }
 0x467   : > { %v2813_v8 = vsel %vm2785_vm13, %v2771_v49, %v2799_v28  ;;  %v2773_v13 = vadd.f32 %v6448_v14, %v9081_v39  ;;  %v2708_v63 = vpop.f32.mrb[91].mxu0 }
 0x468   : > { %2827 = vst.msk [vmem:[%s9093_s20 + $0x28] sm:$0xff] %vm1457_vm6, %v2813_v8  ;;  %v2812_v16 = vsel %vm2784_vm14, %v2770_v18, %v2798_v1  ;;  %v2772_v45 = vadd.f32 %v9081_v39, %v2708_v63 }
 0x469   : > { %2826 = vst.msk [vmem:[%s9093_s20 + $0x20] sm:$0xff] %vm1457_vm6, %v2812_v16  ;;  %vm2787_vm15 = vcmp.gt.f32.partialorder %v2773_v13, 0.0  ;;  %v2801_v15 = vmul.f32 0.01, %v2773_v13 }
 0x46a   : > { %vm2786_vm4 = vcmp.gt.f32.partialorder %v2772_v45, 0.0  ;;  %v2800_v25 = vmul.f32 0.01, %v2772_v45  ;;  %v6451_v48 = vpop.f32.mrb[92].mxu0 }
 0x46b   : > { %v2815_v4 = vsel %vm2787_vm15, %v2773_v13, %v2801_v15  ;;  %v2775_v12 = vadd.f32 %v6451_v48, %v9081_v39  ;;  %v2718_v17 = vpop.f32.mrb[93].mxu0 }
 0x46c   : > { %2829 = vst.msk [vmem:[%s9093_s20 + $0x38] sm:$0xff] %vm1457_vm6, %v2815_v4  ;;  %v2814_v62 = vsel %vm2786_vm4, %v2772_v45, %v2800_v25  ;;  %v2774_v33 = vadd.f32 %v9081_v39, %v2718_v17 }
 0x46d   : > { %2828 = vst.msk [vmem:[%s9093_s20 + $0x30] sm:$0xff] %vm1457_vm6, %v2814_v62  ;;  %vm2789_vm5 = vcmp.gt.f32.partialorder %v2775_v12, 0.0  ;;  %v2803_v49 = vmul.f32 0.01, %v2775_v12 }
 0x46e   : > { %vm2788_vm7 = vcmp.gt.f32.partialorder %v2774_v33, 0.0  ;;  %v2802_v58 = vmul.f32 0.01, %v2774_v33  ;;  %v6454_v46 = vpop.f32.mrb[94].mxu0 }
 0x46f   : > { %v2817_v18 = vsel %vm2789_vm5, %v2775_v12, %v2803_v49  ;;  %v2777_v28 = vadd.f32 %v6454_v46, %v9081_v39  ;;  %v2728_v1 = vpop.f32.mrb[95].mxu0 }
 0x470   : > { %2831 = vst.msk [vmem:[%s9093_s20 + $0x48] sm:$0xff] %vm1457_vm6, %v2817_v18  ;;  %v2816_v14 = vsel %vm2788_vm7, %v2774_v33, %v2802_v58  ;;  %v2776_v8 = vadd.f32 %v9081_v39, %v2728_v1 }
 0x471   : > { %2830 = vst.msk [vmem:[%s9093_s20 + $0x40] sm:$0xff] %vm1457_vm6, %v2816_v14  ;;  %vm2791_vm8 = vcmp.gt.f32.partialorder %v2777_v28, 0.0  ;;  %v2805_v13 = vmul.f32 0.01, %v2777_v28 }
 0x472   : > { %vm2790_vm9 = vcmp.gt.f32.partialorder %v2776_v8, 0.0  ;;  %v2804_v63 = vmul.f32 0.01, %v2776_v8  ;;  %v6457_v16 = vpop.f32.mrb[96].mxu0 }
 0x473   : > { %v2819_v45 = vsel %vm2791_vm8, %v2777_v28, %v2805_v13  ;;  %v2779_v15 = vadd.f32 %v6457_v16, %v9081_v39  ;;  %v2738_v25 = vpop.f32.mrb[97].mxu0 }
 0x474   : > { %2833 = vst.msk [vmem:[%s9093_s20 + $0x58] sm:$0xff] %vm1457_vm6, %v2819_v45  ;;  %v2818_v48 = vsel %vm2790_vm9, %v2776_v8, %v2804_v63  ;;  %v2778_v4 = vadd.f32 %v9081_v39, %v2738_v25  ;;  %v9143_v8 = vld [vmem:[#allocation12 + $0x3] ss:$0 sm:$0xff] }
 0x475   : > { %2832 = vst.msk [vmem:[%s9093_s20 + $0x50] sm:$0xff] %vm1457_vm6, %v2818_v48  ;;  %vm2793_vm10 = vcmp.gt.f32.partialorder %v2779_v15, 0.0  ;;  %v2807_v12 = vmul.f32 0.01, %v2779_v15 }
 0x476   : > { %vm2792_vm0 = vcmp.gt.f32.partialorder %v2778_v4, 0.0  ;;  %v2806_v17 = vmul.f32 0.01, %v2778_v4  ;;  %v3256_v62 = vpop.f32.mrb[98].mxu0 }
 0x477   : > { %v2821_v33 = vsel %vm2793_vm10, %v2779_v15, %v2807_v12  ;;  %v3257_v49 = vadd.f32 %v3256_v62, %v8918_v3  ;;  %v6527_v58 = vpop.f32.mrb[99].mxu0 }
 0x478   : > { %2835 = vst.msk [vmem:[%s9093_s20 + $0x68] sm:$0xff] %vm1457_vm6, %v2821_v33  ;;  %v2820_v46 = vsel %vm2792_vm0, %v2778_v4, %v2806_v17 }
 0x479   : > { %2834 = vst.msk [vmem:[%s9093_s20 + $0x60] sm:$0xff] %vm1457_vm6, %v2820_v46  ;;  %v9139_v18 = vadd.f32 %v9040_v47, %v3257_v49 }
 0x47a   : > { %v3261_v39 = vpop.f32.mrb[100].mxu0 }
 0x47b   : > { %v3262_v28 = vadd.f32 %v3261_v39, %v8924_v31  ;;  %v6530_v1 = vpop.f32.mrb[101].mxu0 }
 0x47c   : > { %v3735_v1 = vld [vmem:[#allocation9 + $0x18] sm:$0xff] }
 0x47d   : > { %v3623_v14 = vadd.f32 %v9042_v27, %v3262_v28 }
 0x47e   : > { %v3266_v13 = vpop.f32.mrb[102].mxu0 }
 0x47f   : > { %v3649_v3 = vadd.f32 %v9143_v8, %v3623_v14  ;;  %v3267_v63 = vadd.f32 %v3266_v13, %v8932_v20  ;;  %v6533_v16 = vpop.f32.mrb[103].mxu0 }
 0x481   : > { %v3691_v45 = vmul.f32 0.01, %v3649_v3  ;;  %v3624_v15 = vadd.f32 %v9044_v10, %v3267_v63  ;;  %vm3670_vm2 = vcmp.gt.f32.partialorder %v3649_v3, 0.0 }
 0x482   : > { %v3271_v47 = vpop.f32.mrb[104].mxu0 }
 0x483   : > { %v3650_v25 = vadd.f32 %v9143_v8, %v3624_v15  ;;  %v3272_v31 = vadd.f32 %v3271_v47, %v8938_v22  ;;  %v6536_v48 = vpop.f32.mrb[105].mxu0  ;;  %v9150_v4 = vsel %vm3670_vm2, %v3649_v3, %v3691_v45 }
 0x484   : > { %v3760_v49 = vrot.slane %v9150_v4, 6 }
 0x485   : > { %vm3671_vm11 = vcmp.gt.f32.partialorder %v3650_v25, 0.0  ;;  %v3692_v27 = vmul.f32 0.01, %v3650_v25  ;;  %v3625_v12 = vadd.f32 %v9046_v21, %v3272_v31  ;;  %v3734_v21 = vld [vmem:[#allocation9 + $0x10] sm:$0xff]  ;;  %v4182_v31 = vld [vmem:[#allocation9 + $0x48] sm:$0xff] }
 0x486   : > { %v3276_v17 = vpop.f32.mrb[106].mxu0  ;;  %v6905_v45 = vpack.c.bf16 %v3735_v1, %v3734_v21 }
 0x487   : > { %v9153_v62 = vsel %vm3671_vm11, %v3650_v25, %v3692_v27  ;;  %v3651_v20 = vadd.f32 %v9143_v8, %v3625_v12  ;;  %v3277_v10 = vadd.f32 %v3276_v17, %v8944_v34  ;;  %v6539_v33 = vpop.f32.mrb[107].mxu0  ;;  %v4181_v25 = vld [vmem:[#allocation9 + $0x40] sm:$0xff] }
 0x488   : > { %v3761_v58 = vrot.slane %v9153_v62, 6 }
 0x489   : > { %vm3672_vm12 = vcmp.gt.f32.partialorder %v3651_v20, 0.0  ;;  %v3693_v22 = vmul.f32 0.01, %v3651_v20  ;;  %v3626_v46 = vadd.f32 %v9048_v26, %v3277_v10  ;;  %v9177_v10 = vpack.c.bf16 %v4182_v31, %v4181_v25 }
 0x48a   : > { %v3281_v39 = vpop.f32.mrb[108].mxu0  ;;  %v3762_v28 = vsel %vm543_vm3, %v3760_v49, %v3761_v58 }
 0x48b   : > { %v9161_v14 = vsel %vm3672_vm12, %v3651_v20, %v3693_v22  ;;  %v3652_v13 = vadd.f32 %v9143_v8, %v3626_v46  ;;  %v3282_v34 = vadd.f32 %v3281_v39, %v8950_v24  ;;  %v6542_v3 = vpop.f32.mrb[109].mxu0  ;;  %6661 = vmatprep.mubr.msk.f32.mxu0 %vm1457_vm6, %v3762_v28 }
 0x48c   : > { %v3763_v63 = vrot.slane %v9161_v14, 6  ;;  %v4512_v3 = vld [vmem:[#allocation10 + $0x20] sm:$0xff] }
 0x48d   : > { %vm3673_vm13 = vcmp.gt.f32.partialorder %v3652_v13, 0.0  ;;  %v3694_v16 = vmul.f32 0.01, %v3652_v13  ;;  %v3627_v26 = vadd.f32 %v9050_v51, %v3282_v34 }
 0x48e   : > { %v3286_v15 = vpop.f32.mrb[110].mxu0  ;;  %v3764_v47 = vsel %vm543_vm3, %v3761_v58, %v3763_v63 }
 0x48f   : > { %v9169_v48 = vsel %vm3673_vm13, %v3652_v13, %v3694_v16  ;;  %v3653_v27 = vadd.f32 %v9143_v8, %v3627_v26  ;;  %v3287_v24 = vadd.f32 %v3286_v15, %v8956_v7  ;;  %v6545_v12 = vpop.f32.mrb[111].mxu0  ;;  %6662 = vmatmul.mubr.msk.f32.vlgmr.msra.gmra.mrb[140].mxu0 %vm1457_vm6, %v3764_v47  ;;  %v4514_v16 = vld [vmem:[#allocation10 + $0x30] sm:$0xff] }
 0x490   : > { %v3765_v17 = vrot.slane %v9169_v48, 6  ;;  %6904 = vmatpush3.bf16.msra.mxu0 %v9062_v55 }
 0x491   : > { %vm3674_vm14 = vcmp.gt.f32.partialorder %v3653_v27, 0.0  ;;  %v3695_v51 = vmul.f32 0.01, %v3653_v27  ;;  %v3628_v20 = vadd.f32 %v9052_v61, %v3287_v24  ;;  %6906 = vmatprep.subr.bf16.mxu0 %v6905_v45 }
 0x492   : > { %v3291_v33 = vpop.f32.mrb[112].mxu0  ;;  %v3766_v49 = vsel %vm543_vm3, %v3763_v63, %v3765_v17  ;;  %v4513_v63 = vld [vmem:[#allocation10 + $0x28] sm:$0xff] }
 0x493   : > { %v9180_v58 = vsel %vm3674_vm14, %v3653_v27, %v3695_v51  ;;  %v3654_v7 = vadd.f32 %v9143_v8, %v3628_v20  ;;  %v3292_v22 = vadd.f32 %v3291_v33, %v8962_v38  ;;  %v6548_v46 = vpop.f32.mrb[113].mxu0  ;;  %6664 = vmatprep.mubr.msk.f32.mxu0 %vm1457_vm6, %v3766_v49 }
 0x494   : > { %v3767_v55 = vrot.slane %v9180_v58, 6  ;;  %6908 = vmatpush3.bf16.msra.mxu0 %v6905_v45  ;;  %v4515_v45 = vld [vmem:[#allocation10 + $0x38] sm:$0xff] }
 0x495   : > { %vm3675_vm15 = vcmp.gt.f32.partialorder %v3654_v7, 0.0  ;;  %v3696_v61 = vmul.f32 0.01, %v3654_v7  ;;  %v3629_v39 = vadd.f32 %v9054_v30, %v3292_v22  ;;  %6910 = vmatprep.subr.bf16.mxu0 %v9177_v10  ;;  %v6917_v30 = vpack.c.bf16 %v4513_v63, %v4512_v3 }
 0x496   : > { %v3296_v28 = vpop.f32.mrb[114].mxu0  ;;  %v3768_v21 = vsel %vm543_vm3, %v3765_v17, %v3767_v55  ;;  %v6921_v25 = vpack.c.bf16 %v4515_v45, %v4514_v16 }
 0x497   : > { %v9189_v1 = vsel %vm3675_vm15, %v3654_v7, %v3696_v61  ;;  %v3655_v13 = vadd.f32 %v9143_v8, %v3629_v39  ;;  %v3297_v38 = vadd.f32 %v3296_v28, %v8968_v43  ;;  %v6551_v34 = vpop.f32.mrb[115].mxu0  ;;  %6665 = vmatmul.mubr.msk.f32.gmra.mrb[142].mxu0 %vm1457_vm6, %v3768_v21  ;;  %6918 = vmatprep.subr.bf16.mxu1 %v6917_v30 }
 0x498   : > { %v3769_v26 = vrot.slane %v9189_v1, 6  ;;  %6920 = vmatpush3.bf16.msra.mxu1 %v6917_v30 }
 0x499   : > { %vm3676_vm4 = vcmp.gt.f32.partialorder %v3655_v13, 0.0  ;;  %v3697_v15 = vmul.f32 0.01, %v3655_v13  ;;  %v3630_v47 = vadd.f32 %v9056_v37, %v3297_v38  ;;  %6922 = vmatprep.subr.bf16.mxu1 %v6921_v25 }
 0x49a   : > { %v3301_v31 = vpop.f32.mrb[116].mxu0  ;;  %v3770_v27 = vsel %vm543_vm3, %v3767_v55, %v3769_v26 }
 0x49b   : > { %v9197_v43 = vsel %vm3676_vm4, %v3655_v13, %v3697_v15  ;;  %v3656_v24 = vadd.f32 %v9143_v8, %v3630_v47  ;;  %v3302_v12 = vadd.f32 %v3301_v31, %v8974_v11  ;;  %v6554_v17 = vpop.f32.mrb[117].mxu0  ;;  %6667 = vmatprep.mubr.msk.f32.mxu0 %vm1457_vm6, %v3770_v27 }
 0x49c   : > { %v3771_v51 = vrot.slane %v9197_v43, 6  ;;  %6924 = vmatpush3.bf16.msra.mxu1 %v6921_v25 }
 0x49d   : > { %vm3677_vm5 = vcmp.gt.f32.partialorder %v3656_v24, 0.0  ;;  %v3698_v37 = vmul.f32 0.01, %v3656_v24  ;;  %v3631_v20 = vadd.f32 %v9058_v56, %v3302_v12 }
 0x49e   : > { %v3306_v33 = vpop.f32.mrb[118].mxu0  ;;  %v3772_v49 = vsel %vm543_vm3, %v3769_v26, %v3771_v51 }
 0x49f   : > { %v9205_v7 = vsel %vm3677_vm5, %v3656_v24, %v3698_v37  ;;  %v3657_v22 = vadd.f32 %v9143_v8, %v3631_v20  ;;  %v3307_v11 = vadd.f32 %v3306_v33, %v8980_v6  ;;  %v6557_v46 = vpop.f32.mrb[119].mxu0  ;;  %6668 = vmatmul.mubr.msk.f32.gmra.mrb[144].mxu0 %vm1457_vm6, %v3772_v49 }
 0x4a0   : > { %v3773_v55 = vrot.slane %v9205_v7, 6  ;;  %v4195_v3 = vrot.slane %v9205_v7, 4 }
 0x4a1   : > { %vm3678_vm7 = vcmp.gt.f32.partialorder %v3657_v22, 0.0  ;;  %v3699_v61 = vmul.f32 0.01, %v3657_v22  ;;  %v3632_v39 = vadd.f32 %v9060_v59, %v3307_v11 }
 0x4a2   : > { %v3311_v56 = vpop.f32.mrb[120].mxu0  ;;  %v3774_v28 = vsel %vm543_vm3, %v3771_v51, %v3773_v55 }
 0x4a3   : > { %v9213_v21 = vsel %vm3678_vm7, %v3657_v22, %v3699_v61  ;;  %v3658_v13 = vadd.f32 %v9143_v8, %v3632_v39  ;;  %v3312_v38 = vadd.f32 %v3311_v56, %v8986_v40  ;;  %v6560_v6 = vpop.f32.mrb[121].mxu0  ;;  %6670 = vmatprep.mubr.msk.f32.mxu0 %vm1457_vm6, %v3774_v28 }
 0x4a4   : > { %v3775_v34 = vrot.slane %v9213_v21, 6  ;;  %v4197_v63 = vrot.slane %v9213_v21, 4 }
 0x4a5   : > { %vm3679_vm8 = vcmp.gt.f32.partialorder %v3658_v13, 0.0  ;;  %v3700_v59 = vmul.f32 0.01, %v3658_v13  ;;  %v3633_v16 = vadd.f32 %v9065_v0, %v3312_v38 }
 0x4a6   : > { %v3316_v26 = vpop.f32.mrb[122].mxu0  ;;  %v3776_v30 = vsel %vm543_vm3, %v3773_v55, %v3775_v34  ;;  %v9226_v40 = vsel %vm630_vm1, %v4195_v3, %v4197_v63 }
 0x4a7   : > { %v9228_v45 = vsel %vm3679_vm8, %v3658_v13, %v3700_v59  ;;  %v3659_v15 = vadd.f32 %v9143_v8, %v3633_v16  ;;  %v3317_v47 = vadd.f32 %v3316_v26, %v8992_v32  ;;  %v6563_v25 = vpop.f32.mrb[123].mxu0  ;;  %6671 = vmatmul.mubr.msk.f32.gmra.mrb[146].mxu0 %vm1457_vm6, %v3776_v30 }
 0x4a8   : > { %v3777_v31 = vrot.slane %v9228_v45, 6  ;;  %v4199_v0 = vrot.slane %v9228_v45, 4 }
 0x4a9   : > { %vm3680_vm9 = vcmp.gt.f32.partialorder %v3659_v15, 0.0  ;;  %v3701_v27 = vmul.f32 0.01, %v3659_v15  ;;  %v3634_v24 = vadd.f32 %v9067_v36, %v3317_v47 }
 0x4aa   : > { %v3321_v12 = vpop.f32.mrb[124].mxu0  ;;  %v3778_v17 = vsel %vm543_vm3, %v3775_v34, %v3777_v31  ;;  %v9238_v51 = vsel %vm630_vm1, %v4197_v63, %v4199_v0 }
 0x4ab   : > { %v9240_v37 = vsel %vm3680_vm9, %v3659_v15, %v3701_v27  ;;  %v3660_v32 = vadd.f32 %v9143_v8, %v3634_v24  ;;  %v3322_v20 = vadd.f32 %v3321_v12, %v8998_v57  ;;  %v6566_v33 = vpop.f32.mrb[125].mxu0  ;;  %6673 = vmatprep.mubr.msk.f32.mxu0 %vm1457_vm6, %v3778_v17 }
 0x4ac   : > { %v3779_v49 = vrot.slane %v9240_v37, 6  ;;  %v4201_v22 = vrot.slane %v9240_v37, 4 }
 0x4ad   : > { %vm3681_vm10 = vcmp.gt.f32.partialorder %v3660_v32, 0.0  ;;  %v3702_v36 = vmul.f32 0.01, %v3660_v32  ;;  %v3635_v11 = vadd.f32 %v9069_v41, %v3322_v20 }
 0x4ae   : > { %v3326_v46 = vpop.f32.mrb[126].mxu0  ;;  %v3780_v55 = vsel %vm543_vm3, %v3777_v31, %v3779_v49  ;;  %v9250_v61 = vsel %vm630_vm1, %v4199_v0, %v4201_v22 }
 0x4af   : > { %v9252_v39 = vsel %vm3681_vm10, %v3660_v32, %v3702_v36  ;;  %v3661_v57 = vadd.f32 %v9143_v8, %v3635_v11  ;;  %v3327_v56 = vadd.f32 %v3326_v46, %v9004_v53  ;;  %v6569_v28 = vpop.f32.mrb[127].mxu0  ;;  %6674 = vmatmul.mubr.msk.f32.gmra.mrb[148].mxu0 %vm1457_vm6, %v3780_v55 }
 0x4b0   : > { %v3781_v13 = vrot.slane %v9252_v39, 6  ;;  %v4203_v38 = vrot.slane %v9252_v39, 4 }
 0x4b1   : > { %vm3682_vm0 = vcmp.gt.f32.partialorder %v3661_v57, 0.0  ;;  %v3703_v41 = vmul.f32 0.01, %v3661_v57  ;;  %v3636_v6 = vadd.f32 %v9071_v44, %v3327_v56 }
 0x4b2   : > { %v3331_v34 = vpop.f32.mrb[128].mxu0  ;;  %v3782_v63 = vsel %vm543_vm3, %v3779_v49, %v3781_v13  ;;  %v9262_v59 = vsel %vm630_vm1, %v4201_v22, %v4203_v38 }
 0x4b3   : > { %v9264_v16 = vsel %vm3682_vm0, %v3661_v57, %v3703_v41  ;;  %v3662_v53 = vadd.f32 %v9143_v8, %v3636_v6  ;;  %v3332_v26 = vadd.f32 %v3331_v34, %v9010_v2  ;;  %v6572_v30 = vpop.f32.mrb[129].mxu0  ;;  %6676 = vmatprep.mubr.msk.f32.mxu0 %vm1457_vm6, %v3782_v63 }
 0x4b4   : > { %v3783_v15 = vrot.slane %v9264_v16, 6  ;;  %v4205_v47 = vrot.slane %v9264_v16, 4 }
 0x4b5   : > { %vm3683_vm2 = vcmp.gt.f32.partialorder %v3662_v53, 0.0  ;;  %v3704_v44 = vmul.f32 0.01, %v3662_v53  ;;  %v3637_v25 = vadd.f32 %v9073_v60, %v3332_v26 }
 0x4b6   : > { %v3336_v31 = vpop.f32.mrb[130].mxu0  ;;  %v3784_v0 = vsel %vm543_vm3, %v3781_v13, %v3783_v15  ;;  %v9274_v27 = vsel %vm630_vm1, %v4203_v38, %v4205_v47 }
 0x4b7   : > { %v9276_v24 = vsel %vm3683_vm2, %v3662_v53, %v3704_v44  ;;  %v3663_v2 = vadd.f32 %v9143_v8, %v3637_v25  ;;  %v3337_v12 = vadd.f32 %v3336_v31, %v9016_v19  ;;  %v6575_v17 = vpop.f32.mrb[131].mxu0  ;;  %6677 = vmatmul.mubr.msk.f32.gmra.mrb[150].mxu0 %vm1457_vm6, %v3784_v0 }
 0x4b8   : > { %v3785_v32 = vrot.slane %v9276_v24, 6  ;;  %v4207_v20 = vrot.slane %v9276_v24, 4 }
 0x4b9   : > { %vm3684_vm11 = vcmp.gt.f32.partialorder %v3663_v2, 0.0  ;;  %v3705_v60 = vmul.f32 0.01, %v3663_v2  ;;  %v3638_v33 = vadd.f32 %v9075_v29, %v3337_v12 }
 0x4ba   : > { %v3341_v49 = vpop.f32.mrb[132].mxu0  ;;  %v3786_v22 = vsel %vm543_vm3, %v3783_v15, %v3785_v32  ;;  %v9286_v36 = vsel %vm630_vm1, %v4205_v47, %v4207_v20 }
 0x4bb   : > { %v9288_v11 = vsel %vm3684_vm11, %v3663_v2, %v3705_v60  ;;  %v3664_v19 = vadd.f32 %v9143_v8, %v3638_v33  ;;  %v3342_v46 = vadd.f32 %v3341_v49, %v9022_v54  ;;  %v6578_v55 = vpop.f32.mrb[133].mxu0  ;;  %6679 = vmatprep.mubr.msk.f32.mxu0 %vm1457_vm6, %v3786_v22 }
 0x4bc   : > { %v3787_v57 = vrot.slane %v9288_v11, 6  ;;  %v4209_v56 = vrot.slane %v9288_v11, 4 }
 0x4bd   : > { %vm3685_vm12 = vcmp.gt.f32.partialorder %v3664_v19, 0.0  ;;  %v3706_v29 = vmul.f32 0.01, %v3664_v19  ;;  %v3639_v28 = vadd.f32 %v9077_v9, %v3342_v46 }
 0x4be   : > { %v3346_v13 = vpop.f32.mrb[134].mxu0  ;;  %v3788_v38 = vsel %vm543_vm3, %v3785_v32, %v3787_v57  ;;  %v9298_v41 = vsel %vm630_vm1, %v4207_v20, %v4209_v56 }
 0x4bf   : > { %v9300_v6 = vsel %vm3685_vm12, %v3664_v19, %v3706_v29  ;;  %v3665_v54 = vadd.f32 %v9143_v8, %v3639_v28  ;;  %v3347_v34 = vadd.f32 %v3346_v13, %v9028_v42  ;;  %v6581_v63 = vpop.f32.mrb[135].mxu0  ;;  %6680 = vmatmul.mubr.msk.f32.gmra.mrb[152].mxu0 %vm1457_vm6, %v3788_v38 }
 0x4c0   : > { %v3789_v53 = vrot.slane %v9300_v6, 6  ;;  %v4211_v26 = vrot.slane %v9300_v6, 4  ;;  %v4183_v63 = vld [vmem:[#allocation9 + $0x50] sm:$0xff] }
 0x4c1   : > { %vm3686_vm13 = vcmp.gt.f32.partialorder %v3665_v54, 0.0  ;;  %v3707_v9 = vmul.f32 0.01, %v3665_v54  ;;  %v3640_v30 = vadd.f32 %v9079_v23, %v3347_v34 }
 0x4c2   : > { %v3351_v15 = vpop.f32.mrb[136].mxu0  ;;  %v3790_v47 = vsel %vm543_vm3, %v3787_v57, %v3789_v53  ;;  %v9310_v44 = vsel %vm630_vm1, %v4209_v56, %v4211_v26 }
 0x4c3   : > { %v9312_v25 = vsel %vm3686_vm13, %v3665_v54, %v3707_v9  ;;  %v3666_v42 = vadd.f32 %v9143_v8, %v3640_v30  ;;  %v3352_v31 = vadd.f32 %v3351_v15, %v9034_v5  ;;  %v6584_v0 = vpop.f32.mrb[137].mxu0  ;;  %6682 = vmatprep.mubr.msk.f32.mxu0 %vm1457_vm6, %v3790_v47  ;;  %v3648_v5 = vadd.f32 %v9143_v8, %v9139_v18 }
 0x4c4   : > { %v3791_v2 = vrot.slane %v9312_v25, 6  ;;  %v4213_v12 = vrot.slane %v9312_v25, 4  ;;  %v4510_v0 = vld [vmem:[#allocation10 + $0x18] sm:$0xff] }
 0x4c5   : > { %vm3687_vm14 = vcmp.gt.f32.partialorder %v3666_v42, 0.0  ;;  %v3708_v23 = vmul.f32 0.01, %v3666_v42  ;;  %v3641_v17 = vadd.f32 %v9084_v50, %v3352_v31  ;;  %v3690_v18 = vmul.f32 0.01, %v3648_v5 }
 0x4c6   : > { %v3356_v32 = vpop.f32.mrb[138].mxu0  ;;  %v3792_v20 = vsel %vm543_vm3, %v3789_v53, %v3791_v2  ;;  %v9322_v60 = vsel %vm630_vm1, %v4211_v26, %v4213_v12  ;;  %vm3669_vm4 = vcmp.gt.f32.partialorder %v3648_v5, 0.0 }
 0x4c7   : > { %v3729_v33 = vsel %vm3687_vm14, %v3666_v42, %v3708_v23  ;;  %v3667_v49 = vadd.f32 %v9143_v8, %v3641_v17  ;;  %v3357_v22 = vadd.f32 %v3356_v32, %v9038_v52  ;;  %6683 = vmatmul.mubr.msk.f32.gmra.mrb[154].mxu0 %vm1457_vm6, %v3792_v20  ;;  %v6587_v19 = vpop.f32.mrb[139].mxu0  ;;  %v3711_v9 = vsel %vm3669_vm4, %v3648_v5, %v3690_v18 }
 0x4c8   : > { %v3793_v46 = vrot.slane %v3729_v33, 6  ;;  %v4215_v55 = vrot.slane %v3729_v33, 4 }
 0x4c9   : > { %vm3688_vm15 = vcmp.gt.f32.partialorder %v3667_v49, 0.0  ;;  %v3709_v50 = vmul.f32 0.01, %v3667_v49  ;;  %v3642_v57 = vadd.f32 %v9095_v35, %v3357_v22  ;;  %v4184_v35 = vld [vmem:[#allocation9 + $0x58] sm:$0xff] }
 0x4ca   : > { %v3794_v56 = vsel %vm543_vm3, %v3791_v2, %v3793_v46  ;;  %v9332_v29 = vsel %vm630_vm1, %v4213_v12, %v4215_v55  ;;  %v4888_v2 = vld [vmem:[#allocation10 + $0x40] sm:$0xff]  ;;  %v4889_v12 = vld [vmem:[#allocation10 + $0x48] sm:$0xff] }
 0x4cb   : > { %v3730_v28 = vsel %vm3688_vm15, %v3667_v49, %v3709_v50  ;;  %v3668_v13 = vadd.f32 %v9143_v8, %v3642_v57  ;;  %6685 = vmatprep.mubr.msk.f32.mxu0 %vm1457_vm6, %v3794_v56  ;;  %v6913_v8 = vpack.c.bf16 %v4184_v35, %v4183_v63 }
 0x4cc   : > { %v3795_v52 = vrot.slane %v3730_v28, 6  ;;  %v4217_v38 = vrot.slane %v3730_v28, 4 }
 0x4cd   : > { %vm3689_vm5 = vcmp.gt.f32.partialorder %v3668_v13, 0.0  ;;  %v3710_v54 = vmul.f32 0.01, %v3668_v13 }
 0x4ce   : > { %v3796_v34 = vsel %vm543_vm3, %v3793_v46, %v3795_v52  ;;  %v4218_v53 = vsel %vm630_vm1, %v4215_v55, %v4217_v38  ;;  %v9435_v46 = vpack.c.bf16 %v4889_v12, %v4888_v2 }
 0x4cf   : > { %v3731_v26 = vsel %vm3689_vm5, %v3668_v13, %v3710_v54  ;;  %6686 = vmatmul.mubr.msk.f32.gmra.mrb[156].mxu0 %vm1457_vm6, %v3796_v34 }
 0x4d0   : > { %v4219_v30 = vrot.slane %v3731_v26, 4  ;;  %6696 = vmatprep.mubr.msk.f32.mxu0 %vm1457_vm6, %v3711_v9 }
 0x4d2   : > { %v4220_v15 = vsel %vm630_vm1, %v4217_v38, %v4219_v30 }
 0x4d3   : > { %6697 = vmatmul.mubr.msk.f32.vlgmr.msra.gmra.mrb[140].mxu0 %vm1457_vm6, %v9150_v4  ;;  %v4187_v4 = vrot.slane %v9169_v48, 4 }
 0x4d4   : > { %6912 = vmatpush3.bf16.msra.mxu0 %v9177_v10  ;;  %6699 = vmatprep.mubr.msk.f32.mxu0 %vm1457_vm6, %v9153_v62  ;;  %v4186_v62 = vrot.slane %v9161_v14, 4  ;;  %v4189_v10 = vrot.slane %v9180_v58, 4 }
 0x4d5   : > { %6914 = vmatprep.subr.bf16.mxu0 %v6913_v8 }
 0x4d7   : > { %6700 = vmatmul.mubr.msk.f32.gmra.mrb[142].mxu0 %vm1457_vm6, %v9161_v14 }
 0x4d8   : > { %6702 = vmatprep.mubr.msk.f32.mxu0 %vm1457_vm6, %v9169_v48  ;;  %6916 = vmatpush3.bf16.msra.mxu0 %v6913_v8  ;;  %v4193_v48 = vrot.slane %v9197_v43, 4 }
 0x4db   : > { %6703 = vmatmul.mubr.msk.f32.gmra.mrb[144].mxu0 %vm1457_vm6, %v9180_v58  ;;  %v4196_v58 = vsel %vm630_vm1, %v4193_v48, %v4195_v3  ;;  %v9416_v3 = vld [vmem:[#allocation12 + $0x4] ss:$0 sm:$0xff] }
 0x4dc   : > { %6705 = vmatprep.mubr.msk.f32.mxu0 %vm1457_vm6, %v9189_v1 }
 0x4df   : > { %6706 = vmatmul.mubr.msk.f32.gmra.mrb[146].mxu0 %vm1457_vm6, %v9197_v43  ;;  %v4508_v43 = vld [vmem:[#allocation10 + $0x8] sm:$0xff] }
 0x4e0   : > { %6708 = vmatprep.mubr.msk.f32.mxu0 %vm1457_vm6, %v9205_v7 }
 0x4e3   : > { %6709 = vmatmul.mubr.msk.f32.gmra.mrb[148].mxu0 %vm1457_vm6, %v9213_v21  ;;  %v4188_v21 = vsel %vm630_vm1, %v4186_v62, %v4187_v4 }
 0x4e4   : > { %6711 = vmatprep.mubr.msk.f32.mxu0 %vm1457_vm6, %v9228_v45  ;;  %v4191_v45 = vrot.slane %v9189_v1, 4  ;;  %v4507_v1 = vld [vmem:[#allocation10] sm:$0xff] }
 0x4e5   : > { %v6925_v7 = vpack.c.bf16 %v4508_v43, %v4507_v1 }
 0x4e6   : > { %v4194_v14 = vsel %vm630_vm1, %v4191_v45, %v4193_v48 }
 0x4e7   : > { %6712 = vmatmul.mubr.msk.f32.gmra.mrb[150].mxu0 %vm1457_vm6, %v9240_v37  ;;  %v4190_v37 = vsel %vm630_vm1, %v4187_v4, %v4189_v10  ;;  %6926 = vmatprep.subr.bf16.mxu1 %v6925_v7 }
 0x4e8   : > { %6714 = vmatprep.mubr.msk.f32.mxu0 %vm1457_vm6, %v9252_v39  ;;  %v4192_v39 = vsel %vm630_vm1, %v4189_v10, %v4191_v45 }
 0x4eb   : > { %6715 = vmatmul.mubr.msk.f32.gmra.mrb[152].mxu0 %vm1457_vm6, %v9264_v16 }
 0x4ec   : > { %6717 = vmatprep.mubr.msk.f32.mxu0 %vm1457_vm6, %v9276_v24 }
 0x4ef   : > { %6718 = vmatmul.mubr.msk.f32.gmra.mrb[154].mxu0 %vm1457_vm6, %v9288_v11 }
 0x4f0   : > { %6720 = vmatprep.mubr.msk.f32.mxu0 %vm1457_vm6, %v9300_v6 }
 0x4f3   : > { %6721 = vmatmul.mubr.msk.f32.gmra.mrb[156].mxu0 %vm1457_vm6, %v9312_v25 }
 0x4f4   : > { %6731 = vmatprep.mubr.msk.f32.mxu0 %vm1457_vm6, %v4188_v21 }
 0x4f7   : > { %6732 = vmatmul.mubr.msk.f32.vlgmr.msra.gmra.mrb[140].mxu0 %vm1457_vm6, %v4190_v37 }
 0x4f8   : > { %6734 = vmatprep.mubr.msk.f32.mxu0 %vm1457_vm6, %v4192_v39 }
 0x4fb   : > { %6735 = vmatmul.mubr.msk.f32.gmra.mrb[142].mxu0 %vm1457_vm6, %v4194_v14 }
 0x4fc   : > { %6737 = vmatprep.mubr.msk.f32.mxu0 %vm1457_vm6, %v4196_v58 }
 0x4ff   : > { %6738 = vmatmul.mubr.msk.f32.gmra.mrb[144].mxu0 %vm1457_vm6, %v9226_v40 }
 0x500   : > { %6740 = vmatprep.mubr.msk.f32.mxu0 %vm1457_vm6, %v9238_v51 }
 0x503   : > { %6741 = vmatmul.mubr.msk.f32.gmra.mrb[146].mxu0 %vm1457_vm6, %v9250_v61 }
 0x504   : > { %6743 = vmatprep.mubr.msk.f32.mxu0 %vm1457_vm6, %v9262_v59 }
 0x507   : > { %6744 = vmatmul.mubr.msk.f32.gmra.mrb[148].mxu0 %vm1457_vm6, %v9274_v27 }
 0x508   : > { %6746 = vmatprep.mubr.msk.f32.mxu0 %vm1457_vm6, %v9286_v36 }
 0x50b   : > { %6747 = vmatmul.mubr.msk.f32.gmra.mrb[150].mxu0 %vm1457_vm6, %v9298_v41 }
 0x50c   : > { %6749 = vmatprep.mubr.msk.f32.mxu0 %vm1457_vm6, %v9310_v44  ;;  %v4509_v44 = vld [vmem:[#allocation10 + $0x10] sm:$0xff] }
 0x50d   : > { %v6929_v19 = vpack.c.bf16 %v4510_v0, %v4509_v44 }
 0x50f   : > { %6750 = vmatmul.mubr.msk.f32.gmra.mrb[152].mxu0 %vm1457_vm6, %v9322_v60 }
 0x510   : > { %6752 = vmatprep.mubr.msk.f32.mxu0 %vm1457_vm6, %v9332_v29 }
 0x513   : > { %6753 = vmatmul.mubr.msk.f32.gmra.mrb[154].mxu0 %vm1457_vm6, %v4218_v53 }
 0x514   : > { %6755 = vmatprep.mubr.msk.f32.mxu0 %vm1457_vm6, %v4220_v15 }
 0x517   : > { %6756 = vmatmul.mubr.msk.f32.gmra.mrb[156].mxu0 %vm1457_vm6, %v4219_v30 }
 0x5ca   : > { %v6733_v40 = vpop.f32.mrb[140].mxu0 }
 0x5cb   : > { %v4436_v51 = vadd.f32 %v6733_v40, %v9416_v3  ;;  %v4323_v61 = vpop.f32.mrb[141].mxu0 }
 0x5cc   : > { %v9427_v23 = vadd.f32 %v9416_v3, %v4323_v61 }
 0x5cd   : > { %v4472_v59 = vmul.f32 0.01, %v4436_v51  ;;  %vm4454_vm7 = vcmp.gt.f32.partialorder %v4436_v51, 0.0 }
 0x5ce   : > { %v6736_v16 = vpop.f32.mrb[142].mxu0  ;;  %v9443_v18 = vmul.f32 0.01, %v9427_v23  ;;  %vm4453_vm5 = vcmp.gt.f32.partialorder %v9427_v23, 0.0 }
 0x5cf   : > { %v4438_v27 = vadd.f32 %v6736_v16, %v9416_v3  ;;  %v4333_v24 = vpop.f32.mrb[143].mxu0  ;;  %v9421_v41 = vsel %vm4454_vm7, %v4436_v51, %v4472_v59 }
 0x5d0   : > { %v4437_v36 = vadd.f32 %v9416_v3, %v4333_v24  ;;  %v4531_v60 = vrot.slane %v9421_v41, 6 }
 0x5d1   : > { %vm4456_vm8 = vcmp.gt.f32.partialorder %v4438_v27, 0.0  ;;  %v4474_v11 = vmul.f32 0.01, %v4438_v27 }
 0x5d2   : > { %vm4455_vm9 = vcmp.gt.f32.partialorder %v4437_v36, 0.0  ;;  %v4473_v6 = vmul.f32 0.01, %v4437_v36  ;;  %v6739_v47 = vpop.f32.mrb[144].mxu0 }
 0x5d3   : > { %v9423_v25 = vsel %vm4456_vm8, %v4438_v27, %v4474_v11  ;;  %v4440_v42 = vadd.f32 %v6739_v47, %v9416_v3  ;;  %v4343_v31 = vpop.f32.mrb[145].mxu0 }
 0x5d4   : > { %v4534_v17 = vrot.slane %v9423_v25, 6  ;;  %v9430_v32 = vsel %vm4455_vm9, %v4437_v36, %v4473_v6  ;;  %v4439_v20 = vadd.f32 %v9416_v3, %v4343_v31  ;;  %v4894_v38 = vrot.slane %v9423_v25, 4 }
 0x5d5   : > { %v4532_v5 = vrot.slane %v9430_v32, 6  ;;  %vm4458_vm10 = vcmp.gt.f32.partialorder %v4440_v42, 0.0  ;;  %v4476_v33 = vmul.f32 0.01, %v4440_v42 }
 0x5d6   : > { %vm4457_vm0 = vcmp.gt.f32.partialorder %v4439_v20, 0.0  ;;  %v4475_v49 = vmul.f32 0.01, %v4439_v20  ;;  %v6742_v22 = vpop.f32.mrb[146].mxu0 }
 0x5d7   : > { %v9437_v55 = vsel %vm4458_vm10, %v4440_v42, %v4476_v33  ;;  %v4442_v50 = vadd.f32 %v6742_v22, %v9416_v3  ;;  %v4353_v57 = vpop.f32.mrb[147].mxu0  ;;  %v4533_v56 = vsel %vm543_vm3, %v4531_v60, %v4532_v5  ;;  %v4535_v29 = vsel %vm543_vm3, %v4532_v5, %v4534_v17 }
 0x5d8   : > { %v4538_v28 = vrot.slane %v9437_v55, 6  ;;  %v9446_v13 = vsel %vm4457_vm0, %v4439_v20, %v4475_v49  ;;  %v4441_v52 = vadd.f32 %v9416_v3, %v4353_v57  ;;  %6766 = vmatprep.mubr.msk.f32.mxu1 %vm1457_vm6, %v4533_v56  ;;  %v4897_v63 = vrot.slane %v9437_v55, 4 }
 0x5d9   : > { %v4536_v54 = vrot.slane %v9446_v13, 6  ;;  %vm4460_vm2 = vcmp.gt.f32.partialorder %v4442_v50, 0.0  ;;  %v4478_v34 = vmul.f32 0.01, %v4442_v50  ;;  %6767 = vmatmul.mubr.msk.f32.vlgmr.msra.gmra.mrb[144].mxu1 %vm1457_vm6, %v4535_v29  ;;  %v4895_v35 = vrot.slane %v9446_v13, 4 }
 0x5da   : > { %vm4459_vm11 = vcmp.gt.f32.partialorder %v4441_v52, 0.0  ;;  %v4477_v53 = vmul.f32 0.01, %v4441_v52  ;;  %6928 = vmatpush3.bf16.msra.mxu1 %v6925_v7  ;;  %v6745_v26 = vpop.f32.mrb[148].mxu0 }
 0x5db   : > { %v9455_v9 = vsel %vm4460_vm2, %v4442_v50, %v4478_v34  ;;  %v4444_v30 = vadd.f32 %v6745_v26, %v9416_v3  ;;  %v4363_v8 = vpop.f32.mrb[149].mxu0  ;;  %v4537_v15 = vsel %vm543_vm3, %v4534_v17, %v4536_v54  ;;  %v4539_v4 = vsel %vm543_vm3, %v4536_v54, %v4538_v28  ;;  %6930 = vmatprep.subr.bf16.mxu1 %v6929_v19 }
 0x5dc   : > { %v4542_v62 = vrot.slane %v9455_v9, 6  ;;  %v4901_v10 = vrot.slane %v9455_v9, 4  ;;  %v9462_v21 = vsel %vm4459_vm11, %v4441_v52, %v4477_v53  ;;  %v4443_v45 = vadd.f32 %v9416_v3, %v4363_v8  ;;  %6769 = vmatprep.mubr.msk.f32.mxu1 %vm1457_vm6, %v4537_v15 }
 0x5dd   : > { %v4540_v37 = vrot.slane %v9462_v21, 6  ;;  %v4899_v48 = vrot.slane %v9462_v21, 4  ;;  %vm4462_vm12 = vcmp.gt.f32.partialorder %v4444_v30, 0.0  ;;  %v4480_v39 = vmul.f32 0.01, %v4444_v30  ;;  %6770 = vmatmul.mubr.msk.f32.gmra.mrb[146].mxu1 %vm1457_vm6, %v4539_v4 }
 0x5de   : > { %vm4461_vm13 = vcmp.gt.f32.partialorder %v4443_v45, 0.0  ;;  %v4479_v14 = vmul.f32 0.01, %v4443_v45  ;;  %v6748_v58 = vpop.f32.mrb[150].mxu0  ;;  %6932 = vmatpush3.bf16.msra.mxu1 %v6929_v19  ;;  %v9470_v1 = vsel %vm630_vm1, %v4894_v38, %v4895_v35  ;;  %v9473_v43 = vsel %vm630_vm1, %v4895_v35, %v4897_v63 }
 0x5df   : > { %v9475_v7 = vsel %vm4462_vm12, %v4444_v30, %v4480_v39  ;;  %v4446_v40 = vadd.f32 %v6748_v58, %v9416_v3  ;;  %v4373_v51 = vpop.f32.mrb[151].mxu0  ;;  %v4541_v61 = vsel %vm543_vm3, %v4538_v28, %v4540_v37  ;;  %v4543_v59 = vsel %vm543_vm3, %v4540_v37, %v4542_v62  ;;  %6934 = vmatprep.subr.bf16.mxu1 %v9435_v46 }
 0x5e0   : > { %v4546_v16 = vrot.slane %v9475_v7, 6  ;;  %v4905_v27 = vrot.slane %v9475_v7, 4  ;;  %v9483_v24 = vsel %vm4461_vm13, %v4443_v45, %v4479_v14  ;;  %v4445_v36 = vadd.f32 %v9416_v3, %v4373_v51  ;;  %6772 = vmatprep.mubr.msk.f32.mxu1 %vm1457_vm6, %v4541_v61 }
 0x5e1   : > { %v4544_v11 = vrot.slane %v9483_v24, 6  ;;  %v4903_v6 = vrot.slane %v9483_v24, 4  ;;  %vm4464_vm14 = vcmp.gt.f32.partialorder %v4446_v40, 0.0  ;;  %v4482_v47 = vmul.f32 0.01, %v4446_v40  ;;  %6773 = vmatmul.mubr.msk.f32.gmra.mrb[148].mxu1 %vm1457_vm6, %v4543_v59 }
 0x5e2   : > { %vm4463_vm15 = vcmp.gt.f32.partialorder %v4445_v36, 0.0  ;;  %v4481_v44 = vmul.f32 0.01, %v4445_v36  ;;  %v6751_v42 = vpop.f32.mrb[152].mxu0  ;;  %v9491_v31 = vsel %vm630_vm1, %v4897_v63, %v4899_v48  ;;  %v9494_v0 = vsel %vm630_vm1, %v4899_v48, %v4901_v10 }
 0x5e3   : > { %v9496_v2 = vsel %vm4464_vm14, %v4446_v40, %v4482_v47  ;;  %v4448_v12 = vadd.f32 %v6751_v42, %v9416_v3  ;;  %v4383_v17 = vpop.f32.mrb[153].mxu0  ;;  %v4545_v20 = vsel %vm543_vm3, %v4542_v62, %v4544_v11  ;;  %v4547_v60 = vsel %vm543_vm3, %v4544_v11, %v4546_v16 }
 0x5e4   : > { %v4550_v5 = vrot.slane %v9496_v2, 6  ;;  %v4909_v33 = vrot.slane %v9496_v2, 4  ;;  %v9503_v49 = vsel %vm4463_vm15, %v4445_v36, %v4481_v44  ;;  %v4447_v22 = vadd.f32 %v9416_v3, %v4383_v17  ;;  %6775 = vmatprep.mubr.msk.f32.mxu1 %vm1457_vm6, %v4545_v20 }
 0x5e5   : > { %v4548_v19 = vrot.slane %v9503_v49, 6  ;;  %v4907_v50 = vrot.slane %v9503_v49, 4  ;;  %vm4466_vm4 = vcmp.gt.f32.partialorder %v4448_v12, 0.0  ;;  %v4484_v57 = vmul.f32 0.01, %v4448_v12  ;;  %6776 = vmatmul.mubr.msk.f32.gmra.mrb[150].mxu1 %vm1457_vm6, %v4547_v60 }
 0x5e6   : > { %vm4465_vm7 = vcmp.gt.f32.partialorder %v4447_v22, 0.0  ;;  %v4483_v56 = vmul.f32 0.01, %v4447_v22  ;;  %v6754_v29 = vpop.f32.mrb[154].mxu0  ;;  %v9512_v28 = vsel %vm630_vm1, %v4901_v10, %v4903_v6  ;;  %v9515_v52 = vsel %vm630_vm1, %v4903_v6, %v4905_v27 }
 0x5e7   : > { %v9517_v38 = vsel %vm4466_vm4, %v4448_v12, %v4484_v57  ;;  %v4450_v54 = vadd.f32 %v6754_v29, %v9416_v3  ;;  %v4393_v34 = vpop.f32.mrb[155].mxu0  ;;  %v4549_v63 = vsel %vm543_vm3, %v4546_v16, %v4548_v19  ;;  %v4551_v35 = vsel %vm543_vm3, %v4548_v19, %v4550_v5  ;;  %v4891_v19 = vld [vmem:[#allocation10 + $0x58] sm:$0xff] }
 0x5e8   : > { %v4554_v53 = vrot.slane %v9517_v38, 6  ;;  %v4913_v26 = vrot.slane %v9517_v38, 4  ;;  %v9524_v30 = vsel %vm4465_vm7, %v4447_v22, %v4483_v56  ;;  %v4449_v8 = vadd.f32 %v9416_v3, %v4393_v34  ;;  %6778 = vmatprep.mubr.msk.f32.mxu1 %vm1457_vm6, %v4549_v63  ;;  %v4890_v22 = vld [vmem:[#allocation10 + $0x50] sm:$0xff] }
 0x5e9   : > { %v4552_v15 = vrot.slane %v9524_v30, 6  ;;  %v4911_v4 = vrot.slane %v9524_v30, 4  ;;  %vm4468_vm8 = vcmp.gt.f32.partialorder %v4450_v54, 0.0  ;;  %v4486_v62 = vmul.f32 0.01, %v4450_v54  ;;  %6779 = vmatmul.mubr.msk.f32.gmra.mrb[152].mxu1 %vm1457_vm6, %v4551_v35 }
 0x5ea   : > { %vm4467_vm9 = vcmp.gt.f32.partialorder %v4449_v8, 0.0  ;;  %v4485_v10 = vmul.f32 0.01, %v4449_v8  ;;  %v6757_v45 = vpop.f32.mrb[156].mxu0  ;;  %v4908_v37 = vsel %vm630_vm1, %v4905_v27, %v4907_v50  ;;  %v4910_v48 = vsel %vm630_vm1, %v4907_v50, %v4909_v33 }
 0x5eb   : > { %v4504_v39 = vsel %vm4468_vm8, %v4450_v54, %v4486_v62  ;;  %v4452_v14 = vadd.f32 %v6757_v45, %v9416_v3  ;;  %v4403_v58 = vpop.f32.mrb[157].mxu0  ;;  %v4553_v40 = vsel %vm543_vm3, %v4550_v5, %v4552_v15  ;;  %v4555_v51 = vsel %vm543_vm3, %v4552_v15, %v4554_v53 }
 0x5ec   : > { %v4558_v61 = vrot.slane %v4504_v39, 6  ;;  %v4917_v59 = vrot.slane %v4504_v39, 4  ;;  %v4503_v16 = vsel %vm4467_vm9, %v4449_v8, %v4485_v10  ;;  %v4451_v36 = vadd.f32 %v9416_v3, %v4403_v58  ;;  %6781 = vmatprep.mubr.msk.f32.mxu1 %vm1457_vm6, %v4553_v40 }
 0x5ed   : > { %v4556_v11 = vrot.slane %v4503_v16, 6  ;;  %v4915_v6 = vrot.slane %v4503_v16, 4  ;;  %vm4470_vm10 = vcmp.gt.f32.partialorder %v4452_v14, 0.0  ;;  %v4488_v27 = vmul.f32 0.01, %v4452_v14  ;;  %6782 = vmatmul.mubr.msk.f32.gmra.mrb[154].mxu1 %vm1457_vm6, %v4555_v51 }
 0x5ee   : > { %vm4469_vm0 = vcmp.gt.f32.partialorder %v4451_v36, 0.0  ;;  %v4487_v47 = vmul.f32 0.01, %v4451_v36  ;;  %v4912_v44 = vsel %vm630_vm1, %v4909_v33, %v4911_v4  ;;  %v4914_v42 = vsel %vm630_vm1, %v4911_v4, %v4913_v26 }
 0x5ef   : > { %v4506_v12 = vsel %vm4470_vm10, %v4452_v14, %v4488_v27  ;;  %v4557_v17 = vsel %vm543_vm3, %v4554_v53, %v4556_v11  ;;  %v4559_v20 = vsel %vm543_vm3, %v4556_v11, %v4558_v61  ;;  %v4916_v3 = vsel %vm630_vm1, %v4913_v26, %v4915_v6 }
 0x5f0   : > { %v4921_v60 = vrot.slane %v4506_v12, 4  ;;  %v4505_v5 = vsel %vm4469_vm0, %v4451_v36, %v4487_v47  ;;  %6784 = vmatprep.mubr.msk.f32.mxu1 %vm1457_vm6, %v4557_v17  ;;  %v4918_v50 = vsel %vm630_vm1, %v4915_v6, %v4917_v59  ;;  %v4489_v33 = vsel %vm4453_vm5, %v9427_v23, %v9443_v18 }
 0x5f1   : > { %v4919_v57 = vrot.slane %v4505_v5, 4  ;;  %6785 = vmatmul.mubr.msk.f32.gmra.mrb[156].mxu1 %vm1457_vm6, %v4559_v20  ;;  %v6937_v56 = vpack.c.bf16 %v4891_v19, %v4890_v22 }
 0x5f2   : > { %6795 = vmatprep.mubr.msk.f32.mxu1 %vm1457_vm6, %v4489_v33 }
 0x5f3   : > { %v4920_v29 = vsel %vm630_vm1, %v4917_v59, %v4919_v57  ;;  %v4922_v54 = vsel %vm630_vm1, %v4919_v57, %v4921_v60 }
 0x5f5   : > { %6796 = vmatmul.mubr.msk.f32.vlgmr.msra.gmra.mrb[144].mxu1 %vm1457_vm6, %v9421_v41  ;;  %v9601_v41 = vld [vmem:[#allocation12 + $0x5] ss:$0 sm:$0xff] }
 0x5f6   : > { %6936 = vmatpush3.bf16.msra.mxu1 %v9435_v46  ;;  %6798 = vmatprep.mubr.msk.f32.mxu1 %vm1457_vm6, %v9430_v32 }
 0x5f7   : > { %6938 = vmatprep.subr.bf16.mxu1 %v6937_v56 }
 0x5f9   : > { %6799 = vmatmul.mubr.msk.f32.gmra.mrb[146].mxu1 %vm1457_vm6, %v9423_v25 }
 0x5fa   : > { %6801 = vmatprep.mubr.msk.f32.mxu1 %vm1457_vm6, %v9446_v13  ;;  %6940 = vmatpush3.bf16.msra.mxu1 %v6937_v56 }
 0x5fd   : > { %6802 = vmatmul.mubr.msk.f32.gmra.mrb[148].mxu1 %vm1457_vm6, %v9437_v55 }
 0x5fe   : > { %6804 = vmatprep.mubr.msk.f32.mxu1 %vm1457_vm6, %v9462_v21 }
 0x601   : > { %6805 = vmatmul.mubr.msk.f32.gmra.mrb[150].mxu1 %vm1457_vm6, %v9455_v9 }
 0x602   : > { %6807 = vmatprep.mubr.msk.f32.mxu1 %vm1457_vm6, %v9483_v24 }
 0x605   : > { %6808 = vmatmul.mubr.msk.f32.gmra.mrb[152].mxu1 %vm1457_vm6, %v9475_v7 }
 0x606   : > { %6810 = vmatprep.mubr.msk.f32.mxu1 %vm1457_vm6, %v9503_v49 }
 0x609   : > { %6811 = vmatmul.mubr.msk.f32.gmra.mrb[154].mxu1 %vm1457_vm6, %v9496_v2 }
 0x60a   : > { %6813 = vmatprep.mubr.msk.f32.mxu1 %vm1457_vm6, %v9524_v30 }
 0x60d   : > { %6814 = vmatmul.mubr.msk.f32.gmra.mrb[156].mxu1 %vm1457_vm6, %v9517_v38 }
 0x60e   : > { %6824 = vmatprep.mubr.msk.f32.mxu1 %vm1457_vm6, %v9470_v1 }
 0x611   : > { %6825 = vmatmul.mubr.msk.f32.vlgmr.msra.gmra.mrb[144].mxu1 %vm1457_vm6, %v9473_v43 }
 0x612   : > { %6827 = vmatprep.mubr.msk.f32.mxu1 %vm1457_vm6, %v9491_v31 }
 0x615   : > { %6828 = vmatmul.mubr.msk.f32.gmra.mrb[146].mxu1 %vm1457_vm6, %v9494_v0 }
 0x616   : > { %6830 = vmatprep.mubr.msk.f32.mxu1 %vm1457_vm6, %v9512_v28 }
 0x619   : > { %6831 = vmatmul.mubr.msk.f32.gmra.mrb[148].mxu1 %vm1457_vm6, %v9515_v52 }
 0x61a   : > { %6833 = vmatprep.mubr.msk.f32.mxu1 %vm1457_vm6, %v4908_v37 }
 0x61d   : > { %6834 = vmatmul.mubr.msk.f32.gmra.mrb[150].mxu1 %vm1457_vm6, %v4910_v48 }
 0x61e   : > { %6836 = vmatprep.mubr.msk.f32.mxu1 %vm1457_vm6, %v4912_v44 }
 0x621   : > { %6837 = vmatmul.mubr.msk.f32.gmra.mrb[152].mxu1 %vm1457_vm6, %v4914_v42 }
 0x622   : > { %6839 = vmatprep.mubr.msk.f32.mxu1 %vm1457_vm6, %v4916_v3 }
 0x625   : > { %6840 = vmatmul.mubr.msk.f32.gmra.mrb[154].mxu1 %vm1457_vm6, %v4918_v50 }
 0x626   : > { %6842 = vmatprep.mubr.msk.f32.mxu1 %vm1457_vm6, %v4920_v29 }
 0x629   : > { %6843 = vmatmul.mubr.msk.f32.gmra.mrb[156].mxu1 %vm1457_vm6, %v4922_v54 }
 0x6e4   : > { %v6826_v25 = vpop.f32.mrb[144].mxu1 }
 0x6e5   : > { %v5106_v23 = vadd.f32 %v6826_v25, %v9601_v41  ;;  %v5017_v32 = vpop.f32.mrb[145].mxu1 }
 0x6e6   : > { %v5105_v46 = vadd.f32 %v9601_v41, %v5017_v32 }
 0x6e7   : > { %vm5120_vm1 = vcmp.gt.f32.partialorder %v5106_v23, 0.0  ;;  %v5134_v55 = vmul.f32 0.01, %v5106_v23 }
 0x6e8   : > { %vm5119_vm3 = vcmp.gt.f32.partialorder %v5105_v46, 0.0  ;;  %v5133_v18 = vmul.f32 0.01, %v5105_v46  ;;  %v6829_v13 = vpop.f32.mrb[146].mxu1 }
 0x6e9   : > { %v5148_v9 = vsel %vm5120_vm1, %v5106_v23, %v5134_v55  ;;  %v5108_v21 = vadd.f32 %v6829_v13, %v9601_v41  ;;  %v5027_v1 = vpop.f32.mrb[147].mxu1 }
 0x6ea   : > { %5162 = vst.msk [vmem:[%s9610_s23 + $0x8] sm:$0xff] %vm1457_vm6, %v5148_v9  ;;  %v5147_v43 = vsel %vm5119_vm3, %v5105_v46, %v5133_v18  ;;  %v5107_v7 = vadd.f32 %v9601_v41, %v5027_v1 }
 0x6eb   : > { %5161 = vst.msk [vmem:[%s9610_s23] sm:$0xff] %vm1457_vm6, %v5147_v43  ;;  %vm5122_vm2 = vcmp.gt.f32.partialorder %v5108_v21, 0.0  ;;  %v5136_v24 = vmul.f32 0.01, %v5108_v21 }
 0x6ec   : > { %vm5121_vm11 = vcmp.gt.f32.partialorder %v5107_v7, 0.0  ;;  %v5135_v31 = vmul.f32 0.01, %v5107_v7  ;;  %v6832_v0 = vpop.f32.mrb[148].mxu1 }
 0x6ed   : > { %v5150_v2 = vsel %vm5122_vm2, %v5108_v21, %v5136_v24  ;;  %v5110_v49 = vadd.f32 %v6832_v0, %v9601_v41  ;;  %v5037_v28 = vpop.f32.mrb[149].mxu1 }
 0x6ee   : > { %5164 = vst.msk [vmem:[%s9610_s23 + $0x18] sm:$0xff] %vm1457_vm6, %v5150_v2  ;;  %v5149_v52 = vsel %vm5121_vm11, %v5107_v7, %v5135_v31  ;;  %v5109_v38 = vadd.f32 %v9601_v41, %v5037_v28 }
 0x6ef   : > { %5163 = vst.msk [vmem:[%s9610_s23 + $0x10] sm:$0xff] %vm1457_vm6, %v5149_v52  ;;  %vm5124_vm12 = vcmp.gt.f32.partialorder %v5110_v49, 0.0  ;;  %v5138_v34 = vmul.f32 0.01, %v5110_v49 }
 0x6f0   : > { %vm5123_vm13 = vcmp.gt.f32.partialorder %v5109_v38, 0.0  ;;  %v5137_v63 = vmul.f32 0.01, %v5109_v38  ;;  %v6835_v35 = vpop.f32.mrb[150].mxu1 }
 0x6f1   : > { %v5152_v53 = vsel %vm5124_vm12, %v5110_v49, %v5138_v34  ;;  %v5112_v26 = vadd.f32 %v6835_v35, %v9601_v41  ;;  %v5047_v30 = vpop.f32.mrb[151].mxu1 }
 0x6f2   : > { %5166 = vst.msk [vmem:[%s9610_s23 + $0x28] sm:$0xff] %vm1457_vm6, %v5152_v53  ;;  %v5151_v8 = vsel %vm5123_vm13, %v5109_v38, %v5137_v63  ;;  %v5111_v15 = vadd.f32 %v9601_v41, %v5047_v30 }
 0x6f3   : > { %5165 = vst.msk [vmem:[%s9610_s23 + $0x20] sm:$0xff] %vm1457_vm6, %v5151_v8  ;;  %vm5126_vm14 = vcmp.gt.f32.partialorder %v5112_v26, 0.0  ;;  %v5140_v4 = vmul.f32 0.01, %v5112_v26 }
 0x6f4   : > { %vm5125_vm15 = vcmp.gt.f32.partialorder %v5111_v15, 0.0  ;;  %v5139_v62 = vmul.f32 0.01, %v5111_v15  ;;  %v6838_v10 = vpop.f32.mrb[152].mxu1 }
 0x6f5   : > { %v5154_v45 = vsel %vm5126_vm14, %v5112_v26, %v5140_v4  ;;  %v5114_v37 = vadd.f32 %v6838_v10, %v9601_v41  ;;  %v5057_v48 = vpop.f32.mrb[153].mxu1 }
 0x6f6   : > { %5168 = vst.msk [vmem:[%s9610_s23 + $0x38] sm:$0xff] %vm1457_vm6, %v5154_v45  ;;  %v5153_v39 = vsel %vm5125_vm15, %v5111_v15, %v5139_v62  ;;  %v5113_v14 = vadd.f32 %v9601_v41, %v5057_v48 }
 0x6f7   : > { %5167 = vst.msk [vmem:[%s9610_s23 + $0x30] sm:$0xff] %vm1457_vm6, %v5153_v39  ;;  %vm5128_vm4 = vcmp.gt.f32.partialorder %v5114_v37, 0.0  ;;  %v5142_v58 = vmul.f32 0.01, %v5114_v37 }
 0x6f8   : > { %vm5127_vm5 = vcmp.gt.f32.partialorder %v5113_v14, 0.0  ;;  %v5141_v40 = vmul.f32 0.01, %v5113_v14  ;;  %v6841_v51 = vpop.f32.mrb[154].mxu1 }
 0x6f9   : > { %v5156_v61 = vsel %vm5128_vm4, %v5114_v37, %v5142_v58  ;;  %v5116_v59 = vadd.f32 %v6841_v51, %v9601_v41  ;;  %v5067_v16 = vpop.f32.mrb[155].mxu1 }
 0x6fa   : > { %5170 = vst.msk [vmem:[%s9610_s23 + $0x48] sm:$0xff] %vm1457_vm6, %v5156_v61  ;;  %v5155_v36 = vsel %vm5127_vm5, %v5113_v14, %v5141_v40  ;;  %v5115_v11 = vadd.f32 %v9601_v41, %v5067_v16 }
 0x6fb   : > { %5169 = vst.msk [vmem:[%s9610_s23 + $0x40] sm:$0xff] %vm1457_vm6, %v5155_v36  ;;  %vm5130_vm7 = vcmp.gt.f32.partialorder %v5116_v59, 0.0  ;;  %v5144_v6 = vmul.f32 0.01, %v5116_v59 }
 0x6fc   : > { %vm5129_vm8 = vcmp.gt.f32.partialorder %v5115_v11, 0.0  ;;  %v5143_v27 = vmul.f32 0.01, %v5115_v11  ;;  %v6844_v47 = vpop.f32.mrb[156].mxu1 }
 0x6fd   : > { %v5158_v44 = vsel %vm5130_vm7, %v5116_v59, %v5144_v6  ;;  %v5118_v42 = vadd.f32 %v6844_v47, %v9601_v41  ;;  %v5077_v12 = vpop.f32.mrb[157].mxu1 }
 0x6fe   : > { %5172 = vst.msk [vmem:[%s9610_s23 + $0x58] sm:$0xff] %vm1457_vm6, %v5158_v44  ;;  %v5157_v17 = vsel %vm5129_vm8, %v5115_v11, %v5143_v27  ;;  %v5117_v20 = vadd.f32 %v9601_v41, %v5077_v12 }
 0x6ff   : > { %5171 = vst.msk [vmem:[%s9610_s23 + $0x50] sm:$0xff] %vm1457_vm6, %v5157_v17  ;;  %vm5132_vm9 = vcmp.gt.f32.partialorder %v5118_v42, 0.0  ;;  %v5146_v3 = vmul.f32 0.01, %v5118_v42 }
 0x700   : > { %vm5131_vm10 = vcmp.gt.f32.partialorder %v5117_v20, 0.0  ;;  %v5145_v60 = vmul.f32 0.01, %v5117_v20 }
 0x701   : > { %v5160_v5 = vsel %vm5132_vm9, %v5118_v42, %v5146_v3 }
 0x702   : > { %5174 = vst.msk [vmem:[%s9610_s23 + $0x68] sm:$0xff] %vm1457_vm6, %v5160_v5  ;;  %v5159_v22 = vsel %vm5131_vm10, %v5117_v20, %v5145_v60 }
 0x703   : > { %5173 = vst.msk [vmem:[%s9610_s23 + $0x60] sm:$0xff] %vm1457_vm6, %v5159_v22 }
 0x704 PF: > { %s25_s13 = sadd.s32 1, %s7374_s13  }
 0x705   : > { %p22_p9 = scmp.ge.s32.totalorder %s25_s13, 4  }
 0x707   :  { %24 = sbr.rel (!%p22_p9) target bundleno = 4 (0x4), region = 142 }
 0x70e   :  { %5212 = vsyncpa [#allocation3], 1 }
 0x70f   :  { %5214 = vsyncpa [#allocation3 + $0x1], 1 }
 0x710   :  { %5215 = vsyncpa [#allocation5], 1 }
 0x711   :  { %5216 = vsyncpa [#allocation8], 1 }
 0x712   :  { %5217 = vsyncpa [#allocation11], 1 }

// kernel: forward.3
= control target key start
LH: loop header
LB: loop body
LE: loop exit
PB: predicated region body
PF: predicated region fallthrough
CT: control target
= control target key end

     0   :  { %s14437_s0 = inlined_call_operand.vmem [shape: f32[2,3584], index: 0, kind: input, shape index: {}]   ;;  %s14438_s1 = inlined_call_operand.hbm [shape: f32[2,512], index: 1, kind: input, shape index: {}]   ;;  %s14439_s2 = inlined_call_operand.hbm [shape: f32[2,512], index: 2, kind: input, shape index: {}]   ;;  %s14440_s3 = inlined_call_operand.hbm [shape: bf16[3584,2048], index: 3, kind: input, shape index: {}]   ;;  %s14441_s4 = inlined_call_operand.hbm [shape: bf16[512,2048], index: 4, kind: input, shape index: {}]   ;;  %s14442_s5 = inlined_call_operand.hbm [shape: f32[1,2048], index: 5, kind: input, shape index: {}]   ;;  %s14443_s6 = inlined_call_operand.hbm [shape: bf16[512,256], index: 6, kind: input, shape index: {}]   ;;  %s14444_s7 = inlined_call_operand.hbm [shape: f32[1,256], index: 7, kind: input, shape index: {}]   ;;  %s14445_s8 = inlined_call_operand.vmem [shape: f32[256,9], index: 8, kind: input, shape index: {}]   ;;  %s14446_s9 = inlined_call_operand.hbm [shape: f32[1,9], index: 9, kind: input, shape index: {}]   ;;  %s14447_s10 = inlined_call_operand.hbm [shape: f32[2,8], index: 10, kind: output, shape index: {0}]   ;;  %s14448_s11 = inlined_call_operand.hbm [shape: f32[2,512], index: 11, kind: output, shape index: {1}]   ;;  %s14449_s12 = inlined_call_operand.hbm [shape: f32[2,512], index: 12, kind: output, shape index: {2}]  }
   0x1   :  { %14475 = sst [smem:[#allocation31_spill]] %s14437_s0 }
   0x2   :  { %14476 = sst [smem:[#allocation32_spill]] %s14438_s1 }
   0x3   :  { %14477 = sst [smem:[#allocation33_spill]] %s14440_s3 }
   0x4   :  { %14478 = sst [smem:[#allocation34_spill]] %s14445_s8 }
   0x5   :  { %14479 = sst [smem:[#allocation35_spill]] %s14447_s10 }
   0x6   :  { %14480 = sst [smem:[#allocation36_spill]] %s14448_s11 }
   0x7   :  { %14481 = sst [smem:[#allocation37_spill]] %s14449_s12 }
   0x8   :  { %18 = vsyncpa [#allocation4], 0 }
   0x9   :  { %19 = vsyncpa [#allocation7], 0 }
   0xa   :  { %20 = vsyncpa [#allocation13], 0 }
   0xb   :  { %21 = vsyncpa [#allocation5], 0 }
   0xc   :  { %22 = vsyncpa [#allocation17], 0  ;;  %s12599_s21 = smov 0   ;;  %s12601_s22 = smov 0  }
   0xd   :  { %s12603_s23 = smov 0   ;;  %s12605_s24 = smov 0  }
   0xe LB: > { %14482 = sst [smem:[#allocation26_spill]] %s12505_s22  ;;  %s12618_s25 = sadd.s32 4294967295, %s12513_s24   ;;  %s12513_s24 = sphi %s12605_s24, %s14526_s24   ;;  %s12509_s23 = sphi %s12603_s23, %s14529_s23   ;;  %s12505_s22 = sphi %s12601_s22, %s14528_s22   ;;  %s12501_s21 = sphi %s12599_s21, %s14527_s21  }
   0xf   : > { %14483 = sst [smem:[#allocation27_spill]] %s12509_s23  ;;  %p111_p0 = scmp.ne.s32.totalorder %s12505_s22, %s12501_s21 }
  0x10   : > { %p14452_p1 = scmp.eq.s32.totalorder %s12618_s25, 0  ;;  %p9154_p2 = scmp.ge.s32.totalorder %s12513_s24, 1 }
  0x11   : > { %p321_p3 = scmp.lt.s32.totalorder %s12513_s24, 5  ;;  %s12515_s28 = smov [#allocation3]  }
  0x12   : > { %p12626_p4 = por %p14452_p1, %p111_p0  ;;  %s337_s29 = sshll.u32 %s12515_s28, 4  ;;  %s338_s29 = int_to_ptr.vmem [resolvable:$true] %s337_s29 }
  0x13   : > { %p12630_p5 = pnand %p9154_p2, %p321_p3  ;;  %s12637_s30 = sadd.s32 1, %s12513_s24  }
  0x14   : > { %s14484_s26 = scalar_select %p12626_p4, 1, 0 }
  0x15   : > { %s14486_s27 = scalar_select %p12630_p5, 1, 0 }
  0x16   : > { %14485 = sst [smem:[#allocation28_spill]] %s14484_s26  ;;  %p10397_p6 = pneg %p12630_p5 }
  0x17   : > { %14487 = sst [smem:[#allocation29_spill]] %s12637_s30  ;;  %s95_s14 = ssub.s32 %s12513_s24, %s12637_s30 }
  0x18   : > { %p12641_p7 = pnand %p10397_p6, %p14452_p1  ;;  %p12647_p8 = scmp.eq.s32.totalorder %s95_s14, 0 }
  0x19   : > { %s98_s16 = sadd.s32 1, %s12509_s23  ;;  %s14490_s1 = sld [smem:[#allocation32_spill]] }
  0x1a   : > { %s14488_s13 = scalar_select %p12641_p7, 1, 0 }
  0x1b   : > { %s14489_s15 = scalar_select %p12647_p8, 1, 0 }
  0x1c   : > { %p12662_p11 = pneg %p12641_p7 }
  0x1e   : > { %s14491_s28 = scalar_select %p12662_p11, 1, 0 }
  0x1f   : > { %s12147_s19 = scalar_lea.hbm %s14490_s1, 128 }
  0x20   : > { %p12148_p10 = scmp.ne.s32.totalorder %s14490_s1, %s12147_s19  ;;  %p12154_p0 = scmp.lt.u32.totalorder %s12147_s19, %s14490_s1 }
  0x22   : > { %p12150_p12 = pnand %p12662_p11, %p12148_p10 }
  0x24   : > { %p12151_p13 = pneg %p12150_p12 }
  0x26   : > { %p12156_p2 = pnand %p12154_p0, %p12151_p13 }
  0x28   : > { %12159 = shalt.err (!%p12156_p2)
}
  0x29   : > { %s12160_s17 = scalar_lea.vmem %s338_s29, 128  ;;  %p12168_p9 = scmp.lt.s32.totalorder %s338_s29, %s338_s29 }
  0x2a   : > { %p12161_p3 = scmp.ne.s32.totalorder %s338_s29, %s12160_s17  ;;  %p12169_p4 = scmp.lt.s32.totalorder %s12160_s17, %s12160_s17 }
  0x2c   : > { %p12163_p6 = pnand %p12161_p3, %p12662_p11  ;;  %p12170_p5 = por %p12169_p4, %p12168_p9 }
  0x2e   : > { %p12164_p1 = pneg %p12163_p6 }
  0x30   : > { %p12171_p8 = pnand %p12170_p5, %p12164_p1 }
  0x32   : > { %12174 = shalt.err (!%p12171_p8)
}
  0x33   : > { %10400 = dma.hbm_to_vmem [thread:$0]  (!%p12641_p7), %s14490_s1, 128, %s338_s29, [#allocation4]  }
  0x34   : > { %p14492_p10 = scmp.ne.s32.totalorder %s14489_s15, 0  ;;  %p106_p1 = scmp.eq.s32.totalorder %s12513_s24, 0 }
  0x35   : > { %p10428_p4 = scmp.lt.s32.totalorder %s12513_s24, 4  ;;  %s397_s19 = sand.u32 1, %s12513_s24  }
  0x36   : > { %s12681_s30 = scalar_select %p14492_p10, %s12509_s23, %s98_s16  }
  0x37   : > { %s12687_s21 = sand.u32 1, %s12509_s23   ;;  %p14494_p5 = scmp.ne.s32.totalorder %s12509_s23, %s12505_s22 }
  0x38   : > { %14493 = sst [smem:[#allocation30_spill]] %s12681_s30  ;;  %s10355_s14 = smul.u32 7168, %s12687_s21 }
  0x39   : > { %p107_p8 = por %p106_p1, %p14494_p5  ;;  %s14456_s17 = sshll.u32 %s12513_s24, 8 }
  0x3a   : > { %s14495_s3 = sld [smem:[#allocation33_spill]]  ;;  %s401_s15 = scalar_lea.vmem [#allocation8], %s10355_s14 }
  0x3b   : > { %p12701_p9 = pnand %p10428_p4, %p107_p8  ;;  %s408_s16 = sshll.u32 %s401_s15, 4  ;;  %s12705_s16 = int_to_ptr.vmem [resolvable:$true] %s408_s16 }
  0x3c   : > { %s12707_s1 = scalar_lea.sflag [#allocation4], %s397_s19 }
  0x3d   : > { %s14496_s29 = scalar_select %p12701_p9, 1, 0 }
  0x3e   : > { %p12713_p13 = pneg %p12701_p9 }
  0x40   : > { %s12699_s12 = scalar_lea.hbm %s14495_s3, %s14456_s17  ;;  %s12180_s14 = scalar_lea.hbm %s14495_s3, 458752 }
  0x41   : > { %s12175_s30 = scalar_lea.hbm %s12699_s12, 114688  ;;  %p12181_p3 = scmp.lt.u32.totalorder %s12699_s12, %s14495_s3 }
  0x42   : > { %p12176_p12 = scmp.ne.s32.totalorder %s12699_s12, %s12175_s30  ;;  %p12182_p6 = scmp.lt.u32.totalorder %s12180_s14, %s12175_s30 }
  0x43   : > { %s14497_s18 = scalar_select %p12713_p13, 1, 0 }
  0x44   : > { %p12178_p0 = pnand %p12713_p13, %p12176_p12  ;;  %p12183_p10 = por %p12182_p6, %p12181_p3 }
  0x45   : > { %p12184_p1 = scmp.lt.u32.totalorder %s12175_s30, %s12699_s12 }
  0x46   : > { %p12179_p2 = pneg %p12178_p0 }
  0x47   : > { %p12185_p4 = por %p12184_p1, %p12183_p10 }
  0x49   : > { %p12186_p5 = pnand %p12185_p4, %p12179_p2 }
  0x4b   : > { %12189 = shalt.err (!%p12186_p5)
}
  0x4c   : > { %s12190_s19 = scalar_lea.vmem %s12705_s16, 114688  ;;  %s12516_s17 = smov [#allocation8]  }
  0x4d   : > { %p12191_p8 = scmp.ne.s32.totalorder %s12705_s16, %s12190_s19  ;;  %s12195_s20 = sshll.u32 %s12516_s17, 4  ;;  %s12196_s20 = int_to_ptr.vmem [resolvable:$false] %s12195_s20 }
  0x4e   : > { %s12197_s23 = scalar_lea.vmem %s12196_s20, 229376  ;;  %p12198_p7 = scmp.lt.s32.totalorder %s12705_s16, %s12196_s20 }
  0x4f   : > { %p12193_p12 = pnand %p12191_p8, %p12713_p13  ;;  %p12199_p11 = scmp.lt.s32.totalorder %s12197_s23, %s12190_s19 }
  0x51   : > { %p12194_p0 = pneg %p12193_p12  ;;  %p12200_p3 = por %p12199_p11, %p12198_p7 }
  0x53   : > { %p12201_p6 = pnand %p12200_p3, %p12194_p0 }
  0x55   : > { %12204 = shalt.err (!%p12201_p6)
}
  0x56   : > { %s12517_s30 = smov 1024   ;;  %s12518_s14 = smov 256  }
  0x57   : > { %s12519_s15 = smov 16   ;;  %s12520_s17 = smov [#allocation6]  }
  0x58   : > { %10416 = dma.hbm_to_vmem [thread:$0]  (!%p12701_p9), %s12699_s12, 114688, %s12705_s16, %s12707_s1, %s12517_s30, %s12518_s14, %s12519_s15  }
  0x59   : > { %s348_s3 = sshll.u32 %s12520_s17, 4  ;;  %s12521_s19 = smov [#allocation12]   ;;  %s349_s3 = int_to_ptr.vmem [resolvable:$true] %s348_s3 }
  0x5a   : > { %s372_s20 = sshll.u32 %s12521_s19, 4  ;;  %s12205_s11 = scalar_lea.hbm %s14439_s2, 128  ;;  %s373_s20 = int_to_ptr.vmem [resolvable:$true] %s372_s20 }
  0x5b   : > { %p12206_p7 = scmp.ne.s32.totalorder %s14439_s2, %s12205_s11  ;;  %p14498_p11 = scmp.ne.s32.totalorder %s14491_s28, 0 }
  0x5c   : > { %p12212_p1 = scmp.lt.u32.totalorder %s12205_s11, %s14439_s2 }
  0x5d   : > { %p12208_p2 = pnand %p12206_p7, %p14498_p11 }
  0x5f   : > { %p12209_p10 = pneg %p12208_p2 }
  0x61   : > { %p12214_p4 = pnand %p12212_p1, %p12209_p10 }
  0x63   : > { %12217 = shalt.err (!%p12214_p4)
}
  0x64   : > { %s12218_s12 = scalar_lea.vmem %s349_s3, 128  ;;  %p12226_p0 = scmp.lt.s32.totalorder %s349_s3, %s349_s3 }
  0x65   : > { %p12219_p5 = scmp.ne.s32.totalorder %s349_s3, %s12218_s12  ;;  %p12227_p3 = scmp.lt.s32.totalorder %s12218_s12, %s12218_s12 }
  0x67   : > { %p12221_p8 = pnand %p12219_p5, %p14498_p11  ;;  %p12228_p6 = por %p12227_p3, %p12226_p0 }
  0x69   : > { %p12222_p12 = pneg %p12221_p8 }
  0x6b   : > { %p12229_p9 = pnand %p12228_p6, %p12222_p12 }
  0x6d   : > { %12232 = shalt.err (!%p12229_p9)
}
  0x6e   : > { %p14499_p7 = scmp.ne.s32.totalorder %s14488_s13, 0  ;;  %s9163_s10 = sshll.u32 %s12687_s21, 10 }
  0x6f   : > { %s12233_s26 = scalar_lea.hbm %s14444_s7, 32 }
  0x70   : > { %10403 = dma.hbm_to_vmem [thread:$0]  (!%p14499_p7), %s14439_s2, 128, %s349_s3, [#allocation7]  }
  0x71   : > { %p12234_p2 = scmp.ne.s32.totalorder %s14444_s7, %s12233_s26  ;;  %p12240_p1 = scmp.lt.u32.totalorder %s12233_s26, %s14444_s7 }
  0x73   : > { %p12236_p9 = pnand %p12234_p2, %p14498_p11 }
  0x75   : > { %p12237_p10 = pneg %p12236_p9 }
  0x77   : > { %p12242_p4 = pnand %p12240_p1, %p12237_p10 }
  0x79   : > { %12245 = shalt.err (!%p12242_p4)
}
  0x7a   : > { %s12246_s3 = scalar_lea.vmem %s373_s20, 32  ;;  %p12254_p0 = scmp.lt.s32.totalorder %s373_s20, %s373_s20 }
  0x7b   : > { %p12247_p5 = scmp.ne.s32.totalorder %s373_s20, %s12246_s3  ;;  %p12255_p3 = scmp.lt.s32.totalorder %s12246_s3, %s12246_s3 }
  0x7d   : > { %p12249_p8 = pnand %p12247_p5, %p14498_p11  ;;  %p12256_p6 = por %p12255_p3, %p12254_p0 }
  0x7f   : > { %p12250_p12 = pneg %p12249_p8 }
  0x81   : > { %p12257_p13 = pnand %p12256_p6, %p12250_p12 }
  0x83   : > { %12260 = shalt.err (!%p12257_p13)
}
  0x84   : > { %10409 = dma.hbm_to_vmem [thread:$0]  (!%p14499_p7), %s14444_s7, 32, %s373_s20, [#allocation13]  }
  0x85   : > { %s14500_s8 = sshll.u32 %s12513_s24, 8  ;;  %s422_s16 = scalar_lea.vmem [#allocation9], %s9163_s10 }
  0x86   : > { %s12782_s26 = scalar_lea.hbm %s14441_s4, %s14500_s8  ;;  %s429_s17 = sshll.u32 %s422_s16, 4  ;;  %s12784_s17 = int_to_ptr.vmem [resolvable:$true] %s429_s17 }
  0x87   : > { %s12522_s19 = smov [#allocation11]   ;;  %s12261_s3 = scalar_lea.hbm %s12782_s26, 16384 }
  0x88   : > { %s12786_s23 = sshll.u32 %s12522_s19, 4  ;;  %p12262_p13 = scmp.ne.s32.totalorder %s12782_s26, %s12261_s3  ;;  %s359_s23 = int_to_ptr.vmem [resolvable:$true] %s12786_s23 }
  0x89   : > { %p14501_p2 = scmp.ne.s32.totalorder %s14497_s18, 0  ;;  %s12266_s0 = scalar_lea.hbm %s14441_s4, 65536 }
  0x8a   : > { %p12267_p1 = scmp.lt.u32.totalorder %s12782_s26, %s14441_s4  ;;  %p12268_p4 = scmp.lt.u32.totalorder %s12266_s0, %s12261_s3 }
  0x8b   : > { %p12264_p9 = pnand %p12262_p13, %p14501_p2  ;;  %p12270_p8 = scmp.lt.u32.totalorder %s12261_s3, %s12782_s26 }
  0x8c   : > { %p12269_p5 = por %p12268_p4, %p12267_p1 }
  0x8d   : > { %p12265_p10 = pneg %p12264_p9 }
  0x8e   : > { %p12271_p12 = por %p12270_p8, %p12269_p5 }
  0x90   : > { %p12272_p0 = pnand %p12271_p12, %p12265_p10 }
  0x92   : > { %12275 = shalt.err (!%p12272_p0)
}
  0x93   : > { %s12276_s10 = scalar_lea.vmem %s12784_s17, 16384  ;;  %s12523_s22 = smov [#allocation9]  }
  0x94   : > { %p12277_p3 = scmp.ne.s32.totalorder %s12784_s17, %s12276_s10  ;;  %s12281_s16 = sshll.u32 %s12523_s22, 4  ;;  %s12282_s16 = int_to_ptr.vmem [resolvable:$false] %s12281_s16 }
  0x95   : > { %s12283_s19 = scalar_lea.vmem %s12282_s16, 32768  ;;  %p12284_p9 = scmp.lt.s32.totalorder %s12784_s17, %s12282_s16 }
  0x96   : > { %p12279_p6 = pnand %p12277_p3, %p14501_p2  ;;  %p12285_p7 = scmp.lt.s32.totalorder %s12283_s19, %s12276_s10 }
  0x98   : > { %p12280_p13 = pneg %p12279_p6  ;;  %p12286_p1 = por %p12285_p7, %p12284_p9 }
  0x9a   : > { %p12287_p4 = pnand %p12286_p1, %p12280_p13 }
  0x9c   : > { %12290 = shalt.err (!%p12287_p4)
}
  0x9d   : > { %p14502_p10 = scmp.ne.s32.totalorder %s14496_s29, 0  ;;  %s12291_s12 = scalar_lea.hbm %s14443_s6, 8192 }
  0x9e   : > { %p12292_p7 = scmp.ne.s32.totalorder %s14443_s6, %s12291_s12  ;;  %p12298_p12 = scmp.lt.u32.totalorder %s12291_s12, %s14443_s6 }
  0x9f   : > { %10419 = dma.hbm_to_vmem [thread:$0]  (!%p14502_p10), %s12782_s26, 16384, %s12784_s17, %s12707_s1, %s12517_s30, %s12518_s14, %s12519_s15  }
  0xa0   : > { %p12294_p5 = pnand %p12292_p7, %p14498_p11 }
  0xa2   : > { %p12295_p8 = pneg %p12294_p5 }
  0xa4   : > { %p12300_p0 = pnand %p12298_p12, %p12295_p8 }
  0xa6   : > { %12303 = shalt.err (!%p12300_p0)
}
  0xa7   : > { %s12304_s22 = scalar_lea.vmem %s359_s23, 8192  ;;  %p12312_p9 = scmp.lt.s32.totalorder %s359_s23, %s359_s23 }
  0xa8   : > { %p12305_p3 = scmp.ne.s32.totalorder %s359_s23, %s12304_s22  ;;  %p12313_p1 = scmp.lt.s32.totalorder %s12304_s22, %s12304_s22 }
  0xaa   : > { %p12307_p6 = pnand %p12305_p3, %p14498_p11  ;;  %p12314_p4 = por %p12313_p1, %p12312_p9 }
  0xac   : > { %p12308_p13 = pneg %p12307_p6 }
  0xae   : > { %p12315_p10 = pnand %p12314_p4, %p12308_p13 }
  0xb0   : > { %12318 = shalt.err (!%p12315_p10)
}
  0xb1   : > { %s12524_s30 = smov 128   ;;  %s12525_s14 = smov 8  }
  0xb2   : > { %p14503_p7 = scmp.ne.s32.totalorder %s14488_s13, 0  ;;  %s12526_s17 = smov [#allocation14]  }
  0xb3   : > { %s386_s16 = sshll.u32 %s12526_s17, 4  ;;  %s9166_s19 = sshll.u32 %s12687_s21, 2  ;;  %s387_s16 = int_to_ptr.vmem [resolvable:$true] %s386_s16 }
  0xb4   : > { %10406 = dma.hbm_to_vmem [thread:$0]  (!%p14503_p7), %s14443_s6, 8192, %s359_s23, [#allocation7], %s12524_s30, %s12524_s30, %s12525_s14  }
  0xb5   : > { %s12319_s12 = scalar_lea.hbm %s14446_s9, 16 }
  0xb6   : > { %p12320_p10 = scmp.ne.s32.totalorder %s14446_s9, %s12319_s12  ;;  %p12326_p12 = scmp.lt.u32.totalorder %s12319_s12, %s14446_s9 }
  0xb8   : > { %p12322_p5 = pnand %p12320_p10, %p14498_p11 }
  0xba   : > { %p12323_p8 = pneg %p12322_p5 }
  0xbc   : > { %p12328_p0 = pnand %p12326_p12, %p12323_p8 }
  0xbe   : > { %12331 = shalt.err (!%p12328_p0)
}
  0xbf   : > { %s12332_s23 = scalar_lea.vmem %s387_s16, 16  ;;  %s12339_s21 = scalar_lea.vmem %s387_s16, 32 }
  0xc0   : > { %p12333_p3 = scmp.ne.s32.totalorder %s387_s16, %s12332_s23  ;;  %p12340_p9 = scmp.lt.s32.totalorder %s387_s16, %s387_s16 }
  0xc1   : > { %p12341_p1 = scmp.lt.s32.totalorder %s12339_s21, %s12332_s23 }
  0xc2   : > { %p12335_p6 = pnand %p12333_p3, %p14498_p11 }
  0xc3   : > { %p12342_p4 = por %p12341_p1, %p12340_p9 }
  0xc4   : > { %p12336_p13 = pneg %p12335_p6 }
  0xc6   : > { %p12343_p2 = pnand %p12342_p4, %p12336_p13 }
  0xc8   : > { %12346 = shalt.err (!%p12343_p2)
}
  0xc9   : > { %10412 = dma.hbm_to_vmem [thread:$0]  (!%p14503_p7), %s14446_s9, 16, %s387_s16, [#allocation13]  }
  0xca   : > { %s10282_s14 = sshll.u32 %s12513_s24, 6  ;;  %s443_s15 = scalar_lea.vmem [#allocation10], %s9166_s19 }
  0xcb   : > { %s451_s26 = sshll.u32 %s443_s15, 4  ;;  %s449_s3 = scalar_lea.hbm %s14442_s5, %s10282_s14  ;;  %s452_s26 = int_to_ptr.vmem [resolvable:$true] %s451_s26 }
  0xcc   : > { %s12347_s20 = scalar_lea.hbm %s449_s3, 64  ;;  %p14504_p10 = scmp.ne.s32.totalorder %s14497_s18, 0 }
  0xcd   : > { %p12348_p11 = scmp.ne.s32.totalorder %s449_s3, %s12347_s20  ;;  %s12352_s0 = scalar_lea.hbm %s14442_s5, 256 }
  0xce   : > { %p12353_p7 = scmp.lt.u32.totalorder %s449_s3, %s14442_s5  ;;  %p12354_p8 = scmp.lt.u32.totalorder %s12352_s0, %s12347_s20 }
  0xcf   : > { %p12350_p2 = pnand %p12348_p11, %p14504_p10  ;;  %p12356_p0 = scmp.lt.u32.totalorder %s12347_s20, %s449_s3 }
  0xd0   : > { %p12355_p12 = por %p12354_p8, %p12353_p7 }
  0xd1   : > { %p12351_p5 = pneg %p12350_p2 }
  0xd2   : > { %p12357_p3 = por %p12356_p0, %p12355_p12 }
  0xd4   : > { %p12358_p6 = pnand %p12357_p3, %p12351_p5 }
  0xd6   : > { %12361 = shalt.err (!%p12358_p6)
}
  0xd7   : > { %s12362_s24 = scalar_lea.vmem %s452_s26, 64  ;;  %s12527_s16 = smov [#allocation10]  }
  0xd8   : > { %p12363_p13 = scmp.ne.s32.totalorder %s452_s26, %s12362_s24  ;;  %s12367_s19 = sshll.u32 %s12527_s16, 4  ;;  %s12368_s19 = int_to_ptr.vmem [resolvable:$false] %s12367_s19 }
  0xd9   : > { %s12369_s10 = scalar_lea.vmem %s12368_s19, 128  ;;  %p12370_p4 = scmp.lt.s32.totalorder %s452_s26, %s12368_s19 }
  0xda   : > { %p12365_p9 = pnand %p12363_p13, %p14504_p10  ;;  %p12371_p11 = scmp.lt.s32.totalorder %s12369_s10, %s12362_s24 }
  0xdc   : > { %p12366_p1 = pneg %p12365_p9  ;;  %p12372_p2 = por %p12371_p11, %p12370_p4 }
  0xde   : > { %p12373_p7 = pnand %p12372_p2, %p12366_p1 }
  0xe0   : > { %12376 = shalt.err (!%p12373_p7)
}
  0xe1   : > { %p14505_p8 = scmp.ne.s32.totalorder %s14496_s29, 0  ;;  %p14506_p5 = scmp.ne.s32.totalorder %s14486_s27, 0 }
  0xe2   : > { %p14507_p12 = scmp.eq.s32.totalorder (!%p14506_p5), %s12618_s25, 0 }
  0xe3   : > { %10422 = dma.hbm_to_vmem [thread:$0]  (!%p14505_p8), %s449_s3, 64, %s452_s26, %s12707_s1  }
  0xe4   : > { %460 = sbr.rel (%p14506_p5) target bundleno = 2538 (0x9ea), region = 60 }
  0xeb   : > { %12472 = dma.done.wait (%p14507_p12), [#allocation4], 128   ;;  %p14508_p10 = pmov %p14507_p12 }
  0xed   : > { %12474 = vsyncadd (%p14508_p10), [#allocation4], 4294967168  ;;  %p14509_p0 = pmov %p14508_p10 }
  0xef   : > { %12476 = dma.done.wait (%p14509_p0), [#allocation7], 128   ;;  %p14510_p3 = pmov %p14509_p0 }
  0xf0   : > { %s14511_s18 = sld [smem:[#allocation26_spill]]  ;;  %s14512_s29 = sld [smem:[#allocation28_spill]] }
  0xf1   : > { %12478 = vsyncadd (%p14510_p3), [#allocation7], 4294967168  ;;  %s470_s23 = sand.u32 1, %s12618_s25  }
  0xf2   : > { %s471_s27 = scalar_lea.sflag [#allocation4], %s470_s23 }
  0xf6   : > { %s472_s1 = sand.u32 1, %s14511_s18   ;;  %p14513_p6 = scmp.ne.s32.totalorder %s14512_s29, 0 }
  0xf7   : > { %s10356_s21 = smul.u32 7168, %s472_s1 }
  0xf9   : > { %s12880_s22 = scalar_lea.vmem [#allocation8], %s10356_s21 }
  0xfa   : > { %12480 = dma.done.wait (%p14513_p6), %s471_s27, 131136  }
  0xfb   : > { %12482 = vsyncadd (%p14513_p6), %s471_s27, 4294836160  ;;  %s9172_s30 = sshll.u32 %s472_s1, 10  ;;  %s9173_s14 = sshll.u32 %s472_s1, 2 }
  0xfc   : > { %s12886_s15 = scalar_lea.vmem [#allocation9], %s9172_s30  ;;  %s12888_s26 = scalar_lea.vmem [#allocation10], %s9173_s14 }
  0xfd   : > { %p14514_p13 = pmov %p14509_p0 }
  0xfe   : > { %p14515_p9 = pmov %p14509_p0 }
  0xff   : > { %12484 = dma.done.wait (%p14514_p13), [#allocation7], 8192  }
 0x100   : > { %12486 = vsyncadd (%p14515_p9), [#allocation7], 4294959104  ;;  %p14516_p1 = pmov %p14509_p0 }
 0x101   : > { %p14517_p4 = pmov %p14509_p0 }
 0x102   : > { %12488 = dma.done.wait (%p14516_p1), [#allocation13], 48  }
 0x103   : > { %12490 = vsyncadd (%p14517_p4), [#allocation13], 4294967248  ;;  %v10488_v0 = vld [vmem:[%s12886_s15 + $0x4] ss:$16 sps:$4 sm:$0xff]   ;;  %v10492_v2 = vld [vmem:[%s12886_s15] ss:$16 sps:$4 sm:$0xff]   ;;  %v571_v38 = vlaneseq }
 0x104   : > { %v10490_v1 = vld [vmem:[%s12886_s15 + $0x204] ss:$16 sps:$4 sm:$0xff]   ;;  %2433 = vmatprep.subr.bf16.mxu0 %v10488_v0  ;;  %v10493_v3 = vld [vmem:[%s12886_s15 + $0x200] ss:$16 sps:$4 sm:$0xff]   ;;  %v12528_v36 = vmov 1983009808  }
 0x105   : > { %2474 = vmatprep.subr.bf16.mxu1 %v10490_v1  ;;  %v10494_v4 = vld [vmem:[%s12886_s15 + $0x24] ss:$16 sps:$4 sm:$0xff]   ;;  %2434 = vmatpush1.bf16.msra.mxu0 %v10492_v2  ;;  %v10498_v6 = vld [vmem:[%s12886_s15 + $0x20] ss:$16 sps:$4 sm:$0xff]   ;;  %v569_v37 = vunpack.c.l.s4 %v12528_v36  ;;  %v12937_v43 = vshrl.u32 %v571_v38, 7  ;;  %s14518_s3 = sld [smem:[#allocation31_spill]] }
 0x106   : > { %2475 = vmatpush1.bf16.msra.mxu1 %v10493_v3  ;;  %v10496_v5 = vld [vmem:[%s12886_s15 + $0x224] ss:$16 sps:$4 sm:$0xff]   ;;  %2435 = vmatprep.subr.bf16.mxu0 %v10494_v4  ;;  %v10499_v7 = vld [vmem:[%s12886_s15 + $0x220] ss:$16 sps:$4 sm:$0xff]   ;;  %v10617_v36 = vld [vmem:[%s12886_s15 + $0xac] ss:$16 sps:$4 sm:$0xff]  }
 0x107   : > { %2476 = vmatprep.subr.bf16.mxu1 %v10496_v5  ;;  %v10500_v8 = vld [vmem:[%s12886_s15 + $0x44] ss:$16 sps:$4 sm:$0xff]   ;;  %v10504_v10 = vld [vmem:[%s12886_s15 + $0x40] ss:$16 sps:$4 sm:$0xff]   ;;  %v570_v42 = vunpack.c.0.s8 %v569_v37  ;;  %v10620_v37 = vld [vmem:[%s12886_s15 + $0x2ac] ss:$16 sps:$4 sm:$0xff]  }
 0x108   : > { %v10502_v9 = vld [vmem:[%s12886_s15 + $0x244] ss:$16 sps:$4 sm:$0xff]   ;;  %v10505_v11 = vld [vmem:[%s12886_s15 + $0x240] ss:$16 sps:$4 sm:$0xff]   ;;  %v10615_v38 = vld [vmem:[%s12886_s15 + $0xa8] ss:$16 sps:$4 sm:$0xff]  }
 0x109   : > { %2436 = vmatpush1.bf16.msra.mxu0 %v10498_v6  ;;  %v10506_v12 = vld [vmem:[%s12886_s15 + $0x64] ss:$16 sps:$4 sm:$0xff]   ;;  %v10510_v14 = vld [vmem:[%s12886_s15 + $0x60] ss:$16 sps:$4 sm:$0xff]   ;;  %v12945_v49 = vsub.s32 %v570_v42, %v12937_v43  ;;  %v10621_v42 = vld [vmem:[%s12886_s15 + $0xc8] ss:$16 sps:$4 sm:$0xff]  }
 0x10a   : > { %2477 = vmatpush1.bf16.msra.mxu1 %v10499_v7  ;;  %2437 = vmatprep.subr.bf16.mxu0 %v10500_v8  ;;  %v10508_v13 = vld [vmem:[%s12886_s15 + $0x264] ss:$16 sps:$4 sm:$0xff]   ;;  %v10511_v15 = vld [vmem:[%s12886_s15 + $0x260] ss:$16 sps:$4 sm:$0xff]   ;;  %s10283_s23 = sshll.u32 %s12618_s25, 3  ;;  %p10203_p11 = scmp.ne.s32.totalorder %s12618_s25, 3 }
 0x10b   : > { %2478 = vmatprep.subr.bf16.mxu1 %v10502_v9  ;;  %v10512_v16 = vld [vmem:[%s12886_s15 + $0x84] ss:$16 sps:$4 sm:$0xff]   ;;  %v10516_v18 = vld [vmem:[%s12886_s15 + $0x80] ss:$16 sps:$4 sm:$0xff]   ;;  %s8275_s1 = scalar_lea.vmem [#allocation2], %s10283_s23  ;;  %vm8938_vm2 = vcmask (!%p10203_p11), 58368  }
 0x10c   : > { %v10514_v17 = vld [vmem:[%s12886_s15 + $0x284] ss:$16 sps:$4 sm:$0xff]   ;;  %v10517_v19 = vld [vmem:[%s12886_s15 + $0x280] ss:$16 sps:$4 sm:$0xff]  }
 0x10d   : > { %2438 = vmatpush1.bf16.msra.mxu0 %v10504_v10  ;;  %v10518_v20 = vld [vmem:[%s12886_s15 + $0xa4] ss:$16 sps:$4 sm:$0xff]   ;;  %v10522_v22 = vld [vmem:[%s12886_s15 + $0xa0] ss:$16 sps:$4 sm:$0xff]  }
 0x10e   : > { %2479 = vmatpush1.bf16.msra.mxu1 %v10505_v11  ;;  %2439 = vmatprep.subr.bf16.mxu0 %v10506_v12  ;;  %v10520_v21 = vld [vmem:[%s12886_s15 + $0x2a4] ss:$16 sps:$4 sm:$0xff]   ;;  %v10523_v23 = vld [vmem:[%s12886_s15 + $0x2a0] ss:$16 sps:$4 sm:$0xff]  }
 0x10f   : > { %2480 = vmatprep.subr.bf16.mxu1 %v10508_v13  ;;  %v10524_v24 = vld [vmem:[%s12886_s15 + $0xc4] ss:$16 sps:$4 sm:$0xff]   ;;  %v10528_v26 = vld [vmem:[%s12886_s15 + $0xc0] ss:$16 sps:$4 sm:$0xff]  }
 0x110   : > { %v10526_v25 = vld [vmem:[%s12886_s15 + $0x2c4] ss:$16 sps:$4 sm:$0xff]   ;;  %v10529_v27 = vld [vmem:[%s12886_s15 + $0x2c0] ss:$16 sps:$4 sm:$0xff]  }
 0x111   : > { %2440 = vmatpush1.bf16.msra.mxu0 %v10510_v14  ;;  %v10530_v28 = vld [vmem:[%s12886_s15 + $0xe4] ss:$16 sps:$4 sm:$0xff]   ;;  %v10534_v30 = vld [vmem:[%s12886_s15 + $0xe0] ss:$16 sps:$4 sm:$0xff]   ;;  %v10587_v14 = vld [vmem:[%s12886_s15 + $0xc] ss:$16 sps:$4 sm:$0xff]  }
 0x112   : > { %2481 = vmatpush1.bf16.msra.mxu1 %v10511_v15  ;;  %2441 = vmatprep.subr.bf16.mxu0 %v10512_v16  ;;  %v10532_v29 = vld [vmem:[%s12886_s15 + $0x2e4] ss:$16 sps:$4 sm:$0xff]   ;;  %v10535_v31 = vld [vmem:[%s12886_s15 + $0x2e0] ss:$16 sps:$4 sm:$0xff]   ;;  %v10590_v15 = vld [vmem:[%s12886_s15 + $0x20c] ss:$16 sps:$4 sm:$0xff]  }
 0x113   : > { %2482 = vmatprep.subr.bf16.mxu1 %v10514_v17  ;;  %v10536_v32 = vld [vmem:[%s12886_s15 + $0x104] ss:$16 sps:$4 sm:$0xff]   ;;  %v10540_v34 = vld [vmem:[%s12886_s15 + $0x100] ss:$16 sps:$4 sm:$0xff]  }
 0x114   : > { %v10538_v33 = vld [vmem:[%s12886_s15 + $0x304] ss:$16 sps:$4 sm:$0xff]   ;;  %v10541_v35 = vld [vmem:[%s12886_s15 + $0x300] ss:$16 sps:$4 sm:$0xff]  }
 0x115   : > { %2442 = vmatpush1.bf16.msra.mxu0 %v10516_v18  ;;  %v10542_v39 = vld [vmem:[%s12886_s15 + $0x124] ss:$16 sps:$4 sm:$0xff]   ;;  %v10546_v41 = vld [vmem:[%s12886_s15 + $0x120] ss:$16 sps:$4 sm:$0xff]   ;;  %v10585_v18 = vld [vmem:[%s12886_s15 + $0x8] ss:$16 sps:$4 sm:$0xff]  }
 0x116   : > { %2483 = vmatpush1.bf16.msra.mxu1 %v10517_v19  ;;  %2443 = vmatprep.subr.bf16.mxu0 %v10518_v20  ;;  %v10544_v40 = vld [vmem:[%s12886_s15 + $0x324] ss:$16 sps:$4 sm:$0xff]   ;;  %v10547_v44 = vld [vmem:[%s12886_s15 + $0x320] ss:$16 sps:$4 sm:$0xff]   ;;  %v10588_v19 = vld [vmem:[%s12886_s15 + $0x208] ss:$16 sps:$4 sm:$0xff]  }
 0x117   : > { %2484 = vmatprep.subr.bf16.mxu1 %v10520_v21  ;;  %v10548_v45 = vld [vmem:[%s12886_s15 + $0x144] ss:$16 sps:$4 sm:$0xff]   ;;  %v10552_v47 = vld [vmem:[%s12886_s15 + $0x140] ss:$16 sps:$4 sm:$0xff]   ;;  %v10593_v20 = vld [vmem:[%s12886_s15 + $0x2c] ss:$16 sps:$4 sm:$0xff]  }
 0x118   : > { %v10550_v46 = vld [vmem:[%s12886_s15 + $0x344] ss:$16 sps:$4 sm:$0xff]   ;;  %v10553_v48 = vld [vmem:[%s12886_s15 + $0x340] ss:$16 sps:$4 sm:$0xff]   ;;  %v10596_v21 = vld [vmem:[%s12886_s15 + $0x22c] ss:$16 sps:$4 sm:$0xff]  }
 0x119   : > { %2444 = vmatpush1.bf16.msra.mxu0 %v10522_v22  ;;  %v10554_v50 = vld [vmem:[%s12886_s15 + $0x164] ss:$16 sps:$4 sm:$0xff]   ;;  %v10558_v53 = vld [vmem:[%s12886_s15 + $0x160] ss:$16 sps:$4 sm:$0xff]   ;;  %v10591_v22 = vld [vmem:[%s12886_s15 + $0x28] ss:$16 sps:$4 sm:$0xff]  }
 0x11a   : > { %2485 = vmatpush1.bf16.msra.mxu1 %v10523_v23  ;;  %2445 = vmatprep.subr.bf16.mxu0 %v10524_v24  ;;  %v10556_v51 = vld [vmem:[%s12886_s15 + $0x364] ss:$16 sps:$4 sm:$0xff]   ;;  %v10559_v56 = vld [vmem:[%s12886_s15 + $0x360] ss:$16 sps:$4 sm:$0xff]   ;;  %v10594_v23 = vld [vmem:[%s12886_s15 + $0x228] ss:$16 sps:$4 sm:$0xff]  }
 0x11b   : > { %2486 = vmatprep.subr.bf16.mxu1 %v10526_v25  ;;  %v742_v52 = vld [vmem:[#allocation3] sm:$0xff]  ;;  %v10599_v24 = vld [vmem:[%s12886_s15 + $0x4c] ss:$16 sps:$4 sm:$0xff]  }
 0x11c   : > { %v751_v54 = vrot.slane %v742_v52, %v12945_v49  ;;  %v744_v55 = vcombine.high %v742_v52, %v742_v52  ;;  %v10560_v57 = vld [vmem:[%s12886_s15 + $0x184] ss:$16 sps:$4 sm:$0xff]   ;;  %v10564_v61 = vld [vmem:[%s12886_s15 + $0x180] ss:$16 sps:$4 sm:$0xff]   ;;  %v10602_v25 = vld [vmem:[%s12886_s15 + $0x24c] ss:$16 sps:$4 sm:$0xff]  }
 0x11d   : > { %2446 = vmatpush1.bf16.msra.mxu0 %v10528_v26  ;;  %v10562_v58 = vld [vmem:[%s12886_s15 + $0x384] ss:$16 sps:$4 sm:$0xff]   ;;  %v10565_v0 = vld [vmem:[%s12886_s15 + $0x380] ss:$16 sps:$4 sm:$0xff]   ;;  %v10597_v26 = vld [vmem:[%s12886_s15 + $0x48] ss:$16 sps:$4 sm:$0xff]  }
 0x11e   : > { %2487 = vmatpush1.bf16.msra.mxu1 %v10529_v27  ;;  %2447 = vmatprep.subr.bf16.mxu0 %v10530_v28  ;;  %v759_v59 = vcombine.high %v751_v54, %v751_v54  ;;  %v758_v60 = vrot.slane %v744_v55, %v12945_v49  ;;  %v10566_v1 = vld [vmem:[%s12886_s15 + $0x1a4] ss:$16 sps:$4 sm:$0xff]   ;;  %v10570_v4 = vld [vmem:[%s12886_s15 + $0x1a0] ss:$16 sps:$4 sm:$0xff]   ;;  %v12971_v16 = vpack.c.bf16 %v751_v54, %v751_v54  ;;  %v10600_v27 = vld [vmem:[%s12886_s15 + $0x248] ss:$16 sps:$4 sm:$0xff]  }
 0x11f   : > { %2488 = vmatprep.subr.bf16.mxu1 %v10532_v29  ;;  %v10568_v2 = vld [vmem:[%s12886_s15 + $0x3a4] ss:$16 sps:$4 sm:$0xff]   ;;  %v10571_v5 = vld [vmem:[%s12886_s15 + $0x3a0] ss:$16 sps:$4 sm:$0xff]   ;;  %v10605_v28 = vld [vmem:[%s12886_s15 + $0x6c] ss:$16 sps:$4 sm:$0xff]  }
 0x120   : > { %v766_v62 = vpack.c.bf16 %v759_v59, %v759_v59  ;;  %v760_v63 = vcombine.high %v758_v60, %v758_v60  ;;  %v10572_v6 = vld [vmem:[%s12886_s15 + $0x1c4] ss:$16 sps:$4 sm:$0xff]   ;;  %v10576_v8 = vld [vmem:[%s12886_s15 + $0x1c0] ss:$16 sps:$4 sm:$0xff]   ;;  %v12973_v17 = vpack.c.bf16 %v758_v60, %v758_v60  ;;  %v10608_v29 = vld [vmem:[%s12886_s15 + $0x26c] ss:$16 sps:$4 sm:$0xff]  }
 0x121   : > { %2448 = vmatpush1.bf16.msra.mxu0 %v10534_v30  ;;  %v10574_v7 = vld [vmem:[%s12886_s15 + $0x3c4] ss:$16 sps:$4 sm:$0xff]   ;;  %v10577_v9 = vld [vmem:[%s12886_s15 + $0x3c0] ss:$16 sps:$4 sm:$0xff]   ;;  %v10603_v30 = vld [vmem:[%s12886_s15 + $0x68] ss:$16 sps:$4 sm:$0xff]  }
 0x122   : > { %2489 = vmatpush1.bf16.msra.mxu1 %v10535_v31  ;;  %2449 = vmatprep.subr.bf16.mxu0 %v10536_v32  ;;  %v768_v3 = vpack.c.bf16 %v760_v63, %v760_v63  ;;  %v10578_v10 = vld [vmem:[%s12886_s15 + $0x1e4] ss:$16 sps:$4 sm:$0xff]   ;;  %v10582_v12 = vld [vmem:[%s12886_s15 + $0x1e0] ss:$16 sps:$4 sm:$0xff]   ;;  %v10606_v31 = vld [vmem:[%s12886_s15 + $0x268] ss:$16 sps:$4 sm:$0xff]  }
 0x123   : > { %2490 = vmatprep.subr.bf16.mxu1 %v10538_v33  ;;  %2465 = vmatprep.mubr.bf16.mxu0 %v766_v62  ;;  %v10580_v11 = vld [vmem:[%s12886_s15 + $0x3e4] ss:$16 sps:$4 sm:$0xff]   ;;  %v10583_v13 = vld [vmem:[%s12886_s15 + $0x3e0] ss:$16 sps:$4 sm:$0xff]   ;;  %v10611_v32 = vld [vmem:[%s12886_s15 + $0x8c] ss:$16 sps:$4 sm:$0xff]  }
 0x124   : > { %2506 = vmatprep.mubr.bf16.mxu1 %v768_v3  ;;  %v10614_v33 = vld [vmem:[%s12886_s15 + $0x28c] ss:$16 sps:$4 sm:$0xff]   ;;  %v10633_v52 = vld [vmem:[%s12886_s15 + $0x108] ss:$16 sps:$4 sm:$0xff]  }
 0x125   : > { %2450 = vmatpush1.bf16.msra.mxu0 %v10540_v34  ;;  %v10609_v34 = vld [vmem:[%s12886_s15 + $0x88] ss:$16 sps:$4 sm:$0xff]   ;;  %v10641_v54 = vld [vmem:[%s12886_s15 + $0x12c] ss:$16 sps:$4 sm:$0xff]  }
 0x126   : > { %2491 = vmatpush1.bf16.msra.mxu1 %v10541_v35  ;;  %2451 = vmatprep.subr.bf16.mxu0 %v10542_v39  ;;  %v10612_v35 = vld [vmem:[%s12886_s15 + $0x288] ss:$16 sps:$4 sm:$0xff]   ;;  %v10644_v55 = vld [vmem:[%s12886_s15 + $0x32c] ss:$16 sps:$4 sm:$0xff]  }
 0x127   : > { %2492 = vmatprep.subr.bf16.mxu1 %v10544_v40  ;;  %v10618_v39 = vld [vmem:[%s12886_s15 + $0x2a8] ss:$16 sps:$4 sm:$0xff]   ;;  %v10623_v40 = vld [vmem:[%s12886_s15 + $0xcc] ss:$16 sps:$4 sm:$0xff]  }
 0x128   : > { %v10650_v59 = vld [vmem:[%s12886_s15 + $0x34c] ss:$16 sps:$4 sm:$0xff]   ;;  %v10645_v60 = vld [vmem:[%s12886_s15 + $0x148] ss:$16 sps:$4 sm:$0xff]  }
 0x129   : > { %2452 = vmatpush1.bf16.msra.mxu0 %v10546_v41  ;;  %v10626_v41 = vld [vmem:[%s12886_s15 + $0x2cc] ss:$16 sps:$4 sm:$0xff]  }
 0x12a   : > { %2493 = vmatpush1.bf16.msra.mxu1 %v10547_v44  ;;  %2453 = vmatprep.subr.bf16.mxu0 %v10548_v45  ;;  %v10624_v44 = vld [vmem:[%s12886_s15 + $0x2c8] ss:$16 sps:$4 sm:$0xff]   ;;  %v10629_v45 = vld [vmem:[%s12886_s15 + $0xec] ss:$16 sps:$4 sm:$0xff]  }
 0x12b   : > { %2494 = vmatprep.subr.bf16.mxu1 %v10550_v46  ;;  %v10632_v46 = vld [vmem:[%s12886_s15 + $0x2ec] ss:$16 sps:$4 sm:$0xff]  }
 0x12c   : > { %v10656_v63 = vld [vmem:[%s12886_s15 + $0x36c] ss:$16 sps:$4 sm:$0xff]  }
 0x12d   : > { %2454 = vmatpush1.bf16.msra.mxu0 %v10552_v47  ;;  %v10627_v47 = vld [vmem:[%s12886_s15 + $0xe8] ss:$16 sps:$4 sm:$0xff]  }
 0x12e   : > { %2495 = vmatpush1.bf16.msra.mxu1 %v10553_v48  ;;  %2455 = vmatprep.subr.bf16.mxu0 %v10554_v50  ;;  %v10630_v48 = vld [vmem:[%s12886_s15 + $0x2e8] ss:$16 sps:$4 sm:$0xff]   ;;  %v10635_v50 = vld [vmem:[%s12886_s15 + $0x10c] ss:$16 sps:$4 sm:$0xff]  }
 0x12f   : > { %2496 = vmatprep.subr.bf16.mxu1 %v10556_v51  ;;  %v10638_v51 = vld [vmem:[%s12886_s15 + $0x30c] ss:$16 sps:$4 sm:$0xff]  }
 0x131   : > { %2456 = vmatpush1.bf16.msra.mxu0 %v10558_v53  ;;  %v10636_v53 = vld [vmem:[%s12886_s15 + $0x308] ss:$16 sps:$4 sm:$0xff]  }
 0x132   : > { %2497 = vmatpush1.bf16.msra.mxu1 %v10559_v56  ;;  %2457 = vmatprep.subr.bf16.mxu0 %v10560_v57  ;;  %v10639_v56 = vld [vmem:[%s12886_s15 + $0x128] ss:$16 sps:$4 sm:$0xff]  }
 0x133   : > { %2498 = vmatprep.subr.bf16.mxu1 %v10562_v58  ;;  %v10642_v57 = vld [vmem:[%s12886_s15 + $0x328] ss:$16 sps:$4 sm:$0xff]   ;;  %v10647_v58 = vld [vmem:[%s12886_s15 + $0x14c] ss:$16 sps:$4 sm:$0xff]  }
 0x135   : > { %2458 = vmatpush1.bf16.msra.mxu0 %v10564_v61  ;;  %v10648_v61 = vld [vmem:[%s12886_s15 + $0x348] ss:$16 sps:$4 sm:$0xff]  }
 0x136   : > { %2499 = vmatpush1.bf16.msra.mxu1 %v10565_v0  ;;  %2459 = vmatprep.subr.bf16.mxu0 %v10566_v1  ;;  %v10651_v0 = vld [vmem:[%s12886_s15 + $0x168] ss:$16 sps:$4 sm:$0xff]  }
 0x137   : > { %2500 = vmatprep.subr.bf16.mxu1 %v10568_v2  ;;  %v10654_v1 = vld [vmem:[%s12886_s15 + $0x368] ss:$16 sps:$4 sm:$0xff]   ;;  %v10659_v2 = vld [vmem:[%s12886_s15 + $0x18c] ss:$16 sps:$4 sm:$0xff]  }
 0x139   : > { %2460 = vmatpush1.bf16.msra.mxu0 %v10570_v4  ;;  %v10657_v4 = vld [vmem:[%s12886_s15 + $0x188] ss:$16 sps:$4 sm:$0xff]  }
 0x13a   : > { %2501 = vmatpush1.bf16.msra.mxu1 %v10571_v5  ;;  %2461 = vmatprep.subr.bf16.mxu0 %v10572_v6  ;;  %v10660_v5 = vld [vmem:[%s12886_s15 + $0x388] ss:$16 sps:$4 sm:$0xff]   ;;  %v10665_v6 = vld [vmem:[%s12886_s15 + $0x1ac] ss:$16 sps:$4 sm:$0xff]  }
 0x13b   : > { %2502 = vmatprep.subr.bf16.mxu1 %v10574_v7  ;;  %v10668_v7 = vld [vmem:[%s12886_s15 + $0x3ac] ss:$16 sps:$4 sm:$0xff]  }
 0x13d   : > { %2462 = vmatpush1.bf16.msra.mxu0 %v10576_v8  ;;  %v10663_v8 = vld [vmem:[%s12886_s15 + $0x1a8] ss:$16 sps:$4 sm:$0xff]  }
 0x13e   : > { %2503 = vmatpush1.bf16.msra.mxu1 %v10577_v9  ;;  %2463 = vmatprep.subr.bf16.mxu0 %v10578_v10  ;;  %v10666_v9 = vld [vmem:[%s12886_s15 + $0x3a8] ss:$16 sps:$4 sm:$0xff]   ;;  %v10671_v10 = vld [vmem:[%s12886_s15 + $0x1cc] ss:$16 sps:$4 sm:$0xff]  }
 0x13f   : > { %2504 = vmatprep.subr.bf16.mxu1 %v10580_v11  ;;  %v10674_v11 = vld [vmem:[%s12886_s15 + $0x3cc] ss:$16 sps:$4 sm:$0xff]  }
 0x141   : > { %2464 = vmatpush1.bf16.msra.mxu0 %v10582_v12  ;;  %v10669_v12 = vld [vmem:[%s12886_s15 + $0x1c8] ss:$16 sps:$4 sm:$0xff]  }
 0x142   : > { %2505 = vmatpush1.bf16.msra.mxu1 %v10583_v13  ;;  %2515 = vmatprep.subr.bf16.mxu0 %v10587_v14  ;;  %v10672_v13 = vld [vmem:[%s12886_s15 + $0x3c8] ss:$16 sps:$4 sm:$0xff]   ;;  %v10677_v14 = vld [vmem:[%s12886_s15 + $0x1ec] ss:$16 sps:$4 sm:$0xff]  }
 0x143   : > { %2556 = vmatprep.subr.bf16.mxu1 %v10590_v15  ;;  %v10680_v15 = vld [vmem:[%s12886_s15 + $0x3ec] ss:$16 sps:$4 sm:$0xff]  }
 0x144   : > { %2466 = vmatmul.mubr.bf16.vlgmr.msra.gmra.mrb[0].mxu0 %v12971_v16 }
 0x145   : > { %2507 = vmatmul.mubr.bf16.vlgmr.msra.gmra.mrb[0].mxu1 %v12973_v17  ;;  %2516 = vmatpush1.bf16.msra.mxu0 %v10585_v18  ;;  %v10675_v18 = vld [vmem:[%s12886_s15 + $0x1e8] ss:$16 sps:$4 sm:$0xff]  }
 0x146   : > { %2557 = vmatpush1.bf16.msra.mxu1 %v10588_v19  ;;  %2517 = vmatprep.subr.bf16.mxu0 %v10593_v20  ;;  %v10678_v19 = vld [vmem:[%s12886_s15 + $0x3e8] ss:$16 sps:$4 sm:$0xff]   ;;  %v10683_v20 = vld [vmem:[%s12880_s22 + $0x4] ss:$16 sps:$4 sm:$0xff]  }
 0x147   : > { %2558 = vmatprep.subr.bf16.mxu1 %v10596_v21  ;;  %2547 = vmatprep.mubr.bf16.mxu0 %v766_v62  ;;  %v10653_v62 = vld [vmem:[%s12886_s15 + $0x16c] ss:$16 sps:$4 sm:$0xff]   ;;  %v10686_v21 = vld [vmem:[%s12880_s22 + $0x204] ss:$16 sps:$4 sm:$0xff]  }
 0x148   : > { %2588 = vmatprep.mubr.bf16.mxu1 %v768_v3  ;;  %v10662_v3 = vld [vmem:[%s12886_s15 + $0x38c] ss:$16 sps:$4 sm:$0xff]  }
 0x149   : > { %2518 = vmatpush1.bf16.msra.mxu0 %v10591_v22  ;;  %v10681_v22 = vld [vmem:[%s12880_s22] ss:$16 sps:$4 sm:$0xff]  }
 0x14a   : > { %2559 = vmatpush1.bf16.msra.mxu1 %v10594_v23  ;;  %2519 = vmatprep.subr.bf16.mxu0 %v10599_v24  ;;  %v10684_v23 = vld [vmem:[%s12880_s22 + $0x200] ss:$16 sps:$4 sm:$0xff]  }
 0x14b   : > { %2560 = vmatprep.subr.bf16.mxu1 %v10602_v25  ;;  %v553_v24 = vld [vmem:[%s14518_s3] sm:$0xff] }
 0x14c   : > { %v10689_v25 = vld [vmem:[%s12880_s22 + $0x24] ss:$16 sps:$4 sm:$0xff]  }
 0x14d   : > { %2520 = vmatpush1.bf16.msra.mxu0 %v10597_v26  ;;  %v10692_v26 = vld [vmem:[%s12880_s22 + $0x224] ss:$16 sps:$4 sm:$0xff]  }
 0x14e   : > { %2561 = vmatpush1.bf16.msra.mxu1 %v10600_v27  ;;  %2521 = vmatprep.subr.bf16.mxu0 %v10605_v28  ;;  %v13049_v27 = vrot.slane %v553_v24, %v12945_v49  ;;  %v567_v28 = vcombine.high %v553_v24, %v553_v24  ;;  %v10770_v24 = vld [vmem:[%s12880_s22 + $0x3c4] ss:$16 sps:$4 sm:$0xff]  }
 0x14f   : > { %2562 = vmatprep.subr.bf16.mxu1 %v10608_v29 }
 0x150   : > { %v582_v29 = vcombine.high %v13049_v27, %v13049_v27 }
 0x151   : > { %2522 = vmatpush1.bf16.msra.mxu0 %v10603_v30  ;;  %v13056_v30 = vrot.slane %v567_v28, %v12945_v49  ;;  %v10768_v28 = vld [vmem:[%s12880_s22 + $0x3c0] ss:$16 sps:$4 sm:$0xff]  }
 0x152   : > { %2563 = vmatpush1.bf16.msra.mxu1 %v10606_v31  ;;  %2523 = vmatprep.subr.bf16.mxu0 %v10611_v32  ;;  %v10687_v31 = vld [vmem:[%s12880_s22 + $0x20] ss:$16 sps:$4 sm:$0xff]  }
 0x153   : > { %2564 = vmatprep.subr.bf16.mxu1 %v10614_v33  ;;  %v10690_v32 = vld [vmem:[%s12880_s22 + $0x220] ss:$16 sps:$4 sm:$0xff]   ;;  %v10695_v33 = vld [vmem:[%s12880_s22 + $0x44] ss:$16 sps:$4 sm:$0xff]  }
 0x155   : > { %2524 = vmatpush1.bf16.msra.mxu0 %v10609_v34  ;;  %v583_v34 = vcombine.high %v13056_v30, %v13056_v30 }
 0x156   : > { %2565 = vmatpush1.bf16.msra.mxu1 %v10612_v35  ;;  %2525 = vmatprep.subr.bf16.mxu0 %v10617_v36  ;;  %v10693_v36 = vld [vmem:[%s12880_s22 + $0x40] ss:$16 sps:$4 sm:$0xff]  }
 0x157   : > { %2566 = vmatprep.subr.bf16.mxu1 %v10620_v37  ;;  %v13067_v35 = vpack.c.bf16 %v583_v34, %v583_v34  ;;  %v10696_v37 = vld [vmem:[%s12880_s22 + $0x240] ss:$16 sps:$4 sm:$0xff]  }
 0x158   : > { %v10774_v34 = vld [vmem:[%s12880_s22 + $0x3e0] ss:$16 sps:$4 sm:$0xff]  }
 0x159   : > { %2526 = vmatpush1.bf16.msra.mxu0 %v10615_v38  ;;  %v10701_v38 = vld [vmem:[%s12880_s22 + $0x64] ss:$16 sps:$4 sm:$0xff]  }
 0x15a   : > { %2567 = vmatpush1.bf16.msra.mxu1 %v10618_v39  ;;  %2527 = vmatprep.subr.bf16.mxu0 %v10623_v40  ;;  %v10704_v39 = vld [vmem:[%s12880_s22 + $0x264] ss:$16 sps:$4 sm:$0xff]   ;;  %v10699_v40 = vld [vmem:[%s12880_s22 + $0x60] ss:$16 sps:$4 sm:$0xff]  }
 0x15b   : > { %2568 = vmatprep.subr.bf16.mxu1 %v10626_v41  ;;  %v10702_v41 = vld [vmem:[%s12880_s22 + $0x260] ss:$16 sps:$4 sm:$0xff]  }
 0x15d   : > { %2528 = vmatpush1.bf16.msra.mxu0 %v10621_v42  ;;  %v10707_v42 = vld [vmem:[%s12880_s22 + $0x84] ss:$16 sps:$4 sm:$0xff]  }
 0x15e   : > { %2569 = vmatpush1.bf16.msra.mxu1 %v10624_v44  ;;  %2529 = vmatprep.subr.bf16.mxu0 %v10629_v45  ;;  %v10710_v44 = vld [vmem:[%s12880_s22 + $0x284] ss:$16 sps:$4 sm:$0xff]   ;;  %v10705_v45 = vld [vmem:[%s12880_s22 + $0x80] ss:$16 sps:$4 sm:$0xff]  }
 0x15f   : > { %2570 = vmatprep.subr.bf16.mxu1 %v10632_v46  ;;  %v10708_v46 = vld [vmem:[%s12880_s22 + $0x280] ss:$16 sps:$4 sm:$0xff]  }
 0x161   : > { %2530 = vmatpush1.bf16.msra.mxu0 %v10627_v47  ;;  %v10713_v47 = vld [vmem:[%s12880_s22 + $0xa4] ss:$16 sps:$4 sm:$0xff]  }
 0x162   : > { %2571 = vmatpush1.bf16.msra.mxu1 %v10630_v48  ;;  %2531 = vmatprep.subr.bf16.mxu0 %v10635_v50  ;;  %v10716_v48 = vld [vmem:[%s12880_s22 + $0x2a4] ss:$16 sps:$4 sm:$0xff]   ;;  %v10711_v50 = vld [vmem:[%s12880_s22 + $0xa0] ss:$16 sps:$4 sm:$0xff]  }
 0x163   : > { %2572 = vmatprep.subr.bf16.mxu1 %v10638_v51  ;;  %v10714_v51 = vld [vmem:[%s12880_s22 + $0x2a0] ss:$16 sps:$4 sm:$0xff]  }
 0x165   : > { %2532 = vmatpush1.bf16.msra.mxu0 %v10633_v52  ;;  %v10719_v52 = vld [vmem:[%s12880_s22 + $0xc4] ss:$16 sps:$4 sm:$0xff]  }
 0x166   : > { %2573 = vmatpush1.bf16.msra.mxu1 %v10636_v53  ;;  %2533 = vmatprep.subr.bf16.mxu0 %v10641_v54  ;;  %v10722_v53 = vld [vmem:[%s12880_s22 + $0x2c4] ss:$16 sps:$4 sm:$0xff]   ;;  %v10717_v54 = vld [vmem:[%s12880_s22 + $0xc0] ss:$16 sps:$4 sm:$0xff]  }
 0x167   : > { %2574 = vmatprep.subr.bf16.mxu1 %v10644_v55  ;;  %v10720_v55 = vld [vmem:[%s12880_s22 + $0x2c0] ss:$16 sps:$4 sm:$0xff]  }
 0x169   : > { %2534 = vmatpush1.bf16.msra.mxu0 %v10639_v56  ;;  %v10725_v56 = vld [vmem:[%s12880_s22 + $0xe4] ss:$16 sps:$4 sm:$0xff]  }
 0x16a   : > { %2575 = vmatpush1.bf16.msra.mxu1 %v10642_v57  ;;  %2535 = vmatprep.subr.bf16.mxu0 %v10647_v58  ;;  %v10728_v57 = vld [vmem:[%s12880_s22 + $0x2e4] ss:$16 sps:$4 sm:$0xff]   ;;  %v10723_v58 = vld [vmem:[%s12880_s22 + $0xe0] ss:$16 sps:$4 sm:$0xff]  }
 0x16b   : > { %2576 = vmatprep.subr.bf16.mxu1 %v10650_v59  ;;  %v10726_v59 = vld [vmem:[%s12880_s22 + $0x2e0] ss:$16 sps:$4 sm:$0xff]  }
 0x16d   : > { %2536 = vmatpush1.bf16.msra.mxu0 %v10645_v60  ;;  %v10731_v60 = vld [vmem:[%s12880_s22 + $0x104] ss:$16 sps:$4 sm:$0xff]  }
 0x16e   : > { %2577 = vmatpush1.bf16.msra.mxu1 %v10648_v61  ;;  %2537 = vmatprep.subr.bf16.mxu0 %v10653_v62  ;;  %v10734_v61 = vld [vmem:[%s12880_s22 + $0x304] ss:$16 sps:$4 sm:$0xff]   ;;  %v10729_v62 = vld [vmem:[%s12880_s22 + $0x100] ss:$16 sps:$4 sm:$0xff]  }
 0x16f   : > { %2578 = vmatprep.subr.bf16.mxu1 %v10656_v63  ;;  %v10732_v63 = vld [vmem:[%s12880_s22 + $0x300] ss:$16 sps:$4 sm:$0xff]  }
 0x171   : > { %2538 = vmatpush1.bf16.msra.mxu0 %v10651_v0  ;;  %v10737_v0 = vld [vmem:[%s12880_s22 + $0x124] ss:$16 sps:$4 sm:$0xff]  }
 0x172   : > { %2579 = vmatpush1.bf16.msra.mxu1 %v10654_v1  ;;  %2539 = vmatprep.subr.bf16.mxu0 %v10659_v2  ;;  %v10740_v1 = vld [vmem:[%s12880_s22 + $0x324] ss:$16 sps:$4 sm:$0xff]   ;;  %v10735_v2 = vld [vmem:[%s12880_s22 + $0x120] ss:$16 sps:$4 sm:$0xff]  }
 0x173   : > { %2580 = vmatprep.subr.bf16.mxu1 %v10662_v3  ;;  %v10738_v3 = vld [vmem:[%s12880_s22 + $0x320] ss:$16 sps:$4 sm:$0xff]  }
 0x175   : > { %2540 = vmatpush1.bf16.msra.mxu0 %v10657_v4  ;;  %v10743_v4 = vld [vmem:[%s12880_s22 + $0x144] ss:$16 sps:$4 sm:$0xff]  }
 0x176   : > { %2581 = vmatpush1.bf16.msra.mxu1 %v10660_v5  ;;  %2541 = vmatprep.subr.bf16.mxu0 %v10665_v6  ;;  %v10746_v5 = vld [vmem:[%s12880_s22 + $0x344] ss:$16 sps:$4 sm:$0xff]   ;;  %v10741_v6 = vld [vmem:[%s12880_s22 + $0x140] ss:$16 sps:$4 sm:$0xff]  }
 0x177   : > { %2582 = vmatprep.subr.bf16.mxu1 %v10668_v7  ;;  %v10744_v7 = vld [vmem:[%s12880_s22 + $0x340] ss:$16 sps:$4 sm:$0xff]  }
 0x179   : > { %2542 = vmatpush1.bf16.msra.mxu0 %v10663_v8  ;;  %v10749_v8 = vld [vmem:[%s12880_s22 + $0x164] ss:$16 sps:$4 sm:$0xff]  }
 0x17a   : > { %2583 = vmatpush1.bf16.msra.mxu1 %v10666_v9  ;;  %2543 = vmatprep.subr.bf16.mxu0 %v10671_v10  ;;  %v10752_v9 = vld [vmem:[%s12880_s22 + $0x364] ss:$16 sps:$4 sm:$0xff]   ;;  %v10747_v10 = vld [vmem:[%s12880_s22 + $0x160] ss:$16 sps:$4 sm:$0xff]  }
 0x17b   : > { %2584 = vmatprep.subr.bf16.mxu1 %v10674_v11  ;;  %v10750_v11 = vld [vmem:[%s12880_s22 + $0x360] ss:$16 sps:$4 sm:$0xff]  }
 0x17d   : > { %2544 = vmatpush1.bf16.msra.mxu0 %v10669_v12  ;;  %v10755_v12 = vld [vmem:[%s12880_s22 + $0x184] ss:$16 sps:$4 sm:$0xff]  }
 0x17e   : > { %2585 = vmatpush1.bf16.msra.mxu1 %v10672_v13  ;;  %2545 = vmatprep.subr.bf16.mxu0 %v10677_v14  ;;  %v10758_v13 = vld [vmem:[%s12880_s22 + $0x384] ss:$16 sps:$4 sm:$0xff]   ;;  %v10753_v14 = vld [vmem:[%s12880_s22 + $0x180] ss:$16 sps:$4 sm:$0xff]  }
 0x17f   : > { %2586 = vmatprep.subr.bf16.mxu1 %v10680_v15  ;;  %v10756_v15 = vld [vmem:[%s12880_s22 + $0x380] ss:$16 sps:$4 sm:$0xff]  }
 0x181   : > { %2546 = vmatpush1.bf16.msra.mxu0 %v10675_v18  ;;  %v10761_v18 = vld [vmem:[%s12880_s22 + $0x1a4] ss:$16 sps:$4 sm:$0xff]  }
 0x182   : > { %2587 = vmatpush1.bf16.msra.mxu1 %v10678_v19  ;;  %7077 = vmatprep.subr.bf16.mxu0 %v10683_v20  ;;  %v10764_v19 = vld [vmem:[%s12880_s22 + $0x3a4] ss:$16 sps:$4 sm:$0xff]   ;;  %v10759_v20 = vld [vmem:[%s12880_s22 + $0x1a0] ss:$16 sps:$4 sm:$0xff]  }
 0x183   : > { %7118 = vmatprep.subr.bf16.mxu1 %v10686_v21  ;;  %v554_v21 = vld [vmem:[%s14518_s3 + $0x8] sm:$0xff] }
 0x184   : > { %2548 = vmatmul.mubr.bf16.vlgmr.msra.gmra.mrb[4].mxu0 %v12971_v16  ;;  %v10698_v16 = vld [vmem:[%s12880_s22 + $0x244] ss:$16 sps:$4 sm:$0xff]  }
 0x185   : > { %2589 = vmatmul.mubr.bf16.vlgmr.msra.gmra.mrb[4].mxu1 %v12973_v17  ;;  %7078 = vmatpush1.bf16.msra.mxu0 %v10681_v22  ;;  %v13062_v17 = vpack.c.bf16 %v582_v29, %v582_v29  ;;  %v10762_v22 = vld [vmem:[%s12880_s22 + $0x3a0] ss:$16 sps:$4 sm:$0xff]   ;;  %v10773_v29 = vld [vmem:[%s12880_s22 + $0x1e4] ss:$16 sps:$4 sm:$0xff]  }
 0x186   : > { %7119 = vmatpush1.bf16.msra.mxu1 %v10684_v23  ;;  %7079 = vmatprep.subr.bf16.mxu0 %v10689_v25  ;;  %v10767_v23 = vld [vmem:[%s12880_s22 + $0x1c4] ss:$16 sps:$4 sm:$0xff]   ;;  %v584_v25 = vcombine.high %v554_v21, %v554_v21 }
 0x187   : > { %7120 = vmatprep.subr.bf16.mxu1 %v10692_v26  ;;  %7109 = vmatprep.mubr.bf16.mxu0 %v13062_v17  ;;  %v10765_v26 = vld [vmem:[%s12880_s22 + $0x1c0] ss:$16 sps:$4 sm:$0xff]  }
 0x188   : > { %7150 = vmatprep.mubr.bf16.mxu1 %v13067_v35 }
 0x189   : > { %7080 = vmatpush1.bf16.msra.mxu0 %v10687_v31  ;;  %v10776_v31 = vld [vmem:[%s12880_s22 + $0x3e4] ss:$16 sps:$4 sm:$0xff]  }
 0x18a   : > { %7121 = vmatpush1.bf16.msra.mxu1 %v10690_v32  ;;  %7081 = vmatprep.subr.bf16.mxu0 %v10695_v33  ;;  %v13126_v32 = vrot.slane %v554_v21, %v12945_v49  ;;  %v13129_v33 = vrot.slane %v584_v25, %v12945_v49  ;;  %v10843_v21 = vld [vmem:[%s12880_s22 + $0x744] ss:$16 sps:$4 sm:$0xff]  }
 0x18b   : > { %7122 = vmatprep.subr.bf16.mxu1 %v10698_v16  ;;  %v10771_v16 = vld [vmem:[%s12880_s22 + $0x1e0] ss:$16 sps:$4 sm:$0xff]   ;;  %v10849_v25 = vld [vmem:[%s12880_s22 + $0x764] ss:$16 sps:$4 sm:$0xff]  }
 0x18d   : > { %7082 = vmatpush1.bf16.msra.mxu0 %v10693_v36  ;;  %v10780_v36 = vld [vmem:[%s12880_s22 + $0x404] ss:$16 sps:$4 sm:$0xff]  }
 0x18e   : > { %7123 = vmatpush1.bf16.msra.mxu1 %v10696_v37  ;;  %7083 = vmatprep.subr.bf16.mxu0 %v10701_v38  ;;  %v10783_v37 = vld [vmem:[%s12880_s22 + $0x604] ss:$16 sps:$4 sm:$0xff]   ;;  %v599_v38 = vcombine.high %v13126_v32, %v13126_v32 }
 0x18f   : > { %7124 = vmatprep.subr.bf16.mxu1 %v10704_v39  ;;  %v600_v39 = vcombine.high %v13129_v33, %v13129_v33 }
 0x191   : > { %7084 = vmatpush1.bf16.msra.mxu0 %v10699_v40  ;;  %v13141_v40 = vpack.c.bf16 %v13049_v27, %v13049_v27  ;;  %v13153_v27 = vpack.c.bf16 %v600_v39, %v600_v39  ;;  %v10859_v39 = vld [vmem:[%s12880_s22 + $0x7a0] ss:$16 sps:$4 sm:$0xff]  }
 0x192   : > { %7125 = vmatpush1.bf16.msra.mxu1 %v10702_v41  ;;  %7085 = vmatprep.subr.bf16.mxu0 %v10707_v42  ;;  %v13145_v41 = vpack.c.bf16 %v13056_v30, %v13056_v30  ;;  %v10778_v42 = vld [vmem:[%s12880_s22 + $0x400] ss:$16 sps:$4 sm:$0xff]  }
 0x193   : > { %7126 = vmatprep.subr.bf16.mxu1 %v10710_v44  ;;  %v10781_v44 = vld [vmem:[%s12880_s22 + $0x600] ss:$16 sps:$4 sm:$0xff]  }
 0x194   : > { %v10784_v30 = vld [vmem:[%s12880_s22 + $0x420] ss:$16 sps:$4 sm:$0xff]  }
 0x195   : > { %7086 = vmatpush1.bf16.msra.mxu0 %v10705_v45  ;;  %v10786_v45 = vld [vmem:[%s12880_s22 + $0x424] ss:$16 sps:$4 sm:$0xff]  }
 0x196   : > { %7127 = vmatpush1.bf16.msra.mxu1 %v10708_v46  ;;  %7087 = vmatprep.subr.bf16.mxu0 %v10713_v47  ;;  %v10789_v46 = vld [vmem:[%s12880_s22 + $0x624] ss:$16 sps:$4 sm:$0xff]   ;;  %v13151_v47 = vpack.c.bf16 %v599_v38, %v599_v38  ;;  %v10856_v38 = vld [vmem:[%s12880_s22 + $0x5a0] ss:$16 sps:$4 sm:$0xff]  }
 0x197   : > { %7128 = vmatprep.subr.bf16.mxu1 %v10716_v48  ;;  %v10787_v48 = vld [vmem:[%s12880_s22 + $0x620] ss:$16 sps:$4 sm:$0xff]  }
 0x199   : > { %7088 = vmatpush1.bf16.msra.mxu0 %v10711_v50  ;;  %v10792_v50 = vld [vmem:[%s12880_s22 + $0x444] ss:$16 sps:$4 sm:$0xff]  }
 0x19a   : > { %7129 = vmatpush1.bf16.msra.mxu1 %v10714_v51  ;;  %7089 = vmatprep.subr.bf16.mxu0 %v10719_v52  ;;  %v10795_v51 = vld [vmem:[%s12880_s22 + $0x644] ss:$16 sps:$4 sm:$0xff]   ;;  %v10790_v52 = vld [vmem:[%s12880_s22 + $0x440] ss:$16 sps:$4 sm:$0xff]  }
 0x19b   : > { %7130 = vmatprep.subr.bf16.mxu1 %v10722_v53  ;;  %v10793_v53 = vld [vmem:[%s12880_s22 + $0x640] ss:$16 sps:$4 sm:$0xff]  }
 0x19d   : > { %7090 = vmatpush1.bf16.msra.mxu0 %v10717_v54  ;;  %v10798_v54 = vld [vmem:[%s12880_s22 + $0x464] ss:$16 sps:$4 sm:$0xff]  }
 0x19e   : > { %7131 = vmatpush1.bf16.msra.mxu1 %v10720_v55  ;;  %7091 = vmatprep.subr.bf16.mxu0 %v10725_v56  ;;  %v10801_v55 = vld [vmem:[%s12880_s22 + $0x664] ss:$16 sps:$4 sm:$0xff]   ;;  %v10796_v56 = vld [vmem:[%s12880_s22 + $0x460] ss:$16 sps:$4 sm:$0xff]  }
 0x19f   : > { %7132 = vmatprep.subr.bf16.mxu1 %v10728_v57  ;;  %v10799_v57 = vld [vmem:[%s12880_s22 + $0x660] ss:$16 sps:$4 sm:$0xff]  }
 0x1a1   : > { %7092 = vmatpush1.bf16.msra.mxu0 %v10723_v58  ;;  %v10804_v58 = vld [vmem:[%s12880_s22 + $0x484] ss:$16 sps:$4 sm:$0xff]  }
 0x1a2   : > { %7133 = vmatpush1.bf16.msra.mxu1 %v10726_v59  ;;  %7093 = vmatprep.subr.bf16.mxu0 %v10731_v60  ;;  %v10807_v59 = vld [vmem:[%s12880_s22 + $0x684] ss:$16 sps:$4 sm:$0xff]   ;;  %v10802_v60 = vld [vmem:[%s12880_s22 + $0x480] ss:$16 sps:$4 sm:$0xff]  }
 0x1a3   : > { %7134 = vmatprep.subr.bf16.mxu1 %v10734_v61  ;;  %v10805_v61 = vld [vmem:[%s12880_s22 + $0x680] ss:$16 sps:$4 sm:$0xff]  }
 0x1a5   : > { %7094 = vmatpush1.bf16.msra.mxu0 %v10729_v62  ;;  %v10810_v62 = vld [vmem:[%s12880_s22 + $0x4a4] ss:$16 sps:$4 sm:$0xff]  }
 0x1a6   : > { %7135 = vmatpush1.bf16.msra.mxu1 %v10732_v63  ;;  %7095 = vmatprep.subr.bf16.mxu0 %v10737_v0  ;;  %v10813_v63 = vld [vmem:[%s12880_s22 + $0x6a4] ss:$16 sps:$4 sm:$0xff]   ;;  %v10808_v0 = vld [vmem:[%s12880_s22 + $0x4a0] ss:$16 sps:$4 sm:$0xff]  }
 0x1a7   : > { %7136 = vmatprep.subr.bf16.mxu1 %v10740_v1  ;;  %v10811_v1 = vld [vmem:[%s12880_s22 + $0x6a0] ss:$16 sps:$4 sm:$0xff]  }
 0x1a9   : > { %7096 = vmatpush1.bf16.msra.mxu0 %v10735_v2  ;;  %v10816_v2 = vld [vmem:[%s12880_s22 + $0x4c4] ss:$16 sps:$4 sm:$0xff]  }
 0x1aa   : > { %7137 = vmatpush1.bf16.msra.mxu1 %v10738_v3  ;;  %7097 = vmatprep.subr.bf16.mxu0 %v10743_v4  ;;  %v10819_v3 = vld [vmem:[%s12880_s22 + $0x6c4] ss:$16 sps:$4 sm:$0xff]   ;;  %v10814_v4 = vld [vmem:[%s12880_s22 + $0x4c0] ss:$16 sps:$4 sm:$0xff]  }
 0x1ab   : > { %7138 = vmatprep.subr.bf16.mxu1 %v10746_v5  ;;  %v10817_v5 = vld [vmem:[%s12880_s22 + $0x6c0] ss:$16 sps:$4 sm:$0xff]  }
 0x1ad   : > { %7098 = vmatpush1.bf16.msra.mxu0 %v10741_v6  ;;  %v10822_v6 = vld [vmem:[%s12880_s22 + $0x4e4] ss:$16 sps:$4 sm:$0xff]  }
 0x1ae   : > { %7139 = vmatpush1.bf16.msra.mxu1 %v10744_v7  ;;  %7099 = vmatprep.subr.bf16.mxu0 %v10749_v8  ;;  %v10825_v7 = vld [vmem:[%s12880_s22 + $0x6e4] ss:$16 sps:$4 sm:$0xff]   ;;  %v10820_v8 = vld [vmem:[%s12880_s22 + $0x4e0] ss:$16 sps:$4 sm:$0xff]  }
 0x1af   : > { %7140 = vmatprep.subr.bf16.mxu1 %v10752_v9  ;;  %v10823_v9 = vld [vmem:[%s12880_s22 + $0x6e0] ss:$16 sps:$4 sm:$0xff]  }
 0x1b1   : > { %7100 = vmatpush1.bf16.msra.mxu0 %v10747_v10  ;;  %v10828_v10 = vld [vmem:[%s12880_s22 + $0x504] ss:$16 sps:$4 sm:$0xff]  }
 0x1b2   : > { %7141 = vmatpush1.bf16.msra.mxu1 %v10750_v11  ;;  %7101 = vmatprep.subr.bf16.mxu0 %v10755_v12  ;;  %v10831_v11 = vld [vmem:[%s12880_s22 + $0x704] ss:$16 sps:$4 sm:$0xff]   ;;  %v10826_v12 = vld [vmem:[%s12880_s22 + $0x500] ss:$16 sps:$4 sm:$0xff]  }
 0x1b3   : > { %7142 = vmatprep.subr.bf16.mxu1 %v10758_v13  ;;  %v10829_v13 = vld [vmem:[%s12880_s22 + $0x700] ss:$16 sps:$4 sm:$0xff]  }
 0x1b5   : > { %7102 = vmatpush1.bf16.msra.mxu0 %v10753_v14  ;;  %v10834_v14 = vld [vmem:[%s12880_s22 + $0x524] ss:$16 sps:$4 sm:$0xff]  }
 0x1b6   : > { %7143 = vmatpush1.bf16.msra.mxu1 %v10756_v15  ;;  %7103 = vmatprep.subr.bf16.mxu0 %v10761_v18  ;;  %v10837_v15 = vld [vmem:[%s12880_s22 + $0x724] ss:$16 sps:$4 sm:$0xff]   ;;  %v10832_v18 = vld [vmem:[%s12880_s22 + $0x520] ss:$16 sps:$4 sm:$0xff]  }
 0x1b7   : > { %7144 = vmatprep.subr.bf16.mxu1 %v10764_v19  ;;  %v10835_v19 = vld [vmem:[%s12880_s22 + $0x720] ss:$16 sps:$4 sm:$0xff]  }
 0x1b9   : > { %7104 = vmatpush1.bf16.msra.mxu0 %v10759_v20  ;;  %v10840_v20 = vld [vmem:[%s12880_s22 + $0x544] ss:$16 sps:$4 sm:$0xff]  }
 0x1ba   : > { %7145 = vmatpush1.bf16.msra.mxu1 %v10762_v22  ;;  %7105 = vmatprep.subr.bf16.mxu0 %v10767_v23  ;;  %v10838_v22 = vld [vmem:[%s12880_s22 + $0x540] ss:$16 sps:$4 sm:$0xff]  }
 0x1bb   : > { %7146 = vmatprep.subr.bf16.mxu1 %v10770_v24  ;;  %v10841_v23 = vld [vmem:[%s12880_s22 + $0x740] ss:$16 sps:$4 sm:$0xff]   ;;  %v10846_v24 = vld [vmem:[%s12880_s22 + $0x564] ss:$16 sps:$4 sm:$0xff]  }
 0x1bd   : > { %7106 = vmatpush1.bf16.msra.mxu0 %v10765_v26  ;;  %v10844_v26 = vld [vmem:[%s12880_s22 + $0x560] ss:$16 sps:$4 sm:$0xff]  }
 0x1be   : > { %7147 = vmatpush1.bf16.msra.mxu1 %v10768_v28  ;;  %7107 = vmatprep.subr.bf16.mxu0 %v10773_v29  ;;  %v10847_v28 = vld [vmem:[%s12880_s22 + $0x760] ss:$16 sps:$4 sm:$0xff]   ;;  %v10852_v29 = vld [vmem:[%s12880_s22 + $0x584] ss:$16 sps:$4 sm:$0xff]  }
 0x1bf   : > { %7148 = vmatprep.subr.bf16.mxu1 %v10776_v31  ;;  %v10855_v31 = vld [vmem:[%s12880_s22 + $0x784] ss:$16 sps:$4 sm:$0xff]  }
 0x1c1   : > { %7108 = vmatpush1.bf16.msra.mxu0 %v10771_v16  ;;  %v10850_v16 = vld [vmem:[%s12880_s22 + $0x580] ss:$16 sps:$4 sm:$0xff]  }
 0x1c2   : > { %7149 = vmatpush1.bf16.msra.mxu1 %v10774_v34  ;;  %7159 = vmatprep.subr.bf16.mxu0 %v10780_v36  ;;  %v10853_v34 = vld [vmem:[%s12880_s22 + $0x780] ss:$16 sps:$4 sm:$0xff]   ;;  %v10858_v36 = vld [vmem:[%s12880_s22 + $0x5a4] ss:$16 sps:$4 sm:$0xff]  }
 0x1c3   : > { %7200 = vmatprep.subr.bf16.mxu1 %v10783_v37  ;;  %v10861_v37 = vld [vmem:[%s12880_s22 + $0x7a4] ss:$16 sps:$4 sm:$0xff]  }
 0x1c4   : > { %7110 = vmatmul.mubr.bf16.vlgmr.msra.gmra.mrb[8].mxu0 %v13141_v40 }
 0x1c5   : > { %7151 = vmatmul.mubr.bf16.vlgmr.msra.gmra.mrb[8].mxu1 %v13145_v41  ;;  %7160 = vmatpush1.bf16.msra.mxu0 %v10778_v42  ;;  %v555_v42 = vld [vmem:[%s14518_s3 + $0x10] sm:$0xff] }
 0x1c6   : > { %7201 = vmatpush1.bf16.msra.mxu1 %v10781_v44  ;;  %7161 = vmatprep.subr.bf16.mxu0 %v10786_v45  ;;  %v10864_v44 = vld [vmem:[%s12880_s22 + $0x5c4] ss:$16 sps:$4 sm:$0xff]  }
 0x1c7   : > { %7202 = vmatprep.subr.bf16.mxu1 %v10789_v46  ;;  %7191 = vmatprep.mubr.bf16.mxu0 %v13151_v47  ;;  %v10867_v45 = vld [vmem:[%s12880_s22 + $0x7c4] ss:$16 sps:$4 sm:$0xff]   ;;  %v601_v46 = vcombine.high %v555_v42, %v555_v42 }
 0x1c8   : > { %7232 = vmatprep.mubr.bf16.mxu1 %v13153_v27 }
 0x1c9   : > { %7162 = vmatpush1.bf16.msra.mxu0 %v10784_v30  ;;  %v10862_v30 = vld [vmem:[%s12880_s22 + $0x5c0] ss:$16 sps:$4 sm:$0xff]  }
 0x1ca   : > { %7203 = vmatpush1.bf16.msra.mxu1 %v10787_v48  ;;  %7163 = vmatprep.subr.bf16.mxu0 %v10792_v50  ;;  %v10865_v48 = vld [vmem:[%s12880_s22 + $0x7c0] ss:$16 sps:$4 sm:$0xff]   ;;  %v10870_v50 = vld [vmem:[%s12880_s22 + $0x5e4] ss:$16 sps:$4 sm:$0xff]  }
 0x1cb   : > { %7204 = vmatprep.subr.bf16.mxu1 %v10795_v51  ;;  %v10873_v51 = vld [vmem:[%s12880_s22 + $0x7e4] ss:$16 sps:$4 sm:$0xff]  }
 0x1cd   : > { %7164 = vmatpush1.bf16.msra.mxu0 %v10790_v52  ;;  %v13219_v52 = vrot.slane %v555_v42, %v12945_v49  ;;  %v10919_v42 = vld [vmem:[%s12880_s22 + $0x8e4] ss:$16 sps:$4 sm:$0xff]  }
 0x1ce   : > { %7205 = vmatpush1.bf16.msra.mxu1 %v10793_v53  ;;  %7165 = vmatprep.subr.bf16.mxu0 %v10798_v54  ;;  %v13222_v53 = vrot.slane %v601_v46, %v12945_v49  ;;  %v10868_v54 = vld [vmem:[%s12880_s22 + $0x5e0] ss:$16 sps:$4 sm:$0xff]  }
 0x1cf   : > { %7206 = vmatprep.subr.bf16.mxu1 %v10801_v55  ;;  %v10871_v55 = vld [vmem:[%s12880_s22 + $0x7e0] ss:$16 sps:$4 sm:$0xff]  }
 0x1d0   : > { %v10920_v46 = vld [vmem:[%s12880_s22 + $0xae0] ss:$16 sps:$4 sm:$0xff]  }
 0x1d1   : > { %7166 = vmatpush1.bf16.msra.mxu0 %v10796_v56  ;;  %v10877_v56 = vld [vmem:[%s12880_s22 + $0x804] ss:$16 sps:$4 sm:$0xff]  }
 0x1d2   : > { %7207 = vmatpush1.bf16.msra.mxu1 %v10799_v57  ;;  %7167 = vmatprep.subr.bf16.mxu0 %v10804_v58  ;;  %v10880_v57 = vld [vmem:[%s12880_s22 + $0xa04] ss:$16 sps:$4 sm:$0xff]   ;;  %v616_v58 = vcombine.high %v13219_v52, %v13219_v52 }
 0x1d3   : > { %7208 = vmatprep.subr.bf16.mxu1 %v10807_v59  ;;  %v617_v59 = vcombine.high %v13222_v53, %v13222_v53 }
 0x1d5   : > { %7168 = vmatpush1.bf16.msra.mxu0 %v10802_v60  ;;  %v13234_v60 = vpack.c.bf16 %v13126_v32, %v13126_v32  ;;  %v13246_v32 = vpack.c.bf16 %v617_v59, %v617_v59  ;;  %v10940_v59 = vld [vmem:[%s12880_s22 + $0xb44] ss:$16 sps:$4 sm:$0xff]  }
 0x1d6   : > { %7209 = vmatpush1.bf16.msra.mxu1 %v10805_v61  ;;  %7169 = vmatprep.subr.bf16.mxu0 %v10810_v62  ;;  %v13238_v61 = vpack.c.bf16 %v13129_v33, %v13129_v33  ;;  %v10875_v62 = vld [vmem:[%s12880_s22 + $0x800] ss:$16 sps:$4 sm:$0xff]  }
 0x1d7   : > { %7210 = vmatprep.subr.bf16.mxu1 %v10813_v63  ;;  %v10878_v63 = vld [vmem:[%s12880_s22 + $0xa00] ss:$16 sps:$4 sm:$0xff]  }
 0x1d8   : > { %v10881_v33 = vld [vmem:[%s12880_s22 + $0x820] ss:$16 sps:$4 sm:$0xff]  }
 0x1d9   : > { %7170 = vmatpush1.bf16.msra.mxu0 %v10808_v0  ;;  %v10883_v0 = vld [vmem:[%s12880_s22 + $0x824] ss:$16 sps:$4 sm:$0xff]  }
 0x1da   : > { %7211 = vmatpush1.bf16.msra.mxu1 %v10811_v1  ;;  %7171 = vmatprep.subr.bf16.mxu0 %v10816_v2  ;;  %v10886_v1 = vld [vmem:[%s12880_s22 + $0xa24] ss:$16 sps:$4 sm:$0xff]   ;;  %v13244_v2 = vpack.c.bf16 %v616_v58, %v616_v58 }
 0x1db   : > { %7212 = vmatprep.subr.bf16.mxu1 %v10819_v3  ;;  %v10884_v3 = vld [vmem:[%s12880_s22 + $0xa20] ss:$16 sps:$4 sm:$0xff]   ;;  %v10937_v58 = vld [vmem:[%s12880_s22 + $0x944] ss:$16 sps:$4 sm:$0xff]  }
 0x1dd   : > { %7172 = vmatpush1.bf16.msra.mxu0 %v10814_v4  ;;  %v10889_v4 = vld [vmem:[%s12880_s22 + $0x844] ss:$16 sps:$4 sm:$0xff]  }
 0x1de   : > { %7213 = vmatpush1.bf16.msra.mxu1 %v10817_v5  ;;  %7173 = vmatprep.subr.bf16.mxu0 %v10822_v6  ;;  %v10892_v5 = vld [vmem:[%s12880_s22 + $0xa44] ss:$16 sps:$4 sm:$0xff]   ;;  %v10887_v6 = vld [vmem:[%s12880_s22 + $0x840] ss:$16 sps:$4 sm:$0xff]  }
 0x1df   : > { %7214 = vmatprep.subr.bf16.mxu1 %v10825_v7  ;;  %v10890_v7 = vld [vmem:[%s12880_s22 + $0xa40] ss:$16 sps:$4 sm:$0xff]  }
 0x1e1   : > { %7174 = vmatpush1.bf16.msra.mxu0 %v10820_v8  ;;  %v10895_v8 = vld [vmem:[%s12880_s22 + $0x864] ss:$16 sps:$4 sm:$0xff]  }
 0x1e2   : > { %7215 = vmatpush1.bf16.msra.mxu1 %v10823_v9  ;;  %7175 = vmatprep.subr.bf16.mxu0 %v10828_v10  ;;  %v10898_v9 = vld [vmem:[%s12880_s22 + $0xa64] ss:$16 sps:$4 sm:$0xff]   ;;  %v10893_v10 = vld [vmem:[%s12880_s22 + $0x860] ss:$16 sps:$4 sm:$0xff]  }
 0x1e3   : > { %7216 = vmatprep.subr.bf16.mxu1 %v10831_v11  ;;  %v10896_v11 = vld [vmem:[%s12880_s22 + $0xa60] ss:$16 sps:$4 sm:$0xff]  }
 0x1e5   : > { %7176 = vmatpush1.bf16.msra.mxu0 %v10826_v12  ;;  %v10901_v12 = vld [vmem:[%s12880_s22 + $0x884] ss:$16 sps:$4 sm:$0xff]  }
 0x1e6   : > { %7217 = vmatpush1.bf16.msra.mxu1 %v10829_v13  ;;  %7177 = vmatprep.subr.bf16.mxu0 %v10834_v14  ;;  %v10904_v13 = vld [vmem:[%s12880_s22 + $0xa84] ss:$16 sps:$4 sm:$0xff]   ;;  %v10899_v14 = vld [vmem:[%s12880_s22 + $0x880] ss:$16 sps:$4 sm:$0xff]  }
 0x1e7   : > { %7218 = vmatprep.subr.bf16.mxu1 %v10837_v15  ;;  %v10902_v15 = vld [vmem:[%s12880_s22 + $0xa80] ss:$16 sps:$4 sm:$0xff]  }
 0x1e9   : > { %7178 = vmatpush1.bf16.msra.mxu0 %v10832_v18  ;;  %v10907_v18 = vld [vmem:[%s12880_s22 + $0x8a4] ss:$16 sps:$4 sm:$0xff]  }
 0x1ea   : > { %7219 = vmatpush1.bf16.msra.mxu1 %v10835_v19  ;;  %7179 = vmatprep.subr.bf16.mxu0 %v10840_v20  ;;  %v10910_v19 = vld [vmem:[%s12880_s22 + $0xaa4] ss:$16 sps:$4 sm:$0xff]   ;;  %v10905_v20 = vld [vmem:[%s12880_s22 + $0x8a0] ss:$16 sps:$4 sm:$0xff]  }
 0x1eb   : > { %7220 = vmatprep.subr.bf16.mxu1 %v10843_v21  ;;  %v10908_v21 = vld [vmem:[%s12880_s22 + $0xaa0] ss:$16 sps:$4 sm:$0xff]  }
 0x1ed   : > { %7180 = vmatpush1.bf16.msra.mxu0 %v10838_v22  ;;  %v10913_v22 = vld [vmem:[%s12880_s22 + $0x8c4] ss:$16 sps:$4 sm:$0xff]  }
 0x1ee   : > { %7221 = vmatpush1.bf16.msra.mxu1 %v10841_v23  ;;  %7181 = vmatprep.subr.bf16.mxu0 %v10846_v24  ;;  %v10916_v23 = vld [vmem:[%s12880_s22 + $0xac4] ss:$16 sps:$4 sm:$0xff]  }
 0x1ef   : > { %7222 = vmatprep.subr.bf16.mxu1 %v10849_v25 }
 0x1f1   : > { %7182 = vmatpush1.bf16.msra.mxu0 %v10844_v26  ;;  %v10911_v26 = vld [vmem:[%s12880_s22 + $0x8c0] ss:$16 sps:$4 sm:$0xff]  }
 0x1f2   : > { %7223 = vmatpush1.bf16.msra.mxu1 %v10847_v28  ;;  %7183 = vmatprep.subr.bf16.mxu0 %v10852_v29  ;;  %v10914_v28 = vld [vmem:[%s12880_s22 + $0xac0] ss:$16 sps:$4 sm:$0xff]  }
 0x1f3   : > { %7224 = vmatprep.subr.bf16.mxu1 %v10855_v31 }
 0x1f5   : > { %7184 = vmatpush1.bf16.msra.mxu0 %v10850_v16 }
 0x1f6   : > { %7225 = vmatpush1.bf16.msra.mxu1 %v10853_v34  ;;  %7185 = vmatprep.subr.bf16.mxu0 %v10858_v36 }
 0x1f7   : > { %7226 = vmatprep.subr.bf16.mxu1 %v10861_v37 }
 0x1f9   : > { %7186 = vmatpush1.bf16.msra.mxu0 %v10856_v38 }
 0x1fa   : > { %7227 = vmatpush1.bf16.msra.mxu1 %v10859_v39  ;;  %7187 = vmatprep.subr.bf16.mxu0 %v10864_v44  ;;  %v10922_v44 = vld [vmem:[%s12880_s22 + $0xae4] ss:$16 sps:$4 sm:$0xff]  }
 0x1fb   : > { %7228 = vmatprep.subr.bf16.mxu1 %v10867_v45  ;;  %v10917_v45 = vld [vmem:[%s12880_s22 + $0x8e0] ss:$16 sps:$4 sm:$0xff]  }
 0x1fd   : > { %7188 = vmatpush1.bf16.msra.mxu0 %v10862_v30  ;;  %v10925_v30 = vld [vmem:[%s12880_s22 + $0x904] ss:$16 sps:$4 sm:$0xff]  }
 0x1fe   : > { %7229 = vmatpush1.bf16.msra.mxu1 %v10865_v48  ;;  %7189 = vmatprep.subr.bf16.mxu0 %v10870_v50  ;;  %v10928_v48 = vld [vmem:[%s12880_s22 + $0xb04] ss:$16 sps:$4 sm:$0xff]   ;;  %v10923_v50 = vld [vmem:[%s12880_s22 + $0x900] ss:$16 sps:$4 sm:$0xff]  }
 0x1ff   : > { %7230 = vmatprep.subr.bf16.mxu1 %v10873_v51  ;;  %v10926_v51 = vld [vmem:[%s12880_s22 + $0xb00] ss:$16 sps:$4 sm:$0xff]  }
 0x201   : > { %7190 = vmatpush1.bf16.msra.mxu0 %v10868_v54  ;;  %v10931_v54 = vld [vmem:[%s12880_s22 + $0x924] ss:$16 sps:$4 sm:$0xff]  }
 0x202   : > { %7231 = vmatpush1.bf16.msra.mxu1 %v10871_v55  ;;  %7241 = vmatprep.subr.bf16.mxu0 %v10877_v56  ;;  %v10934_v55 = vld [vmem:[%s12880_s22 + $0xb24] ss:$16 sps:$4 sm:$0xff]   ;;  %v10929_v56 = vld [vmem:[%s12880_s22 + $0x920] ss:$16 sps:$4 sm:$0xff]  }
 0x203   : > { %7282 = vmatprep.subr.bf16.mxu1 %v10880_v57  ;;  %v10932_v57 = vld [vmem:[%s12880_s22 + $0xb20] ss:$16 sps:$4 sm:$0xff]  }
 0x204   : > { %7192 = vmatmul.mubr.bf16.vlgmr.msra.gmra.mrb[12].mxu0 %v13234_v60 }
 0x205   : > { %7233 = vmatmul.mubr.bf16.vlgmr.msra.gmra.mrb[12].mxu1 %v13238_v61  ;;  %7242 = vmatpush1.bf16.msra.mxu0 %v10875_v62  ;;  %v10935_v62 = vld [vmem:[%s12880_s22 + $0x940] ss:$16 sps:$4 sm:$0xff]  }
 0x206   : > { %7283 = vmatpush1.bf16.msra.mxu1 %v10878_v63  ;;  %7243 = vmatprep.subr.bf16.mxu0 %v10883_v0  ;;  %v10938_v63 = vld [vmem:[%s12880_s22 + $0xb40] ss:$16 sps:$4 sm:$0xff]   ;;  %v10943_v0 = vld [vmem:[%s12880_s22 + $0x964] ss:$16 sps:$4 sm:$0xff]  }
 0x207   : > { %7284 = vmatprep.subr.bf16.mxu1 %v10886_v1  ;;  %7273 = vmatprep.mubr.bf16.mxu0 %v13244_v2  ;;  %v10946_v1 = vld [vmem:[%s12880_s22 + $0xb64] ss:$16 sps:$4 sm:$0xff]  }
 0x208   : > { %7314 = vmatprep.mubr.bf16.mxu1 %v13246_v32 }
 0x209   : > { %7244 = vmatpush1.bf16.msra.mxu0 %v10881_v33  ;;  %v10941_v33 = vld [vmem:[%s12880_s22 + $0x960] ss:$16 sps:$4 sm:$0xff]  }
 0x20a   : > { %7285 = vmatpush1.bf16.msra.mxu1 %v10884_v3  ;;  %7245 = vmatprep.subr.bf16.mxu0 %v10889_v4  ;;  %v10944_v3 = vld [vmem:[%s12880_s22 + $0xb60] ss:$16 sps:$4 sm:$0xff]   ;;  %v10949_v4 = vld [vmem:[%s12880_s22 + $0x984] ss:$16 sps:$4 sm:$0xff]  }
 0x20b   : > { %7286 = vmatprep.subr.bf16.mxu1 %v10892_v5  ;;  %v10952_v5 = vld [vmem:[%s12880_s22 + $0xb84] ss:$16 sps:$4 sm:$0xff]  }
 0x20d   : > { %7246 = vmatpush1.bf16.msra.mxu0 %v10887_v6  ;;  %v10947_v6 = vld [vmem:[%s12880_s22 + $0x980] ss:$16 sps:$4 sm:$0xff]  }
 0x20e   : > { %7287 = vmatpush1.bf16.msra.mxu1 %v10890_v7  ;;  %7247 = vmatprep.subr.bf16.mxu0 %v10895_v8  ;;  %v10950_v7 = vld [vmem:[%s12880_s22 + $0xb80] ss:$16 sps:$4 sm:$0xff]   ;;  %v10955_v8 = vld [vmem:[%s12880_s22 + $0x9a4] ss:$16 sps:$4 sm:$0xff]  }
 0x20f   : > { %7288 = vmatprep.subr.bf16.mxu1 %v10898_v9  ;;  %v10958_v9 = vld [vmem:[%s12880_s22 + $0xba4] ss:$16 sps:$4 sm:$0xff]  }
 0x211   : > { %7248 = vmatpush1.bf16.msra.mxu0 %v10893_v10  ;;  %v556_v10 = vld [vmem:[%s14518_s3 + $0x18] sm:$0xff] }
 0x212   : > { %7289 = vmatpush1.bf16.msra.mxu1 %v10896_v11  ;;  %7249 = vmatprep.subr.bf16.mxu0 %v10901_v12  ;;  %v10953_v11 = vld [vmem:[%s12880_s22 + $0x9a0] ss:$16 sps:$4 sm:$0xff]  }
 0x213   : > { %7290 = vmatprep.subr.bf16.mxu1 %v10904_v13  ;;  %v10956_v12 = vld [vmem:[%s12880_s22 + $0xba0] ss:$16 sps:$4 sm:$0xff]   ;;  %v10961_v13 = vld [vmem:[%s12880_s22 + $0x9c4] ss:$16 sps:$4 sm:$0xff]  }
 0x215   : > { %7250 = vmatpush1.bf16.msra.mxu0 %v10899_v14  ;;  %v10964_v14 = vld [vmem:[%s12880_s22 + $0xbc4] ss:$16 sps:$4 sm:$0xff]  }
 0x216   : > { %7291 = vmatpush1.bf16.msra.mxu1 %v10902_v15  ;;  %7251 = vmatprep.subr.bf16.mxu0 %v10907_v18  ;;  %v618_v15 = vcombine.high %v556_v10, %v556_v10  ;;  %v10959_v18 = vld [vmem:[%s12880_s22 + $0x9c0] ss:$16 sps:$4 sm:$0xff]  }
 0x217   : > { %7292 = vmatprep.subr.bf16.mxu1 %v10910_v19  ;;  %v2467_v24 = vpop.f32.mrb[0].mxu0  ;;  %v10962_v19 = vld [vmem:[%s12880_s22 + $0xbc0] ss:$16 sps:$4 sm:$0xff]  }
 0x218   : > { %v2508_v25 = vpop.f32.mrb[0].mxu1  ;;  %v2469_v31 = vpop.f32.mrb[1].mxu0 }
 0x219   : > { %v13274_v29 = vadd.f32 %v2508_v25, %v2467_v24  ;;  %v2510_v16 = vpop.f32.mrb[1].mxu1  ;;  %v2471_v36 = vpop.f32.mrb[2].mxu0  ;;  %7252 = vmatpush1.bf16.msra.mxu0 %v10905_v20  ;;  %v10967_v20 = vld [vmem:[%s12880_s22 + $0x9e4] ss:$16 sps:$4 sm:$0xff]   ;;  %v10965_v24 = vld [vmem:[%s12880_s22 + $0x9e0] ss:$16 sps:$4 sm:$0xff]  }
 0x21a   : > { %v13276_v34 = vadd.f32 %v2510_v16, %v2469_v31  ;;  %v2512_v37 = vpop.f32.mrb[2].mxu1  ;;  %7293 = vmatpush1.bf16.msra.mxu1 %v10908_v21  ;;  %v2472_v38 = vpop.f32.mrb[3].mxu0  ;;  %7253 = vmatprep.subr.bf16.mxu0 %v10913_v22  ;;  %v10970_v21 = vld [vmem:[%s12880_s22 + $0xbe4] ss:$16 sps:$4 sm:$0xff]   ;;  %v13316_v22 = vrot.slane %v556_v10, %v12945_v49  ;;  %v10968_v25 = vld [vmem:[%s12880_s22 + $0xbe0] ss:$16 sps:$4 sm:$0xff]  }
 0x21b   : > { %v2513_v39 = vpop.f32.mrb[3].mxu1  ;;  %7294 = vmatprep.subr.bf16.mxu1 %v10916_v23  ;;  %v13319_v23 = vrot.slane %v618_v15, %v12945_v49  ;;  %v10972_v31 = vld [vmem:[%s12880_s22 + $0xc00] ss:$16 sps:$4 sm:$0xff]   ;;  %v13333_v38 = vpack.c.bf16 %v13219_v52, %v13219_v52 }
 0x21c   : > { %v10975_v16 = vld [vmem:[%s12880_s22 + $0xe00] ss:$16 sps:$4 sm:$0xff]   ;;  %v633_v36 = vcombine.high %v13316_v22, %v13316_v22  ;;  %v13337_v39 = vpack.c.bf16 %v13222_v53, %v13222_v53 }
 0x21d   : > { %7254 = vmatpush1.bf16.msra.mxu0 %v10911_v26  ;;  %v10974_v26 = vld [vmem:[%s12880_s22 + $0xc04] ss:$16 sps:$4 sm:$0xff]   ;;  %v634_v37 = vcombine.high %v13319_v23, %v13319_v23  ;;  %v10978_v52 = vld [vmem:[%s12880_s22 + $0xc20] ss:$16 sps:$4 sm:$0xff]  }
 0x21e   : > { %7295 = vmatpush1.bf16.msra.mxu1 %v10914_v28  ;;  %7255 = vmatprep.subr.bf16.mxu0 %v10919_v42  ;;  %v10977_v28 = vld [vmem:[%s12880_s22 + $0xe04] ss:$16 sps:$4 sm:$0xff]   ;;  %v10981_v53 = vld [vmem:[%s12880_s22 + $0xe20] ss:$16 sps:$4 sm:$0xff]  }
 0x21f   : > { %7296 = vmatprep.subr.bf16.mxu1 %v10922_v44  ;;  %v10980_v42 = vld [vmem:[%s12880_s22 + $0xc24] ss:$16 sps:$4 sm:$0xff]  }
 0x220   : > { %v10983_v44 = vld [vmem:[%s12880_s22 + $0xe24] ss:$16 sps:$4 sm:$0xff]  }
 0x221   : > { %7256 = vmatpush1.bf16.msra.mxu0 %v10917_v45  ;;  %v13341_v45 = vpack.c.bf16 %v633_v36, %v633_v36  ;;  %v11028_v36 = vld [vmem:[%s12880_s22 + $0xd24] ss:$16 sps:$4 sm:$0xff]  }
 0x222   : > { %7297 = vmatpush1.bf16.msra.mxu1 %v10920_v46  ;;  %7257 = vmatprep.subr.bf16.mxu0 %v10925_v30  ;;  %v13343_v46 = vpack.c.bf16 %v634_v37, %v634_v37  ;;  %v10986_v30 = vld [vmem:[%s12880_s22 + $0xc44] ss:$16 sps:$4 sm:$0xff]  }
 0x223   : > { %7298 = vmatprep.subr.bf16.mxu1 %v10928_v48  ;;  %v10989_v48 = vld [vmem:[%s12880_s22 + $0xe44] ss:$16 sps:$4 sm:$0xff]  }
 0x224   : > { %v11031_v37 = vld [vmem:[%s12880_s22 + $0xf24] ss:$16 sps:$4 sm:$0xff]  }
 0x225   : > { %7258 = vmatpush1.bf16.msra.mxu0 %v10923_v50  ;;  %v10984_v50 = vld [vmem:[%s12880_s22 + $0xc40] ss:$16 sps:$4 sm:$0xff]  }
 0x226   : > { %7299 = vmatpush1.bf16.msra.mxu1 %v10926_v51  ;;  %7259 = vmatprep.subr.bf16.mxu0 %v10931_v54  ;;  %v10987_v51 = vld [vmem:[%s12880_s22 + $0xe40] ss:$16 sps:$4 sm:$0xff]   ;;  %v10992_v54 = vld [vmem:[%s12880_s22 + $0xc64] ss:$16 sps:$4 sm:$0xff]  }
 0x227   : > { %7300 = vmatprep.subr.bf16.mxu1 %v10934_v55  ;;  %v10995_v55 = vld [vmem:[%s12880_s22 + $0xe64] ss:$16 sps:$4 sm:$0xff]  }
 0x229   : > { %7260 = vmatpush1.bf16.msra.mxu0 %v10929_v56  ;;  %v10990_v56 = vld [vmem:[%s12880_s22 + $0xc60] ss:$16 sps:$4 sm:$0xff]  }
 0x22a   : > { %7301 = vmatpush1.bf16.msra.mxu1 %v10932_v57  ;;  %7261 = vmatprep.subr.bf16.mxu0 %v10937_v58  ;;  %v10993_v57 = vld [vmem:[%s12880_s22 + $0xe60] ss:$16 sps:$4 sm:$0xff]   ;;  %v10998_v58 = vld [vmem:[%s12880_s22 + $0xc84] ss:$16 sps:$4 sm:$0xff]  }
 0x22b   : > { %7302 = vmatprep.subr.bf16.mxu1 %v10940_v59  ;;  %v11001_v59 = vld [vmem:[%s12880_s22 + $0xe84] ss:$16 sps:$4 sm:$0xff]  }
 0x22d   : > { %7262 = vmatpush1.bf16.msra.mxu0 %v10935_v62  ;;  %v10996_v62 = vld [vmem:[%s12880_s22 + $0xc80] ss:$16 sps:$4 sm:$0xff]  }
 0x22e   : > { %7303 = vmatpush1.bf16.msra.mxu1 %v10938_v63  ;;  %7263 = vmatprep.subr.bf16.mxu0 %v10943_v0  ;;  %v10999_v63 = vld [vmem:[%s12880_s22 + $0xe80] ss:$16 sps:$4 sm:$0xff]   ;;  %v11004_v0 = vld [vmem:[%s12880_s22 + $0xca4] ss:$16 sps:$4 sm:$0xff]  }
 0x22f   : > { %7304 = vmatprep.subr.bf16.mxu1 %v10946_v1  ;;  %v11007_v1 = vld [vmem:[%s12880_s22 + $0xea4] ss:$16 sps:$4 sm:$0xff]  }
 0x231   : > { %7264 = vmatpush1.bf16.msra.mxu0 %v10941_v33  ;;  %v11002_v33 = vld [vmem:[%s12880_s22 + $0xca0] ss:$16 sps:$4 sm:$0xff]  }
 0x232   : > { %7305 = vmatpush1.bf16.msra.mxu1 %v10944_v3  ;;  %7265 = vmatprep.subr.bf16.mxu0 %v10949_v4  ;;  %v11005_v3 = vld [vmem:[%s12880_s22 + $0xea0] ss:$16 sps:$4 sm:$0xff]   ;;  %v11010_v4 = vld [vmem:[%s12880_s22 + $0xcc4] ss:$16 sps:$4 sm:$0xff]  }
 0x233   : > { %7306 = vmatprep.subr.bf16.mxu1 %v10952_v5  ;;  %v11013_v5 = vld [vmem:[%s12880_s22 + $0xec4] ss:$16 sps:$4 sm:$0xff]  }
 0x235   : > { %7266 = vmatpush1.bf16.msra.mxu0 %v10947_v6 }
 0x236   : > { %7307 = vmatpush1.bf16.msra.mxu1 %v10950_v7  ;;  %7267 = vmatprep.subr.bf16.mxu0 %v10955_v8  ;;  %v11008_v8 = vld [vmem:[%s12880_s22 + $0xcc0] ss:$16 sps:$4 sm:$0xff]  }
 0x237   : > { %7308 = vmatprep.subr.bf16.mxu1 %v10958_v9  ;;  %v11011_v9 = vld [vmem:[%s12880_s22 + $0xec0] ss:$16 sps:$4 sm:$0xff]  }
 0x239   : > { %7268 = vmatpush1.bf16.msra.mxu0 %v10953_v11 }
 0x23a   : > { %7309 = vmatpush1.bf16.msra.mxu1 %v10956_v12  ;;  %7269 = vmatprep.subr.bf16.mxu0 %v10961_v13 }
 0x23b   : > { %7310 = vmatprep.subr.bf16.mxu1 %v10964_v14 }
 0x23d   : > { %7270 = vmatpush1.bf16.msra.mxu0 %v10959_v18 }
 0x23e   : > { %7311 = vmatpush1.bf16.msra.mxu1 %v10962_v19  ;;  %7271 = vmatprep.subr.bf16.mxu0 %v10967_v20  ;;  %v11016_v20 = vld [vmem:[%s12880_s22 + $0xce4] ss:$16 sps:$4 sm:$0xff]  }
 0x23f   : > { %7312 = vmatprep.subr.bf16.mxu1 %v10970_v21  ;;  %v11019_v21 = vld [vmem:[%s12880_s22 + $0xee4] ss:$16 sps:$4 sm:$0xff]  }
 0x241   : > { %7272 = vmatpush1.bf16.msra.mxu0 %v10965_v24  ;;  %v11014_v24 = vld [vmem:[%s12880_s22 + $0xce0] ss:$16 sps:$4 sm:$0xff]  }
 0x242   : > { %7313 = vmatpush1.bf16.msra.mxu1 %v10968_v25  ;;  %7323 = vmatprep.subr.bf16.mxu0 %v10974_v26  ;;  %v11017_v25 = vld [vmem:[%s12880_s22 + $0xee0] ss:$16 sps:$4 sm:$0xff]   ;;  %v11022_v26 = vld [vmem:[%s12880_s22 + $0xd04] ss:$16 sps:$4 sm:$0xff]  }
 0x243   : > { %7364 = vmatprep.subr.bf16.mxu1 %v10977_v28  ;;  %v11025_v28 = vld [vmem:[%s12880_s22 + $0xf04] ss:$16 sps:$4 sm:$0xff]  }
 0x244   : > { %7274 = vmatmul.mubr.bf16.vlgmr.msra.gmra.mrb[16].mxu0 %v13333_v38 }
 0x245   : > { %7315 = vmatmul.mubr.bf16.vlgmr.msra.gmra.mrb[16].mxu1 %v13337_v39  ;;  %7324 = vmatpush1.bf16.msra.mxu0 %v10972_v31  ;;  %v11020_v31 = vld [vmem:[%s12880_s22 + $0xd00] ss:$16 sps:$4 sm:$0xff]  }
 0x246   : > { %7365 = vmatpush1.bf16.msra.mxu1 %v10975_v16  ;;  %7325 = vmatprep.subr.bf16.mxu0 %v10980_v42  ;;  %v11023_v16 = vld [vmem:[%s12880_s22 + $0xf00] ss:$16 sps:$4 sm:$0xff]  }
 0x247   : > { %7366 = vmatprep.subr.bf16.mxu1 %v10983_v44  ;;  %7355 = vmatprep.mubr.bf16.mxu0 %v13341_v45  ;;  %v11026_v42 = vld [vmem:[%s12880_s22 + $0xd20] ss:$16 sps:$4 sm:$0xff]  }
 0x248   : > { %7396 = vmatprep.mubr.bf16.mxu1 %v13343_v46  ;;  %v11029_v44 = vld [vmem:[%s12880_s22 + $0xf20] ss:$16 sps:$4 sm:$0xff]  }
 0x249   : > { %7326 = vmatpush1.bf16.msra.mxu0 %v10978_v52  ;;  %v11034_v52 = vld [vmem:[%s12880_s22 + $0xd44] ss:$16 sps:$4 sm:$0xff]  }
 0x24a   : > { %7367 = vmatpush1.bf16.msra.mxu1 %v10981_v53  ;;  %7327 = vmatprep.subr.bf16.mxu0 %v10986_v30  ;;  %v11037_v53 = vld [vmem:[%s12880_s22 + $0xf44] ss:$16 sps:$4 sm:$0xff]   ;;  %v11032_v30 = vld [vmem:[%s12880_s22 + $0xd40] ss:$16 sps:$4 sm:$0xff]  }
 0x24b   : > { %7368 = vmatprep.subr.bf16.mxu1 %v10989_v48  ;;  %v11035_v48 = vld [vmem:[%s12880_s22 + $0xf40] ss:$16 sps:$4 sm:$0xff]  }
 0x24d   : > { %7328 = vmatpush1.bf16.msra.mxu0 %v10984_v50  ;;  %v11040_v50 = vld [vmem:[%s12880_s22 + $0xd64] ss:$16 sps:$4 sm:$0xff]  }
 0x24e   : > { %7369 = vmatpush1.bf16.msra.mxu1 %v10987_v51  ;;  %7329 = vmatprep.subr.bf16.mxu0 %v10992_v54  ;;  %v11043_v51 = vld [vmem:[%s12880_s22 + $0xf64] ss:$16 sps:$4 sm:$0xff]   ;;  %v11038_v54 = vld [vmem:[%s12880_s22 + $0xd60] ss:$16 sps:$4 sm:$0xff]  }
 0x24f   : > { %7370 = vmatprep.subr.bf16.mxu1 %v10995_v55  ;;  %v11041_v55 = vld [vmem:[%s12880_s22 + $0xf60] ss:$16 sps:$4 sm:$0xff]  }
 0x251   : > { %7330 = vmatpush1.bf16.msra.mxu0 %v10990_v56  ;;  %v11046_v56 = vld [vmem:[%s12880_s22 + $0xd84] ss:$16 sps:$4 sm:$0xff]  }
 0x252   : > { %7371 = vmatpush1.bf16.msra.mxu1 %v10993_v57  ;;  %7331 = vmatprep.subr.bf16.mxu0 %v10998_v58  ;;  %v11049_v57 = vld [vmem:[%s12880_s22 + $0xf84] ss:$16 sps:$4 sm:$0xff]   ;;  %v11044_v58 = vld [vmem:[%s12880_s22 + $0xd80] ss:$16 sps:$4 sm:$0xff]  }
 0x253   : > { %7372 = vmatprep.subr.bf16.mxu1 %v11001_v59  ;;  %v11047_v59 = vld [vmem:[%s12880_s22 + $0xf80] ss:$16 sps:$4 sm:$0xff]  }
 0x255   : > { %7332 = vmatpush1.bf16.msra.mxu0 %v10996_v62  ;;  %v11052_v62 = vld [vmem:[%s12880_s22 + $0xda4] ss:$16 sps:$4 sm:$0xff]  }
 0x256   : > { %7373 = vmatpush1.bf16.msra.mxu1 %v10999_v63  ;;  %7333 = vmatprep.subr.bf16.mxu0 %v11004_v0  ;;  %v11055_v63 = vld [vmem:[%s12880_s22 + $0xfa4] ss:$16 sps:$4 sm:$0xff]  }
 0x257   : > { %7374 = vmatprep.subr.bf16.mxu1 %v11007_v1  ;;  %v2549_v6 = vpop.f32.mrb[4].mxu0  ;;  %v557_v0 = vld [vmem:[%s14518_s3 + $0x20] sm:$0xff] }
 0x258   : > { %v2590_v7 = vpop.f32.mrb[4].mxu1  ;;  %v2551_v11 = vpop.f32.mrb[5].mxu0  ;;  %v11050_v1 = vld [vmem:[%s12880_s22 + $0xda0] ss:$16 sps:$4 sm:$0xff]  }
 0x259   : > { %v13371_v10 = vadd.f32 %v2590_v7, %v2549_v6  ;;  %v2592_v12 = vpop.f32.mrb[5].mxu1  ;;  %v2553_v14 = vpop.f32.mrb[6].mxu0  ;;  %7334 = vmatpush1.bf16.msra.mxu0 %v11002_v33  ;;  %v11053_v33 = vld [vmem:[%s12880_s22 + $0xfa0] ss:$16 sps:$4 sm:$0xff]  }
 0x25a   : > { %v13373_v13 = vadd.f32 %v2592_v12, %v2551_v11  ;;  %v2594_v15 = vpop.f32.mrb[6].mxu1  ;;  %7375 = vmatpush1.bf16.msra.mxu1 %v11005_v3  ;;  %v2554_v18 = vpop.f32.mrb[7].mxu0  ;;  %7335 = vmatprep.subr.bf16.mxu0 %v11010_v4  ;;  %v11058_v3 = vld [vmem:[%s12880_s22 + $0xdc4] ss:$16 sps:$4 sm:$0xff]   ;;  %v11056_v6 = vld [vmem:[%s12880_s22 + $0xdc0] ss:$16 sps:$4 sm:$0xff]   ;;  %v13413_v11 = vrot.slane %v557_v0, %v12945_v49 }
 0x25b   : > { %v2595_v19 = vpop.f32.mrb[7].mxu1  ;;  %7376 = vmatprep.subr.bf16.mxu1 %v11013_v5  ;;  %v11061_v4 = vld [vmem:[%s12880_s22 + $0xfc4] ss:$16 sps:$4 sm:$0xff]   ;;  %v635_v5 = vcombine.high %v557_v0, %v557_v0  ;;  %v11059_v7 = vld [vmem:[%s12880_s22 + $0xfc0] ss:$16 sps:$4 sm:$0xff]  }
 0x25c   : > { %v11062_v14 = vld [vmem:[%s12880_s22 + $0xde0] ss:$16 sps:$4 sm:$0xff]   ;;  %v11071_v18 = vld [vmem:[%s12880_s22 + $0x1004] ss:$16 sps:$4 sm:$0xff]  }
 0x25d   : > { %7336 = vmatpush1.bf16.msra.mxu0 %v11008_v8  ;;  %v11064_v8 = vld [vmem:[%s12880_s22 + $0xde4] ss:$16 sps:$4 sm:$0xff]   ;;  %v13416_v12 = vrot.slane %v635_v5, %v12945_v49  ;;  %v11065_v15 = vld [vmem:[%s12880_s22 + $0xfe0] ss:$16 sps:$4 sm:$0xff]  }
 0x25e   : > { %7377 = vmatpush1.bf16.msra.mxu1 %v11011_v9  ;;  %7337 = vmatprep.subr.bf16.mxu0 %v11016_v20  ;;  %v11067_v9 = vld [vmem:[%s12880_s22 + $0xfe4] ss:$16 sps:$4 sm:$0xff]   ;;  %v11069_v20 = vld [vmem:[%s12880_s22 + $0x1000] ss:$16 sps:$4 sm:$0xff]  }
 0x25f   : > { %7378 = vmatprep.subr.bf16.mxu1 %v11019_v21  ;;  %v11074_v19 = vld [vmem:[%s12880_s22 + $0x1204] ss:$16 sps:$4 sm:$0xff]   ;;  %v11072_v21 = vld [vmem:[%s12880_s22 + $0x1200] ss:$16 sps:$4 sm:$0xff]  }
 0x260   : > { %v11107_v0 = vld [vmem:[%s12880_s22 + $0x10c4] ss:$16 sps:$4 sm:$0xff]   ;;  %v11108_v5 = vld [vmem:[%s12880_s22 + $0x12c0] ss:$16 sps:$4 sm:$0xff]  }
 0x261   : > { %7338 = vmatpush1.bf16.msra.mxu0 %v11014_v24  ;;  %v650_v24 = vcombine.high %v13413_v11, %v13413_v11 }
 0x262   : > { %7379 = vmatpush1.bf16.msra.mxu1 %v11017_v25  ;;  %7339 = vmatprep.subr.bf16.mxu0 %v11022_v26  ;;  %v651_v25 = vcombine.high %v13416_v12, %v13416_v12  ;;  %v13430_v26 = vpack.c.bf16 %v13316_v22, %v13316_v22  ;;  %v11075_v22 = vld [vmem:[%s12880_s22 + $0x1020] ss:$16 sps:$4 sm:$0xff]  }
 0x263   : > { %7380 = vmatprep.subr.bf16.mxu1 %v11025_v28  ;;  %v13434_v28 = vpack.c.bf16 %v13319_v23, %v13319_v23  ;;  %v11078_v23 = vld [vmem:[%s12880_s22 + $0x1220] ss:$16 sps:$4 sm:$0xff]  }
 0x265   : > { %7340 = vmatpush1.bf16.msra.mxu0 %v11020_v31  ;;  %v11077_v31 = vld [vmem:[%s12880_s22 + $0x1024] ss:$16 sps:$4 sm:$0xff]  }
 0x266   : > { %7381 = vmatpush1.bf16.msra.mxu1 %v11023_v16  ;;  %7341 = vmatprep.subr.bf16.mxu0 %v11028_v36  ;;  %v11080_v16 = vld [vmem:[%s12880_s22 + $0x1224] ss:$16 sps:$4 sm:$0xff]   ;;  %v13438_v36 = vpack.c.bf16 %v650_v24, %v650_v24 }
 0x267   : > { %7382 = vmatprep.subr.bf16.mxu1 %v11031_v37  ;;  %v13440_v37 = vpack.c.bf16 %v651_v25, %v651_v25  ;;  %v11114_v25 = vld [vmem:[%s12880_s22 + $0x12e0] ss:$16 sps:$4 sm:$0xff]  }
 0x269   : > { %7342 = vmatpush1.bf16.msra.mxu0 %v11026_v42  ;;  %v11083_v42 = vld [vmem:[%s12880_s22 + $0x1044] ss:$16 sps:$4 sm:$0xff]  }
 0x26a   : > { %7383 = vmatpush1.bf16.msra.mxu1 %v11029_v44  ;;  %7343 = vmatprep.subr.bf16.mxu0 %v11034_v52  ;;  %v11086_v44 = vld [vmem:[%s12880_s22 + $0x1244] ss:$16 sps:$4 sm:$0xff]   ;;  %v11081_v52 = vld [vmem:[%s12880_s22 + $0x1040] ss:$16 sps:$4 sm:$0xff]  }
 0x26b   : > { %7384 = vmatprep.subr.bf16.mxu1 %v11037_v53  ;;  %v11084_v53 = vld [vmem:[%s12880_s22 + $0x1240] ss:$16 sps:$4 sm:$0xff]  }
 0x26d   : > { %7344 = vmatpush1.bf16.msra.mxu0 %v11032_v30  ;;  %v11089_v30 = vld [vmem:[%s12880_s22 + $0x1064] ss:$16 sps:$4 sm:$0xff]  }
 0x26e   : > { %7385 = vmatpush1.bf16.msra.mxu1 %v11035_v48  ;;  %7345 = vmatprep.subr.bf16.mxu0 %v11040_v50  ;;  %v11092_v48 = vld [vmem:[%s12880_s22 + $0x1264] ss:$16 sps:$4 sm:$0xff]   ;;  %v11087_v50 = vld [vmem:[%s12880_s22 + $0x1060] ss:$16 sps:$4 sm:$0xff]  }
 0x26f   : > { %7386 = vmatprep.subr.bf16.mxu1 %v11043_v51  ;;  %v11090_v51 = vld [vmem:[%s12880_s22 + $0x1260] ss:$16 sps:$4 sm:$0xff]  }
 0x271   : > { %7346 = vmatpush1.bf16.msra.mxu0 %v11038_v54  ;;  %v11095_v54 = vld [vmem:[%s12880_s22 + $0x1084] ss:$16 sps:$4 sm:$0xff]  }
 0x272   : > { %7387 = vmatpush1.bf16.msra.mxu1 %v11041_v55  ;;  %7347 = vmatprep.subr.bf16.mxu0 %v11046_v56  ;;  %v11098_v55 = vld [vmem:[%s12880_s22 + $0x1284] ss:$16 sps:$4 sm:$0xff]   ;;  %v11093_v56 = vld [vmem:[%s12880_s22 + $0x1080] ss:$16 sps:$4 sm:$0xff]  }
 0x273   : > { %7388 = vmatprep.subr.bf16.mxu1 %v11049_v57  ;;  %v11096_v57 = vld [vmem:[%s12880_s22 + $0x1280] ss:$16 sps:$4 sm:$0xff]  }
 0x275   : > { %7348 = vmatpush1.bf16.msra.mxu0 %v11044_v58  ;;  %v11101_v58 = vld [vmem:[%s12880_s22 + $0x10a4] ss:$16 sps:$4 sm:$0xff]  }
 0x276   : > { %7389 = vmatpush1.bf16.msra.mxu1 %v11047_v59  ;;  %7349 = vmatprep.subr.bf16.mxu0 %v11052_v62  ;;  %v11104_v59 = vld [vmem:[%s12880_s22 + $0x12a4] ss:$16 sps:$4 sm:$0xff]   ;;  %v11099_v62 = vld [vmem:[%s12880_s22 + $0x10a0] ss:$16 sps:$4 sm:$0xff]  }
 0x277   : > { %7390 = vmatprep.subr.bf16.mxu1 %v11055_v63  ;;  %v11102_v63 = vld [vmem:[%s12880_s22 + $0x12a0] ss:$16 sps:$4 sm:$0xff]  }
 0x279   : > { %7350 = vmatpush1.bf16.msra.mxu0 %v11050_v1  ;;  %v11110_v1 = vld [vmem:[%s12880_s22 + $0x12c4] ss:$16 sps:$4 sm:$0xff]  }
 0x27a   : > { %7391 = vmatpush1.bf16.msra.mxu1 %v11053_v33  ;;  %7351 = vmatprep.subr.bf16.mxu0 %v11058_v3 }
 0x27b   : > { %7392 = vmatprep.subr.bf16.mxu1 %v11061_v4  ;;  %v11105_v4 = vld [vmem:[%s12880_s22 + $0x10c0] ss:$16 sps:$4 sm:$0xff]  }
 0x27d   : > { %7352 = vmatpush1.bf16.msra.mxu0 %v11056_v6 }
 0x27e   : > { %7393 = vmatpush1.bf16.msra.mxu1 %v11059_v7  ;;  %7353 = vmatprep.subr.bf16.mxu0 %v11064_v8 }
 0x27f   : > { %7394 = vmatprep.subr.bf16.mxu1 %v11067_v9 }
 0x281   : > { %7354 = vmatpush1.bf16.msra.mxu0 %v11062_v14 }
 0x282   : > { %7395 = vmatpush1.bf16.msra.mxu1 %v11065_v15  ;;  %7405 = vmatprep.subr.bf16.mxu0 %v11071_v18 }
 0x283   : > { %7446 = vmatprep.subr.bf16.mxu1 %v11074_v19 }
 0x284   : > { %7356 = vmatmul.mubr.bf16.vlgmr.msra.gmra.mrb[20].mxu0 %v13430_v26 }
 0x285   : > { %7397 = vmatmul.mubr.bf16.vlgmr.msra.gmra.mrb[20].mxu1 %v13434_v28  ;;  %7406 = vmatpush1.bf16.msra.mxu0 %v11069_v20 }
 0x286   : > { %7447 = vmatpush1.bf16.msra.mxu1 %v11072_v21  ;;  %7407 = vmatprep.subr.bf16.mxu0 %v11077_v31  ;;  %v11116_v21 = vld [vmem:[%s12880_s22 + $0x12e4] ss:$16 sps:$4 sm:$0xff]  }
 0x287   : > { %7448 = vmatprep.subr.bf16.mxu1 %v11080_v16  ;;  %7437 = vmatprep.mubr.bf16.mxu0 %v13438_v36  ;;  %v11119_v31 = vld [vmem:[%s12880_s22 + $0x1104] ss:$16 sps:$4 sm:$0xff]  }
 0x288   : > { %7478 = vmatprep.mubr.bf16.mxu1 %v13440_v37  ;;  %v11122_v16 = vld [vmem:[%s12880_s22 + $0x1304] ss:$16 sps:$4 sm:$0xff]  }
 0x289   : > { %7408 = vmatpush1.bf16.msra.mxu0 %v11075_v22  ;;  %v11117_v22 = vld [vmem:[%s12880_s22 + $0x1100] ss:$16 sps:$4 sm:$0xff]  }
 0x28a   : > { %7449 = vmatpush1.bf16.msra.mxu1 %v11078_v23  ;;  %7409 = vmatprep.subr.bf16.mxu0 %v11083_v42  ;;  %v11120_v23 = vld [vmem:[%s12880_s22 + $0x1300] ss:$16 sps:$4 sm:$0xff]   ;;  %v11125_v42 = vld [vmem:[%s12880_s22 + $0x1124] ss:$16 sps:$4 sm:$0xff]  }
 0x28b   : > { %7450 = vmatprep.subr.bf16.mxu1 %v11086_v44  ;;  %v11128_v44 = vld [vmem:[%s12880_s22 + $0x1324] ss:$16 sps:$4 sm:$0xff]  }
 0x28d   : > { %7410 = vmatpush1.bf16.msra.mxu0 %v11081_v52  ;;  %v11123_v52 = vld [vmem:[%s12880_s22 + $0x1120] ss:$16 sps:$4 sm:$0xff]  }
 0x28e   : > { %7451 = vmatpush1.bf16.msra.mxu1 %v11084_v53  ;;  %7411 = vmatprep.subr.bf16.mxu0 %v11089_v30  ;;  %v11126_v53 = vld [vmem:[%s12880_s22 + $0x1320] ss:$16 sps:$4 sm:$0xff]   ;;  %v11131_v30 = vld [vmem:[%s12880_s22 + $0x1144] ss:$16 sps:$4 sm:$0xff]  }
 0x28f   : > { %7452 = vmatprep.subr.bf16.mxu1 %v11092_v48  ;;  %v11134_v48 = vld [vmem:[%s12880_s22 + $0x1344] ss:$16 sps:$4 sm:$0xff]  }
 0x291   : > { %7412 = vmatpush1.bf16.msra.mxu0 %v11087_v50  ;;  %v11129_v50 = vld [vmem:[%s12880_s22 + $0x1140] ss:$16 sps:$4 sm:$0xff]  }
 0x292   : > { %7453 = vmatpush1.bf16.msra.mxu1 %v11090_v51  ;;  %7413 = vmatprep.subr.bf16.mxu0 %v11095_v54  ;;  %v11132_v51 = vld [vmem:[%s12880_s22 + $0x1340] ss:$16 sps:$4 sm:$0xff]   ;;  %v11137_v54 = vld [vmem:[%s12880_s22 + $0x1164] ss:$16 sps:$4 sm:$0xff]  }
 0x293   : > { %7454 = vmatprep.subr.bf16.mxu1 %v11098_v55  ;;  %v11140_v55 = vld [vmem:[%s12880_s22 + $0x1364] ss:$16 sps:$4 sm:$0xff]  }
 0x295   : > { %7414 = vmatpush1.bf16.msra.mxu0 %v11093_v56  ;;  %v11135_v56 = vld [vmem:[%s12880_s22 + $0x1160] ss:$16 sps:$4 sm:$0xff]  }
 0x296   : > { %7455 = vmatpush1.bf16.msra.mxu1 %v11096_v57  ;;  %7415 = vmatprep.subr.bf16.mxu0 %v11101_v58  ;;  %v11138_v57 = vld [vmem:[%s12880_s22 + $0x1360] ss:$16 sps:$4 sm:$0xff]   ;;  %v11143_v58 = vld [vmem:[%s12880_s22 + $0x1184] ss:$16 sps:$4 sm:$0xff]  }
 0x297   : > { %7456 = vmatprep.subr.bf16.mxu1 %v11104_v59  ;;  %v7111_v33 = vpop.f32.mrb[8].mxu0  ;;  %v11146_v59 = vld [vmem:[%s12880_s22 + $0x1384] ss:$16 sps:$4 sm:$0xff]  }
 0x298   : > { %v7152_v3 = vpop.f32.mrb[8].mxu1  ;;  %v7112_v6 = vadd.f32 %v7111_v33, %v13274_v29  ;;  %v7113_v7 = vpop.f32.mrb[9].mxu0  ;;  %v11113_v29 = vld [vmem:[%s12880_s22 + $0x10e4] ss:$16 sps:$4 sm:$0xff]   ;;  %v558_v33 = vld [vmem:[%s14518_s3 + $0x28] sm:$0xff] }
 0x299   : > { %v7154_v8 = vpop.f32.mrb[9].mxu1  ;;  %v7114_v9 = vadd.f32 %v7113_v7, %v13276_v34  ;;  %v7115_v14 = vpop.f32.mrb[10].mxu0  ;;  %7416 = vmatpush1.bf16.msra.mxu0 %v11099_v62  ;;  %v11111_v34 = vld [vmem:[%s12880_s22 + $0x10e0] ss:$16 sps:$4 sm:$0xff]   ;;  %v652_v7 = vcombine.high %v558_v33, %v558_v33 }
 0x29a   : > { %v7156_v15 = vpop.f32.mrb[10].mxu1  ;;  %7457 = vmatpush1.bf16.msra.mxu1 %v11102_v63  ;;  %v13470_v18 = vadd.f32 %v7152_v3, %v7112_v6  ;;  %v7116_v19 = vpop.f32.mrb[11].mxu0  ;;  %7417 = vmatprep.subr.bf16.mxu0 %v11107_v0  ;;  %v11141_v62 = vld [vmem:[%s12880_s22 + $0x1180] ss:$16 sps:$4 sm:$0xff]   ;;  %v11149_v0 = vld [vmem:[%s12880_s22 + $0x11a4] ss:$16 sps:$4 sm:$0xff]  }
 0x29b   : > { %v7157_v20 = vpop.f32.mrb[11].mxu1  ;;  %7458 = vmatprep.subr.bf16.mxu1 %v11110_v1  ;;  %v13474_v24 = vadd.f32 %v7154_v8, %v7114_v9  ;;  %v11144_v63 = vld [vmem:[%s12880_s22 + $0x1380] ss:$16 sps:$4 sm:$0xff]   ;;  %v11152_v1 = vld [vmem:[%s12880_s22 + $0x13a4] ss:$16 sps:$4 sm:$0xff]   ;;  %v13512_v19 = vrot.slane %v558_v33, %v12945_v49 }
 0x29c   : > { %v11147_v3 = vld [vmem:[%s12880_s22 + $0x11a0] ss:$16 sps:$4 sm:$0xff]   ;;  %v11158_v6 = vld [vmem:[%s12880_s22 + $0x13c4] ss:$16 sps:$4 sm:$0xff]   ;;  %v13515_v20 = vrot.slane %v652_v7, %v12945_v49 }
 0x29d   : > { %7418 = vmatpush1.bf16.msra.mxu0 %v11105_v4  ;;  %v11150_v4 = vld [vmem:[%s12880_s22 + $0x13a0] ss:$16 sps:$4 sm:$0xff]   ;;  %v11161_v14 = vld [vmem:[%s12880_s22 + $0x11e4] ss:$16 sps:$4 sm:$0xff]  }
 0x29e   : > { %7459 = vmatpush1.bf16.msra.mxu1 %v11108_v5  ;;  %7419 = vmatprep.subr.bf16.mxu0 %v11113_v29  ;;  %v11155_v5 = vld [vmem:[%s12880_s22 + $0x11c4] ss:$16 sps:$4 sm:$0xff]   ;;  %v11153_v8 = vld [vmem:[%s12880_s22 + $0x11c0] ss:$16 sps:$4 sm:$0xff]  }
 0x29f   : > { %7460 = vmatprep.subr.bf16.mxu1 %v11116_v21  ;;  %v11156_v9 = vld [vmem:[%s12880_s22 + $0x13c0] ss:$16 sps:$4 sm:$0xff]   ;;  %v11164_v15 = vld [vmem:[%s12880_s22 + $0x13e4] ss:$16 sps:$4 sm:$0xff]  }
 0x2a0   : > { %v11159_v29 = vld [vmem:[%s12880_s22 + $0x11e0] ss:$16 sps:$4 sm:$0xff]   ;;  %v11198_v33 = vld [vmem:[%s12880_s22 + $0x14a4] ss:$16 sps:$4 sm:$0xff]  }
 0x2a1   : > { %7420 = vmatpush1.bf16.msra.mxu0 %v11111_v34  ;;  %v11162_v21 = vld [vmem:[%s12880_s22 + $0x13e0] ss:$16 sps:$4 sm:$0xff]   ;;  %v11168_v34 = vld [vmem:[%s12880_s22 + $0x1404] ss:$16 sps:$4 sm:$0xff]  }
 0x2a2   : > { %7461 = vmatpush1.bf16.msra.mxu1 %v11114_v25  ;;  %7421 = vmatprep.subr.bf16.mxu0 %v11119_v31  ;;  %v11171_v25 = vld [vmem:[%s12880_s22 + $0x1604] ss:$16 sps:$4 sm:$0xff]   ;;  %v11166_v31 = vld [vmem:[%s12880_s22 + $0x1400] ss:$16 sps:$4 sm:$0xff]  }
 0x2a3   : > { %7462 = vmatprep.subr.bf16.mxu1 %v11122_v16  ;;  %v11169_v16 = vld [vmem:[%s12880_s22 + $0x1600] ss:$16 sps:$4 sm:$0xff]   ;;  %v11207_v7 = vld [vmem:[%s12880_s22 + $0x16c4] ss:$16 sps:$4 sm:$0xff]  }
 0x2a5   : > { %7422 = vmatpush1.bf16.msra.mxu0 %v11117_v22  ;;  %v667_v22 = vcombine.high %v13512_v19, %v13512_v19 }
 0x2a6   : > { %7463 = vmatpush1.bf16.msra.mxu1 %v11120_v23  ;;  %7423 = vmatprep.subr.bf16.mxu0 %v11125_v42  ;;  %v668_v23 = vcombine.high %v13515_v20, %v13515_v20  ;;  %v13529_v42 = vpack.c.bf16 %v13413_v11, %v13413_v11  ;;  %v11172_v11 = vld [vmem:[%s12880_s22 + $0x1420] ss:$16 sps:$4 sm:$0xff]  }
 0x2a7   : > { %7464 = vmatprep.subr.bf16.mxu1 %v11128_v44  ;;  %v13533_v44 = vpack.c.bf16 %v13416_v12, %v13416_v12  ;;  %v11175_v12 = vld [vmem:[%s12880_s22 + $0x1620] ss:$16 sps:$4 sm:$0xff]  }
 0x2a9   : > { %7424 = vmatpush1.bf16.msra.mxu0 %v11123_v52  ;;  %v11174_v52 = vld [vmem:[%s12880_s22 + $0x1424] ss:$16 sps:$4 sm:$0xff]  }
 0x2aa   : > { %7465 = vmatpush1.bf16.msra.mxu1 %v11126_v53  ;;  %7425 = vmatprep.subr.bf16.mxu0 %v11131_v30  ;;  %v11177_v53 = vld [vmem:[%s12880_s22 + $0x1624] ss:$16 sps:$4 sm:$0xff]   ;;  %v13537_v30 = vpack.c.bf16 %v667_v22, %v667_v22 }
 0x2ab   : > { %7466 = vmatprep.subr.bf16.mxu1 %v11134_v48  ;;  %v13539_v48 = vpack.c.bf16 %v668_v23, %v668_v23 }
 0x2ad   : > { %7426 = vmatpush1.bf16.msra.mxu0 %v11129_v50  ;;  %v11180_v50 = vld [vmem:[%s12880_s22 + $0x1444] ss:$16 sps:$4 sm:$0xff]  }
 0x2ae   : > { %7467 = vmatpush1.bf16.msra.mxu1 %v11132_v51  ;;  %7427 = vmatprep.subr.bf16.mxu0 %v11137_v54  ;;  %v11183_v51 = vld [vmem:[%s12880_s22 + $0x1644] ss:$16 sps:$4 sm:$0xff]   ;;  %v11178_v54 = vld [vmem:[%s12880_s22 + $0x1440] ss:$16 sps:$4 sm:$0xff]  }
 0x2af   : > { %7468 = vmatprep.subr.bf16.mxu1 %v11140_v55  ;;  %v11181_v55 = vld [vmem:[%s12880_s22 + $0x1640] ss:$16 sps:$4 sm:$0xff]  }
 0x2b1   : > { %7428 = vmatpush1.bf16.msra.mxu0 %v11135_v56  ;;  %v11186_v56 = vld [vmem:[%s12880_s22 + $0x1464] ss:$16 sps:$4 sm:$0xff]  }
 0x2b2   : > { %7469 = vmatpush1.bf16.msra.mxu1 %v11138_v57  ;;  %7429 = vmatprep.subr.bf16.mxu0 %v11143_v58  ;;  %v11189_v57 = vld [vmem:[%s12880_s22 + $0x1664] ss:$16 sps:$4 sm:$0xff]   ;;  %v11184_v58 = vld [vmem:[%s12880_s22 + $0x1460] ss:$16 sps:$4 sm:$0xff]  }
 0x2b3   : > { %7470 = vmatprep.subr.bf16.mxu1 %v11146_v59  ;;  %v11187_v59 = vld [vmem:[%s12880_s22 + $0x1660] ss:$16 sps:$4 sm:$0xff]  }
 0x2b5   : > { %7430 = vmatpush1.bf16.msra.mxu0 %v11141_v62  ;;  %v11192_v62 = vld [vmem:[%s12880_s22 + $0x1484] ss:$16 sps:$4 sm:$0xff]  }
 0x2b6   : > { %7471 = vmatpush1.bf16.msra.mxu1 %v11144_v63  ;;  %7431 = vmatprep.subr.bf16.mxu0 %v11149_v0  ;;  %v11195_v63 = vld [vmem:[%s12880_s22 + $0x1684] ss:$16 sps:$4 sm:$0xff]   ;;  %v11190_v0 = vld [vmem:[%s12880_s22 + $0x1480] ss:$16 sps:$4 sm:$0xff]  }
 0x2b7   : > { %7472 = vmatprep.subr.bf16.mxu1 %v11152_v1  ;;  %v11193_v1 = vld [vmem:[%s12880_s22 + $0x1680] ss:$16 sps:$4 sm:$0xff]  }
 0x2b9   : > { %7432 = vmatpush1.bf16.msra.mxu0 %v11147_v3  ;;  %v11201_v3 = vld [vmem:[%s12880_s22 + $0x16a4] ss:$16 sps:$4 sm:$0xff]  }
 0x2ba   : > { %7473 = vmatpush1.bf16.msra.mxu1 %v11150_v4  ;;  %7433 = vmatprep.subr.bf16.mxu0 %v11155_v5  ;;  %v11196_v4 = vld [vmem:[%s12880_s22 + $0x14a0] ss:$16 sps:$4 sm:$0xff]  }
 0x2bb   : > { %7474 = vmatprep.subr.bf16.mxu1 %v11158_v6  ;;  %v11199_v5 = vld [vmem:[%s12880_s22 + $0x16a0] ss:$16 sps:$4 sm:$0xff]   ;;  %v11204_v6 = vld [vmem:[%s12880_s22 + $0x14c4] ss:$16 sps:$4 sm:$0xff]  }
 0x2bd   : > { %7434 = vmatpush1.bf16.msra.mxu0 %v11153_v8 }
 0x2be   : > { %7475 = vmatpush1.bf16.msra.mxu1 %v11156_v9  ;;  %7435 = vmatprep.subr.bf16.mxu0 %v11161_v14  ;;  %v11202_v14 = vld [vmem:[%s12880_s22 + $0x14c0] ss:$16 sps:$4 sm:$0xff]  }
 0x2bf   : > { %7476 = vmatprep.subr.bf16.mxu1 %v11164_v15  ;;  %v11205_v15 = vld [vmem:[%s12880_s22 + $0x16c0] ss:$16 sps:$4 sm:$0xff]  }
 0x2c1   : > { %7436 = vmatpush1.bf16.msra.mxu0 %v11159_v29 }
 0x2c2   : > { %7477 = vmatpush1.bf16.msra.mxu1 %v11162_v21  ;;  %7487 = vmatprep.subr.bf16.mxu0 %v11168_v34 }
 0x2c3   : > { %7528 = vmatprep.subr.bf16.mxu1 %v11171_v25 }
 0x2c4   : > { %7438 = vmatmul.mubr.bf16.vlgmr.msra.gmra.mrb[24].mxu0 %v13529_v42 }
 0x2c5   : > { %7479 = vmatmul.mubr.bf16.vlgmr.msra.gmra.mrb[24].mxu1 %v13533_v44  ;;  %7488 = vmatpush1.bf16.msra.mxu0 %v11166_v31 }
 0x2c6   : > { %7529 = vmatpush1.bf16.msra.mxu1 %v11169_v16  ;;  %7489 = vmatprep.subr.bf16.mxu0 %v11174_v52 }
 0x2c7   : > { %7530 = vmatprep.subr.bf16.mxu1 %v11177_v53  ;;  %7519 = vmatprep.mubr.bf16.mxu0 %v13537_v30  ;;  %v11213_v53 = vld [vmem:[%s12880_s22 + $0x16e4] ss:$16 sps:$4 sm:$0xff]  }
 0x2c8   : > { %7560 = vmatprep.mubr.bf16.mxu1 %v13539_v48 }
 0x2c9   : > { %7490 = vmatpush1.bf16.msra.mxu0 %v11172_v11 }
 0x2ca   : > { %7531 = vmatpush1.bf16.msra.mxu1 %v11175_v12  ;;  %7491 = vmatprep.subr.bf16.mxu0 %v11180_v50  ;;  %v11211_v12 = vld [vmem:[%s12880_s22 + $0x16e0] ss:$16 sps:$4 sm:$0xff]   ;;  %v11216_v50 = vld [vmem:[%s12880_s22 + $0x1504] ss:$16 sps:$4 sm:$0xff]  }
 0x2cb   : > { %7532 = vmatprep.subr.bf16.mxu1 %v11183_v51  ;;  %v11219_v51 = vld [vmem:[%s12880_s22 + $0x1704] ss:$16 sps:$4 sm:$0xff]  }
 0x2cd   : > { %7492 = vmatpush1.bf16.msra.mxu0 %v11178_v54  ;;  %v11214_v54 = vld [vmem:[%s12880_s22 + $0x1500] ss:$16 sps:$4 sm:$0xff]  }
 0x2ce   : > { %7533 = vmatpush1.bf16.msra.mxu1 %v11181_v55  ;;  %7493 = vmatprep.subr.bf16.mxu0 %v11186_v56  ;;  %v11217_v55 = vld [vmem:[%s12880_s22 + $0x1700] ss:$16 sps:$4 sm:$0xff]   ;;  %v11222_v56 = vld [vmem:[%s12880_s22 + $0x1524] ss:$16 sps:$4 sm:$0xff]  }
 0x2cf   : > { %7534 = vmatprep.subr.bf16.mxu1 %v11189_v57  ;;  %v11225_v57 = vld [vmem:[%s12880_s22 + $0x1724] ss:$16 sps:$4 sm:$0xff]  }
 0x2d1   : > { %7494 = vmatpush1.bf16.msra.mxu0 %v11184_v58  ;;  %v11220_v58 = vld [vmem:[%s12880_s22 + $0x1520] ss:$16 sps:$4 sm:$0xff]  }
 0x2d2   : > { %7535 = vmatpush1.bf16.msra.mxu1 %v11187_v59  ;;  %7495 = vmatprep.subr.bf16.mxu0 %v11192_v62  ;;  %v11223_v59 = vld [vmem:[%s12880_s22 + $0x1720] ss:$16 sps:$4 sm:$0xff]   ;;  %v11228_v62 = vld [vmem:[%s12880_s22 + $0x1544] ss:$16 sps:$4 sm:$0xff]  }
 0x2d3   : > { %7536 = vmatprep.subr.bf16.mxu1 %v11195_v63  ;;  %v11231_v63 = vld [vmem:[%s12880_s22 + $0x1744] ss:$16 sps:$4 sm:$0xff]  }
 0x2d5   : > { %7496 = vmatpush1.bf16.msra.mxu0 %v11190_v0  ;;  %v11226_v0 = vld [vmem:[%s12880_s22 + $0x1540] ss:$16 sps:$4 sm:$0xff]  }
 0x2d6   : > { %7537 = vmatpush1.bf16.msra.mxu1 %v11193_v1  ;;  %7497 = vmatprep.subr.bf16.mxu0 %v11198_v33  ;;  %v11229_v1 = vld [vmem:[%s12880_s22 + $0x1740] ss:$16 sps:$4 sm:$0xff]   ;;  %v11234_v33 = vld [vmem:[%s12880_s22 + $0x1564] ss:$16 sps:$4 sm:$0xff]  }
 0x2d7   : > { %7538 = vmatprep.subr.bf16.mxu1 %v11201_v3  ;;  %v7193_v8 = vpop.f32.mrb[12].mxu0  ;;  %v11237_v3 = vld [vmem:[%s12880_s22 + $0x1764] ss:$16 sps:$4 sm:$0xff]  }
 0x2d8   : > { %v7234_v9 = vpop.f32.mrb[12].mxu1  ;;  %v7194_v29 = vadd.f32 %v7193_v8, %v13470_v18  ;;  %v7195_v21 = vpop.f32.mrb[13].mxu0  ;;  %v11210_v18 = vld [vmem:[%s12880_s22 + $0x14e4] ss:$16 sps:$4 sm:$0xff]   ;;  %v11238_v8 = vld [vmem:[%s12880_s22 + $0x1580] ss:$16 sps:$4 sm:$0xff]  }
 0x2d9   : > { %v7236_v34 = vpop.f32.mrb[13].mxu1  ;;  %v7196_v25 = vadd.f32 %v7195_v21, %v13474_v24  ;;  %v7197_v31 = vpop.f32.mrb[14].mxu0  ;;  %7498 = vmatpush1.bf16.msra.mxu0 %v11196_v4  ;;  %v11208_v24 = vld [vmem:[%s12880_s22 + $0x14e0] ss:$16 sps:$4 sm:$0xff]  }
 0x2da   : > { %v7238_v16 = vpop.f32.mrb[14].mxu1  ;;  %7539 = vmatpush1.bf16.msra.mxu1 %v11199_v5  ;;  %v13569_v22 = vadd.f32 %v7234_v9, %v7194_v29  ;;  %v7198_v23 = vpop.f32.mrb[15].mxu0  ;;  %7499 = vmatprep.subr.bf16.mxu0 %v11204_v6  ;;  %v11232_v4 = vld [vmem:[%s12880_s22 + $0x1560] ss:$16 sps:$4 sm:$0xff]   ;;  %v11240_v6 = vld [vmem:[%s12880_s22 + $0x1584] ss:$16 sps:$4 sm:$0xff]  }
 0x2db   : > { %v7239_v52 = vpop.f32.mrb[15].mxu1  ;;  %7540 = vmatprep.subr.bf16.mxu1 %v11207_v7  ;;  %v13573_v11 = vadd.f32 %v7236_v34, %v7196_v25  ;;  %v11235_v5 = vld [vmem:[%s12880_s22 + $0x1760] ss:$16 sps:$4 sm:$0xff]   ;;  %v11243_v7 = vld [vmem:[%s12880_s22 + $0x1784] ss:$16 sps:$4 sm:$0xff]  }
 0x2dc   : > { %v11241_v9 = vld [vmem:[%s12880_s22 + $0x1780] ss:$16 sps:$4 sm:$0xff]   ;;  %v11252_v25 = vld [vmem:[%s12880_s22 + $0x15c4] ss:$16 sps:$4 sm:$0xff]  }
 0x2dd   : > { %7500 = vmatpush1.bf16.msra.mxu0 %v11202_v14  ;;  %v11246_v14 = vld [vmem:[%s12880_s22 + $0x15a4] ss:$16 sps:$4 sm:$0xff]   ;;  %v11244_v21 = vld [vmem:[%s12880_s22 + $0x15a0] ss:$16 sps:$4 sm:$0xff]  }
 0x2de   : > { %7541 = vmatpush1.bf16.msra.mxu1 %v11205_v15  ;;  %7501 = vmatprep.subr.bf16.mxu0 %v11210_v18  ;;  %v11249_v15 = vld [vmem:[%s12880_s22 + $0x17a4] ss:$16 sps:$4 sm:$0xff]   ;;  %v11247_v34 = vld [vmem:[%s12880_s22 + $0x17a0] ss:$16 sps:$4 sm:$0xff]  }
 0x2df   : > { %7542 = vmatprep.subr.bf16.mxu1 %v11213_v53  ;;  %v559_v29 = vld [vmem:[%s14518_s3 + $0x30] sm:$0xff] }
 0x2e0   : > { %v11255_v31 = vld [vmem:[%s12880_s22 + $0x17c4] ss:$16 sps:$4 sm:$0xff]   ;;  %v669_v16 = vcombine.high %v559_v29, %v559_v29  ;;  %v11250_v23 = vld [vmem:[%s12880_s22 + $0x15c0] ss:$16 sps:$4 sm:$0xff]  }
 0x2e1   : > { %7502 = vmatpush1.bf16.msra.mxu0 %v11208_v24  ;;  %v11253_v52 = vld [vmem:[%s12880_s22 + $0x17c0] ss:$16 sps:$4 sm:$0xff]   ;;  %v11258_v18 = vld [vmem:[%s12880_s22 + $0x15e4] ss:$16 sps:$4 sm:$0xff]   ;;  %v13611_v24 = vrot.slane %v559_v29, %v12945_v49 }
 0x2e2   : > { %7543 = vmatpush1.bf16.msra.mxu1 %v11211_v12  ;;  %7503 = vmatprep.subr.bf16.mxu0 %v11216_v50  ;;  %v11261_v53 = vld [vmem:[%s12880_s22 + $0x17e4] ss:$16 sps:$4 sm:$0xff]   ;;  %v13614_v12 = vrot.slane %v669_v16, %v12945_v49  ;;  %v11256_v50 = vld [vmem:[%s12880_s22 + $0x15e0] ss:$16 sps:$4 sm:$0xff]  }
 0x2e3   : > { %7544 = vmatprep.subr.bf16.mxu1 %v11219_v51  ;;  %v11259_v51 = vld [vmem:[%s12880_s22 + $0x17e0] ss:$16 sps:$4 sm:$0xff]   ;;  %v11289_v29 = vld [vmem:[%s12880_s22 + $0x1884] ss:$16 sps:$4 sm:$0xff]  }
 0x2e4   : > { %v11298_v16 = vld [vmem:[%s12880_s22 + $0x1aa4] ss:$16 sps:$4 sm:$0xff]  }
 0x2e5   : > { %7504 = vmatpush1.bf16.msra.mxu0 %v11214_v54  ;;  %v11265_v54 = vld [vmem:[%s12880_s22 + $0x1804] ss:$16 sps:$4 sm:$0xff]  }
 0x2e6   : > { %7545 = vmatpush1.bf16.msra.mxu1 %v11217_v55  ;;  %7505 = vmatprep.subr.bf16.mxu0 %v11222_v56  ;;  %v11268_v55 = vld [vmem:[%s12880_s22 + $0x1a04] ss:$16 sps:$4 sm:$0xff]   ;;  %v11263_v56 = vld [vmem:[%s12880_s22 + $0x1800] ss:$16 sps:$4 sm:$0xff]  }
 0x2e7   : > { %7546 = vmatprep.subr.bf16.mxu1 %v11225_v57  ;;  %v11266_v57 = vld [vmem:[%s12880_s22 + $0x1a00] ss:$16 sps:$4 sm:$0xff]  }
 0x2e9   : > { %7506 = vmatpush1.bf16.msra.mxu0 %v11220_v58  ;;  %v684_v58 = vcombine.high %v13611_v24, %v13611_v24 }
 0x2ea   : > { %7547 = vmatpush1.bf16.msra.mxu1 %v11223_v59  ;;  %7507 = vmatprep.subr.bf16.mxu0 %v11228_v62  ;;  %v685_v59 = vcombine.high %v13614_v12, %v13614_v12  ;;  %v13628_v62 = vpack.c.bf16 %v13512_v19, %v13512_v19  ;;  %v11269_v19 = vld [vmem:[%s12880_s22 + $0x1820] ss:$16 sps:$4 sm:$0xff]  }
 0x2eb   : > { %7548 = vmatprep.subr.bf16.mxu1 %v11231_v63  ;;  %v13632_v63 = vpack.c.bf16 %v13515_v20, %v13515_v20  ;;  %v11272_v20 = vld [vmem:[%s12880_s22 + $0x1a20] ss:$16 sps:$4 sm:$0xff]  }
 0x2ed   : > { %7508 = vmatpush1.bf16.msra.mxu0 %v11226_v0  ;;  %v11271_v0 = vld [vmem:[%s12880_s22 + $0x1824] ss:$16 sps:$4 sm:$0xff]  }
 0x2ee   : > { %7549 = vmatpush1.bf16.msra.mxu1 %v11229_v1  ;;  %7509 = vmatprep.subr.bf16.mxu0 %v11234_v33  ;;  %v11274_v1 = vld [vmem:[%s12880_s22 + $0x1a24] ss:$16 sps:$4 sm:$0xff]   ;;  %v13636_v33 = vpack.c.bf16 %v684_v58, %v684_v58 }
 0x2ef   : > { %7550 = vmatprep.subr.bf16.mxu1 %v11237_v3  ;;  %v13638_v3 = vpack.c.bf16 %v685_v59, %v685_v59 }
 0x2f1   : > { %7510 = vmatpush1.bf16.msra.mxu0 %v11232_v4  ;;  %v11277_v4 = vld [vmem:[%s12880_s22 + $0x1844] ss:$16 sps:$4 sm:$0xff]  }
 0x2f2   : > { %7551 = vmatpush1.bf16.msra.mxu1 %v11235_v5  ;;  %7511 = vmatprep.subr.bf16.mxu0 %v11240_v6  ;;  %v11280_v5 = vld [vmem:[%s12880_s22 + $0x1a44] ss:$16 sps:$4 sm:$0xff]   ;;  %v11275_v6 = vld [vmem:[%s12880_s22 + $0x1840] ss:$16 sps:$4 sm:$0xff]  }
 0x2f3   : > { %7552 = vmatprep.subr.bf16.mxu1 %v11243_v7  ;;  %v11278_v7 = vld [vmem:[%s12880_s22 + $0x1a40] ss:$16 sps:$4 sm:$0xff]  }
 0x2f5   : > { %7512 = vmatpush1.bf16.msra.mxu0 %v11238_v8  ;;  %v11283_v8 = vld [vmem:[%s12880_s22 + $0x1864] ss:$16 sps:$4 sm:$0xff]  }
 0x2f6   : > { %7553 = vmatpush1.bf16.msra.mxu1 %v11241_v9  ;;  %7513 = vmatprep.subr.bf16.mxu0 %v11246_v14  ;;  %v11286_v9 = vld [vmem:[%s12880_s22 + $0x1a64] ss:$16 sps:$4 sm:$0xff]   ;;  %v11281_v14 = vld [vmem:[%s12880_s22 + $0x1860] ss:$16 sps:$4 sm:$0xff]  }
 0x2f7   : > { %7554 = vmatprep.subr.bf16.mxu1 %v11249_v15  ;;  %v11284_v15 = vld [vmem:[%s12880_s22 + $0x1a60] ss:$16 sps:$4 sm:$0xff]  }
 0x2f9   : > { %7514 = vmatpush1.bf16.msra.mxu0 %v11244_v21  ;;  %v11292_v21 = vld [vmem:[%s12880_s22 + $0x1a84] ss:$16 sps:$4 sm:$0xff]  }
 0x2fa   : > { %7555 = vmatpush1.bf16.msra.mxu1 %v11247_v34  ;;  %7515 = vmatprep.subr.bf16.mxu0 %v11252_v25  ;;  %v11287_v34 = vld [vmem:[%s12880_s22 + $0x1880] ss:$16 sps:$4 sm:$0xff]  }
 0x2fb   : > { %7556 = vmatprep.subr.bf16.mxu1 %v11255_v31  ;;  %v11290_v25 = vld [vmem:[%s12880_s22 + $0x1a80] ss:$16 sps:$4 sm:$0xff]   ;;  %v11295_v31 = vld [vmem:[%s12880_s22 + $0x18a4] ss:$16 sps:$4 sm:$0xff]  }
 0x2fd   : > { %7516 = vmatpush1.bf16.msra.mxu0 %v11250_v23  ;;  %v11293_v23 = vld [vmem:[%s12880_s22 + $0x18a0] ss:$16 sps:$4 sm:$0xff]  }
 0x2fe   : > { %7557 = vmatpush1.bf16.msra.mxu1 %v11253_v52  ;;  %7517 = vmatprep.subr.bf16.mxu0 %v11258_v18  ;;  %v11296_v52 = vld [vmem:[%s12880_s22 + $0x1aa0] ss:$16 sps:$4 sm:$0xff]   ;;  %v11301_v18 = vld [vmem:[%s12880_s22 + $0x18c4] ss:$16 sps:$4 sm:$0xff]  }
 0x2ff   : > { %7558 = vmatprep.subr.bf16.mxu1 %v11261_v53  ;;  %v11304_v53 = vld [vmem:[%s12880_s22 + $0x1ac4] ss:$16 sps:$4 sm:$0xff]  }
 0x301   : > { %7518 = vmatpush1.bf16.msra.mxu0 %v11256_v50 }
 0x302   : > { %7559 = vmatpush1.bf16.msra.mxu1 %v11259_v51  ;;  %7569 = vmatprep.subr.bf16.mxu0 %v11265_v54  ;;  %v11299_v54 = vld [vmem:[%s12880_s22 + $0x18c0] ss:$16 sps:$4 sm:$0xff]  }
 0x303   : > { %7610 = vmatprep.subr.bf16.mxu1 %v11268_v55  ;;  %v11302_v55 = vld [vmem:[%s12880_s22 + $0x1ac0] ss:$16 sps:$4 sm:$0xff]  }
 0x304   : > { %7520 = vmatmul.mubr.bf16.vlgmr.msra.gmra.mrb[28].mxu0 %v13628_v62 }
 0x305   : > { %7561 = vmatmul.mubr.bf16.vlgmr.msra.gmra.mrb[28].mxu1 %v13632_v63  ;;  %7570 = vmatpush1.bf16.msra.mxu0 %v11263_v56 }
 0x306   : > { %7611 = vmatpush1.bf16.msra.mxu1 %v11266_v57  ;;  %7571 = vmatprep.subr.bf16.mxu0 %v11271_v0 }
 0x307   : > { %7612 = vmatprep.subr.bf16.mxu1 %v11274_v1  ;;  %7601 = vmatprep.mubr.bf16.mxu0 %v13636_v33 }
 0x308   : > { %7642 = vmatprep.mubr.bf16.mxu1 %v13638_v3 }
 0x309   : > { %7572 = vmatpush1.bf16.msra.mxu0 %v11269_v19 }
 0x30a   : > { %7613 = vmatpush1.bf16.msra.mxu1 %v11272_v20  ;;  %7573 = vmatprep.subr.bf16.mxu0 %v11277_v4 }
 0x30b   : > { %7614 = vmatprep.subr.bf16.mxu1 %v11280_v5  ;;  %v11310_v5 = vld [vmem:[%s12880_s22 + $0x1ae4] ss:$16 sps:$4 sm:$0xff]  }
 0x30d   : > { %7574 = vmatpush1.bf16.msra.mxu0 %v11275_v6 }
 0x30e   : > { %7615 = vmatpush1.bf16.msra.mxu1 %v11278_v7  ;;  %7575 = vmatprep.subr.bf16.mxu0 %v11283_v8  ;;  %v11308_v7 = vld [vmem:[%s12880_s22 + $0x1ae0] ss:$16 sps:$4 sm:$0xff]   ;;  %v11313_v8 = vld [vmem:[%s12880_s22 + $0x1904] ss:$16 sps:$4 sm:$0xff]  }
 0x30f   : > { %7616 = vmatprep.subr.bf16.mxu1 %v11286_v9  ;;  %v11316_v9 = vld [vmem:[%s12880_s22 + $0x1b04] ss:$16 sps:$4 sm:$0xff]  }
 0x311   : > { %7576 = vmatpush1.bf16.msra.mxu0 %v11281_v14  ;;  %v11311_v14 = vld [vmem:[%s12880_s22 + $0x1900] ss:$16 sps:$4 sm:$0xff]  }
 0x312   : > { %7617 = vmatpush1.bf16.msra.mxu1 %v11284_v15  ;;  %7577 = vmatprep.subr.bf16.mxu0 %v11289_v29  ;;  %v11314_v15 = vld [vmem:[%s12880_s22 + $0x1b00] ss:$16 sps:$4 sm:$0xff]   ;;  %v11319_v29 = vld [vmem:[%s12880_s22 + $0x1924] ss:$16 sps:$4 sm:$0xff]  }
 0x313   : > { %7618 = vmatprep.subr.bf16.mxu1 %v11292_v21  ;;  %v11322_v21 = vld [vmem:[%s12880_s22 + $0x1b24] ss:$16 sps:$4 sm:$0xff]  }
 0x315   : > { %7578 = vmatpush1.bf16.msra.mxu0 %v11287_v34  ;;  %v11317_v34 = vld [vmem:[%s12880_s22 + $0x1920] ss:$16 sps:$4 sm:$0xff]  }
 0x316   : > { %7619 = vmatpush1.bf16.msra.mxu1 %v11290_v25  ;;  %7579 = vmatprep.subr.bf16.mxu0 %v11295_v31  ;;  %v11320_v25 = vld [vmem:[%s12880_s22 + $0x1b20] ss:$16 sps:$4 sm:$0xff]   ;;  %v11325_v31 = vld [vmem:[%s12880_s22 + $0x1944] ss:$16 sps:$4 sm:$0xff]  }
 0x317   : > { %7620 = vmatprep.subr.bf16.mxu1 %v11298_v16  ;;  %v7275_v50 = vpop.f32.mrb[16].mxu0  ;;  %v11328_v16 = vld [vmem:[%s12880_s22 + $0x1b44] ss:$16 sps:$4 sm:$0xff]  }
 0x318   : > { %v7316_v51 = vpop.f32.mrb[16].mxu1  ;;  %v7276_v56 = vadd.f32 %v7275_v50, %v13569_v22  ;;  %v7277_v57 = vpop.f32.mrb[17].mxu0  ;;  %v11307_v22 = vld [vmem:[%s12880_s22 + $0x18e4] ss:$16 sps:$4 sm:$0xff]   ;;  %v11329_v50 = vld [vmem:[%s12880_s22 + $0x1960] ss:$16 sps:$4 sm:$0xff]  }
 0x319   : > { %v7318_v58 = vpop.f32.mrb[17].mxu1  ;;  %v7278_v59 = vadd.f32 %v7277_v57, %v13573_v11  ;;  %v7279_v0 = vpop.f32.mrb[18].mxu0  ;;  %7580 = vmatpush1.bf16.msra.mxu0 %v11293_v23  ;;  %v11305_v11 = vld [vmem:[%s12880_s22 + $0x18e0] ss:$16 sps:$4 sm:$0xff]  }
 0x31a   : > { %v7320_v1 = vpop.f32.mrb[18].mxu1  ;;  %7621 = vmatpush1.bf16.msra.mxu1 %v11296_v52  ;;  %v13668_v19 = vadd.f32 %v7316_v51, %v7276_v56  ;;  %v7280_v20 = vpop.f32.mrb[19].mxu0  ;;  %7581 = vmatprep.subr.bf16.mxu0 %v11301_v18  ;;  %v11323_v23 = vld [vmem:[%s12880_s22 + $0x1940] ss:$16 sps:$4 sm:$0xff]   ;;  %v11331_v18 = vld [vmem:[%s12880_s22 + $0x1964] ss:$16 sps:$4 sm:$0xff]  }
 0x31b   : > { %v7321_v4 = vpop.f32.mrb[19].mxu1  ;;  %7622 = vmatprep.subr.bf16.mxu1 %v11304_v53  ;;  %v13672_v6 = vadd.f32 %v7318_v58, %v7278_v59  ;;  %v11326_v52 = vld [vmem:[%s12880_s22 + $0x1b40] ss:$16 sps:$4 sm:$0xff]   ;;  %v11334_v53 = vld [vmem:[%s12880_s22 + $0x1b64] ss:$16 sps:$4 sm:$0xff]  }
 0x31c   : > { %v11332_v51 = vld [vmem:[%s12880_s22 + $0x1b60] ss:$16 sps:$4 sm:$0xff]   ;;  %v11343_v58 = vld [vmem:[%s12880_s22 + $0x19a4] ss:$16 sps:$4 sm:$0xff]  }
 0x31d   : > { %7582 = vmatpush1.bf16.msra.mxu0 %v11299_v54  ;;  %v11337_v54 = vld [vmem:[%s12880_s22 + $0x1984] ss:$16 sps:$4 sm:$0xff]   ;;  %v11335_v56 = vld [vmem:[%s12880_s22 + $0x1980] ss:$16 sps:$4 sm:$0xff]  }
 0x31e   : > { %7623 = vmatpush1.bf16.msra.mxu1 %v11302_v55  ;;  %7583 = vmatprep.subr.bf16.mxu0 %v11307_v22  ;;  %v11340_v55 = vld [vmem:[%s12880_s22 + $0x1b84] ss:$16 sps:$4 sm:$0xff]   ;;  %v11338_v57 = vld [vmem:[%s12880_s22 + $0x1b80] ss:$16 sps:$4 sm:$0xff]  }
 0x31f   : > { %7624 = vmatprep.subr.bf16.mxu1 %v11310_v5  ;;  %v11346_v59 = vld [vmem:[%s12880_s22 + $0x1ba4] ss:$16 sps:$4 sm:$0xff]   ;;  %v11341_v0 = vld [vmem:[%s12880_s22 + $0x19a0] ss:$16 sps:$4 sm:$0xff]  }
 0x320   : > { %v11344_v1 = vld [vmem:[%s12880_s22 + $0x1ba0] ss:$16 sps:$4 sm:$0xff]   ;;  %v11349_v20 = vld [vmem:[%s12880_s22 + $0x19c4] ss:$16 sps:$4 sm:$0xff]  }
 0x321   : > { %7584 = vmatpush1.bf16.msra.mxu0 %v11305_v11  ;;  %v11352_v4 = vld [vmem:[%s12880_s22 + $0x1bc4] ss:$16 sps:$4 sm:$0xff]   ;;  %v11347_v22 = vld [vmem:[%s12880_s22 + $0x19c0] ss:$16 sps:$4 sm:$0xff]  }
 0x322   : > { %7625 = vmatpush1.bf16.msra.mxu1 %v11308_v7  ;;  %7585 = vmatprep.subr.bf16.mxu0 %v11313_v8  ;;  %v11350_v5 = vld [vmem:[%s12880_s22 + $0x1bc0] ss:$16 sps:$4 sm:$0xff]   ;;  %v11355_v11 = vld [vmem:[%s12880_s22 + $0x19e4] ss:$16 sps:$4 sm:$0xff]  }
 0x323   : > { %7626 = vmatprep.subr.bf16.mxu1 %v11316_v9  ;;  %v11358_v7 = vld [vmem:[%s12880_s22 + $0x1be4] ss:$16 sps:$4 sm:$0xff]   ;;  %v11353_v8 = vld [vmem:[%s12880_s22 + $0x19e0] ss:$16 sps:$4 sm:$0xff]  }
 0x324   : > { %v11356_v9 = vld [vmem:[%s12880_s22 + $0x1be0] ss:$16 sps:$4 sm:$0xff]  }
 0x325   : > { %7586 = vmatpush1.bf16.msra.mxu0 %v11311_v14  ;;  %v11362_v14 = vld [vmem:[%s12880_s22 + $0xc] ss:$16 sps:$4 sm:$0xff]  }
 0x326   : > { %7627 = vmatpush1.bf16.msra.mxu1 %v11314_v15  ;;  %7587 = vmatprep.subr.bf16.mxu0 %v11319_v29  ;;  %v11365_v15 = vld [vmem:[%s12880_s22 + $0x20c] ss:$16 sps:$4 sm:$0xff]   ;;  %v11360_v29 = vld [vmem:[%s12880_s22 + $0x8] ss:$16 sps:$4 sm:$0xff]  }
 0x327   : > { %7628 = vmatprep.subr.bf16.mxu1 %v11322_v21  ;;  %v11363_v21 = vld [vmem:[%s12880_s22 + $0x208] ss:$16 sps:$4 sm:$0xff]  }
 0x329   : > { %7588 = vmatpush1.bf16.msra.mxu0 %v11317_v34  ;;  %v13714_v34 = vpack.c.bf16 %v13611_v24, %v13611_v24  ;;  %v11366_v24 = vld [vmem:[%s12880_s22 + $0x28] ss:$16 sps:$4 sm:$0xff]  }
 0x32a   : > { %7629 = vmatpush1.bf16.msra.mxu1 %v11320_v25  ;;  %7589 = vmatprep.subr.bf16.mxu0 %v11325_v31  ;;  %v13718_v25 = vpack.c.bf16 %v13614_v12, %v13614_v12  ;;  %v11368_v31 = vld [vmem:[%s12880_s22 + $0x2c] ss:$16 sps:$4 sm:$0xff]   ;;  %v11369_v12 = vld [vmem:[%s12880_s22 + $0x228] ss:$16 sps:$4 sm:$0xff]  }
 0x32b   : > { %7630 = vmatprep.subr.bf16.mxu1 %v11328_v16  ;;  %v11371_v16 = vld [vmem:[%s12880_s22 + $0x22c] ss:$16 sps:$4 sm:$0xff]  }
 0x32d   : > { %7590 = vmatpush1.bf16.msra.mxu0 %v11323_v23  ;;  %v11374_v23 = vld [vmem:[%s12880_s22 + $0x4c] ss:$16 sps:$4 sm:$0xff]  }
 0x32e   : > { %7631 = vmatpush1.bf16.msra.mxu1 %v11326_v52  ;;  %7591 = vmatprep.subr.bf16.mxu0 %v11331_v18  ;;  %v11377_v52 = vld [vmem:[%s12880_s22 + $0x24c] ss:$16 sps:$4 sm:$0xff]   ;;  %v11372_v18 = vld [vmem:[%s12880_s22 + $0x48] ss:$16 sps:$4 sm:$0xff]  }
 0x32f   : > { %7632 = vmatprep.subr.bf16.mxu1 %v11334_v53  ;;  %v11375_v53 = vld [vmem:[%s12880_s22 + $0x248] ss:$16 sps:$4 sm:$0xff]  }
 0x331   : > { %7592 = vmatpush1.bf16.msra.mxu0 %v11329_v50  ;;  %v11380_v50 = vld [vmem:[%s12880_s22 + $0x6c] ss:$16 sps:$4 sm:$0xff]  }
 0x332   : > { %7633 = vmatpush1.bf16.msra.mxu1 %v11332_v51  ;;  %7593 = vmatprep.subr.bf16.mxu0 %v11337_v54  ;;  %v11383_v51 = vld [vmem:[%s12880_s22 + $0x26c] ss:$16 sps:$4 sm:$0xff]   ;;  %v11378_v54 = vld [vmem:[%s12880_s22 + $0x68] ss:$16 sps:$4 sm:$0xff]  }
 0x333   : > { %7634 = vmatprep.subr.bf16.mxu1 %v11340_v55  ;;  %v11389_v55 = vld [vmem:[%s12880_s22 + $0x28c] ss:$16 sps:$4 sm:$0xff]  }
 0x335   : > { %7594 = vmatpush1.bf16.msra.mxu0 %v11335_v56  ;;  %v11384_v56 = vld [vmem:[%s12880_s22 + $0x88] ss:$16 sps:$4 sm:$0xff]  }
 0x336   : > { %7635 = vmatpush1.bf16.msra.mxu1 %v11338_v57  ;;  %7595 = vmatprep.subr.bf16.mxu0 %v11343_v58  ;;  %v11387_v57 = vld [vmem:[%s12880_s22 + $0x288] ss:$16 sps:$4 sm:$0xff]   ;;  %v11392_v58 = vld [vmem:[%s12880_s22 + $0xac] ss:$16 sps:$4 sm:$0xff]  }
 0x337   : > { %7636 = vmatprep.subr.bf16.mxu1 %v11346_v59  ;;  %v11395_v59 = vld [vmem:[%s12880_s22 + $0x2ac] ss:$16 sps:$4 sm:$0xff]  }
 0x339   : > { %7596 = vmatpush1.bf16.msra.mxu0 %v11341_v0  ;;  %v11390_v0 = vld [vmem:[%s12880_s22 + $0xa8] ss:$16 sps:$4 sm:$0xff]  }
 0x33a   : > { %7637 = vmatpush1.bf16.msra.mxu1 %v11344_v1  ;;  %7597 = vmatprep.subr.bf16.mxu0 %v11349_v20  ;;  %v11393_v1 = vld [vmem:[%s12880_s22 + $0x2a8] ss:$16 sps:$4 sm:$0xff]   ;;  %v11398_v20 = vld [vmem:[%s12880_s22 + $0xcc] ss:$16 sps:$4 sm:$0xff]  }
 0x33b   : > { %7638 = vmatprep.subr.bf16.mxu1 %v11352_v4  ;;  %v11401_v4 = vld [vmem:[%s12880_s22 + $0x2cc] ss:$16 sps:$4 sm:$0xff]  }
 0x33d   : > { %7598 = vmatpush1.bf16.msra.mxu0 %v11347_v22 }
 0x33e   : > { %7639 = vmatpush1.bf16.msra.mxu1 %v11350_v5  ;;  %7599 = vmatprep.subr.bf16.mxu0 %v11355_v11 }
 0x33f   : > { %7640 = vmatprep.subr.bf16.mxu1 %v11358_v7 }
 0x341   : > { %7600 = vmatpush1.bf16.msra.mxu0 %v11353_v8 }
 0x342   : > { %7641 = vmatpush1.bf16.msra.mxu1 %v11356_v9  ;;  %7651 = vmatprep.subr.bf16.mxu0 %v11362_v14 }
 0x343   : > { %7692 = vmatprep.subr.bf16.mxu1 %v11365_v15 }
 0x344   : > { %7602 = vmatmul.mubr.bf16.vlgmr.msra.gmra.mrb[32].mxu0 %v13714_v34 }
 0x345   : > { %7643 = vmatmul.mubr.bf16.vlgmr.msra.gmra.mrb[32].mxu1 %v13718_v25  ;;  %7652 = vmatpush1.bf16.msra.mxu0 %v11360_v29  ;;  %v11396_v29 = vld [vmem:[%s12880_s22 + $0xc8] ss:$16 sps:$4 sm:$0xff]  }
 0x346   : > { %7693 = vmatpush1.bf16.msra.mxu1 %v11363_v21  ;;  %7653 = vmatprep.subr.bf16.mxu0 %v11368_v31  ;;  %v11399_v21 = vld [vmem:[%s12880_s22 + $0x2c8] ss:$16 sps:$4 sm:$0xff]  }
 0x347   : > { %7694 = vmatprep.subr.bf16.mxu1 %v11371_v16  ;;  %7683 = vmatprep.mubr.bf16.mxu0 %v13062_v17  ;;  %v11381_v17 = vld [vmem:[%s12880_s22 + $0x268] ss:$16 sps:$4 sm:$0xff]  }
 0x348   : > { %7724 = vmatprep.mubr.bf16.mxu1 %v13067_v35  ;;  %v11386_v35 = vld [vmem:[%s12880_s22 + $0x8c] ss:$16 sps:$4 sm:$0xff]  }
 0x349   : > { %7654 = vmatpush1.bf16.msra.mxu0 %v11366_v24 }
 0x34a   : > { %7695 = vmatpush1.bf16.msra.mxu1 %v11369_v12  ;;  %7655 = vmatprep.subr.bf16.mxu0 %v11374_v23  ;;  %v11402_v23 = vld [vmem:[%s12880_s22 + $0xe8] ss:$16 sps:$4 sm:$0xff]  }
 0x34b   : > { %7696 = vmatprep.subr.bf16.mxu1 %v11377_v52  ;;  %v11405_v52 = vld [vmem:[%s12880_s22 + $0x2e8] ss:$16 sps:$4 sm:$0xff]  }
 0x34d   : > { %7656 = vmatpush1.bf16.msra.mxu0 %v11372_v18  ;;  %v11410_v18 = vld [vmem:[%s12880_s22 + $0x10c] ss:$16 sps:$4 sm:$0xff]  }
 0x34e   : > { %7697 = vmatpush1.bf16.msra.mxu1 %v11375_v53  ;;  %7657 = vmatprep.subr.bf16.mxu0 %v11380_v50  ;;  %v11413_v53 = vld [vmem:[%s12880_s22 + $0x30c] ss:$16 sps:$4 sm:$0xff]   ;;  %v11408_v50 = vld [vmem:[%s12880_s22 + $0x108] ss:$16 sps:$4 sm:$0xff]  }
 0x34f   : > { %7698 = vmatprep.subr.bf16.mxu1 %v11383_v51  ;;  %v11411_v51 = vld [vmem:[%s12880_s22 + $0x308] ss:$16 sps:$4 sm:$0xff]  }
 0x351   : > { %7658 = vmatpush1.bf16.msra.mxu0 %v11378_v54  ;;  %v11416_v54 = vld [vmem:[%s12880_s22 + $0x12c] ss:$16 sps:$4 sm:$0xff]  }
 0x352   : > { %7699 = vmatpush1.bf16.msra.mxu1 %v11381_v17  ;;  %7659 = vmatprep.subr.bf16.mxu0 %v11386_v35  ;;  %v11419_v17 = vld [vmem:[%s12880_s22 + $0x32c] ss:$16 sps:$4 sm:$0xff]   ;;  %v11414_v35 = vld [vmem:[%s12880_s22 + $0x128] ss:$16 sps:$4 sm:$0xff]  }
 0x353   : > { %7700 = vmatprep.subr.bf16.mxu1 %v11389_v55  ;;  %v11417_v55 = vld [vmem:[%s12880_s22 + $0x328] ss:$16 sps:$4 sm:$0xff]  }
 0x355   : > { %7660 = vmatpush1.bf16.msra.mxu0 %v11384_v56  ;;  %v11422_v56 = vld [vmem:[%s12880_s22 + $0x14c] ss:$16 sps:$4 sm:$0xff]  }
 0x356   : > { %7701 = vmatpush1.bf16.msra.mxu1 %v11387_v57  ;;  %7661 = vmatprep.subr.bf16.mxu0 %v11392_v58  ;;  %v11425_v57 = vld [vmem:[%s12880_s22 + $0x34c] ss:$16 sps:$4 sm:$0xff]   ;;  %v11420_v58 = vld [vmem:[%s12880_s22 + $0x148] ss:$16 sps:$4 sm:$0xff]  }
 0x357   : > { %7702 = vmatprep.subr.bf16.mxu1 %v11395_v59  ;;  %v7357_v22 = vpop.f32.mrb[20].mxu0  ;;  %v11423_v59 = vld [vmem:[%s12880_s22 + $0x348] ss:$16 sps:$4 sm:$0xff]  }
 0x358   : > { %v7398_v5 = vpop.f32.mrb[20].mxu1  ;;  %v7358_v11 = vadd.f32 %v7357_v22, %v13668_v19  ;;  %v7359_v7 = vpop.f32.mrb[21].mxu0  ;;  %v11404_v19 = vld [vmem:[%s12880_s22 + $0xec] ss:$16 sps:$4 sm:$0xff]  }
 0x359   : > { %v7400_v8 = vpop.f32.mrb[21].mxu1  ;;  %v7360_v9 = vadd.f32 %v7359_v7, %v13672_v6  ;;  %v7361_v14 = vpop.f32.mrb[22].mxu0  ;;  %7662 = vmatpush1.bf16.msra.mxu0 %v11390_v0  ;;  %v11407_v6 = vld [vmem:[%s12880_s22 + $0x2ec] ss:$16 sps:$4 sm:$0xff]   ;;  %v11435_v7 = vld [vmem:[%s12880_s22 + $0x388] ss:$16 sps:$4 sm:$0xff]  }
 0x35a   : > { %v7402_v15 = vpop.f32.mrb[22].mxu1  ;;  %7703 = vmatpush1.bf16.msra.mxu1 %v11393_v1  ;;  %v13750_v31 = vadd.f32 %v7398_v5, %v7358_v11  ;;  %v7362_v16 = vpop.f32.mrb[23].mxu0  ;;  %7663 = vmatprep.subr.bf16.mxu0 %v11398_v20  ;;  %v11428_v0 = vld [vmem:[%s12880_s22 + $0x16c] ss:$16 sps:$4 sm:$0xff]   ;;  %v11426_v20 = vld [vmem:[%s12880_s22 + $0x168] ss:$16 sps:$4 sm:$0xff]  }
 0x35b   : > { %v7403_v24 = vpop.f32.mrb[23].mxu1  ;;  %7704 = vmatprep.subr.bf16.mxu1 %v11401_v4  ;;  %v13754_v12 = vadd.f32 %v7400_v8, %v7360_v9  ;;  %v11431_v1 = vld [vmem:[%s12880_s22 + $0x36c] ss:$16 sps:$4 sm:$0xff]   ;;  %v11429_v4 = vld [vmem:[%s12880_s22 + $0x368] ss:$16 sps:$4 sm:$0xff]  }
 0x35c   : > { %v11434_v22 = vld [vmem:[%s12880_s22 + $0x18c] ss:$16 sps:$4 sm:$0xff]   ;;  %v11432_v11 = vld [vmem:[%s12880_s22 + $0x188] ss:$16 sps:$4 sm:$0xff]  }
 0x35d   : > { %7664 = vmatpush1.bf16.msra.mxu0 %v11396_v29  ;;  %v11437_v5 = vld [vmem:[%s12880_s22 + $0x38c] ss:$16 sps:$4 sm:$0xff]   ;;  %v11438_v14 = vld [vmem:[%s12880_s22 + $0x1a8] ss:$16 sps:$4 sm:$0xff]  }
 0x35e   : > { %7705 = vmatpush1.bf16.msra.mxu1 %v11399_v21  ;;  %7665 = vmatprep.subr.bf16.mxu0 %v11404_v19  ;;  %v11440_v8 = vld [vmem:[%s12880_s22 + $0x1ac] ss:$16 sps:$4 sm:$0xff]   ;;  %v11441_v15 = vld [vmem:[%s12880_s22 + $0x3a8] ss:$16 sps:$4 sm:$0xff]  }
 0x35f   : > { %7706 = vmatprep.subr.bf16.mxu1 %v11407_v6  ;;  %v11443_v9 = vld [vmem:[%s12880_s22 + $0x3ac] ss:$16 sps:$4 sm:$0xff]   ;;  %v11444_v16 = vld [vmem:[%s12880_s22 + $0x1c8] ss:$16 sps:$4 sm:$0xff]  }
 0x360   : > { %v11446_v29 = vld [vmem:[%s12880_s22 + $0x1cc] ss:$16 sps:$4 sm:$0xff]   ;;  %v11447_v24 = vld [vmem:[%s12880_s22 + $0x3c8] ss:$16 sps:$4 sm:$0xff]  }
 0x361   : > { %7666 = vmatpush1.bf16.msra.mxu0 %v11402_v23  ;;  %v11449_v21 = vld [vmem:[%s12880_s22 + $0x3cc] ss:$16 sps:$4 sm:$0xff]   ;;  %v11450_v23 = vld [vmem:[%s12880_s22 + $0x1e8] ss:$16 sps:$4 sm:$0xff]  }
 0x362   : > { %7707 = vmatpush1.bf16.msra.mxu1 %v11405_v52  ;;  %7667 = vmatprep.subr.bf16.mxu0 %v11410_v18  ;;  %v11452_v19 = vld [vmem:[%s12880_s22 + $0x1ec] ss:$16 sps:$4 sm:$0xff]   ;;  %v11453_v52 = vld [vmem:[%s12880_s22 + $0x3e8] ss:$16 sps:$4 sm:$0xff]  }
 0x363   : > { %7708 = vmatprep.subr.bf16.mxu1 %v11413_v53  ;;  %v11455_v6 = vld [vmem:[%s12880_s22 + $0x3ec] ss:$16 sps:$4 sm:$0xff]  }
 0x364   : > { %v11458_v18 = vld [vmem:[%s12880_s22 + $0x40c] ss:$16 sps:$4 sm:$0xff]  }
 0x365   : > { %7668 = vmatpush1.bf16.msra.mxu0 %v11408_v50  ;;  %v11461_v53 = vld [vmem:[%s12880_s22 + $0x60c] ss:$16 sps:$4 sm:$0xff]   ;;  %v11456_v50 = vld [vmem:[%s12880_s22 + $0x408] ss:$16 sps:$4 sm:$0xff]  }
 0x366   : > { %7709 = vmatpush1.bf16.msra.mxu1 %v11411_v51  ;;  %7669 = vmatprep.subr.bf16.mxu0 %v11416_v54  ;;  %v11459_v51 = vld [vmem:[%s12880_s22 + $0x608] ss:$16 sps:$4 sm:$0xff]   ;;  %v11464_v54 = vld [vmem:[%s12880_s22 + $0x42c] ss:$16 sps:$4 sm:$0xff]  }
 0x367   : > { %7710 = vmatprep.subr.bf16.mxu1 %v11419_v17  ;;  %v11467_v17 = vld [vmem:[%s12880_s22 + $0x62c] ss:$16 sps:$4 sm:$0xff]  }
 0x369   : > { %7670 = vmatpush1.bf16.msra.mxu0 %v11414_v35  ;;  %v11462_v35 = vld [vmem:[%s12880_s22 + $0x428] ss:$16 sps:$4 sm:$0xff]  }
 0x36a   : > { %7711 = vmatpush1.bf16.msra.mxu1 %v11417_v55  ;;  %7671 = vmatprep.subr.bf16.mxu0 %v11422_v56  ;;  %v11465_v55 = vld [vmem:[%s12880_s22 + $0x628] ss:$16 sps:$4 sm:$0xff]   ;;  %v11470_v56 = vld [vmem:[%s12880_s22 + $0x44c] ss:$16 sps:$4 sm:$0xff]  }
 0x36b   : > { %7712 = vmatprep.subr.bf16.mxu1 %v11425_v57  ;;  %v11473_v57 = vld [vmem:[%s12880_s22 + $0x64c] ss:$16 sps:$4 sm:$0xff]  }
 0x36d   : > { %7672 = vmatpush1.bf16.msra.mxu0 %v11420_v58  ;;  %v11476_v58 = vld [vmem:[%s12880_s22 + $0x46c] ss:$16 sps:$4 sm:$0xff]  }
 0x36e   : > { %7713 = vmatpush1.bf16.msra.mxu1 %v11423_v59  ;;  %7673 = vmatprep.subr.bf16.mxu0 %v11428_v0  ;;  %v11479_v59 = vld [vmem:[%s12880_s22 + $0x66c] ss:$16 sps:$4 sm:$0xff]   ;;  %v11474_v0 = vld [vmem:[%s12880_s22 + $0x468] ss:$16 sps:$4 sm:$0xff]  }
 0x36f   : > { %7714 = vmatprep.subr.bf16.mxu1 %v11431_v1  ;;  %v11485_v1 = vld [vmem:[%s12880_s22 + $0x68c] ss:$16 sps:$4 sm:$0xff]  }
 0x371   : > { %7674 = vmatpush1.bf16.msra.mxu0 %v11426_v20  ;;  %v11480_v20 = vld [vmem:[%s12880_s22 + $0x488] ss:$16 sps:$4 sm:$0xff]  }
 0x372   : > { %7715 = vmatpush1.bf16.msra.mxu1 %v11429_v4  ;;  %7675 = vmatprep.subr.bf16.mxu0 %v11434_v22  ;;  %v11483_v4 = vld [vmem:[%s12880_s22 + $0x688] ss:$16 sps:$4 sm:$0xff]   ;;  %v11488_v22 = vld [vmem:[%s12880_s22 + $0x4ac] ss:$16 sps:$4 sm:$0xff]  }
 0x373   : > { %7716 = vmatprep.subr.bf16.mxu1 %v11437_v5  ;;  %v11491_v5 = vld [vmem:[%s12880_s22 + $0x6ac] ss:$16 sps:$4 sm:$0xff]  }
 0x375   : > { %7676 = vmatpush1.bf16.msra.mxu0 %v11432_v11  ;;  %v11486_v11 = vld [vmem:[%s12880_s22 + $0x4a8] ss:$16 sps:$4 sm:$0xff]  }
 0x376   : > { %7717 = vmatpush1.bf16.msra.mxu1 %v11435_v7  ;;  %7677 = vmatprep.subr.bf16.mxu0 %v11440_v8  ;;  %v11489_v7 = vld [vmem:[%s12880_s22 + $0x6a8] ss:$16 sps:$4 sm:$0xff]   ;;  %v11494_v8 = vld [vmem:[%s12880_s22 + $0x4cc] ss:$16 sps:$4 sm:$0xff]  }
 0x377   : > { %7718 = vmatprep.subr.bf16.mxu1 %v11443_v9  ;;  %v11497_v9 = vld [vmem:[%s12880_s22 + $0x6cc] ss:$16 sps:$4 sm:$0xff]  }
 0x379   : > { %7678 = vmatpush1.bf16.msra.mxu0 %v11438_v14 }
 0x37a   : > { %7719 = vmatpush1.bf16.msra.mxu1 %v11441_v15  ;;  %7679 = vmatprep.subr.bf16.mxu0 %v11446_v29 }
 0x37b   : > { %7720 = vmatprep.subr.bf16.mxu1 %v11449_v21 }
 0x37d   : > { %7680 = vmatpush1.bf16.msra.mxu0 %v11444_v16 }
 0x37e   : > { %7721 = vmatpush1.bf16.msra.mxu1 %v11447_v24  ;;  %7681 = vmatprep.subr.bf16.mxu0 %v11452_v19 }
 0x37f   : > { %7722 = vmatprep.subr.bf16.mxu1 %v11455_v6 }
 0x381   : > { %7682 = vmatpush1.bf16.msra.mxu0 %v11450_v23  ;;  %v11492_v23 = vld [vmem:[%s12880_s22 + $0x4c8] ss:$16 sps:$4 sm:$0xff]  }
 0x382   : > { %7723 = vmatpush1.bf16.msra.mxu1 %v11453_v52  ;;  %7733 = vmatprep.subr.bf16.mxu0 %v11458_v18  ;;  %v11495_v52 = vld [vmem:[%s12880_s22 + $0x6c8] ss:$16 sps:$4 sm:$0xff]  }
 0x383   : > { %7774 = vmatprep.subr.bf16.mxu1 %v11461_v53 }
 0x384   : > { %7684 = vmatmul.mubr.bf16.vlgmr.msra.gmra.mrb[36].mxu0 %v13141_v40  ;;  %v11468_v40 = vld [vmem:[%s12880_s22 + $0x448] ss:$16 sps:$4 sm:$0xff]  }
 0x385   : > { %7725 = vmatmul.mubr.bf16.vlgmr.msra.gmra.mrb[36].mxu1 %v13145_v41  ;;  %7734 = vmatpush1.bf16.msra.mxu0 %v11456_v50  ;;  %v11471_v41 = vld [vmem:[%s12880_s22 + $0x648] ss:$16 sps:$4 sm:$0xff]  }
 0x386   : > { %7775 = vmatpush1.bf16.msra.mxu1 %v11459_v51  ;;  %7735 = vmatprep.subr.bf16.mxu0 %v11464_v54  ;;  %v11498_v54 = vld [vmem:[%s12880_s22 + $0x4e8] ss:$16 sps:$4 sm:$0xff]  }
 0x387   : > { %7776 = vmatprep.subr.bf16.mxu1 %v11467_v17  ;;  %7765 = vmatprep.mubr.bf16.mxu0 %v13151_v47  ;;  %v11477_v47 = vld [vmem:[%s12880_s22 + $0x668] ss:$16 sps:$4 sm:$0xff]  }
 0x388   : > { %7806 = vmatprep.mubr.bf16.mxu1 %v13153_v27  ;;  %v11482_v27 = vld [vmem:[%s12880_s22 + $0x48c] ss:$16 sps:$4 sm:$0xff]   ;;  %v11501_v17 = vld [vmem:[%s12880_s22 + $0x6e8] ss:$16 sps:$4 sm:$0xff]  }
 0x389   : > { %7736 = vmatpush1.bf16.msra.mxu0 %v11462_v35  ;;  %v11506_v35 = vld [vmem:[%s12880_s22 + $0x50c] ss:$16 sps:$4 sm:$0xff]  }
 0x38a   : > { %7777 = vmatpush1.bf16.msra.mxu1 %v11465_v55  ;;  %7737 = vmatprep.subr.bf16.mxu0 %v11470_v56  ;;  %v11509_v55 = vld [vmem:[%s12880_s22 + $0x70c] ss:$16 sps:$4 sm:$0xff]   ;;  %v11504_v56 = vld [vmem:[%s12880_s22 + $0x508] ss:$16 sps:$4 sm:$0xff]  }
 0x38b   : > { %7778 = vmatprep.subr.bf16.mxu1 %v11473_v57  ;;  %v11507_v57 = vld [vmem:[%s12880_s22 + $0x708] ss:$16 sps:$4 sm:$0xff]  }
 0x38d   : > { %7738 = vmatpush1.bf16.msra.mxu0 %v11468_v40  ;;  %v11512_v40 = vld [vmem:[%s12880_s22 + $0x52c] ss:$16 sps:$4 sm:$0xff]  }
 0x38e   : > { %7779 = vmatpush1.bf16.msra.mxu1 %v11471_v41  ;;  %7739 = vmatprep.subr.bf16.mxu0 %v11476_v58  ;;  %v11515_v41 = vld [vmem:[%s12880_s22 + $0x72c] ss:$16 sps:$4 sm:$0xff]   ;;  %v11510_v58 = vld [vmem:[%s12880_s22 + $0x528] ss:$16 sps:$4 sm:$0xff]  }
 0x38f   : > { %7780 = vmatprep.subr.bf16.mxu1 %v11479_v59  ;;  %v11513_v59 = vld [vmem:[%s12880_s22 + $0x728] ss:$16 sps:$4 sm:$0xff]  }
 0x391   : > { %7740 = vmatpush1.bf16.msra.mxu0 %v11474_v0  ;;  %v11518_v0 = vld [vmem:[%s12880_s22 + $0x54c] ss:$16 sps:$4 sm:$0xff]  }
 0x392   : > { %7781 = vmatpush1.bf16.msra.mxu1 %v11477_v47  ;;  %7741 = vmatprep.subr.bf16.mxu0 %v11482_v27  ;;  %v11521_v47 = vld [vmem:[%s12880_s22 + $0x74c] ss:$16 sps:$4 sm:$0xff]   ;;  %v11516_v27 = vld [vmem:[%s12880_s22 + $0x548] ss:$16 sps:$4 sm:$0xff]  }
 0x393   : > { %7782 = vmatprep.subr.bf16.mxu1 %v11485_v1  ;;  %v11519_v1 = vld [vmem:[%s12880_s22 + $0x748] ss:$16 sps:$4 sm:$0xff]  }
 0x395   : > { %7742 = vmatpush1.bf16.msra.mxu0 %v11480_v20  ;;  %v11524_v20 = vld [vmem:[%s12880_s22 + $0x56c] ss:$16 sps:$4 sm:$0xff]  }
 0x396   : > { %7783 = vmatpush1.bf16.msra.mxu1 %v11483_v4  ;;  %7743 = vmatprep.subr.bf16.mxu0 %v11488_v22  ;;  %v11527_v4 = vld [vmem:[%s12880_s22 + $0x76c] ss:$16 sps:$4 sm:$0xff]   ;;  %v11522_v22 = vld [vmem:[%s12880_s22 + $0x568] ss:$16 sps:$4 sm:$0xff]  }
 0x397   : > { %7784 = vmatprep.subr.bf16.mxu1 %v11491_v5  ;;  %v7439_v14 = vpop.f32.mrb[24].mxu0  ;;  %v11525_v5 = vld [vmem:[%s12880_s22 + $0x768] ss:$16 sps:$4 sm:$0xff]  }
 0x398   : > { %v7480_v15 = vpop.f32.mrb[24].mxu1  ;;  %v7440_v29 = vadd.f32 %v7439_v14, %v13750_v31  ;;  %v7441_v21 = vpop.f32.mrb[25].mxu0  ;;  %v11500_v31 = vld [vmem:[%s12880_s22 + $0x4ec] ss:$16 sps:$4 sm:$0xff]  }
 0x399   : > { %v7482_v16 = vpop.f32.mrb[25].mxu1  ;;  %v7442_v24 = vadd.f32 %v7441_v21, %v13754_v12  ;;  %v7443_v19 = vpop.f32.mrb[26].mxu0  ;;  %7744 = vmatpush1.bf16.msra.mxu0 %v11486_v11  ;;  %v11503_v12 = vld [vmem:[%s12880_s22 + $0x6ec] ss:$16 sps:$4 sm:$0xff]   ;;  %v11537_v21 = vld [vmem:[%s12880_s22 + $0x7a8] ss:$16 sps:$4 sm:$0xff]  }
 0x39a   : > { %v7484_v6 = vpop.f32.mrb[26].mxu1  ;;  %7785 = vmatpush1.bf16.msra.mxu1 %v11489_v7  ;;  %v13824_v18 = vadd.f32 %v7480_v15, %v7440_v29  ;;  %v7444_v53 = vpop.f32.mrb[27].mxu0  ;;  %7745 = vmatprep.subr.bf16.mxu0 %v11494_v8  ;;  %v11530_v11 = vld [vmem:[%s12880_s22 + $0x58c] ss:$16 sps:$4 sm:$0xff]   ;;  %v11528_v8 = vld [vmem:[%s12880_s22 + $0x588] ss:$16 sps:$4 sm:$0xff]  }
 0x39b   : > { %v7485_v50 = vpop.f32.mrb[27].mxu1  ;;  %7786 = vmatprep.subr.bf16.mxu1 %v11497_v9  ;;  %v13828_v51 = vadd.f32 %v7482_v16, %v7442_v24  ;;  %v11533_v7 = vld [vmem:[%s12880_s22 + $0x78c] ss:$16 sps:$4 sm:$0xff]   ;;  %v11531_v9 = vld [vmem:[%s12880_s22 + $0x788] ss:$16 sps:$4 sm:$0xff]  }
 0x39c   : > { %v11536_v14 = vld [vmem:[%s12880_s22 + $0x5ac] ss:$16 sps:$4 sm:$0xff]   ;;  %v11534_v29 = vld [vmem:[%s12880_s22 + $0x5a8] ss:$16 sps:$4 sm:$0xff]  }
 0x39d   : > { %7746 = vmatpush1.bf16.msra.mxu0 %v11492_v23  ;;  %v11539_v15 = vld [vmem:[%s12880_s22 + $0x7ac] ss:$16 sps:$4 sm:$0xff]   ;;  %v11540_v19 = vld [vmem:[%s12880_s22 + $0x5c8] ss:$16 sps:$4 sm:$0xff]  }
 0x39e   : > { %7787 = vmatpush1.bf16.msra.mxu1 %v11495_v52  ;;  %7747 = vmatprep.subr.bf16.mxu0 %v11500_v31  ;;  %v11542_v16 = vld [vmem:[%s12880_s22 + $0x5cc] ss:$16 sps:$4 sm:$0xff]   ;;  %v11543_v6 = vld [vmem:[%s12880_s22 + $0x7c8] ss:$16 sps:$4 sm:$0xff]  }
 0x39f   : > { %7788 = vmatprep.subr.bf16.mxu1 %v11503_v12  ;;  %v11545_v24 = vld [vmem:[%s12880_s22 + $0x7cc] ss:$16 sps:$4 sm:$0xff]   ;;  %v11546_v53 = vld [vmem:[%s12880_s22 + $0x5e8] ss:$16 sps:$4 sm:$0xff]  }
 0x3a0   : > { %v11548_v23 = vld [vmem:[%s12880_s22 + $0x5ec] ss:$16 sps:$4 sm:$0xff]   ;;  %v11549_v50 = vld [vmem:[%s12880_s22 + $0x7e8] ss:$16 sps:$4 sm:$0xff]  }
 0x3a1   : > { %7748 = vmatpush1.bf16.msra.mxu0 %v11498_v54  ;;  %v11551_v52 = vld [vmem:[%s12880_s22 + $0x7ec] ss:$16 sps:$4 sm:$0xff]   ;;  %v11552_v54 = vld [vmem:[%s12880_s22 + $0x808] ss:$16 sps:$4 sm:$0xff]  }
 0x3a2   : > { %7789 = vmatpush1.bf16.msra.mxu1 %v11501_v17  ;;  %7749 = vmatprep.subr.bf16.mxu0 %v11506_v35  ;;  %v11554_v31 = vld [vmem:[%s12880_s22 + $0x80c] ss:$16 sps:$4 sm:$0xff]   ;;  %v11555_v17 = vld [vmem:[%s12880_s22 + $0xa08] ss:$16 sps:$4 sm:$0xff]  }
 0x3a3   : > { %7790 = vmatprep.subr.bf16.mxu1 %v11509_v55  ;;  %v11557_v12 = vld [vmem:[%s12880_s22 + $0xa0c] ss:$16 sps:$4 sm:$0xff]  }
 0x3a4   : > { %v11560_v35 = vld [vmem:[%s12880_s22 + $0x82c] ss:$16 sps:$4 sm:$0xff]  }
 0x3a5   : > { %7750 = vmatpush1.bf16.msra.mxu0 %v11504_v56  ;;  %v11563_v55 = vld [vmem:[%s12880_s22 + $0xa2c] ss:$16 sps:$4 sm:$0xff]   ;;  %v11558_v56 = vld [vmem:[%s12880_s22 + $0x828] ss:$16 sps:$4 sm:$0xff]  }
 0x3a6   : > { %7791 = vmatpush1.bf16.msra.mxu1 %v11507_v57  ;;  %7751 = vmatprep.subr.bf16.mxu0 %v11512_v40  ;;  %v11561_v57 = vld [vmem:[%s12880_s22 + $0xa28] ss:$16 sps:$4 sm:$0xff]   ;;  %v11566_v40 = vld [vmem:[%s12880_s22 + $0x84c] ss:$16 sps:$4 sm:$0xff]  }
 0x3a7   : > { %7792 = vmatprep.subr.bf16.mxu1 %v11515_v41  ;;  %v11569_v41 = vld [vmem:[%s12880_s22 + $0xa4c] ss:$16 sps:$4 sm:$0xff]  }
 0x3a9   : > { %7752 = vmatpush1.bf16.msra.mxu0 %v11510_v58  ;;  %v11572_v58 = vld [vmem:[%s12880_s22 + $0x86c] ss:$16 sps:$4 sm:$0xff]  }
 0x3aa   : > { %7793 = vmatpush1.bf16.msra.mxu1 %v11513_v59  ;;  %7753 = vmatprep.subr.bf16.mxu0 %v11518_v0  ;;  %v11575_v59 = vld [vmem:[%s12880_s22 + $0xa6c] ss:$16 sps:$4 sm:$0xff]   ;;  %v11570_v0 = vld [vmem:[%s12880_s22 + $0x868] ss:$16 sps:$4 sm:$0xff]  }
 0x3ab   : > { %7794 = vmatprep.subr.bf16.mxu1 %v11521_v47  ;;  %v11581_v47 = vld [vmem:[%s12880_s22 + $0xa8c] ss:$16 sps:$4 sm:$0xff]  }
 0x3ad   : > { %7754 = vmatpush1.bf16.msra.mxu0 %v11516_v27  ;;  %v11576_v27 = vld [vmem:[%s12880_s22 + $0x888] ss:$16 sps:$4 sm:$0xff]  }
 0x3ae   : > { %7795 = vmatpush1.bf16.msra.mxu1 %v11519_v1  ;;  %7755 = vmatprep.subr.bf16.mxu0 %v11524_v20  ;;  %v11579_v1 = vld [vmem:[%s12880_s22 + $0xa88] ss:$16 sps:$4 sm:$0xff]   ;;  %v11584_v20 = vld [vmem:[%s12880_s22 + $0x8ac] ss:$16 sps:$4 sm:$0xff]  }
 0x3af   : > { %7796 = vmatprep.subr.bf16.mxu1 %v11527_v4  ;;  %v11587_v4 = vld [vmem:[%s12880_s22 + $0xaac] ss:$16 sps:$4 sm:$0xff]  }
 0x3b1   : > { %7756 = vmatpush1.bf16.msra.mxu0 %v11522_v22  ;;  %v11582_v22 = vld [vmem:[%s12880_s22 + $0x8a8] ss:$16 sps:$4 sm:$0xff]  }
 0x3b2   : > { %7797 = vmatpush1.bf16.msra.mxu1 %v11525_v5  ;;  %7757 = vmatprep.subr.bf16.mxu0 %v11530_v11  ;;  %v11585_v5 = vld [vmem:[%s12880_s22 + $0xaa8] ss:$16 sps:$4 sm:$0xff]   ;;  %v11590_v11 = vld [vmem:[%s12880_s22 + $0x8cc] ss:$16 sps:$4 sm:$0xff]  }
 0x3b3   : > { %7798 = vmatprep.subr.bf16.mxu1 %v11533_v7  ;;  %v11593_v7 = vld [vmem:[%s12880_s22 + $0xacc] ss:$16 sps:$4 sm:$0xff]  }
 0x3b5   : > { %7758 = vmatpush1.bf16.msra.mxu0 %v11528_v8 }
 0x3b6   : > { %7799 = vmatpush1.bf16.msra.mxu1 %v11531_v9  ;;  %7759 = vmatprep.subr.bf16.mxu0 %v11536_v14 }
 0x3b7   : > { %7800 = vmatprep.subr.bf16.mxu1 %v11539_v15 }
 0x3b9   : > { %7760 = vmatpush1.bf16.msra.mxu0 %v11534_v29 }
 0x3ba   : > { %7801 = vmatpush1.bf16.msra.mxu1 %v11537_v21  ;;  %7761 = vmatprep.subr.bf16.mxu0 %v11542_v16 }
 0x3bb   : > { %7802 = vmatprep.subr.bf16.mxu1 %v11545_v24 }
 0x3bd   : > { %7762 = vmatpush1.bf16.msra.mxu0 %v11540_v19  ;;  %v11588_v19 = vld [vmem:[%s12880_s22 + $0x8c8] ss:$16 sps:$4 sm:$0xff]  }
 0x3be   : > { %7803 = vmatpush1.bf16.msra.mxu1 %v11543_v6  ;;  %7763 = vmatprep.subr.bf16.mxu0 %v11548_v23  ;;  %v11591_v6 = vld [vmem:[%s12880_s22 + $0xac8] ss:$16 sps:$4 sm:$0xff]  }
 0x3bf   : > { %7804 = vmatprep.subr.bf16.mxu1 %v11551_v52 }
 0x3c1   : > { %7764 = vmatpush1.bf16.msra.mxu0 %v11546_v53 }
 0x3c2   : > { %7805 = vmatpush1.bf16.msra.mxu1 %v11549_v50  ;;  %7815 = vmatprep.subr.bf16.mxu0 %v11554_v31  ;;  %v11594_v31 = vld [vmem:[%s12880_s22 + $0x8e8] ss:$16 sps:$4 sm:$0xff]  }
 0x3c3   : > { %7856 = vmatprep.subr.bf16.mxu1 %v11557_v12  ;;  %v11597_v12 = vld [vmem:[%s12880_s22 + $0xae8] ss:$16 sps:$4 sm:$0xff]  }
 0x3c4   : > { %7766 = vmatmul.mubr.bf16.vlgmr.msra.gmra.mrb[40].mxu0 %v13234_v60  ;;  %v11564_v60 = vld [vmem:[%s12880_s22 + $0x848] ss:$16 sps:$4 sm:$0xff]  }
 0x3c5   : > { %7807 = vmatmul.mubr.bf16.vlgmr.msra.gmra.mrb[40].mxu1 %v13238_v61  ;;  %7816 = vmatpush1.bf16.msra.mxu0 %v11552_v54  ;;  %v11567_v61 = vld [vmem:[%s12880_s22 + $0xa48] ss:$16 sps:$4 sm:$0xff]   ;;  %v11602_v54 = vld [vmem:[%s12880_s22 + $0x90c] ss:$16 sps:$4 sm:$0xff]  }
 0x3c6   : > { %7857 = vmatpush1.bf16.msra.mxu1 %v11555_v17  ;;  %7817 = vmatprep.subr.bf16.mxu0 %v11560_v35  ;;  %v11605_v17 = vld [vmem:[%s12880_s22 + $0xb0c] ss:$16 sps:$4 sm:$0xff]   ;;  %v11600_v35 = vld [vmem:[%s12880_s22 + $0x908] ss:$16 sps:$4 sm:$0xff]  }
 0x3c7   : > { %7858 = vmatprep.subr.bf16.mxu1 %v11563_v55  ;;  %7847 = vmatprep.mubr.bf16.mxu0 %v13244_v2  ;;  %v11573_v2 = vld [vmem:[%s12880_s22 + $0xa68] ss:$16 sps:$4 sm:$0xff]  }
 0x3c8   : > { %7888 = vmatprep.mubr.bf16.mxu1 %v13246_v32  ;;  %v11578_v32 = vld [vmem:[%s12880_s22 + $0x88c] ss:$16 sps:$4 sm:$0xff]   ;;  %v11603_v55 = vld [vmem:[%s12880_s22 + $0xb08] ss:$16 sps:$4 sm:$0xff]  }
 0x3c9   : > { %7818 = vmatpush1.bf16.msra.mxu0 %v11558_v56  ;;  %v11608_v56 = vld [vmem:[%s12880_s22 + $0x92c] ss:$16 sps:$4 sm:$0xff]  }
 0x3ca   : > { %7859 = vmatpush1.bf16.msra.mxu1 %v11561_v57  ;;  %7819 = vmatprep.subr.bf16.mxu0 %v11566_v40  ;;  %v11611_v57 = vld [vmem:[%s12880_s22 + $0xb2c] ss:$16 sps:$4 sm:$0xff]   ;;  %v11606_v40 = vld [vmem:[%s12880_s22 + $0x928] ss:$16 sps:$4 sm:$0xff]  }
 0x3cb   : > { %7860 = vmatprep.subr.bf16.mxu1 %v11569_v41  ;;  %v11609_v41 = vld [vmem:[%s12880_s22 + $0xb28] ss:$16 sps:$4 sm:$0xff]  }
 0x3cd   : > { %7820 = vmatpush1.bf16.msra.mxu0 %v11564_v60  ;;  %v11614_v60 = vld [vmem:[%s12880_s22 + $0x94c] ss:$16 sps:$4 sm:$0xff]  }
 0x3ce   : > { %7861 = vmatpush1.bf16.msra.mxu1 %v11567_v61  ;;  %7821 = vmatprep.subr.bf16.mxu0 %v11572_v58  ;;  %v11617_v61 = vld [vmem:[%s12880_s22 + $0xb4c] ss:$16 sps:$4 sm:$0xff]   ;;  %v11612_v58 = vld [vmem:[%s12880_s22 + $0x948] ss:$16 sps:$4 sm:$0xff]  }
 0x3cf   : > { %7862 = vmatprep.subr.bf16.mxu1 %v11575_v59  ;;  %v11615_v59 = vld [vmem:[%s12880_s22 + $0xb48] ss:$16 sps:$4 sm:$0xff]  }
 0x3d1   : > { %7822 = vmatpush1.bf16.msra.mxu0 %v11570_v0  ;;  %v11620_v0 = vld [vmem:[%s12880_s22 + $0x96c] ss:$16 sps:$4 sm:$0xff]  }
 0x3d2   : > { %7863 = vmatpush1.bf16.msra.mxu1 %v11573_v2  ;;  %7823 = vmatprep.subr.bf16.mxu0 %v11578_v32  ;;  %v11623_v2 = vld [vmem:[%s12880_s22 + $0xb6c] ss:$16 sps:$4 sm:$0xff]   ;;  %v11618_v32 = vld [vmem:[%s12880_s22 + $0x968] ss:$16 sps:$4 sm:$0xff]  }
 0x3d3   : > { %7864 = vmatprep.subr.bf16.mxu1 %v11581_v47  ;;  %v11621_v47 = vld [vmem:[%s12880_s22 + $0xb68] ss:$16 sps:$4 sm:$0xff]  }
 0x3d5   : > { %7824 = vmatpush1.bf16.msra.mxu0 %v11576_v27  ;;  %v11626_v27 = vld [vmem:[%s12880_s22 + $0x98c] ss:$16 sps:$4 sm:$0xff]  }
 0x3d6   : > { %7865 = vmatpush1.bf16.msra.mxu1 %v11579_v1  ;;  %7825 = vmatprep.subr.bf16.mxu0 %v11584_v20  ;;  %v11629_v1 = vld [vmem:[%s12880_s22 + $0xb8c] ss:$16 sps:$4 sm:$0xff]   ;;  %v11624_v20 = vld [vmem:[%s12880_s22 + $0x988] ss:$16 sps:$4 sm:$0xff]  }
 0x3d7   : > { %7866 = vmatprep.subr.bf16.mxu1 %v11587_v4  ;;  %v7521_v8 = vpop.f32.mrb[28].mxu0  ;;  %v11627_v4 = vld [vmem:[%s12880_s22 + $0xb88] ss:$16 sps:$4 sm:$0xff]  }
 0x3d8   : > { %v7562_v9 = vpop.f32.mrb[28].mxu1  ;;  %v7522_v14 = vadd.f32 %v7521_v8, %v13824_v18  ;;  %v7523_v15 = vpop.f32.mrb[29].mxu0  ;;  %v11596_v18 = vld [vmem:[%s12880_s22 + $0x8ec] ss:$16 sps:$4 sm:$0xff]  }
 0x3d9   : > { %v7564_v29 = vpop.f32.mrb[29].mxu1  ;;  %v7524_v21 = vadd.f32 %v7523_v15, %v13828_v51  ;;  %v7525_v16 = vpop.f32.mrb[30].mxu0  ;;  %7826 = vmatpush1.bf16.msra.mxu0 %v11582_v22  ;;  %v11599_v51 = vld [vmem:[%s12880_s22 + $0xaec] ss:$16 sps:$4 sm:$0xff]   ;;  %v11639_v15 = vld [vmem:[%s12880_s22 + $0xbc8] ss:$16 sps:$4 sm:$0xff]  }
 0x3da   : > { %v7566_v24 = vpop.f32.mrb[30].mxu1  ;;  %7867 = vmatpush1.bf16.msra.mxu1 %v11585_v5  ;;  %v13898_v23 = vadd.f32 %v7562_v9, %v7522_v14  ;;  %v7526_v52 = vpop.f32.mrb[31].mxu0  ;;  %7827 = vmatprep.subr.bf16.mxu0 %v11590_v11  ;;  %v11632_v22 = vld [vmem:[%s12880_s22 + $0x9ac] ss:$16 sps:$4 sm:$0xff]   ;;  %v11630_v11 = vld [vmem:[%s12880_s22 + $0x9a8] ss:$16 sps:$4 sm:$0xff]  }
 0x3db   : > { %v7567_v53 = vpop.f32.mrb[31].mxu1  ;;  %7868 = vmatprep.subr.bf16.mxu1 %v11593_v7  ;;  %v13902_v50 = vadd.f32 %v7564_v29, %v7524_v21  ;;  %v11635_v5 = vld [vmem:[%s12880_s22 + $0xbac] ss:$16 sps:$4 sm:$0xff]   ;;  %v11633_v7 = vld [vmem:[%s12880_s22 + $0xba8] ss:$16 sps:$4 sm:$0xff]  }
 0x3dc   : > { %v11638_v8 = vld [vmem:[%s12880_s22 + $0x9cc] ss:$16 sps:$4 sm:$0xff]   ;;  %v11636_v14 = vld [vmem:[%s12880_s22 + $0x9c8] ss:$16 sps:$4 sm:$0xff]  }
 0x3dd   : > { %7828 = vmatpush1.bf16.msra.mxu0 %v11588_v19  ;;  %v11641_v9 = vld [vmem:[%s12880_s22 + $0xbcc] ss:$16 sps:$4 sm:$0xff]   ;;  %v11642_v16 = vld [vmem:[%s12880_s22 + $0x9e8] ss:$16 sps:$4 sm:$0xff]  }
 0x3de   : > { %7869 = vmatpush1.bf16.msra.mxu1 %v11591_v6  ;;  %7829 = vmatprep.subr.bf16.mxu0 %v11596_v18  ;;  %v11644_v29 = vld [vmem:[%s12880_s22 + $0x9ec] ss:$16 sps:$4 sm:$0xff]   ;;  %v11645_v24 = vld [vmem:[%s12880_s22 + $0xbe8] ss:$16 sps:$4 sm:$0xff]  }
 0x3df   : > { %7870 = vmatprep.subr.bf16.mxu1 %v11599_v51  ;;  %v11647_v21 = vld [vmem:[%s12880_s22 + $0xbec] ss:$16 sps:$4 sm:$0xff]   ;;  %v11648_v52 = vld [vmem:[%s12880_s22 + $0xc08] ss:$16 sps:$4 sm:$0xff]  }
 0x3e0   : > { %v11650_v19 = vld [vmem:[%s12880_s22 + $0xc0c] ss:$16 sps:$4 sm:$0xff]   ;;  %v11651_v53 = vld [vmem:[%s12880_s22 + $0xe08] ss:$16 sps:$4 sm:$0xff]  }
 0x3e1   : > { %7830 = vmatpush1.bf16.msra.mxu0 %v11594_v31  ;;  %v11653_v6 = vld [vmem:[%s12880_s22 + $0xe0c] ss:$16 sps:$4 sm:$0xff]   ;;  %v11654_v31 = vld [vmem:[%s12880_s22 + $0xc28] ss:$16 sps:$4 sm:$0xff]  }
 0x3e2   : > { %7871 = vmatpush1.bf16.msra.mxu1 %v11597_v12  ;;  %7831 = vmatprep.subr.bf16.mxu0 %v11602_v54  ;;  %v11656_v18 = vld [vmem:[%s12880_s22 + $0xc2c] ss:$16 sps:$4 sm:$0xff]   ;;  %v11657_v12 = vld [vmem:[%s12880_s22 + $0xe28] ss:$16 sps:$4 sm:$0xff]  }
 0x3e3   : > { %7872 = vmatprep.subr.bf16.mxu1 %v11605_v17  ;;  %v11659_v51 = vld [vmem:[%s12880_s22 + $0xe2c] ss:$16 sps:$4 sm:$0xff]  }
 0x3e4   : > { %v11662_v54 = vld [vmem:[%s12880_s22 + $0xc4c] ss:$16 sps:$4 sm:$0xff]  }
 0x3e5   : > { %7832 = vmatpush1.bf16.msra.mxu0 %v11600_v35  ;;  %v11665_v17 = vld [vmem:[%s12880_s22 + $0xe4c] ss:$16 sps:$4 sm:$0xff]  }
 0x3e6   : > { %7873 = vmatpush1.bf16.msra.mxu1 %v11603_v55  ;;  %7833 = vmatprep.subr.bf16.mxu0 %v11608_v56  ;;  %v11668_v35 = vld [vmem:[%s12880_s22 + $0xc6c] ss:$16 sps:$4 sm:$0xff]   ;;  %v11669_v56 = vld [vmem:[%s12880_s22 + $0xe68] ss:$16 sps:$4 sm:$0xff]  }
 0x3e7   : > { %7874 = vmatprep.subr.bf16.mxu1 %v11611_v57  ;;  %v11671_v55 = vld [vmem:[%s12880_s22 + $0xe6c] ss:$16 sps:$4 sm:$0xff]  }
 0x3e8   : > { %v11677_v57 = vld [vmem:[%s12880_s22 + $0xe8c] ss:$16 sps:$4 sm:$0xff]  }
 0x3e9   : > { %7834 = vmatpush1.bf16.msra.mxu0 %v11606_v40  ;;  %v11672_v40 = vld [vmem:[%s12880_s22 + $0xc88] ss:$16 sps:$4 sm:$0xff]  }
 0x3ea   : > { %7875 = vmatpush1.bf16.msra.mxu1 %v11609_v41  ;;  %7835 = vmatprep.subr.bf16.mxu0 %v11614_v60  ;;  %v11675_v41 = vld [vmem:[%s12880_s22 + $0xe88] ss:$16 sps:$4 sm:$0xff]   ;;  %v11680_v60 = vld [vmem:[%s12880_s22 + $0xcac] ss:$16 sps:$4 sm:$0xff]  }
 0x3eb   : > { %7876 = vmatprep.subr.bf16.mxu1 %v11617_v61  ;;  %v11683_v61 = vld [vmem:[%s12880_s22 + $0xeac] ss:$16 sps:$4 sm:$0xff]  }
 0x3ed   : > { %7836 = vmatpush1.bf16.msra.mxu0 %v11612_v58  ;;  %v8229_v58 = vsub.s32 0, %v12937_v43 }
 0x3ee   : > { %7877 = vmatpush1.bf16.msra.mxu1 %v11615_v59  ;;  %7837 = vmatprep.subr.bf16.mxu0 %v11620_v0  ;;  %v11678_v59 = vld [vmem:[%s12880_s22 + $0xca8] ss:$16 sps:$4 sm:$0xff]   ;;  %v8225_v0 = vld [vmem:[%s12888_s26] sm:$0xf] }
 0x3ef   : > { %7878 = vmatprep.subr.bf16.mxu1 %v11623_v2  ;;  %v8233_v2 = vsub.s32 1, %v12937_v43 }
 0x3f1   : > { %7838 = vmatpush1.bf16.msra.mxu0 %v11618_v32  ;;  %v11681_v32 = vld [vmem:[%s12880_s22 + $0xea8] ss:$16 sps:$4 sm:$0xff]  }
 0x3f2   : > { %7879 = vmatpush1.bf16.msra.mxu1 %v11621_v47  ;;  %7839 = vmatprep.subr.bf16.mxu0 %v11626_v27  ;;  %v11686_v47 = vld [vmem:[%s12880_s22 + $0xccc] ss:$16 sps:$4 sm:$0xff]  }
 0x3f3   : > { %7880 = vmatprep.subr.bf16.mxu1 %v11629_v1  ;;  %v11689_v27 = vld [vmem:[%s12880_s22 + $0xecc] ss:$16 sps:$4 sm:$0xff]  }
 0x3f5   : > { %7840 = vmatpush1.bf16.msra.mxu0 %v11624_v20 }
 0x3f6   : > { %7881 = vmatpush1.bf16.msra.mxu1 %v11627_v4  ;;  %7841 = vmatprep.subr.bf16.mxu0 %v11632_v22  ;;  %v8230_v22 = vrot.slane %v8225_v0, %v8229_v58 }
 0x3f7   : > { %7882 = vmatprep.subr.bf16.mxu1 %v11635_v5 }
 0x3f9   : > { %7842 = vmatpush1.bf16.msra.mxu0 %v11630_v11 }
 0x3fa   : > { %7883 = vmatpush1.bf16.msra.mxu1 %v11633_v7  ;;  %7843 = vmatprep.subr.bf16.mxu0 %v11638_v8  ;;  %v8234_v8 = vrot.slane %v8225_v0, %v8233_v2  ;;  %v11725_v0 = vld [vmem:[%s12880_s22 + $0xf8c] ss:$16 sps:$4 sm:$0xff]  }
 0x3fb   : > { %7884 = vmatprep.subr.bf16.mxu1 %v11641_v9 }
 0x3fd   : > { %7844 = vmatpush1.bf16.msra.mxu0 %v11636_v14 }
 0x3fe   : > { %7885 = vmatpush1.bf16.msra.mxu1 %v11639_v15  ;;  %7845 = vmatprep.subr.bf16.mxu0 %v11644_v29  ;;  %v11684_v15 = vld [vmem:[%s12880_s22 + $0xcc8] ss:$16 sps:$4 sm:$0xff]  }
 0x3ff   : > { %7886 = vmatprep.subr.bf16.mxu1 %v11647_v21 }
 0x401   : > { %7846 = vmatpush1.bf16.msra.mxu0 %v11642_v16 }
 0x402   : > { %7887 = vmatpush1.bf16.msra.mxu1 %v11645_v24  ;;  %7897 = vmatprep.subr.bf16.mxu0 %v11650_v19  ;;  %v11692_v24 = vld [vmem:[%s12880_s22 + $0xcec] ss:$16 sps:$4 sm:$0xff]  }
 0x403   : > { %7938 = vmatprep.subr.bf16.mxu1 %v11653_v6 }
 0x404   : > { %7848 = vmatmul.mubr.bf16.vlgmr.msra.gmra.mrb[44].mxu0 %v13333_v38  ;;  %v11660_v38 = vld [vmem:[%s12880_s22 + $0xc48] ss:$16 sps:$4 sm:$0xff]  }
 0x405   : > { %7889 = vmatmul.mubr.bf16.vlgmr.msra.gmra.mrb[44].mxu1 %v13337_v39  ;;  %7898 = vmatpush1.bf16.msra.mxu0 %v11648_v52  ;;  %v11663_v39 = vld [vmem:[%s12880_s22 + $0xe48] ss:$16 sps:$4 sm:$0xff]  }
 0x406   : > { %7939 = vmatpush1.bf16.msra.mxu1 %v11651_v53  ;;  %7899 = vmatprep.subr.bf16.mxu0 %v11656_v18  ;;  %v11690_v53 = vld [vmem:[%s12880_s22 + $0xce8] ss:$16 sps:$4 sm:$0xff]  }
 0x407   : > { %7940 = vmatprep.subr.bf16.mxu1 %v11659_v51  ;;  %7929 = vmatprep.mubr.bf16.mxu0 %v13341_v45  ;;  %v11666_v45 = vld [vmem:[%s12880_s22 + $0xc68] ss:$16 sps:$4 sm:$0xff]   ;;  %v11698_v51 = vld [vmem:[%s12880_s22 + $0xd0c] ss:$16 sps:$4 sm:$0xff]  }
 0x408   : > { %7970 = vmatprep.mubr.bf16.mxu1 %v13343_v46  ;;  %v11674_v46 = vld [vmem:[%s12880_s22 + $0xc8c] ss:$16 sps:$4 sm:$0xff]   ;;  %v11693_v18 = vld [vmem:[%s12880_s22 + $0xee8] ss:$16 sps:$4 sm:$0xff]  }
 0x409   : > { %7900 = vmatpush1.bf16.msra.mxu0 %v11654_v31  ;;  %v11701_v31 = vld [vmem:[%s12880_s22 + $0xf0c] ss:$16 sps:$4 sm:$0xff]  }
 0x40a   : > { %7941 = vmatpush1.bf16.msra.mxu1 %v11657_v12  ;;  %7901 = vmatprep.subr.bf16.mxu0 %v11662_v54  ;;  %v11696_v54 = vld [vmem:[%s12880_s22 + $0xd08] ss:$16 sps:$4 sm:$0xff]  }
 0x40b   : > { %7942 = vmatprep.subr.bf16.mxu1 %v11665_v17  ;;  %v11699_v17 = vld [vmem:[%s12880_s22 + $0xf08] ss:$16 sps:$4 sm:$0xff]  }
 0x40d   : > { %7902 = vmatpush1.bf16.msra.mxu0 %v11660_v38  ;;  %v11704_v38 = vld [vmem:[%s12880_s22 + $0xd2c] ss:$16 sps:$4 sm:$0xff]  }
 0x40e   : > { %7943 = vmatpush1.bf16.msra.mxu1 %v11663_v39  ;;  %7903 = vmatprep.subr.bf16.mxu0 %v11668_v35  ;;  %v11707_v39 = vld [vmem:[%s12880_s22 + $0xf2c] ss:$16 sps:$4 sm:$0xff]   ;;  %v11702_v35 = vld [vmem:[%s12880_s22 + $0xd28] ss:$16 sps:$4 sm:$0xff]  }
 0x40f   : > { %7944 = vmatprep.subr.bf16.mxu1 %v11671_v55  ;;  %v11705_v55 = vld [vmem:[%s12880_s22 + $0xf28] ss:$16 sps:$4 sm:$0xff]  }
 0x411   : > { %7904 = vmatpush1.bf16.msra.mxu0 %v11666_v45  ;;  %v11710_v45 = vld [vmem:[%s12880_s22 + $0xd4c] ss:$16 sps:$4 sm:$0xff]  }
 0x412   : > { %7945 = vmatpush1.bf16.msra.mxu1 %v11669_v56  ;;  %7905 = vmatprep.subr.bf16.mxu0 %v11674_v46  ;;  %v11713_v56 = vld [vmem:[%s12880_s22 + $0xf4c] ss:$16 sps:$4 sm:$0xff]   ;;  %v11708_v46 = vld [vmem:[%s12880_s22 + $0xd48] ss:$16 sps:$4 sm:$0xff]  }
 0x413   : > { %7946 = vmatprep.subr.bf16.mxu1 %v11677_v57  ;;  %v11711_v57 = vld [vmem:[%s12880_s22 + $0xf48] ss:$16 sps:$4 sm:$0xff]  }
 0x415   : > { %7906 = vmatpush1.bf16.msra.mxu0 %v11672_v40  ;;  %v11716_v40 = vld [vmem:[%s12880_s22 + $0xd6c] ss:$16 sps:$4 sm:$0xff]  }
 0x416   : > { %7947 = vmatpush1.bf16.msra.mxu1 %v11675_v41  ;;  %7907 = vmatprep.subr.bf16.mxu0 %v11680_v60  ;;  %v11719_v41 = vld [vmem:[%s12880_s22 + $0xf6c] ss:$16 sps:$4 sm:$0xff]   ;;  %v11714_v60 = vld [vmem:[%s12880_s22 + $0xd68] ss:$16 sps:$4 sm:$0xff]  }
 0x417   : > { %7948 = vmatprep.subr.bf16.mxu1 %v11683_v61  ;;  %v7603_v1 = vpop.f32.mrb[32].mxu0  ;;  %v11717_v61 = vld [vmem:[%s12880_s22 + $0xf68] ss:$16 sps:$4 sm:$0xff]  }
 0x418   : > { %v7644_v20 = vpop.f32.mrb[32].mxu1  ;;  %v7604_v4 = vadd.f32 %v7603_v1, %v13898_v23  ;;  %v7605_v5 = vpop.f32.mrb[33].mxu0  ;;  %v11687_v23 = vld [vmem:[%s12880_s22 + $0xec8] ss:$16 sps:$4 sm:$0xff]   ;;  %v11731_v1 = vld [vmem:[%s12880_s22 + $0xfac] ss:$16 sps:$4 sm:$0xff]  }
 0x419   : > { %v7646_v11 = vpop.f32.mrb[33].mxu1  ;;  %v7606_v7 = vadd.f32 %v7605_v5, %v13902_v50  ;;  %v7607_v9 = vpop.f32.mrb[34].mxu0  ;;  %7908 = vmatpush1.bf16.msra.mxu0 %v11678_v59  ;;  %v11695_v50 = vld [vmem:[%s12880_s22 + $0xeec] ss:$16 sps:$4 sm:$0xff]  }
 0x41a   : > { %v7648_v14 = vpop.f32.mrb[34].mxu1  ;;  %7949 = vmatpush1.bf16.msra.mxu1 %v11681_v32  ;;  %v7645_v29 = vadd.f32 %v7644_v20, %v7604_v4  ;;  %v7608_v21 = vpop.f32.mrb[35].mxu0  ;;  %7909 = vmatprep.subr.bf16.mxu0 %v11686_v47  ;;  %v11722_v59 = vld [vmem:[%s12880_s22 + $0xd8c] ss:$16 sps:$4 sm:$0xff]   ;;  %v11720_v32 = vld [vmem:[%s12880_s22 + $0xd88] ss:$16 sps:$4 sm:$0xff]  }
 0x41b   : > { %v7649_v16 = vpop.f32.mrb[35].mxu1  ;;  %7950 = vmatprep.subr.bf16.mxu1 %v11689_v27  ;;  %v7647_v19 = vadd.f32 %v7646_v11, %v7606_v7  ;;  %v11723_v47 = vld [vmem:[%s12880_s22 + $0xf88] ss:$16 sps:$4 sm:$0xff]   ;;  %v11728_v27 = vld [vmem:[%s12880_s22 + $0xdac] ss:$16 sps:$4 sm:$0xff]  }
 0x41c   : > { %v13981_v6 = vadd.f32 %v8230_v22, %v7645_v29  ;;  %v11726_v20 = vld [vmem:[%s12880_s22 + $0xda8] ss:$16 sps:$4 sm:$0xff]   ;;  %v11734_v22 = vld [vmem:[%s12880_s22 + $0xdcc] ss:$16 sps:$4 sm:$0xff]  }
 0x41d   : > { %v13983_v52 = vadd.f32 %v8234_v8, %v7647_v19  ;;  %7910 = vmatpush1.bf16.msra.mxu0 %v11684_v15  ;;  %v11729_v4 = vld [vmem:[%s12880_s22 + $0xfa8] ss:$16 sps:$4 sm:$0xff]   ;;  %v11737_v5 = vld [vmem:[%s12880_s22 + $0xfcc] ss:$16 sps:$4 sm:$0xff]  }
 0x41e   : > { %7951 = vmatpush1.bf16.msra.mxu1 %v11687_v23  ;;  %7911 = vmatprep.subr.bf16.mxu0 %v11692_v24  ;;  %v11732_v11 = vld [vmem:[%s12880_s22 + $0xdc8] ss:$16 sps:$4 sm:$0xff]   ;;  %v11740_v8 = vld [vmem:[%s12880_s22 + $0xdec] ss:$16 sps:$4 sm:$0xff]  }
 0x41f   : > { %7952 = vmatprep.subr.bf16.mxu1 %v11695_v50  ;;  %v8255_v12 = vcombine.low %v13981_v6, %v13983_v52  ;;  %v11735_v7 = vld [vmem:[%s12880_s22 + $0xfc8] ss:$16 sps:$4 sm:$0xff]   ;;  %v11743_v9 = vld [vmem:[%s12880_s22 + $0xfec] ss:$16 sps:$4 sm:$0xff]  }
 0x420   : > { %v11738_v14 = vld [vmem:[%s12880_s22 + $0xde8] ss:$16 sps:$4 sm:$0xff]   ;;  %v11746_v23 = vld [vmem:[%s12880_s22 + $0x100c] ss:$16 sps:$4 sm:$0xff]  }
 0x421   : > { %7912 = vmatpush1.bf16.msra.mxu0 %v11690_v53  ;;  %v11741_v15 = vld [vmem:[%s12880_s22 + $0xfe8] ss:$16 sps:$4 sm:$0xff]   ;;  %v11749_v29 = vld [vmem:[%s12880_s22 + $0x120c] ss:$16 sps:$4 sm:$0xff]  }
 0x422   : > { %7953 = vmatpush1.bf16.msra.mxu1 %v11693_v18  ;;  %7913 = vmatprep.subr.bf16.mxu0 %v11698_v51  ;;  %v11744_v21 = vld [vmem:[%s12880_s22 + $0x1008] ss:$16 sps:$4 sm:$0xff]   ;;  %v11752_v24 = vld [vmem:[%s12880_s22 + $0x102c] ss:$16 sps:$4 sm:$0xff]  }
 0x423   : > { %7954 = vmatprep.subr.bf16.mxu1 %v11701_v31  ;;  %v11747_v16 = vld [vmem:[%s12880_s22 + $0x1208] ss:$16 sps:$4 sm:$0xff]   ;;  %v11755_v50 = vld [vmem:[%s12880_s22 + $0x122c] ss:$16 sps:$4 sm:$0xff]  }
 0x424   : > { %v11750_v19 = vld [vmem:[%s12880_s22 + $0x1028] ss:$16 sps:$4 sm:$0xff]   ;;  %v11758_v18 = vld [vmem:[%s12880_s22 + $0x104c] ss:$16 sps:$4 sm:$0xff]  }
 0x425   : > { %7914 = vmatpush1.bf16.msra.mxu0 %v11696_v54  ;;  %v11753_v53 = vld [vmem:[%s12880_s22 + $0x1228] ss:$16 sps:$4 sm:$0xff]   ;;  %v11761_v51 = vld [vmem:[%s12880_s22 + $0x124c] ss:$16 sps:$4 sm:$0xff]  }
 0x426   : > { %7955 = vmatpush1.bf16.msra.mxu1 %v11699_v17  ;;  %7915 = vmatprep.subr.bf16.mxu0 %v11704_v38  ;;  %v11764_v31 = vld [vmem:[%s12880_s22 + $0x106c] ss:$16 sps:$4 sm:$0xff]   ;;  %v11762_v17 = vld [vmem:[%s12880_s22 + $0x1068] ss:$16 sps:$4 sm:$0xff]  }
 0x427   : > { %7956 = vmatprep.subr.bf16.mxu1 %v11707_v39  ;;  %v11767_v54 = vld [vmem:[%s12880_s22 + $0x126c] ss:$16 sps:$4 sm:$0xff]   ;;  %v11768_v39 = vld [vmem:[%s12880_s22 + $0x1088] ss:$16 sps:$4 sm:$0xff]  }
 0x428   : > { %v11773_v38 = vld [vmem:[%s12880_s22 + $0x128c] ss:$16 sps:$4 sm:$0xff]   ;;  %v12045_v6 = vld [vmem:[#allocation11 + $0x10] ss:$8 sps:$4 sm:$0xff] (!%p10203_p11)  }
 0x429   : > { %7916 = vmatpush1.bf16.msra.mxu0 %v11702_v35  ;;  %v11771_v35 = vld [vmem:[%s12880_s22 + $0x1288] ss:$16 sps:$4 sm:$0xff]  }
 0x42a   : > { %7957 = vmatpush1.bf16.msra.mxu1 %v11705_v55  ;;  %7917 = vmatprep.subr.bf16.mxu0 %v11710_v45  ;;  %v11776_v55 = vld [vmem:[%s12880_s22 + $0x10ac] ss:$16 sps:$4 sm:$0xff]   ;;  %v12046_v52 = vld [vmem:[#allocation11 + $0x110] ss:$8 sps:$4 sm:$0xff] (!%p10203_p11)  }
 0x42b   : > { %7958 = vmatprep.subr.bf16.mxu1 %v11713_v56  ;;  %v11779_v45 = vld [vmem:[%s12880_s22 + $0x12ac] ss:$16 sps:$4 sm:$0xff]   ;;  %v11774_v56 = vld [vmem:[%s12880_s22 + $0x10a8] ss:$16 sps:$4 sm:$0xff]  }
 0x42d   : > { %7918 = vmatpush1.bf16.msra.mxu0 %v11708_v46  ;;  %v11777_v46 = vld [vmem:[%s12880_s22 + $0x12a8] ss:$16 sps:$4 sm:$0xff]  }
 0x42e   : > { %7959 = vmatpush1.bf16.msra.mxu1 %v11711_v57  ;;  %7919 = vmatprep.subr.bf16.mxu0 %v11716_v40  ;;  %v11782_v57 = vld [vmem:[%s12880_s22 + $0x10cc] ss:$16 sps:$4 sm:$0xff]  }
 0x42f   : > { %7960 = vmatprep.subr.bf16.mxu1 %v11719_v41  ;;  %v11785_v40 = vld [vmem:[%s12880_s22 + $0x12cc] ss:$16 sps:$4 sm:$0xff]  }
 0x431   : > { %7920 = vmatpush1.bf16.msra.mxu0 %v11714_v60 }
 0x432   : > { %7961 = vmatpush1.bf16.msra.mxu1 %v11717_v61  ;;  %7921 = vmatprep.subr.bf16.mxu0 %v11722_v59 }
 0x433   : > { %7962 = vmatprep.subr.bf16.mxu1 %v11725_v0 }
 0x435   : > { %7922 = vmatpush1.bf16.msra.mxu0 %v11720_v32 }
 0x436   : > { %7963 = vmatpush1.bf16.msra.mxu1 %v11723_v47  ;;  %7923 = vmatprep.subr.bf16.mxu0 %v11728_v27 }
 0x437   : > { %7964 = vmatprep.subr.bf16.mxu1 %v11731_v1  ;;  %v11780_v1 = vld [vmem:[%s12880_s22 + $0x10c8] ss:$16 sps:$4 sm:$0xff]  }
 0x439   : > { %7924 = vmatpush1.bf16.msra.mxu0 %v11726_v20  ;;  %v11783_v20 = vld [vmem:[%s12880_s22 + $0x12c8] ss:$16 sps:$4 sm:$0xff]  }
 0x43a   : > { %7965 = vmatpush1.bf16.msra.mxu1 %v11729_v4  ;;  %7925 = vmatprep.subr.bf16.mxu0 %v11734_v22 }
 0x43b   : > { %7966 = vmatprep.subr.bf16.mxu1 %v11737_v5 }
 0x43d   : > { %7926 = vmatpush1.bf16.msra.mxu0 %v11732_v11 }
 0x43e   : > { %7967 = vmatpush1.bf16.msra.mxu1 %v11735_v7  ;;  %7927 = vmatprep.subr.bf16.mxu0 %v11740_v8  ;;  %v11786_v7 = vld [vmem:[%s12880_s22 + $0x10e8] ss:$16 sps:$4 sm:$0xff]  }
 0x43f   : > { %7968 = vmatprep.subr.bf16.mxu1 %v11743_v9  ;;  %v11789_v8 = vld [vmem:[%s12880_s22 + $0x12e8] ss:$16 sps:$4 sm:$0xff]   ;;  %v11794_v9 = vld [vmem:[%s12880_s22 + $0x110c] ss:$16 sps:$4 sm:$0xff]  }
 0x441   : > { %7928 = vmatpush1.bf16.msra.mxu0 %v11738_v14  ;;  %v11797_v14 = vld [vmem:[%s12880_s22 + $0x130c] ss:$16 sps:$4 sm:$0xff]  }
 0x442   : > { %7969 = vmatpush1.bf16.msra.mxu1 %v11741_v15  ;;  %7979 = vmatprep.subr.bf16.mxu0 %v11746_v23  ;;  %v11792_v15 = vld [vmem:[%s12880_s22 + $0x1108] ss:$16 sps:$4 sm:$0xff]  }
 0x443   : > { %8020 = vmatprep.subr.bf16.mxu1 %v11749_v29  ;;  %v11795_v23 = vld [vmem:[%s12880_s22 + $0x1308] ss:$16 sps:$4 sm:$0xff]   ;;  %v11800_v29 = vld [vmem:[%s12880_s22 + $0x112c] ss:$16 sps:$4 sm:$0xff]  }
 0x444   : > { %7930 = vmatmul.mubr.bf16.vlgmr.msra.gmra.mrb[48].mxu0 %v13430_v26  ;;  %v11756_v26 = vld [vmem:[%s12880_s22 + $0x1048] ss:$16 sps:$4 sm:$0xff]  }
 0x445   : > { %7971 = vmatmul.mubr.bf16.vlgmr.msra.gmra.mrb[48].mxu1 %v13434_v28  ;;  %7980 = vmatpush1.bf16.msra.mxu0 %v11744_v21  ;;  %v11759_v28 = vld [vmem:[%s12880_s22 + $0x1248] ss:$16 sps:$4 sm:$0xff]   ;;  %v11803_v21 = vld [vmem:[%s12880_s22 + $0x132c] ss:$16 sps:$4 sm:$0xff]  }
 0x446   : > { %8021 = vmatpush1.bf16.msra.mxu1 %v11747_v16  ;;  %7981 = vmatprep.subr.bf16.mxu0 %v11752_v24  ;;  %v11798_v16 = vld [vmem:[%s12880_s22 + $0x1128] ss:$16 sps:$4 sm:$0xff]  }
 0x447   : > { %8022 = vmatprep.subr.bf16.mxu1 %v11755_v50  ;;  %8011 = vmatprep.mubr.bf16.mxu0 %v13438_v36  ;;  %v11765_v36 = vld [vmem:[%s12880_s22 + $0x1268] ss:$16 sps:$4 sm:$0xff]   ;;  %v11806_v50 = vld [vmem:[%s12880_s22 + $0x114c] ss:$16 sps:$4 sm:$0xff]  }
 0x448   : > { %8052 = vmatprep.mubr.bf16.mxu1 %v13440_v37  ;;  %v11770_v37 = vld [vmem:[%s12880_s22 + $0x108c] ss:$16 sps:$4 sm:$0xff]   ;;  %v11801_v24 = vld [vmem:[%s12880_s22 + $0x1328] ss:$16 sps:$4 sm:$0xff]  }
 0x449   : > { %7982 = vmatpush1.bf16.msra.mxu0 %v11750_v19  ;;  %v11809_v19 = vld [vmem:[%s12880_s22 + $0x134c] ss:$16 sps:$4 sm:$0xff]  }
 0x44a   : > { %8023 = vmatpush1.bf16.msra.mxu1 %v11753_v53  ;;  %7983 = vmatprep.subr.bf16.mxu0 %v11758_v18  ;;  %v11804_v53 = vld [vmem:[%s12880_s22 + $0x1148] ss:$16 sps:$4 sm:$0xff]  }
 0x44b   : > { %8024 = vmatprep.subr.bf16.mxu1 %v11761_v51  ;;  %v11807_v18 = vld [vmem:[%s12880_s22 + $0x1348] ss:$16 sps:$4 sm:$0xff]   ;;  %v11812_v51 = vld [vmem:[%s12880_s22 + $0x116c] ss:$16 sps:$4 sm:$0xff]  }
 0x44d   : > { %7984 = vmatpush1.bf16.msra.mxu0 %v11756_v26  ;;  %v11815_v26 = vld [vmem:[%s12880_s22 + $0x136c] ss:$16 sps:$4 sm:$0xff]  }
 0x44e   : > { %8025 = vmatpush1.bf16.msra.mxu1 %v11759_v28  ;;  %7985 = vmatprep.subr.bf16.mxu0 %v11764_v31  ;;  %v11810_v28 = vld [vmem:[%s12880_s22 + $0x1168] ss:$16 sps:$4 sm:$0xff]  }
 0x44f   : > { %8026 = vmatprep.subr.bf16.mxu1 %v11767_v54  ;;  %v11813_v31 = vld [vmem:[%s12880_s22 + $0x1368] ss:$16 sps:$4 sm:$0xff]   ;;  %v11818_v54 = vld [vmem:[%s12880_s22 + $0x118c] ss:$16 sps:$4 sm:$0xff]  }
 0x451   : > { %7986 = vmatpush1.bf16.msra.mxu0 %v11762_v17  ;;  %v11821_v17 = vld [vmem:[%s12880_s22 + $0x138c] ss:$16 sps:$4 sm:$0xff]  }
 0x452   : > { %8027 = vmatpush1.bf16.msra.mxu1 %v11765_v36  ;;  %7987 = vmatprep.subr.bf16.mxu0 %v11770_v37  ;;  %v11816_v36 = vld [vmem:[%s12880_s22 + $0x1188] ss:$16 sps:$4 sm:$0xff]  }
 0x453   : > { %8028 = vmatprep.subr.bf16.mxu1 %v11773_v38  ;;  %v11819_v37 = vld [vmem:[%s12880_s22 + $0x1388] ss:$16 sps:$4 sm:$0xff]   ;;  %v11824_v38 = vld [vmem:[%s12880_s22 + $0x11ac] ss:$16 sps:$4 sm:$0xff]  }
 0x455   : > { %7988 = vmatpush1.bf16.msra.mxu0 %v11768_v39  ;;  %v11827_v39 = vld [vmem:[%s12880_s22 + $0x13ac] ss:$16 sps:$4 sm:$0xff]  }
 0x456   : > { %8029 = vmatpush1.bf16.msra.mxu1 %v11771_v35  ;;  %7989 = vmatprep.subr.bf16.mxu0 %v11776_v55  ;;  %v11822_v35 = vld [vmem:[%s12880_s22 + $0x11a8] ss:$16 sps:$4 sm:$0xff]  }
 0x457   : > { %8030 = vmatprep.subr.bf16.mxu1 %v11779_v45  ;;  %v7685_v41 = vpop.f32.mrb[36].mxu0  ;;  %v11825_v55 = vld [vmem:[%s12880_s22 + $0x13a8] ss:$16 sps:$4 sm:$0xff]   ;;  %v11830_v45 = vld [vmem:[%s12880_s22 + $0x11cc] ss:$16 sps:$4 sm:$0xff]  }
 0x458   : > { %v7726_v60 = vpop.f32.mrb[36].mxu1  ;;  %v7686_v61 = vadd.f32 %v7685_v41, %v13371_v10  ;;  %v7687_v59 = vpop.f32.mrb[37].mxu0  ;;  %v11788_v10 = vld [vmem:[%s12880_s22 + $0x10ec] ss:$16 sps:$4 sm:$0xff]  }
 0x459   : > { %v7728_v0 = vpop.f32.mrb[37].mxu1  ;;  %v7688_v32 = vadd.f32 %v7687_v59, %v13373_v13  ;;  %v7689_v47 = vpop.f32.mrb[38].mxu0  ;;  %7990 = vmatpush1.bf16.msra.mxu0 %v11774_v56  ;;  %v11791_v13 = vld [vmem:[%s12880_s22 + $0x12ec] ss:$16 sps:$4 sm:$0xff]  }
 0x45a   : > { %v7730_v27 = vpop.f32.mrb[38].mxu1  ;;  %8031 = vmatpush1.bf16.msra.mxu1 %v11777_v46  ;;  %v14055_v4 = vadd.f32 %v7726_v60, %v7686_v61  ;;  %v7690_v22 = vpop.f32.mrb[39].mxu0  ;;  %7991 = vmatprep.subr.bf16.mxu0 %v11782_v57  ;;  %v11833_v56 = vld [vmem:[%s12880_s22 + $0x13cc] ss:$16 sps:$4 sm:$0xff]   ;;  %v11828_v46 = vld [vmem:[%s12880_s22 + $0x11c8] ss:$16 sps:$4 sm:$0xff]  }
 0x45b   : > { %v7731_v5 = vpop.f32.mrb[39].mxu1  ;;  %8032 = vmatprep.subr.bf16.mxu1 %v11785_v40  ;;  %v14059_v11 = vadd.f32 %v7728_v0, %v7688_v32  ;;  %v11831_v57 = vld [vmem:[%s12880_s22 + $0x13c8] ss:$16 sps:$4 sm:$0xff]   ;;  %v11836_v40 = vld [vmem:[%s12880_s22 + $0x11ec] ss:$16 sps:$4 sm:$0xff]  }
 0x45c   : > { %v11839_v41 = vld [vmem:[%s12880_s22 + $0x13ec] ss:$16 sps:$4 sm:$0xff]   ;;  %v11834_v60 = vld [vmem:[%s12880_s22 + $0x11e8] ss:$16 sps:$4 sm:$0xff]  }
 0x45d   : > { %7992 = vmatpush1.bf16.msra.mxu0 %v11780_v1  ;;  %v11837_v61 = vld [vmem:[%s12880_s22 + $0x13e8] ss:$16 sps:$4 sm:$0xff]   ;;  %v11842_v59 = vld [vmem:[%s12880_s22 + $0x140c] ss:$16 sps:$4 sm:$0xff]  }
 0x45e   : > { %8033 = vmatpush1.bf16.msra.mxu1 %v11783_v20  ;;  %7993 = vmatprep.subr.bf16.mxu0 %v11788_v10  ;;  %v11845_v0 = vld [vmem:[%s12880_s22 + $0x160c] ss:$16 sps:$4 sm:$0xff]   ;;  %v11840_v32 = vld [vmem:[%s12880_s22 + $0x1408] ss:$16 sps:$4 sm:$0xff]  }
 0x45f   : > { %8034 = vmatprep.subr.bf16.mxu1 %v11791_v13  ;;  %v11843_v47 = vld [vmem:[%s12880_s22 + $0x1608] ss:$16 sps:$4 sm:$0xff]   ;;  %v11848_v27 = vld [vmem:[%s12880_s22 + $0x142c] ss:$16 sps:$4 sm:$0xff]  }
 0x460   : > { %v11851_v1 = vld [vmem:[%s12880_s22 + $0x162c] ss:$16 sps:$4 sm:$0xff]   ;;  %v11846_v20 = vld [vmem:[%s12880_s22 + $0x1428] ss:$16 sps:$4 sm:$0xff]  }
 0x461   : > { %7994 = vmatpush1.bf16.msra.mxu0 %v11786_v7  ;;  %v11849_v22 = vld [vmem:[%s12880_s22 + $0x1628] ss:$16 sps:$4 sm:$0xff]   ;;  %v11854_v5 = vld [vmem:[%s12880_s22 + $0x144c] ss:$16 sps:$4 sm:$0xff]  }
 0x462   : > { %8035 = vmatpush1.bf16.msra.mxu1 %v11789_v8  ;;  %7995 = vmatprep.subr.bf16.mxu0 %v11794_v9  ;;  %v11857_v10 = vld [vmem:[%s12880_s22 + $0x164c] ss:$16 sps:$4 sm:$0xff]   ;;  %v11858_v8 = vld [vmem:[%s12880_s22 + $0x1468] ss:$16 sps:$4 sm:$0xff]  }
 0x463   : > { %8036 = vmatprep.subr.bf16.mxu1 %v11797_v14  ;;  %v11860_v13 = vld [vmem:[%s12880_s22 + $0x146c] ss:$16 sps:$4 sm:$0xff]   ;;  %v11864_v14 = vld [vmem:[%s12880_s22 + $0x1488] ss:$16 sps:$4 sm:$0xff]  }
 0x464   : > { %v11863_v7 = vld [vmem:[%s12880_s22 + $0x166c] ss:$16 sps:$4 sm:$0xff]  }
 0x465   : > { %7996 = vmatpush1.bf16.msra.mxu0 %v11792_v15  ;;  %v11869_v9 = vld [vmem:[%s12880_s22 + $0x168c] ss:$16 sps:$4 sm:$0xff]   ;;  %v11867_v15 = vld [vmem:[%s12880_s22 + $0x1688] ss:$16 sps:$4 sm:$0xff]  }
 0x466   : > { %8037 = vmatpush1.bf16.msra.mxu1 %v11795_v23  ;;  %7997 = vmatprep.subr.bf16.mxu0 %v11800_v29  ;;  %v11872_v23 = vld [vmem:[%s12880_s22 + $0x14ac] ss:$16 sps:$4 sm:$0xff]  }
 0x467   : > { %8038 = vmatprep.subr.bf16.mxu1 %v11803_v21  ;;  %v11875_v29 = vld [vmem:[%s12880_s22 + $0x16ac] ss:$16 sps:$4 sm:$0xff]   ;;  %v11870_v21 = vld [vmem:[%s12880_s22 + $0x14a8] ss:$16 sps:$4 sm:$0xff]  }
 0x469   : > { %7998 = vmatpush1.bf16.msra.mxu0 %v11798_v16  ;;  %v11873_v16 = vld [vmem:[%s12880_s22 + $0x16a8] ss:$16 sps:$4 sm:$0xff]  }
 0x46a   : > { %8039 = vmatpush1.bf16.msra.mxu1 %v11801_v24  ;;  %7999 = vmatprep.subr.bf16.mxu0 %v11806_v50  ;;  %v11878_v24 = vld [vmem:[%s12880_s22 + $0x14cc] ss:$16 sps:$4 sm:$0xff]  }
 0x46b   : > { %8040 = vmatprep.subr.bf16.mxu1 %v11809_v19  ;;  %v11881_v50 = vld [vmem:[%s12880_s22 + $0x16cc] ss:$16 sps:$4 sm:$0xff]  }
 0x46d   : > { %8000 = vmatpush1.bf16.msra.mxu0 %v11804_v53 }
 0x46e   : > { %8041 = vmatpush1.bf16.msra.mxu1 %v11807_v18  ;;  %8001 = vmatprep.subr.bf16.mxu0 %v11812_v51 }
 0x46f   : > { %8042 = vmatprep.subr.bf16.mxu1 %v11815_v26 }
 0x471   : > { %8002 = vmatpush1.bf16.msra.mxu0 %v11810_v28 }
 0x472   : > { %8043 = vmatpush1.bf16.msra.mxu1 %v11813_v31  ;;  %8003 = vmatprep.subr.bf16.mxu0 %v11818_v54 }
 0x473   : > { %8044 = vmatprep.subr.bf16.mxu1 %v11821_v17  ;;  %v11876_v17 = vld [vmem:[%s12880_s22 + $0x14c8] ss:$16 sps:$4 sm:$0xff]  }
 0x475   : > { %8004 = vmatpush1.bf16.msra.mxu0 %v11816_v36  ;;  %v11879_v36 = vld [vmem:[%s12880_s22 + $0x16c8] ss:$16 sps:$4 sm:$0xff]  }
 0x476   : > { %8045 = vmatpush1.bf16.msra.mxu1 %v11819_v37  ;;  %8005 = vmatprep.subr.bf16.mxu0 %v11824_v38 }
 0x477   : > { %8046 = vmatprep.subr.bf16.mxu1 %v11827_v39 }
 0x479   : > { %8006 = vmatpush1.bf16.msra.mxu0 %v11822_v35 }
 0x47a   : > { %8047 = vmatpush1.bf16.msra.mxu1 %v11825_v55  ;;  %8007 = vmatprep.subr.bf16.mxu0 %v11830_v45  ;;  %v11882_v55 = vld [vmem:[%s12880_s22 + $0x14e8] ss:$16 sps:$4 sm:$0xff]  }
 0x47b   : > { %8048 = vmatprep.subr.bf16.mxu1 %v11833_v56  ;;  %v11885_v45 = vld [vmem:[%s12880_s22 + $0x16e8] ss:$16 sps:$4 sm:$0xff]   ;;  %v11890_v56 = vld [vmem:[%s12880_s22 + $0x150c] ss:$16 sps:$4 sm:$0xff]  }
 0x47d   : > { %8008 = vmatpush1.bf16.msra.mxu0 %v11828_v46  ;;  %v11893_v46 = vld [vmem:[%s12880_s22 + $0x170c] ss:$16 sps:$4 sm:$0xff]  }
 0x47e   : > { %8049 = vmatpush1.bf16.msra.mxu1 %v11831_v57  ;;  %8009 = vmatprep.subr.bf16.mxu0 %v11836_v40  ;;  %v11888_v57 = vld [vmem:[%s12880_s22 + $0x1508] ss:$16 sps:$4 sm:$0xff]  }
 0x47f   : > { %8050 = vmatprep.subr.bf16.mxu1 %v11839_v41  ;;  %v11891_v40 = vld [vmem:[%s12880_s22 + $0x1708] ss:$16 sps:$4 sm:$0xff]   ;;  %v11896_v41 = vld [vmem:[%s12880_s22 + $0x152c] ss:$16 sps:$4 sm:$0xff]  }
 0x481   : > { %8010 = vmatpush1.bf16.msra.mxu0 %v11834_v60  ;;  %v11899_v60 = vld [vmem:[%s12880_s22 + $0x172c] ss:$16 sps:$4 sm:$0xff]  }
 0x482   : > { %8051 = vmatpush1.bf16.msra.mxu1 %v11837_v61  ;;  %8061 = vmatprep.subr.bf16.mxu0 %v11842_v59  ;;  %v11894_v61 = vld [vmem:[%s12880_s22 + $0x1528] ss:$16 sps:$4 sm:$0xff]  }
 0x483   : > { %8102 = vmatprep.subr.bf16.mxu1 %v11845_v0  ;;  %v11897_v59 = vld [vmem:[%s12880_s22 + $0x1728] ss:$16 sps:$4 sm:$0xff]   ;;  %v11902_v0 = vld [vmem:[%s12880_s22 + $0x154c] ss:$16 sps:$4 sm:$0xff]  }
 0x484   : > { %8012 = vmatmul.mubr.bf16.vlgmr.msra.gmra.mrb[52].mxu0 %v13529_v42  ;;  %v11852_v42 = vld [vmem:[%s12880_s22 + $0x1448] ss:$16 sps:$4 sm:$0xff]  }
 0x485   : > { %8053 = vmatmul.mubr.bf16.vlgmr.msra.gmra.mrb[52].mxu1 %v13533_v44  ;;  %8062 = vmatpush1.bf16.msra.mxu0 %v11840_v32  ;;  %v11855_v44 = vld [vmem:[%s12880_s22 + $0x1648] ss:$16 sps:$4 sm:$0xff]   ;;  %v11905_v32 = vld [vmem:[%s12880_s22 + $0x174c] ss:$16 sps:$4 sm:$0xff]  }
 0x486   : > { %8103 = vmatpush1.bf16.msra.mxu1 %v11843_v47  ;;  %8063 = vmatprep.subr.bf16.mxu0 %v11848_v27  ;;  %v11900_v47 = vld [vmem:[%s12880_s22 + $0x1548] ss:$16 sps:$4 sm:$0xff]  }
 0x487   : > { %8104 = vmatprep.subr.bf16.mxu1 %v11851_v1  ;;  %8093 = vmatprep.mubr.bf16.mxu0 %v13537_v30  ;;  %v11861_v30 = vld [vmem:[%s12880_s22 + $0x1668] ss:$16 sps:$4 sm:$0xff]   ;;  %v11908_v1 = vld [vmem:[%s12880_s22 + $0x156c] ss:$16 sps:$4 sm:$0xff]  }
 0x488   : > { %8134 = vmatprep.mubr.bf16.mxu1 %v13539_v48  ;;  %v11866_v48 = vld [vmem:[%s12880_s22 + $0x148c] ss:$16 sps:$4 sm:$0xff]   ;;  %v11903_v27 = vld [vmem:[%s12880_s22 + $0x1748] ss:$16 sps:$4 sm:$0xff]  }
 0x489   : > { %8064 = vmatpush1.bf16.msra.mxu0 %v11846_v20  ;;  %v11911_v20 = vld [vmem:[%s12880_s22 + $0x176c] ss:$16 sps:$4 sm:$0xff]  }
 0x48a   : > { %8105 = vmatpush1.bf16.msra.mxu1 %v11849_v22  ;;  %8065 = vmatprep.subr.bf16.mxu0 %v11854_v5  ;;  %v11906_v22 = vld [vmem:[%s12880_s22 + $0x1568] ss:$16 sps:$4 sm:$0xff]  }
 0x48b   : > { %8106 = vmatprep.subr.bf16.mxu1 %v11857_v10  ;;  %v11909_v5 = vld [vmem:[%s12880_s22 + $0x1768] ss:$16 sps:$4 sm:$0xff]   ;;  %v11914_v10 = vld [vmem:[%s12880_s22 + $0x158c] ss:$16 sps:$4 sm:$0xff]  }
 0x48d   : > { %8066 = vmatpush1.bf16.msra.mxu0 %v11852_v42  ;;  %v11917_v42 = vld [vmem:[%s12880_s22 + $0x178c] ss:$16 sps:$4 sm:$0xff]  }
 0x48e   : > { %8107 = vmatpush1.bf16.msra.mxu1 %v11855_v44  ;;  %8067 = vmatprep.subr.bf16.mxu0 %v11860_v13  ;;  %v11912_v44 = vld [vmem:[%s12880_s22 + $0x1588] ss:$16 sps:$4 sm:$0xff]  }
 0x48f   : > { %8108 = vmatprep.subr.bf16.mxu1 %v11863_v7  ;;  %v11915_v13 = vld [vmem:[%s12880_s22 + $0x1788] ss:$16 sps:$4 sm:$0xff]   ;;  %v11920_v7 = vld [vmem:[%s12880_s22 + $0x15ac] ss:$16 sps:$4 sm:$0xff]  }
 0x491   : > { %8068 = vmatpush1.bf16.msra.mxu0 %v11858_v8  ;;  %v11923_v8 = vld [vmem:[%s12880_s22 + $0x17ac] ss:$16 sps:$4 sm:$0xff]  }
 0x492   : > { %8109 = vmatpush1.bf16.msra.mxu1 %v11861_v30  ;;  %8069 = vmatprep.subr.bf16.mxu0 %v11866_v48  ;;  %v11918_v30 = vld [vmem:[%s12880_s22 + $0x15a8] ss:$16 sps:$4 sm:$0xff]  }
 0x493   : > { %8110 = vmatprep.subr.bf16.mxu1 %v11869_v9  ;;  %v11921_v48 = vld [vmem:[%s12880_s22 + $0x17a8] ss:$16 sps:$4 sm:$0xff]   ;;  %v11926_v9 = vld [vmem:[%s12880_s22 + $0x15cc] ss:$16 sps:$4 sm:$0xff]  }
 0x495   : > { %8070 = vmatpush1.bf16.msra.mxu0 %v11864_v14  ;;  %v11929_v14 = vld [vmem:[%s12880_s22 + $0x17cc] ss:$16 sps:$4 sm:$0xff]  }
 0x496   : > { %8111 = vmatpush1.bf16.msra.mxu1 %v11867_v15  ;;  %8071 = vmatprep.subr.bf16.mxu0 %v11872_v23  ;;  %v11924_v15 = vld [vmem:[%s12880_s22 + $0x15c8] ss:$16 sps:$4 sm:$0xff]  }
 0x497   : > { %8112 = vmatprep.subr.bf16.mxu1 %v11875_v29  ;;  %v7767_v19 = vpop.f32.mrb[40].mxu0  ;;  %v11927_v23 = vld [vmem:[%s12880_s22 + $0x17c8] ss:$16 sps:$4 sm:$0xff]   ;;  %v11932_v29 = vld [vmem:[%s12880_s22 + $0x15ec] ss:$16 sps:$4 sm:$0xff]  }
 0x498   : > { %v7808_v53 = vpop.f32.mrb[40].mxu1  ;;  %v7768_v18 = vadd.f32 %v7767_v19, %v14055_v4  ;;  %v7769_v51 = vpop.f32.mrb[41].mxu0  ;;  %v11884_v4 = vld [vmem:[%s12880_s22 + $0x14ec] ss:$16 sps:$4 sm:$0xff]  }
 0x499   : > { %v7810_v26 = vpop.f32.mrb[41].mxu1  ;;  %v7770_v28 = vadd.f32 %v7769_v51, %v14059_v11  ;;  %v7771_v31 = vpop.f32.mrb[42].mxu0  ;;  %8072 = vmatpush1.bf16.msra.mxu0 %v11870_v21  ;;  %v11887_v11 = vld [vmem:[%s12880_s22 + $0x16ec] ss:$16 sps:$4 sm:$0xff]  }
 0x49a   : > { %v7812_v54 = vpop.f32.mrb[42].mxu1  ;;  %8113 = vmatpush1.bf16.msra.mxu1 %v11873_v16  ;;  %v14129_v37 = vadd.f32 %v7808_v53, %v7768_v18  ;;  %v7772_v38 = vpop.f32.mrb[43].mxu0  ;;  %8073 = vmatprep.subr.bf16.mxu0 %v11878_v24  ;;  %v11935_v21 = vld [vmem:[%s12880_s22 + $0x17ec] ss:$16 sps:$4 sm:$0xff]   ;;  %v11930_v16 = vld [vmem:[%s12880_s22 + $0x15e8] ss:$16 sps:$4 sm:$0xff]  }
 0x49b   : > { %v7813_v39 = vpop.f32.mrb[43].mxu1  ;;  %8114 = vmatprep.subr.bf16.mxu1 %v11881_v50  ;;  %v14133_v35 = vadd.f32 %v7810_v26, %v7770_v28  ;;  %v11933_v24 = vld [vmem:[%s12880_s22 + $0x17e8] ss:$16 sps:$4 sm:$0xff]   ;;  %v11938_v50 = vld [vmem:[%s12880_s22 + $0x180c] ss:$16 sps:$4 sm:$0xff]  }
 0x49c   : > { %v11941_v19 = vld [vmem:[%s12880_s22 + $0x1a0c] ss:$16 sps:$4 sm:$0xff]   ;;  %v11936_v53 = vld [vmem:[%s12880_s22 + $0x1808] ss:$16 sps:$4 sm:$0xff]  }
 0x49d   : > { %8074 = vmatpush1.bf16.msra.mxu0 %v11876_v17  ;;  %v11939_v18 = vld [vmem:[%s12880_s22 + $0x1a08] ss:$16 sps:$4 sm:$0xff]   ;;  %v11944_v51 = vld [vmem:[%s12880_s22 + $0x182c] ss:$16 sps:$4 sm:$0xff]  }
 0x49e   : > { %8115 = vmatpush1.bf16.msra.mxu1 %v11879_v36  ;;  %8075 = vmatprep.subr.bf16.mxu0 %v11884_v4  ;;  %v11947_v26 = vld [vmem:[%s12880_s22 + $0x1a2c] ss:$16 sps:$4 sm:$0xff]   ;;  %v11942_v28 = vld [vmem:[%s12880_s22 + $0x1828] ss:$16 sps:$4 sm:$0xff]  }
 0x49f   : > { %8116 = vmatprep.subr.bf16.mxu1 %v11887_v11  ;;  %v11945_v31 = vld [vmem:[%s12880_s22 + $0x1a28] ss:$16 sps:$4 sm:$0xff]   ;;  %v11950_v54 = vld [vmem:[%s12880_s22 + $0x184c] ss:$16 sps:$4 sm:$0xff]  }
 0x4a0   : > { %v11953_v17 = vld [vmem:[%s12880_s22 + $0x1a4c] ss:$16 sps:$4 sm:$0xff]   ;;  %v11954_v39 = vld [vmem:[%s12880_s22 + $0x1868] ss:$16 sps:$4 sm:$0xff]  }
 0x4a1   : > { %8076 = vmatpush1.bf16.msra.mxu0 %v11882_v55  ;;  %v11956_v36 = vld [vmem:[%s12880_s22 + $0x186c] ss:$16 sps:$4 sm:$0xff]   ;;  %v11960_v11 = vld [vmem:[%s12880_s22 + $0x1888] ss:$16 sps:$4 sm:$0xff]  }
 0x4a2   : > { %8117 = vmatpush1.bf16.msra.mxu1 %v11885_v45  ;;  %8077 = vmatprep.subr.bf16.mxu0 %v11890_v56  ;;  %v11959_v38 = vld [vmem:[%s12880_s22 + $0x1a6c] ss:$16 sps:$4 sm:$0xff]   ;;  %v11963_v55 = vld [vmem:[%s12880_s22 + $0x1a88] ss:$16 sps:$4 sm:$0xff]  }
 0x4a3   : > { %8118 = vmatprep.subr.bf16.mxu1 %v11893_v46  ;;  %v11965_v4 = vld [vmem:[%s12880_s22 + $0x1a8c] ss:$16 sps:$4 sm:$0xff]   ;;  %v11966_v46 = vld [vmem:[%s12880_s22 + $0x18a8] ss:$16 sps:$4 sm:$0xff]  }
 0x4a4   : > { %v11968_v45 = vld [vmem:[%s12880_s22 + $0x18ac] ss:$16 sps:$4 sm:$0xff]  }
 0x4a5   : > { %8078 = vmatpush1.bf16.msra.mxu0 %v11888_v57  ;;  %v11971_v56 = vld [vmem:[%s12880_s22 + $0x1aac] ss:$16 sps:$4 sm:$0xff]   ;;  %v11969_v57 = vld [vmem:[%s12880_s22 + $0x1aa8] ss:$16 sps:$4 sm:$0xff]  }
 0x4a6   : > { %8119 = vmatpush1.bf16.msra.mxu1 %v11891_v40  ;;  %8079 = vmatprep.subr.bf16.mxu0 %v11896_v41  ;;  %v11974_v40 = vld [vmem:[%s12880_s22 + $0x18cc] ss:$16 sps:$4 sm:$0xff]  }
 0x4a7   : > { %8120 = vmatprep.subr.bf16.mxu1 %v11899_v60  ;;  %v11977_v41 = vld [vmem:[%s12880_s22 + $0x1acc] ss:$16 sps:$4 sm:$0xff]  }
 0x4a9   : > { %8080 = vmatpush1.bf16.msra.mxu0 %v11894_v61 }
 0x4aa   : > { %8121 = vmatpush1.bf16.msra.mxu1 %v11897_v59  ;;  %8081 = vmatprep.subr.bf16.mxu0 %v11902_v0 }
 0x4ab   : > { %8122 = vmatprep.subr.bf16.mxu1 %v11905_v32 }
 0x4ad   : > { %8082 = vmatpush1.bf16.msra.mxu0 %v11900_v47 }
 0x4ae   : > { %8123 = vmatpush1.bf16.msra.mxu1 %v11903_v27  ;;  %8083 = vmatprep.subr.bf16.mxu0 %v11908_v1 }
 0x4af   : > { %8124 = vmatprep.subr.bf16.mxu1 %v11911_v20  ;;  %v11972_v20 = vld [vmem:[%s12880_s22 + $0x18c8] ss:$16 sps:$4 sm:$0xff]  }
 0x4b1   : > { %8084 = vmatpush1.bf16.msra.mxu0 %v11906_v22  ;;  %v11975_v22 = vld [vmem:[%s12880_s22 + $0x1ac8] ss:$16 sps:$4 sm:$0xff]  }
 0x4b2   : > { %8125 = vmatpush1.bf16.msra.mxu1 %v11909_v5  ;;  %8085 = vmatprep.subr.bf16.mxu0 %v11914_v10 }
 0x4b3   : > { %8126 = vmatprep.subr.bf16.mxu1 %v11917_v42 }
 0x4b5   : > { %8086 = vmatpush1.bf16.msra.mxu0 %v11912_v44 }
 0x4b6   : > { %8127 = vmatpush1.bf16.msra.mxu1 %v11915_v13  ;;  %8087 = vmatprep.subr.bf16.mxu0 %v11920_v7  ;;  %v11978_v13 = vld [vmem:[%s12880_s22 + $0x18e8] ss:$16 sps:$4 sm:$0xff]  }
 0x4b7   : > { %8128 = vmatprep.subr.bf16.mxu1 %v11923_v8  ;;  %v11981_v7 = vld [vmem:[%s12880_s22 + $0x1ae8] ss:$16 sps:$4 sm:$0xff]   ;;  %v11986_v8 = vld [vmem:[%s12880_s22 + $0x190c] ss:$16 sps:$4 sm:$0xff]  }
 0x4b9   : > { %8088 = vmatpush1.bf16.msra.mxu0 %v11918_v30  ;;  %v11989_v30 = vld [vmem:[%s12880_s22 + $0x1b0c] ss:$16 sps:$4 sm:$0xff]  }
 0x4ba   : > { %8129 = vmatpush1.bf16.msra.mxu1 %v11921_v48  ;;  %8089 = vmatprep.subr.bf16.mxu0 %v11926_v9  ;;  %v11984_v48 = vld [vmem:[%s12880_s22 + $0x1908] ss:$16 sps:$4 sm:$0xff]  }
 0x4bb   : > { %8130 = vmatprep.subr.bf16.mxu1 %v11929_v14  ;;  %v11987_v9 = vld [vmem:[%s12880_s22 + $0x1b08] ss:$16 sps:$4 sm:$0xff]   ;;  %v11992_v14 = vld [vmem:[%s12880_s22 + $0x192c] ss:$16 sps:$4 sm:$0xff]  }
 0x4bd   : > { %8090 = vmatpush1.bf16.msra.mxu0 %v11924_v15  ;;  %v11995_v15 = vld [vmem:[%s12880_s22 + $0x1b2c] ss:$16 sps:$4 sm:$0xff]  }
 0x4be   : > { %8131 = vmatpush1.bf16.msra.mxu1 %v11927_v23  ;;  %8091 = vmatprep.subr.bf16.mxu0 %v11932_v29  ;;  %v11990_v23 = vld [vmem:[%s12880_s22 + $0x1928] ss:$16 sps:$4 sm:$0xff]  }
 0x4bf   : > { %8132 = vmatprep.subr.bf16.mxu1 %v11935_v21  ;;  %v11993_v29 = vld [vmem:[%s12880_s22 + $0x1b28] ss:$16 sps:$4 sm:$0xff]   ;;  %v11998_v21 = vld [vmem:[%s12880_s22 + $0x194c] ss:$16 sps:$4 sm:$0xff]  }
 0x4c1   : > { %8092 = vmatpush1.bf16.msra.mxu0 %v11930_v16  ;;  %v12001_v16 = vld [vmem:[%s12880_s22 + $0x1b4c] ss:$16 sps:$4 sm:$0xff]  }
 0x4c2   : > { %8133 = vmatpush1.bf16.msra.mxu1 %v11933_v24  ;;  %8143 = vmatprep.subr.bf16.mxu0 %v11938_v50  ;;  %v11996_v24 = vld [vmem:[%s12880_s22 + $0x1948] ss:$16 sps:$4 sm:$0xff]  }
 0x4c3   : > { %8184 = vmatprep.subr.bf16.mxu1 %v11941_v19  ;;  %v11999_v50 = vld [vmem:[%s12880_s22 + $0x1b48] ss:$16 sps:$4 sm:$0xff]   ;;  %v12004_v19 = vld [vmem:[%s12880_s22 + $0x196c] ss:$16 sps:$4 sm:$0xff]  }
 0x4c4   : > { %8094 = vmatmul.mubr.bf16.vlgmr.msra.gmra.mrb[56].mxu0 %v13628_v62  ;;  %v11948_v62 = vld [vmem:[%s12880_s22 + $0x1848] ss:$16 sps:$4 sm:$0xff]  }
 0x4c5   : > { %8135 = vmatmul.mubr.bf16.vlgmr.msra.gmra.mrb[56].mxu1 %v13632_v63  ;;  %8144 = vmatpush1.bf16.msra.mxu0 %v11936_v53  ;;  %v11951_v63 = vld [vmem:[%s12880_s22 + $0x1a48] ss:$16 sps:$4 sm:$0xff]   ;;  %v12007_v53 = vld [vmem:[%s12880_s22 + $0x1b6c] ss:$16 sps:$4 sm:$0xff]  }
 0x4c6   : > { %8185 = vmatpush1.bf16.msra.mxu1 %v11939_v18  ;;  %8145 = vmatprep.subr.bf16.mxu0 %v11944_v51  ;;  %v12002_v18 = vld [vmem:[%s12880_s22 + $0x1968] ss:$16 sps:$4 sm:$0xff]  }
 0x4c7   : > { %8186 = vmatprep.subr.bf16.mxu1 %v11947_v26  ;;  %8175 = vmatprep.mubr.bf16.mxu0 %v13636_v33  ;;  %v11957_v33 = vld [vmem:[%s12880_s22 + $0x1a68] ss:$16 sps:$4 sm:$0xff]   ;;  %v12010_v26 = vld [vmem:[%s12880_s22 + $0x198c] ss:$16 sps:$4 sm:$0xff]  }
 0x4c8   : > { %8216 = vmatprep.mubr.bf16.mxu1 %v13638_v3  ;;  %v11962_v3 = vld [vmem:[%s12880_s22 + $0x188c] ss:$16 sps:$4 sm:$0xff]   ;;  %v12005_v51 = vld [vmem:[%s12880_s22 + $0x1b68] ss:$16 sps:$4 sm:$0xff]  }
 0x4c9   : > { %8146 = vmatpush1.bf16.msra.mxu0 %v11942_v28  ;;  %v12013_v28 = vld [vmem:[%s12880_s22 + $0x1b8c] ss:$16 sps:$4 sm:$0xff]  }
 0x4ca   : > { %8187 = vmatpush1.bf16.msra.mxu1 %v11945_v31  ;;  %8147 = vmatprep.subr.bf16.mxu0 %v11950_v54  ;;  %v12008_v31 = vld [vmem:[%s12880_s22 + $0x1988] ss:$16 sps:$4 sm:$0xff]  }
 0x4cb   : > { %8188 = vmatprep.subr.bf16.mxu1 %v11953_v17  ;;  %v12011_v54 = vld [vmem:[%s12880_s22 + $0x1b88] ss:$16 sps:$4 sm:$0xff]   ;;  %v12016_v17 = vld [vmem:[%s12880_s22 + $0x19ac] ss:$16 sps:$4 sm:$0xff]  }
 0x4cd   : > { %8148 = vmatpush1.bf16.msra.mxu0 %v11948_v62  ;;  %v12019_v62 = vld [vmem:[%s12880_s22 + $0x1bac] ss:$16 sps:$4 sm:$0xff]  }
 0x4ce   : > { %8189 = vmatpush1.bf16.msra.mxu1 %v11951_v63  ;;  %8149 = vmatprep.subr.bf16.mxu0 %v11956_v36  ;;  %v12014_v63 = vld [vmem:[%s12880_s22 + $0x19a8] ss:$16 sps:$4 sm:$0xff]  }
 0x4cf   : > { %8190 = vmatprep.subr.bf16.mxu1 %v11959_v38  ;;  %v12017_v36 = vld [vmem:[%s12880_s22 + $0x1ba8] ss:$16 sps:$4 sm:$0xff]   ;;  %v12022_v38 = vld [vmem:[%s12880_s22 + $0x19cc] ss:$16 sps:$4 sm:$0xff]  }
 0x4d1   : > { %8150 = vmatpush1.bf16.msra.mxu0 %v11954_v39  ;;  %v12025_v39 = vld [vmem:[%s12880_s22 + $0x1bcc] ss:$16 sps:$4 sm:$0xff]  }
 0x4d2   : > { %8191 = vmatpush1.bf16.msra.mxu1 %v11957_v33  ;;  %8151 = vmatprep.subr.bf16.mxu0 %v11962_v3  ;;  %v12020_v33 = vld [vmem:[%s12880_s22 + $0x19c8] ss:$16 sps:$4 sm:$0xff]  }
 0x4d3   : > { %8192 = vmatprep.subr.bf16.mxu1 %v11965_v4  ;;  %v12023_v3 = vld [vmem:[%s12880_s22 + $0x1bc8] ss:$16 sps:$4 sm:$0xff]   ;;  %v12028_v4 = vld [vmem:[%s12880_s22 + $0x19ec] ss:$16 sps:$4 sm:$0xff]  }
 0x4d5   : > { %8152 = vmatpush1.bf16.msra.mxu0 %v11960_v11  ;;  %v12031_v11 = vld [vmem:[%s12880_s22 + $0x1bec] ss:$16 sps:$4 sm:$0xff]  }
 0x4d6   : > { %8193 = vmatpush1.bf16.msra.mxu1 %v11963_v55  ;;  %8153 = vmatprep.subr.bf16.mxu0 %v11968_v45  ;;  %v12026_v55 = vld [vmem:[%s12880_s22 + $0x19e8] ss:$16 sps:$4 sm:$0xff]  }
 0x4d7   : > { %8194 = vmatprep.subr.bf16.mxu1 %v11971_v56  ;;  %v7849_v60 = vpop.f32.mrb[44].mxu0  ;;  %v12029_v45 = vld [vmem:[%s12880_s22 + $0x1be8] ss:$16 sps:$4 sm:$0xff]  }
 0x4d8   : > { %v7890_v61 = vpop.f32.mrb[44].mxu1  ;;  %v7850_v59 = vadd.f32 %v7849_v60, %v14129_v37  ;;  %v7851_v0 = vpop.f32.mrb[45].mxu0  ;;  %v11980_v37 = vld [vmem:[%s12880_s22 + $0x18ec] ss:$16 sps:$4 sm:$0xff]  }
 0x4d9   : > { %v7892_v32 = vpop.f32.mrb[45].mxu1  ;;  %v7852_v47 = vadd.f32 %v7851_v0, %v14133_v35  ;;  %v7853_v27 = vpop.f32.mrb[46].mxu0  ;;  %8154 = vmatpush1.bf16.msra.mxu0 %v11966_v46  ;;  %v11983_v35 = vld [vmem:[%s12880_s22 + $0x1aec] ss:$16 sps:$4 sm:$0xff]   ;;  %s14519_s22 = sld [smem:[#allocation34_spill]] (!%p10203_p11) }
 0x4da   : > { %v7894_v1 = vpop.f32.mrb[46].mxu1  ;;  %8195 = vmatpush1.bf16.msra.mxu1 %v11969_v57  ;;  %v14203_v5 = vadd.f32 %v7890_v61, %v7850_v59  ;;  %v7854_v10 = vpop.f32.mrb[47].mxu0  ;;  %8155 = vmatprep.subr.bf16.mxu0 %v11974_v40 }
 0x4db   : > { %v7895_v42 = vpop.f32.mrb[47].mxu1  ;;  %8196 = vmatprep.subr.bf16.mxu1 %v11977_v41  ;;  %v14207_v44 = vadd.f32 %v7892_v32, %v7852_v47 }
 0x4dd   : > { %8156 = vmatpush1.bf16.msra.mxu0 %v11972_v20 }
 0x4de   : > { %8197 = vmatpush1.bf16.msra.mxu1 %v11975_v22  ;;  %8157 = vmatprep.subr.bf16.mxu0 %v11980_v37 }
 0x4df   : > { %8198 = vmatprep.subr.bf16.mxu1 %v11983_v35  ;;  %s14520_s30 = smov (!%p10203_p11), %s14519_s22 }
 0x4e1   : > { %8158 = vmatpush1.bf16.msra.mxu0 %v11978_v13 }
 0x4e2   : > { %8199 = vmatpush1.bf16.msra.mxu1 %v11981_v7  ;;  %8159 = vmatprep.subr.bf16.mxu0 %v11986_v8 }
 0x4e3   : > { %8200 = vmatprep.subr.bf16.mxu1 %v11989_v30 }
 0x4e5   : > { %8160 = vmatpush1.bf16.msra.mxu0 %v11984_v48 }
 0x4e6   : > { %8201 = vmatpush1.bf16.msra.mxu1 %v11987_v9  ;;  %8161 = vmatprep.subr.bf16.mxu0 %v11992_v14 }
 0x4e7   : > { %8202 = vmatprep.subr.bf16.mxu1 %v11995_v15 }
 0x4e9   : > { %8162 = vmatpush1.bf16.msra.mxu0 %v11990_v23 }
 0x4ea   : > { %8203 = vmatpush1.bf16.msra.mxu1 %v11993_v29  ;;  %8163 = vmatprep.subr.bf16.mxu0 %v11998_v21 }
 0x4eb   : > { %8204 = vmatprep.subr.bf16.mxu1 %v12001_v16 }
 0x4ed   : > { %8164 = vmatpush1.bf16.msra.mxu0 %v11996_v24 }
 0x4ee   : > { %8205 = vmatpush1.bf16.msra.mxu1 %v11999_v50  ;;  %8165 = vmatprep.subr.bf16.mxu0 %v12004_v19  ;;  %v8237_v50 = vsub.s32 2, %v12937_v43  ;;  %v8241_v19 = vsub.s32 3, %v12937_v43 }
 0x4ef   : > { %8206 = vmatprep.subr.bf16.mxu1 %v12007_v53 }
 0x4f1   : > { %8166 = vmatpush1.bf16.msra.mxu0 %v12002_v18 }
 0x4f2   : > { %8207 = vmatpush1.bf16.msra.mxu1 %v12005_v51  ;;  %8167 = vmatprep.subr.bf16.mxu0 %v12010_v26  ;;  %v12032_v26 = vld [vmem:[%s12888_s26] sm:$0xf] }
 0x4f3   : > { %8208 = vmatprep.subr.bf16.mxu1 %v12013_v28  ;;  %v8238_v28 = vrot.slane %v12032_v26, %v8237_v50  ;;  %v12091_v50 = vld [vmem:[#allocation11 + $0x194] ss:$8 sps:$4 sm:$0xff] (!%p10203_p11)  }
 0x4f5   : > { %8168 = vmatpush1.bf16.msra.mxu0 %v12008_v31 }
 0x4f6   : > { %8209 = vmatpush1.bf16.msra.mxu1 %v12011_v54  ;;  %8169 = vmatprep.subr.bf16.mxu0 %v12016_v17 }
 0x4f7   : > { %8210 = vmatprep.subr.bf16.mxu1 %v12019_v62  ;;  %v8242_v62 = vrot.slane %v12032_v26, %v8241_v19  ;;  %v12093_v19 = vld [vmem:[#allocation11 + $0x90] ss:$8 sps:$4 sm:$0xff] (!%p10203_p11)   ;;  %v12099_v26 = vld [vmem:[#allocation11 + $0xa0] ss:$8 sps:$4 sm:$0xff] (!%p10203_p11)  }
 0x4f9   : > { %8170 = vmatpush1.bf16.msra.mxu0 %v12014_v63 }
 0x4fa   : > { %8211 = vmatpush1.bf16.msra.mxu1 %v12017_v36  ;;  %8171 = vmatprep.subr.bf16.mxu0 %v12022_v38 }
 0x4fb   : > { %8212 = vmatprep.subr.bf16.mxu1 %v12025_v39 }
 0x4fd   : > { %8172 = vmatpush1.bf16.msra.mxu0 %v12020_v33 }
 0x4fe   : > { %8213 = vmatpush1.bf16.msra.mxu1 %v12023_v3  ;;  %8173 = vmatprep.subr.bf16.mxu0 %v12028_v4 }
 0x4ff   : > { %8214 = vmatprep.subr.bf16.mxu1 %v12031_v11 }
 0x501   : > { %8174 = vmatpush1.bf16.msra.mxu0 %v12026_v55 }
 0x502   : > { %8215 = vmatpush1.bf16.msra.mxu1 %v12029_v45  ;;  %v8263_v45 = vrot.slane %v8255_v12, %v12945_v49  ;;  %v12047_v12 = vld [vmem:[#allocation11 + $0x24] ss:$8 sps:$4 sm:$0xff] (!%p10203_p11)  }
 0x504   : > { %8176 = vmatmul.mubr.bf16.vlgmr.msra.gmra.mrb[60].mxu0 %v13714_v34 }
 0x505   : > { %8217 = vmatmul.mubr.bf16.vlgmr.msra.gmra.mrb[60].mxu1 %v13718_v25 }
 0x517   : > { %v7931_v56 = vpop.f32.mrb[48].mxu0 }
 0x518   : > { %v7972_v46 = vpop.f32.mrb[48].mxu1  ;;  %v7932_v57 = vadd.f32 %v7931_v56, %v14203_v5  ;;  %v7933_v40 = vpop.f32.mrb[49].mxu0 }
 0x519   : > { %v7974_v41 = vpop.f32.mrb[49].mxu1  ;;  %v7934_v60 = vadd.f32 %v7933_v40, %v14207_v44  ;;  %v7935_v61 = vpop.f32.mrb[50].mxu0  ;;  %v12037_v40 = vld [vmem:[#allocation11 + $0x104] ss:$8 sps:$4 sm:$0xff] (!%p10203_p11)  }
 0x51a   : > { %v7976_v59 = vpop.f32.mrb[50].mxu1  ;;  %v7973_v0 = vadd.f32 %v7972_v46, %v7932_v57  ;;  %v7936_v32 = vpop.f32.mrb[51].mxu0  ;;  %v12035_v57 = vld [vmem:[#allocation11 + $0x4] ss:$8 sps:$4 sm:$0xff] (!%p10203_p11)   ;;  %8778 = vmatprep.subr.bf16.mxu0 (!%p10203_p11), %v12037_v40  ;;  %v12041_v61 = vld [vmem:[#allocation11 + $0x14] ss:$8 sps:$4 sm:$0xff] (!%p10203_p11)  }
 0x51b   : > { %v7977_v47 = vpop.f32.mrb[51].mxu1  ;;  %v7975_v27 = vadd.f32 %v7974_v41, %v7934_v60  ;;  %8737 = vmatprep.subr.bf16.mxu1 (!%p10203_p11), %v12035_v57  ;;  %v12039_v41 = vld [vmem:[#allocation11] ss:$8 sps:$4 sm:$0xff] (!%p10203_p11)   ;;  %v12043_v59 = vld [vmem:[#allocation11 + $0x114] ss:$8 sps:$4 sm:$0xff] (!%p10203_p11)  }
 0x51c   : > { %v12040_v60 = vld [vmem:[#allocation11 + $0x100] ss:$8 sps:$4 sm:$0xff] (!%p10203_p11)   ;;  %8738 = vmatpush1.bf16.msra.mxu1 (!%p10203_p11), %v12039_v41  ;;  %v12117_v57 = vld [vmem:[#allocation11 + $0xd0] ss:$8 sps:$4 sm:$0xff] (!%p10203_p11)   ;;  %v12119_v41 = vld [vmem:[#allocation11 + $0xe4] ss:$8 sps:$4 sm:$0xff] (!%p10203_p11)  }
 0x51d   : > { %8779 = vmatpush1.bf16.msra.mxu0 (!%p10203_p11), %v12040_v60  ;;  %8739 = vmatprep.subr.bf16.mxu1 (!%p10203_p11), %v12041_v61  ;;  %v12051_v32 = vld [vmem:[#allocation11 + $0x20] ss:$8 sps:$4 sm:$0xff] (!%p10203_p11)   ;;  %v12118_v40 = vld [vmem:[#allocation11 + $0x1d0] ss:$8 sps:$4 sm:$0xff] (!%p10203_p11)   ;;  %v12121_v60 = vld [vmem:[#allocation11 + $0x1e4] ss:$8 sps:$4 sm:$0xff] (!%p10203_p11)  }
 0x51e   : > { %8780 = vmatprep.subr.bf16.mxu0 (!%p10203_p11), %v12043_v59  ;;  %v12052_v47 = vld [vmem:[#allocation11 + $0x120] ss:$8 sps:$4 sm:$0xff] (!%p10203_p11)  }
 0x520   : > { %8740 = vmatpush1.bf16.msra.mxu1 (!%p10203_p11), %v12045_v6 }
 0x521   : > { %8781 = vmatpush1.bf16.msra.mxu0 (!%p10203_p11), %v12046_v52  ;;  %8741 = vmatprep.subr.bf16.mxu1 (!%p10203_p11), %v12047_v12  ;;  %v12123_v52 = vld [vmem:[#allocation11 + $0xe0] ss:$8 sps:$4 sm:$0xff] (!%p10203_p11)  }
 0x522   : > { %v12124_v12 = vld [vmem:[#allocation11 + $0x1e0] ss:$8 sps:$4 sm:$0xff] (!%p10203_p11)  }
 0x524   : > { %8742 = vmatpush1.bf16.msra.mxu1 (!%p10203_p11), %v12051_v32  ;;  %v12125_v32 = vld [vmem:[#allocation11 + $0xf4] ss:$8 sps:$4 sm:$0xff] (!%p10203_p11)  }
 0x557   : > { %v8013_v1 = vpop.f32.mrb[52].mxu0 }
 0x558   : > { %v8054_v20 = vpop.f32.mrb[52].mxu1  ;;  %v8014_v22 = vadd.f32 %v8013_v1, %v7973_v0  ;;  %v8015_v34 = vpop.f32.mrb[53].mxu0  ;;  %v12049_v0 = vld [vmem:[#allocation11 + $0x124] ss:$8 sps:$4 sm:$0xff] (!%p10203_p11)   ;;  %v12055_v1 = vld [vmem:[#allocation11 + $0x134] ss:$8 sps:$4 sm:$0xff] (!%p10203_p11)  }
 0x559   : > { %v8056_v10 = vpop.f32.mrb[53].mxu1  ;;  %v8016_v25 = vadd.f32 %v8015_v34, %v7975_v27  ;;  %v8017_v42 = vpop.f32.mrb[54].mxu0  ;;  %v12053_v27 = vld [vmem:[#allocation11 + $0x34] ss:$8 sps:$4 sm:$0xff] (!%p10203_p11)   ;;  %8782 = vmatprep.subr.bf16.mxu0 (!%p10203_p11), %v12049_v0  ;;  %v12059_v34 = vld [vmem:[#allocation11 + $0x44] ss:$8 sps:$4 sm:$0xff] (!%p10203_p11)  }
 0x55a   : > { %v8058_v37 = vpop.f32.mrb[54].mxu1  ;;  %v8055_v35 = vadd.f32 %v8054_v20, %v8014_v22  ;;  %v8018_v5 = vpop.f32.mrb[55].mxu0  ;;  %v12057_v20 = vld [vmem:[#allocation11 + $0x30] ss:$8 sps:$4 sm:$0xff] (!%p10203_p11)   ;;  %8783 = vmatpush1.bf16.msra.mxu0 (!%p10203_p11), %v12052_v47  ;;  %8743 = vmatprep.subr.bf16.mxu1 (!%p10203_p11), %v12053_v27  ;;  %v12064_v42 = vld [vmem:[#allocation11 + $0x140] ss:$8 sps:$4 sm:$0xff] (!%p10203_p11)  }
 0x55b   : > { %v8059_v13 = vpop.f32.mrb[55].mxu1  ;;  %v8057_v7 = vadd.f32 %v8056_v10, %v8016_v25  ;;  %v12058_v22 = vld [vmem:[#allocation11 + $0x130] ss:$8 sps:$4 sm:$0xff] (!%p10203_p11)   ;;  %8784 = vmatprep.subr.bf16.mxu0 (!%p10203_p11), %v12055_v1  ;;  %v12061_v10 = vld [vmem:[#allocation11 + $0x144] ss:$8 sps:$4 sm:$0xff] (!%p10203_p11)   ;;  %8744 = vmatpush1.bf16.msra.mxu1 (!%p10203_p11), %v12057_v20 }
 0x55c   : > { %v12063_v25 = vld [vmem:[#allocation11 + $0x40] ss:$8 sps:$4 sm:$0xff] (!%p10203_p11)   ;;  %v12065_v37 = vld [vmem:[#allocation11 + $0x54] ss:$8 sps:$4 sm:$0xff] (!%p10203_p11)   ;;  %8745 = vmatprep.subr.bf16.mxu1 (!%p10203_p11), %v12059_v34  ;;  %v12069_v5 = vld [vmem:[#allocation11 + $0x50] ss:$8 sps:$4 sm:$0xff] (!%p10203_p11)  }
 0x55d   : > { %v12070_v13 = vld [vmem:[#allocation11 + $0x150] ss:$8 sps:$4 sm:$0xff] (!%p10203_p11)   ;;  %v12127_v47 = vld [vmem:[#allocation11 + $0x1f4] ss:$8 sps:$4 sm:$0xff] (!%p10203_p11)   ;;  %v8841_v1 = vld [vmem:[%s14519_s22 + $0x80] sm:$0xff] (!%p10203_p11) }
 0x55e   : > { %8785 = vmatpush1.bf16.msra.mxu0 (!%p10203_p11), %v12058_v22  ;;  %v8842_v20 = vld [vmem:[%s14520_s30 + $0x88] sm:$0xff] (!%p10203_p11) }
 0x55f   : > { %8786 = vmatprep.subr.bf16.mxu0 (!%p10203_p11), %v12061_v10  ;;  %8746 = vmatpush1.bf16.msra.mxu1 (!%p10203_p11), %v12063_v25  ;;  %v12129_v22 = vld [vmem:[#allocation11 + $0xf0] ss:$8 sps:$4 sm:$0xff] (!%p10203_p11)   ;;  %v10319_v10 = vpack.c.bf16 (!%p10203_p11), %v8842_v20, %v8841_v1  ;;  %v8837_v20 = vld [vmem:[%s14520_s30 + $0x60] sm:$0xff] (!%p10203_p11) }
 0x560   : > { %8747 = vmatprep.subr.bf16.mxu1 (!%p10203_p11), %v12065_v37  ;;  %v12130_v34 = vld [vmem:[#allocation11 + $0x1f0] ss:$8 sps:$4 sm:$0xff] (!%p10203_p11)  }
 0x561   : > { %v8307_v37 = vld [vmem:[#allocation6] sm:$0xff] (!%p10203_p11) }
 0x562   : > { %8787 = vmatpush1.bf16.msra.mxu0 (!%p10203_p11), %v12064_v42 }
 0x563   : > { %8748 = vmatpush1.bf16.msra.mxu1 (!%p10203_p11), %v12069_v5 }
 0x597   : > { %v8095_v8 = vpop.f32.mrb[56].mxu0 }
 0x598   : > { %v8136_v44 = vpop.f32.mrb[56].mxu1  ;;  %v8096_v30 = vadd.f32 %v8095_v8, %v8055_v35  ;;  %v8097_v48 = vpop.f32.mrb[57].mxu0  ;;  %v12067_v35 = vld [vmem:[#allocation11 + $0x154] ss:$8 sps:$4 sm:$0xff] (!%p10203_p11)   ;;  %v12073_v8 = vld [vmem:[#allocation11 + $0x164] ss:$8 sps:$4 sm:$0xff] (!%p10203_p11)  }
 0x599   : > { %v8138_v9 = vpop.f32.mrb[57].mxu1  ;;  %v8098_v14 = vadd.f32 %v8097_v48, %v8057_v7  ;;  %v8099_v15 = vpop.f32.mrb[58].mxu0  ;;  %v12071_v7 = vld [vmem:[#allocation11 + $0x64] ss:$8 sps:$4 sm:$0xff] (!%p10203_p11)   ;;  %8788 = vmatprep.subr.bf16.mxu0 (!%p10203_p11), %v12067_v35  ;;  %v12077_v48 = vld [vmem:[#allocation11 + $0x74] ss:$8 sps:$4 sm:$0xff] (!%p10203_p11)  }
 0x59a   : > { %v8140_v23 = vpop.f32.mrb[58].mxu1  ;;  %v8137_v29 = vadd.f32 %v8136_v44, %v8096_v30  ;;  %v8100_v21 = vpop.f32.mrb[59].mxu0  ;;  %v12075_v44 = vld [vmem:[#allocation11 + $0x60] ss:$8 sps:$4 sm:$0xff] (!%p10203_p11)   ;;  %8789 = vmatpush1.bf16.msra.mxu0 (!%p10203_p11), %v12070_v13  ;;  %8749 = vmatprep.subr.bf16.mxu1 (!%p10203_p11), %v12071_v7  ;;  %v12082_v15 = vld [vmem:[#allocation11 + $0x170] ss:$8 sps:$4 sm:$0xff] (!%p10203_p11)  }
 0x59b   : > { %v8141_v16 = vpop.f32.mrb[59].mxu1  ;;  %v8139_v24 = vadd.f32 %v8138_v9, %v8098_v14  ;;  %v12076_v30 = vld [vmem:[#allocation11 + $0x160] ss:$8 sps:$4 sm:$0xff] (!%p10203_p11)   ;;  %8790 = vmatprep.subr.bf16.mxu0 (!%p10203_p11), %v12073_v8  ;;  %v12079_v9 = vld [vmem:[#allocation11 + $0x174] ss:$8 sps:$4 sm:$0xff] (!%p10203_p11)   ;;  %8750 = vmatpush1.bf16.msra.mxu1 (!%p10203_p11), %v12075_v44 }
 0x59c   : > { %v12081_v14 = vld [vmem:[#allocation11 + $0x70] ss:$8 sps:$4 sm:$0xff] (!%p10203_p11)   ;;  %v12083_v23 = vld [vmem:[#allocation11 + $0x84] ss:$8 sps:$4 sm:$0xff] (!%p10203_p11)   ;;  %8751 = vmatprep.subr.bf16.mxu1 (!%p10203_p11), %v12077_v48  ;;  %v12087_v21 = vld [vmem:[#allocation11 + $0x80] ss:$8 sps:$4 sm:$0xff] (!%p10203_p11)  }
 0x59d   : > { %v12088_v16 = vld [vmem:[#allocation11 + $0x180] ss:$8 sps:$4 sm:$0xff] (!%p10203_p11)  }
 0x59e   : > { %8791 = vmatpush1.bf16.msra.mxu0 (!%p10203_p11), %v12076_v30 }
 0x59f   : > { %8792 = vmatprep.subr.bf16.mxu0 (!%p10203_p11), %v12079_v9  ;;  %8752 = vmatpush1.bf16.msra.mxu1 (!%p10203_p11), %v12081_v14 }
 0x5a0   : > { %8753 = vmatprep.subr.bf16.mxu1 (!%p10203_p11), %v12083_v23  ;;  %v8825_v23 = vld [vmem:[%s14520_s30] sm:$0xff] (!%p10203_p11) }
 0x5a2   : > { %8793 = vmatpush1.bf16.msra.mxu0 (!%p10203_p11), %v12082_v15 }
 0x5a3   : > { %8754 = vmatpush1.bf16.msra.mxu1 (!%p10203_p11), %v12087_v21 }
 0x5d7   : > { %v8177_v53 = vpop.f32.mrb[60].mxu0 }
 0x5d8   : > { %v8218_v18 = vpop.f32.mrb[60].mxu1  ;;  %v8178_v51 = vadd.f32 %v8177_v53, %v8137_v29  ;;  %v8179_v31 = vpop.f32.mrb[61].mxu0  ;;  %v12085_v29 = vld [vmem:[#allocation11 + $0x184] ss:$8 sps:$4 sm:$0xff] (!%p10203_p11)   ;;  %v12094_v53 = vld [vmem:[#allocation11 + $0x190] ss:$8 sps:$4 sm:$0xff] (!%p10203_p11)  }
 0x5d9   : > { %v8220_v54 = vpop.f32.mrb[61].mxu1  ;;  %v8180_v17 = vadd.f32 %v8179_v31, %v8139_v24  ;;  %v8181_v63 = vpop.f32.mrb[62].mxu0  ;;  %v12089_v24 = vld [vmem:[#allocation11 + $0x94] ss:$8 sps:$4 sm:$0xff] (!%p10203_p11)   ;;  %8794 = vmatprep.subr.bf16.mxu0 (!%p10203_p11), %v12085_v29 }
 0x5da   : > { %v8222_v36 = vpop.f32.mrb[62].mxu1  ;;  %v8219_v38 = vadd.f32 %v8218_v18, %v8178_v51  ;;  %v8182_v39 = vpop.f32.mrb[63].mxu0  ;;  %8795 = vmatpush1.bf16.msra.mxu0 (!%p10203_p11), %v12088_v16  ;;  %v12095_v18 = vld [vmem:[#allocation11 + $0xa4] ss:$8 sps:$4 sm:$0xff] (!%p10203_p11)   ;;  %8755 = vmatprep.subr.bf16.mxu1 (!%p10203_p11), %v12089_v24  ;;  %v12101_v31 = vld [vmem:[#allocation11 + $0xb4] ss:$8 sps:$4 sm:$0xff] (!%p10203_p11)  }
 0x5db   : > { %v8223_v33 = vpop.f32.mrb[63].mxu1  ;;  %v8221_v3 = vadd.f32 %v8220_v54, %v8180_v17  ;;  %8796 = vmatprep.subr.bf16.mxu0 (!%p10203_p11), %v12091_v50  ;;  %v12097_v51 = vld [vmem:[#allocation11 + $0x1a4] ss:$8 sps:$4 sm:$0xff] (!%p10203_p11)   ;;  %8756 = vmatpush1.bf16.msra.mxu1 (!%p10203_p11), %v12093_v19  ;;  %v12103_v54 = vld [vmem:[#allocation11 + $0x1b4] ss:$8 sps:$4 sm:$0xff] (!%p10203_p11)  }
 0x5dc   : > { %v8249_v4 = vadd.f32 %v8238_v28, %v8219_v38  ;;  %v12100_v28 = vld [vmem:[#allocation11 + $0x1a0] ss:$8 sps:$4 sm:$0xff] (!%p10203_p11)   ;;  %8757 = vmatprep.subr.bf16.mxu1 (!%p10203_p11), %v12095_v18  ;;  %v12105_v36 = vld [vmem:[#allocation11 + $0xb0] ss:$8 sps:$4 sm:$0xff] (!%p10203_p11)   ;;  %v12107_v33 = vld [vmem:[#allocation11 + $0xc4] ss:$8 sps:$4 sm:$0xff] (!%p10203_p11)  }
 0x5dd   : > { %v8250_v11 = vadd.f32 %v8242_v62, %v8221_v3  ;;  %v12106_v38 = vld [vmem:[#allocation11 + $0x1b0] ss:$8 sps:$4 sm:$0xff] (!%p10203_p11)   ;;  %v12109_v3 = vld [vmem:[#allocation11 + $0x1c4] ss:$8 sps:$4 sm:$0xff] (!%p10203_p11)  }
 0x5de   : > { %8797 = vmatpush1.bf16.msra.mxu0 (!%p10203_p11), %v12094_v53  ;;  %v8826_v29 = vld [vmem:[%s14520_s30 + $0x8] sm:$0xff] (!%p10203_p11)  ;;  %v8843_v24 = vld [vmem:[%s14520_s30 + $0x90] sm:$0xff] (!%p10203_p11)  ;;  %v8844_v50 = vld [vmem:[%s14520_s30 + $0x98] sm:$0xff] (!%p10203_p11) }
 0x5df   : > { %v8256_v55 = vcombine.low %v8249_v4, %v8250_v11  ;;  %8280 = sbr.rel (%p10203_p11) target bundleno = 2449 (0x991), region = 96  ;;  %8798 = vmatprep.subr.bf16.mxu0 (!%p10203_p11), %v12097_v51  ;;  %8758 = vmatpush1.bf16.msra.mxu1 (!%p10203_p11), %v12099_v26  ;;  %v12111_v4 = vld [vmem:[#allocation11 + $0xc0] ss:$8 sps:$4 sm:$0xff] (!%p10203_p11)   ;;  %v10321_v51 = vpack.c.bf16 (!%p10203_p11), %v8826_v29, %v8825_v23 }
 0x5e0   : > { %8759 = vmatprep.subr.bf16.mxu1 (!%p10203_p11), %v12101_v31  ;;  %v12112_v11 = vld [vmem:[#allocation11 + $0x1c0] ss:$8 sps:$4 sm:$0xff] (!%p10203_p11)   ;;  %v8827_v31 = vld [vmem:[%s14520_s30 + $0x10] sm:$0xff] (!%p10203_p11) }
 0x5e1   : > { %v8270_v56 = vrot.slane %v8256_v55, %v12945_v49 }
 0x5e2   : > { %8799 = vmatpush1.bf16.msra.mxu0 (!%p10203_p11), %v12100_v28  ;;  %v10323_v28 = vpack.c.bf16 (!%p10203_p11), %v8844_v50, %v8843_v24 }
 0x5e3   : > { %v8271_v46 = vcombine.low %v8263_v45, %v8270_v56  ;;  %8800 = vmatprep.subr.bf16.mxu0 (!%p10203_p11), %v12103_v54  ;;  %8760 = vmatpush1.bf16.msra.mxu1 (!%p10203_p11), %v12105_v36  ;;  %v12113_v45 = vld [vmem:[#allocation11 + $0xd4] ss:$8 sps:$4 sm:$0xff] (!%p10203_p11)  }
 0x5e4   : > { %8761 = vmatprep.subr.bf16.mxu1 (!%p10203_p11), %v12107_v33  ;;  %v12115_v56 = vld [vmem:[#allocation11 + $0x1d4] ss:$8 sps:$4 sm:$0xff] (!%p10203_p11)  }
 0x5e5   : > { %8276 = vst [vmem:[%s8275_s1] sm:$0xff] %v8271_v46  ;;  %v8847_v33 = vld [vmem:[%s14520_s30 + $0xb0] sm:$0xff] (!%p10203_p11)  ;;  %s12530_s1 = smov (!%p10203_p11), 127  }
 0x5e6   : > { %8801 = vmatpush1.bf16.msra.mxu0 %v12106_v38  ;;  %v8829_v38 = vld [vmem:[%s14520_s30 + $0x20] sm:$0xff] }
 0x5e7   : > { %8802 = vmatprep.subr.bf16.mxu0 %v12109_v3  ;;  %8762 = vmatpush1.bf16.msra.mxu1 %v12111_v4  ;;  %v8848_v3 = vld [vmem:[%s14520_s30 + $0xb8] sm:$0xff] }
 0x5e8   : > { %8763 = vmatprep.subr.bf16.mxu1 %v12113_v45  ;;  %v8832_v45 = vld [vmem:[%s14520_s30 + $0x38] sm:$0xff] }
 0x5ea   : > { %8803 = vmatpush1.bf16.msra.mxu0 %v12112_v11  ;;  %v10331_v11 = vpack.c.bf16 %v8848_v3, %v8847_v33 }
 0x5eb   : > { %8804 = vmatprep.subr.bf16.mxu0 %v12115_v56  ;;  %8764 = vmatpush1.bf16.msra.mxu1 %v12117_v57  ;;  %v8849_v56 = vld [vmem:[%s14520_s30 + $0xc0] sm:$0xff] }
 0x5ec   : > { %v8281_v17 = vld [vmem:[#allocation2] sm:$0xff]  ;;  %v8289_v63 = vld [vmem:[#allocation2 + $0x8] sm:$0xff]  ;;  %v8300_v55 = vld [vmem:[#allocation2 + $0x18] sm:$0xff]  ;;  %8765 = vmatprep.subr.bf16.mxu1 %v12119_v41 }
 0x5ed   : > { %v10204_v62 = vmul.f32 -1.442695, %v8281_v17  ;;  %v10205_v39 = vmul.f32 -1.442695, %v8289_v63  ;;  %v10206_v46 = vmul.f32 -1.442695, %v8300_v55 }
 0x5ee   : > { %v8297_v61 = vld [vmem:[#allocation2 + $0x10] sm:$0xff]  ;;  %8805 = vmatpush1.bf16.msra.mxu0 %v12118_v40  ;;  %v8845_v17 = vld [vmem:[%s14520_s30 + $0xa0] sm:$0xff] }
 0x5ef   : > { %12131 = vpow2.f32 %v10204_v62  ;;  %8806 = vmatprep.subr.bf16.mxu0 %v12121_v60  ;;  %8766 = vmatpush1.bf16.msra.mxu1 %v12123_v52  ;;  %v8846_v62 = vld [vmem:[%s14520_s30 + $0xa8] sm:$0xff]  ;;  %v8831_v55 = vld [vmem:[%s14520_s30 + $0x30] sm:$0xff]  ;;  %v8833_v41 = vld [vmem:[%s14520_s30 + $0x40] sm:$0xff] }
 0x5f0   : > { %12133 = vpow2.f32 %v10205_v39  ;;  %8767 = vmatprep.subr.bf16.mxu1 %v12125_v32  ;;  %v10327_v36 = vpack.c.bf16 %v8846_v62, %v8845_v17  ;;  %v8830_v39 = vld [vmem:[%s14520_s30 + $0x28] sm:$0xff]  ;;  %v10333_v57 = vpack.c.bf16 %v8832_v45, %v8831_v55 }
 0x5f1   : > { %12135 = vpow2.f32 %v10206_v46  ;;  %v10329_v4 = vpack.c.bf16 %v8830_v39, %v8829_v38  ;;  %v8850_v46 = vld [vmem:[%s14520_s30 + $0xc8] sm:$0xff] }
 0x5f2   : > { %12137 = vtanh.f32 %v8297_v61  ;;  %8807 = vmatpush1.bf16.msra.mxu0 %v12124_v12  ;;  %v10335_v40 = vpack.c.bf16 %v8850_v46, %v8849_v56  ;;  %v8834_v60 = vld [vmem:[%s14520_s30 + $0x48] sm:$0xff]  ;;  %v8851_v61 = vld [vmem:[%s14520_s30 + $0xd0] sm:$0xff] }
 0x5f3   : > { %8808 = vmatprep.subr.bf16.mxu0 %v12127_v47  ;;  %8768 = vmatpush1.bf16.msra.mxu1 %v12129_v22  ;;  %v8835_v12 = vld [vmem:[%s14520_s30 + $0x50] sm:$0xff]  ;;  %v8853_v47 = vld [vmem:[%s14520_s30 + $0xe0] sm:$0xff]  ;;  %v8838_v22 = vld [vmem:[%s14520_s30 + $0x68] sm:$0xff] }
 0x5f4   : > { %10320 = vmatprep.subr.bf16.mxu1 %v10319_v10  ;;  %v8855_v10 = vld [vmem:[%s14520_s30 + $0xf0] sm:$0xff] }
 0x5f6   : > { %8809 = vmatpush1.bf16.msra.mxu0 %v12130_v34  ;;  %v10345_v34 = vpack.c.bf16 %v8838_v22, %v8837_v20 }
 0x5f9   : > { %v12132_v59 = vpop.eup %12131 }
 0x5fa   : > { %v12134_v6 = vpop.eup %12133  ;;  %v8285_v0 = vadd.f32 1.0, %v12132_v59  ;;  %v8852_v59 = vld [vmem:[%s14520_s30 + $0xd8] sm:$0xff] }
 0x5fb   : > { %v8293_v27 = vadd.f32 1.0, %v12134_v6  ;;  %v12136_v25 = vpop.eup %12135  ;;  %v10337_v6 = vpack.c.bf16 %v8834_v60, %v8833_v41  ;;  %v10339_v52 = vpack.c.bf16 %v8852_v59, %v8851_v61 }
 0x5fc   : > { %12139 = vrcp.f32 %v8285_v0  ;;  %v12138_v42 = vpop.eup %12137  ;;  %v8304_v5 = vadd.f32 1.0, %v12136_v25  ;;  %v8836_v0 = vld [vmem:[%s14520_s30 + $0x58] sm:$0xff] }
 0x5fd   : > { %12141 = vrcp.f32 %v8293_v27  ;;  %v10341_v32 = vpack.c.bf16 %v8836_v0, %v8835_v12  ;;  %v8854_v27 = vld [vmem:[%s14520_s30 + $0xe8] sm:$0xff]  ;;  %v8856_v25 = vld [vmem:[%s14520_s30 + $0xf8] sm:$0xff] }
 0x5fe   : > { %12143 = vrcp.f32 %v8304_v5  ;;  %v10343_v1 = vpack.c.bf16 %v8854_v27, %v8853_v47 }
 0x606   : > { %v12140_v35 = vpop.eup %12139 }
 0x607   : > { %v12142_v13 = vpop.eup %12141  ;;  %v8309_v7 = vmul.f32 %v12140_v35, %v12138_v42  ;;  %v10347_v42 = vpack.c.bf16 %v8856_v25, %v8855_v10  ;;  %v8840_v35 = vld [vmem:[%s14520_s30 + $0x78] sm:$0xff] }
 0x608   : > { %v8308_v8 = vmul.f32 %v12142_v13, %v8307_v37  ;;  %v12144_v30 = vpop.eup %12143  ;;  %v8839_v37 = vld [vmem:[%s14520_s30 + $0x70] sm:$0xff]  ;;  %v8405_v13 = vld [vmem:[#allocation12] sm:$0x3] }
 0x609   : > { %v10349_v5 = vpack.c.bf16 %v8840_v35, %v8839_v37 }
 0x60a   : > { %v8310_v44 = vadd.f32 %v8309_v7, %v8308_v8  ;;  %v8410_v7 = vrot.slane %v8405_v13, %v8229_v58  ;;  %v8414_v8 = vrot.slane %v8405_v13, %v8233_v2  ;;  %v12529_v2 = vmov 0  }
 0x60b   : > { %12033 = vset.pattern.permute.xlu1 %v12529_v2  ;;  %12034 = vset.pattern.permute.xlu0 %v12529_v2 }
 0x60c   : > { %12145 = vtanh.f32 %v8310_v44  ;;  %8313 = vst [vmem:[#allocation18] sm:$0xff] %v8310_v44 }
 0x616   : > { %v12146_v48 = vpop.eup %12145 }
 0x617   : > { %v8312_v9 = vmul.f32 %v12146_v48, %v12144_v30 }
 0x619   : > { %8314 = vst [vmem:[#allocation16] sm:$0xff] %v8312_v9  ;;  %v8323_v14 = vrot.slane %v8312_v9, %v12945_v49  ;;  %v8316_v15 = vcombine.high %v8312_v9, %v8312_v9 }
 0x61b   : > { %v8331_v21 = vcombine.high %v8323_v14, %v8323_v14  ;;  %v8330_v16 = vrot.slane %v8316_v15, %v12945_v49  ;;  %v8337_v19 = vpack.c.bf16 %v8323_v14, %v8323_v14  ;;  %v8828_v49 = vld [vmem:[%s14520_s30 + $0x18] sm:$0xff] }
 0x61c   : > { %v10325_v63 = vpack.c.bf16 %v8828_v49, %v8827_v31 }
 0x61d   : > { %v8338_v53 = vpack.c.bf16 %v8331_v21, %v8331_v21  ;;  %v8332_v18 = vcombine.high %v8330_v16, %v8330_v16  ;;  %v8339_v26 = vpack.c.bf16 %v8330_v16, %v8330_v16 }
 0x61f   : > { %8769 = vmatprep.mubr.bf16.mxu1 %v8338_v53  ;;  %v8340_v54 = vpack.c.bf16 %v8332_v18, %v8332_v18 }
 0x620   : > { %8770 = vmatmul.mubr.bf16.vlgmr.msra.gmra.mrb[0].mxu1 %v8337_v19 }
 0x621   : > { %8810 = vmatprep.mubr.bf16.mxu0 %v8340_v54  ;;  %10322 = vmatpush3.bf16.msra.mxu1 %v10321_v51  ;;  %v10271_v51 = vld [vmem:[#allocation14] ss:$0 sm:$0xff] }
 0x622   : > { %8811 = vmatmul.mubr.bf16.vlgmr.msra.gmra.mrb[0].mxu0 %v8339_v26  ;;  %10324 = vmatprep.subr.bf16.mxu1 %v10323_v28 }
 0x625   : > { %10326 = vmatpush3.bf16.msra.mxu1 %v10325_v63 }
 0x626   : > { %10328 = vmatprep.subr.bf16.mxu1 %v10327_v36 }
 0x629   : > { %10330 = vmatpush3.bf16.msra.mxu1 %v10329_v4 }
 0x62a   : > { %10332 = vmatprep.subr.bf16.mxu1 %v10331_v11 }
 0x62d   : > { %10334 = vmatpush3.bf16.msra.mxu1 %v10333_v57 }
 0x62e   : > { %10336 = vmatprep.subr.bf16.mxu1 %v10335_v40 }
 0x631   : > { %10338 = vmatpush3.bf16.msra.mxu1 %v10337_v6 }
 0x632   : > { %10340 = vmatprep.subr.bf16.mxu1 %v10339_v52 }
 0x635   : > { %10342 = vmatpush3.bf16.msra.mxu1 %v10341_v32 }
 0x636   : > { %10344 = vmatprep.subr.bf16.mxu1 %v10343_v1 }
 0x639   : > { %10346 = vmatpush3.bf16.msra.mxu1 %v10345_v34 }
 0x63a   : > { %10348 = vmatprep.subr.bf16.mxu1 %v10347_v42 }
 0x63d   : > { %10350 = vmatpush3.bf16.msra.mxu1 %v10349_v5 }
 0x6f3   : > { %v8771_v44 = vpop.f32.mrb[0].mxu1 }
 0x6f4   : > { %v8772_v30 = vadd.f32 %v8771_v44, %v8410_v7  ;;  %v8773_v48 = vpop.f32.mrb[1].mxu1 }
 0x6f5   : > { %v8812_v9 = vpop.f32.mrb[0].mxu0  ;;  %v8774_v14 = vadd.f32 %v8773_v48, %v8414_v8  ;;  %v8775_v15 = vpop.f32.mrb[2].mxu1 }
 0x6f6   : > { %v8813_v23 = vadd.f32 %v8812_v9, %v8772_v30  ;;  %v8814_v29 = vpop.f32.mrb[1].mxu0  ;;  %v8776_v21 = vpop.f32.mrb[3].mxu1 }
 0x6f7   : > { %v8815_v16 = vadd.f32 %v8814_v29, %v8774_v14  ;;  %v8816_v24 = vpop.f32.mrb[2].mxu0 }
 0x6f8   : > { %v8821_v50 = vmul.f32 0.01, %v8813_v23  ;;  %v8817_v19 = vpop.f32.mrb[3].mxu0  ;;  %vm8819_vm0 = vcmp.gt.f32.partialorder %v8813_v23, 0.0 }
 0x6f9   : > { %v8822_v53 = vmul.f32 0.01, %v8815_v16  ;;  %vm8820_vm1 = vcmp.gt.f32.partialorder %v8815_v16, 0.0 }
 0x6fa   : > { %v8823_v43 = vsel %vm8819_vm0, %v8813_v23, %v8821_v50 }
 0x6fb   : > { %v8824_v58 = vsel %vm8820_vm1, %v8815_v16, %v8822_v53 }
 0x6fc   : > { %8928 = vmatprep.mubr.f32.mxu1 %v8824_v58 }
 0x6fd   : > { %8929 = vmatmul.mubr.f32.vlgmr.msra.gmra.mrb[4].mxu1 %v8823_v43 }
 0x7d0   : > { %v10316_v18 = vpop.f32.mrb[4].mxu1 }
 0x7d1   : > { %v10317_v26 = vpop.f32.mrb[5].mxu1 }
 0x7d2   : > { %v10318_v28 = vadd.f32 %v10317_v26, %v10316_v18 }
 0x7d4   : > { %v8931_v31 = vadd.f32 %v10318_v28, %v10271_v51 }
 0x7d6   : > { %8955 = vperm.xlu1 %12033, %v8931_v31   ;;  %8935 = vrot.lane.b32.xlu0 %v8931_v31, %s12530_s1 }
 0x848   : > { %v8936_v49 = vpop.permute.xlu0 %8935 }
 0x849   : > { %v8939_v54 = vsel %vm8938_vm2, %v8936_v49, 0.0 }
 0x84a   : > { %8940 = vadd.xlane.f32.xlu0 %v8939_v54 }
 0x855   : > { %v8956_v11 = vpop.permute.xlu1 %8955 }
 0x8d7   : > { %v8941_v17 = vpop.xlane.xlu0 %8940 }
 0x8d8   : > { %v8942_v62 = vrot.slane %v8941_v17, 4 }
 0x8da   : > { %v8943_v63 = vadd.f32 %v8942_v62, %v8941_v17 }
 0x8dc   : > { %v8944_v36 = vrot.slane %v8943_v63, 2 }
 0x8de   : > { %v8945_v38 = vadd.f32 %v8944_v36, %v8943_v63 }
 0x8e0   : > { %v8946_v39 = vrot.slane %v8945_v38, 1 }
 0x8e2   : > { %v8947_v33 = vadd.f32 %v8946_v39, %v8945_v38 }
 0x8e4   : > { %10357 = vpush %v8947_v33 }
 0x915   : > { %s10358_s21 = spop %10357 }
 0x916   : > { %s8951_s27 = smul.f32 0.0625, %s10358_s21 }
 0x918   : > { %v8952_v3 = vstv %s8951_s27 }
 0x919   : > { %v8953_v4 = vsub.f32 %v8931_v31, %v8952_v3 }
 0x91b   : > { %v8958_v55 = vadd.f32 %v8956_v11, %v8953_v4 }
 0x91d   : > { %8960 = vrot.lane.b32.xlu1 %v8958_v55, %s12530_s1 }
 0x98f   : > { %v8961_v45 = vpop.permute.xlu1 %8960 }
 0x990   : > { %8963 = vst.msk [vmem:[#allocation15] sm:$0x3] %vm8938_vm2, %v8961_v45 }
 0x991 PF: > { %p10434_p2 = scmp.eq.s32.totalorder %s12618_s25, 3  ;;  %s12531_s22 = smov [#allocation16]  }
 0x992   : > { %s8982_s14 = sshll.u32 %s12531_s22, 4  ;;  %s12532_s15 = smov [#allocation15]   ;;  %s8983_s14 = int_to_ptr.vmem [resolvable:$true] %s8982_s14 }
 0x993   : > { %s8971_s26 = sshll.u32 %s12532_s15, 4  ;;  %s12377_s28 = scalar_lea.vmem %s8983_s14, 128  ;;  %s8972_s26 = int_to_ptr.vmem [resolvable:$true] %s8971_s26 }
 0x994   : > { %p12378_p7 = scmp.ne.s32.totalorder %s8983_s14, %s12377_s28  ;;  %p12384_p12 = scmp.lt.s32.totalorder %s8983_s14, %s8983_s14 }
 0x995   : > { %p12385_p10 = scmp.lt.s32.totalorder %s12377_s28, %s12377_s28 }
 0x996   : > { %p12379_p8 = pnand %p12378_p7, %p10434_p2 }
 0x997   : > { %p12386_p0 = por %p12385_p10, %p12384_p12 }
 0x998   : > { %p12380_p5 = pneg %p12379_p8 }
 0x99a   : > { %p12387_p3 = pnand %p12386_p0, %p12380_p5 }
 0x99c   : > { %12390 = shalt.err (!%p12387_p3)
}
 0x99d   : > { %s14521_s13 = sld [smem:[#allocation36_spill]] }
 0x9a3   : > { %s12391_s12 = scalar_lea.hbm %s14521_s13, 128 }
 0x9a4   : > { %p12392_p6 = scmp.ne.s32.totalorder %s14521_s13, %s12391_s12  ;;  %p12397_p1 = scmp.lt.u32.totalorder %s12391_s12, %s14521_s13 }
 0x9a6   : > { %p12393_p13 = pnand %p12392_p6, %p10434_p2 }
 0x9a8   : > { %p12394_p9 = pneg %p12393_p13 }
 0x9aa   : > { %p12399_p4 = pnand %p12397_p1, %p12394_p9 }
 0x9ac   : > { %12402 = shalt.err (!%p12399_p4)
}
 0x9ad   : > { %10388 = dma.vmem_to_hbm [thread:$0]  (%p10434_p2), %s8983_s14, 128, %s14521_s13, [#allocation17]  }
 0x9ae   : > { %s12403_s10 = scalar_lea.vmem %s8972_s26, 32  ;;  %p12410_p5 = scmp.lt.s32.totalorder %s8972_s26, %s8972_s26 }
 0x9af   : > { %p12404_p11 = scmp.ne.s32.totalorder %s8972_s26, %s12403_s10  ;;  %p12411_p12 = scmp.lt.s32.totalorder %s12403_s10, %s12403_s10 }
 0x9b1   : > { %p12405_p7 = pnand %p12404_p11, %p10434_p2  ;;  %p12412_p10 = por %p12411_p12, %p12410_p5 }
 0x9b3   : > { %p12406_p8 = pneg %p12405_p7 }
 0x9b5   : > { %p12413_p0 = pnand %p12412_p10, %p12406_p8 }
 0x9b7   : > { %12416 = shalt.err (!%p12413_p0)
}
 0x9b8   : > { %s14522_s23 = sld [smem:[#allocation35_spill]] }
 0x9be   : > { %s14523_s1 = smov %s14522_s23  ;;  %s12417_s21 = scalar_lea.hbm %s14522_s23, 32 }
 0x9bf   : > { %p12418_p3 = scmp.ne.s32.totalorder %s14523_s1, %s12417_s21  ;;  %p12423_p9 = scmp.lt.u32.totalorder %s12417_s21, %s14523_s1 }
 0x9c1   : > { %p12419_p6 = pnand %p12418_p3, %p10434_p2 }
 0x9c3   : > { %p12420_p13 = pneg %p12419_p6 }
 0x9c5   : > { %p12425_p1 = pnand %p12423_p9, %p12420_p13 }
 0x9c7   : > { %12428 = shalt.err (!%p12425_p1)
}
 0x9c8   : > { %10386 = dma.vmem_to_hbm [thread:$0]  (%p10434_p2), %s8972_s26, 32, %s14523_s1, [#allocation5]  }
 0x9c9   : > { %s12533_s20 = smov [#allocation18]  }
 0x9ca   : > { %s8993_s12 = sshll.u32 %s12533_s20, 4  ;;  %s8994_s12 = int_to_ptr.vmem [resolvable:$true] %s8993_s12 }
 0x9cb   : > { %s12429_s0 = scalar_lea.vmem %s8994_s12, 128  ;;  %p12436_p8 = scmp.lt.s32.totalorder %s8994_s12, %s8994_s12 }
 0x9cc   : > { %p12430_p4 = scmp.ne.s32.totalorder %s8994_s12, %s12429_s0  ;;  %p12437_p5 = scmp.lt.s32.totalorder %s12429_s0, %s12429_s0 }
 0x9ce   : > { %p12431_p11 = pnand %p12430_p4, %p10434_p2  ;;  %p12438_p12 = por %p12437_p5, %p12436_p8 }
 0x9d0   : > { %p12432_p7 = pneg %p12431_p11 }
 0x9d2   : > { %p12439_p10 = pnand %p12438_p12, %p12432_p7 }
 0x9d4   : > { %12442 = shalt.err (!%p12439_p10)
}
 0x9d5   : > { %s14524_s24 = sld [smem:[#allocation37_spill]] }
 0x9db   : > { %s14525_s16 = smov %s14524_s24  ;;  %s12443_s19 = scalar_lea.hbm %s14524_s24, 128 }
 0x9dc   : > { %p12444_p0 = scmp.ne.s32.totalorder %s14525_s16, %s12443_s19  ;;  %p12449_p13 = scmp.lt.u32.totalorder %s12443_s19, %s14525_s16 }
 0x9de   : > { %p12445_p3 = pnand %p12444_p0, %p10434_p2 }
 0x9e0   : > { %p12446_p6 = pneg %p12445_p3 }
 0x9e2   : > { %p12451_p9 = pnand %p12449_p13, %p12446_p6 }
 0x9e4   : > { %12454 = shalt.err (!%p12451_p9)
}
 0x9e5   : > { %10390 = dma.vmem_to_hbm [thread:$0]  (%p10434_p2), %s8994_s12, 128, %s14525_s16, [#allocation17]  }
 0x9e6   : > { %12492 = dma.done.wait (%p10434_p2), [#allocation5], 32  }
 0x9e7   : > { %12494 = vsyncadd (%p10434_p2), [#allocation5], 4294967264 }
 0x9e8   : > { %12496 = dma.done.wait (%p10434_p2), [#allocation17], 256  }
 0x9e9   : > { %12498 = vsyncadd (%p10434_p2), [#allocation17], 4294967040 }
 0x9ea PF: > { %s14526_s24 = sld [smem:[#allocation29_spill]]  ;;  %s14527_s21 = sld [smem:[#allocation26_spill]] }
 0x9eb   : > { %s14528_s22 = sld [smem:[#allocation27_spill]]  ;;  %s14529_s23 = sld [smem:[#allocation30_spill]] }
 0x9f0   : > { %p25_p1 = scmp.ge.s32.totalorder %s14526_s24, 6  }
 0x9f2   :  { %27 = sbr.rel (!%p25_p1) target bundleno = 14 (0xe), region = 162 }
 0x9f9   :  { %9014 = vsyncpa [#allocation4], 1 }
 0x9fa   :  { %9016 = vsyncpa [#allocation4 + $0x1], 1 }
 0x9fb   :  { %9017 = vsyncpa [#allocation7], 1 }
 0x9fc   :  { %9018 = vsyncpa [#allocation13], 1 }
 0x9fd   :  { %9019 = vsyncpa [#allocation5], 1 }
 0x9fe   :  { %9021 = vsyncpa [#allocation5 + $0x1], 1 }
 0x9ff   :  { %9022 = vsyncpa [#allocation17], 1 }

</bundles_post_ra>
